<compile_context>
chip_gen: v6e
topology: v6e:2x2x1
jax: 0.10.0
libtpu: 0.0.40
codegen_flags: <defaults>
</compile_context>

<pallas_src>
import math
import jax
import jax.numpy as jnp
from jax.experimental import pallas as pl
from jax.experimental.pallas import tpu as pltpu

_INV_SQRT2 = 1.0 / math.sqrt(2.0)


def _ln_mlp_kernel(x_ref, g_ref, beta_ref, w1_ref, b1_ref, w2_ref, b2_ref, o_ref):
    # x_ref: (T, 384) tokens; whole problem resides in VMEM for this single invocation.
    x = x_ref[...].astype(jnp.float32)

    # LayerNorm over the last dim (eps=1e-6, elementwise affine), all in f32.
    mu = jnp.mean(x, axis=-1, keepdims=True)
    xc = x - mu
    var = jnp.mean(xc * xc, axis=-1, keepdims=True)
    y = xc * jax.lax.rsqrt(var + 1e-6)
    y = y * g_ref[...].astype(jnp.float32) + beta_ref[...].astype(jnp.float32)

    # Linear 384 -> 1536 (+ bias): bf16 MXU inputs, f32 accumulation.
    h = jnp.dot(y.astype(jnp.bfloat16), w1_ref[...],
                preferred_element_type=jnp.float32) + b1_ref[...]

    # Exact GELU (approximate='none'): 0.5 * x * (1 + erf(x / sqrt(2)))
    h = 0.5 * h * (1.0 + jax.lax.erf(h * _INV_SQRT2))

    # Linear 1536 -> 384 (+ bias): bf16 MXU inputs, f32 accumulation.
    out = jnp.dot(h.astype(jnp.bfloat16), w2_ref[...],
                  preferred_element_type=jnp.float32) + b2_ref[...]
    o_ref[...] = out.astype(o_ref.dtype)


def layernorm_mlp(x_nhwc, gamma, beta, w1_bf16, b1, w2_bf16, b2):
    N, H, W, C = x_nhwc.shape
    T = N * H * W
    x2d = x_nhwc.reshape(T, C)   # lane-dense (T, 384) output layout preserved

    vmem_specs = [pl.BlockSpec(memory_space=pltpu.MemorySpace.VMEM) for _ in range(7)]
    out = pl.pallas_call(
        _ln_mlp_kernel,
        out_shape=jax.ShapeDtypeStruct((T, C), x_nhwc.dtype),
        in_specs=vmem_specs,
        out_specs=pl.BlockSpec(memory_space=pltpu.MemorySpace.VMEM),
        compiler_params=pltpu.CompilerParams(vmem_limit_bytes=16 << 20),
    )(x2d, gamma, beta, w1_bf16, b1, w2_bf16, b2)

    return out.reshape(N, H, W, C)


def init_params(key, c=384, hidden=1536):
    k1, k2, k3, k4 = jax.random.split(key, 4)
    # PyTorch Linear default init: U(-1/sqrt(fan_in), 1/sqrt(fan_in))
    bound1 = 1.0 / math.sqrt(c)
    bound2 = 1.0 / math.sqrt(hidden)
    # PyTorch stores weight as (out, in); we keep (in, out) for x @ W.
    w1 = jax.random.uniform(k1, (c, hidden), jnp.float32, -bound1, bound1)
    b1 = jax.random.uniform(k2, (1, hidden), jnp.float32, -bound1, bound1)
    w2 = jax.random.uniform(k3, (hidden, c), jnp.float32, -bound2, bound2)
    b2 = jax.random.uniform(k4, (1, c), jnp.float32, -bound2, bound2)
    # LayerNorm default init: gamma = 1, beta = 0
    gamma = jnp.ones((1, c), jnp.float32)
    beta = jnp.zeros((1, c), jnp.float32)
    return gamma, beta, w1, b1, w2, b2


def reference(x_nhwc, gamma, beta, w1, b1, w2, b2):
    # Pure-f32 reference matching the original PyTorch module semantics.
    x = x_nhwc.astype(jnp.float32).reshape(-1, x_nhwc.shape[-1])
    mu = jnp.mean(x, axis=-1, keepdims=True)
    var = jnp.mean((x - mu) ** 2, axis=-1, keepdims=True)
    y = (x - mu) / jnp.sqrt(var + 1e-6) * gamma[0] + beta[0]
    h = y @ w1 + b1[0]
    h = 0.5 * h * (1.0 + jax.lax.erf(h * _INV_SQRT2))
    return h @ w2 + b2[0]


if __name__ == "__main__":
    key = jax.random.PRNGKey(0)
    kx, kp = jax.random.split(key)
    # Shapes implied by the module: (1, 14, 14, 384)
    x = jax.random.normal(kx, (1, 14, 14, 384), jnp.float32)
    gamma, beta, w1, b1, w2, b2 = init_params(kp)

    # One-time weight quantization to bf16 (outside the per-call hot path).
    w1_bf16 = w1.astype(jnp.bfloat16)
    w2_bf16 = w2.astype(jnp.bfloat16)

    fn = jax.jit(layernorm_mlp)
    out = jax.block_until_ready(fn(x, gamma, beta, w1_bf16, b1, w2_bf16, b2))

    ref = reference(x, gamma, beta, w1, b1, w2, b2)
    assert out.shape == (1, 14, 14, 384)
    out2d = out.reshape(-1, 384)
    max_err = float(jnp.max(jnp.abs(out2d - ref)))
    # Tolerance loosened vs the pure-f32 kernel because weights/MXU inputs are bf16.
    assert jnp.allclose(out2d, ref, atol=2e-2, rtol=2e-2), max_err
    print("KERNEL_OK")
</pallas_src>

<mosaic_0001>
module attributes {stable_mosaic.version = 11 : i64} {
  func.func @_ln_mlp_kernel(%arg0: memref<196x384xf32, #tpu.memory_space<vmem>>, %arg1: memref<1x384xf32, #tpu.memory_space<vmem>>, %arg2: memref<1x384xf32, #tpu.memory_space<vmem>>, %arg3: memref<384x1536xbf16, #tpu.memory_space<vmem>>, %arg4: memref<1x1536xf32, #tpu.memory_space<vmem>>, %arg5: memref<1536x384xbf16, #tpu.memory_space<vmem>>, %arg6: memref<1x384xf32, #tpu.memory_space<vmem>>, %arg7: memref<196x384xf32, #tpu.memory_space<vmem>>) attributes {dimension_semantics = [], scalar_prefetch = 0 : i64, scratch_operands = 0 : i64, tpu.core_type = #tpu.core_type<tc>} {
    %c0 = arith.constant 0 : index
    %c0_0 = arith.constant 0 : index
    %0 = vector.load %arg0[%c0, %c0_0] : memref<196x384xf32, #tpu.memory_space<vmem>>, vector<196x384xf32>
    %cst = arith.constant dense<0.000000e+00> : vector<196xf32>
    %1 = vector.multi_reduction <add>, %0, %cst [1] : vector<196x384xf32> to vector<196xf32>
    %2 = vector.shape_cast %1 : vector<196xf32> to vector<196x1xf32>
    %cst_1 = arith.constant 3.840000e+02 : f32
    %3 = vector.broadcast %cst_1 : f32 to vector<196x1xf32>
    %4 = arith.divf %2, %3 : vector<196x1xf32>
    %5 = vector.broadcast %4 : vector<196x1xf32> to vector<196x384xf32>
    %6 = arith.subf %0, %5 : vector<196x384xf32>
    %7 = arith.mulf %6, %6 : vector<196x384xf32>
    %cst_2 = arith.constant dense<0.000000e+00> : vector<196xf32>
    %8 = vector.multi_reduction <add>, %7, %cst_2 [1] : vector<196x384xf32> to vector<196xf32>
    %9 = vector.shape_cast %8 : vector<196xf32> to vector<196x1xf32>
    %cst_3 = arith.constant 3.840000e+02 : f32
    %10 = vector.broadcast %cst_3 : f32 to vector<196x1xf32>
    %11 = arith.divf %9, %10 : vector<196x1xf32>
    %cst_4 = arith.constant 9.99999997E-7 : f32
    %12 = vector.broadcast %cst_4 : f32 to vector<196x1xf32>
    %13 = arith.addf %11, %12 : vector<196x1xf32>
    %14 = math.rsqrt %13 : vector<196x1xf32>
    %15 = vector.broadcast %14 : vector<196x1xf32> to vector<196x384xf32>
    %16 = arith.mulf %6, %15 : vector<196x384xf32>
    %c0_5 = arith.constant 0 : index
    %c0_6 = arith.constant 0 : index
    %17 = vector.load %arg1[%c0_5, %c0_6] : memref<1x384xf32, #tpu.memory_space<vmem>>, vector<1x384xf32>
    %18 = vector.broadcast %17 : vector<1x384xf32> to vector<196x384xf32>
    %19 = arith.mulf %16, %18 : vector<196x384xf32>
    %c0_7 = arith.constant 0 : index
    %c0_8 = arith.constant 0 : index
    %20 = vector.load %arg2[%c0_7, %c0_8] : memref<1x384xf32, #tpu.memory_space<vmem>>, vector<1x384xf32>
    %21 = vector.broadcast %20 : vector<1x384xf32> to vector<196x384xf32>
    %22 = arith.addf %19, %21 : vector<196x384xf32>
    %23 = arith.truncf %22 : vector<196x384xf32> to vector<196x384xbf16>
    %c0_9 = arith.constant 0 : index
    %c0_10 = arith.constant 0 : index
    %24 = vector.load %arg3[%c0_9, %c0_10] : memref<384x1536xbf16, #tpu.memory_space<vmem>>, vector<384x1536xbf16>
    %cst_11 = arith.constant dense<0.000000e+00> : vector<196x1536xf32>
    %25 = tpu.matmul %23, %24, %cst_11 {dimension_numbers = #tpu.dot_dimension_numbers<[1], [0], [0], [1], [0, 0, 1, 1], [], []>} : vector<196x384xbf16>, vector<384x1536xbf16>, vector<196x1536xf32> -> vector<196x1536xf32>
    %c0_12 = arith.constant 0 : index
    %c0_13 = arith.constant 0 : index
    %26 = vector.load %arg4[%c0_12, %c0_13] : memref<1x1536xf32, #tpu.memory_space<vmem>>, vector<1x1536xf32>
    %27 = vector.broadcast %26 : vector<1x1536xf32> to vector<196x1536xf32>
    %28 = arith.addf %25, %27 : vector<196x1536xf32>
    %cst_14 = arith.constant 5.000000e-01 : f32
    %29 = vector.broadcast %cst_14 : f32 to vector<196x1536xf32>
    %30 = arith.mulf %29, %28 : vector<196x1536xf32>
    %cst_15 = arith.constant 0.707106769 : f32
    %31 = vector.broadcast %cst_15 : f32 to vector<196x1536xf32>
    %32 = arith.mulf %28, %31 : vector<196x1536xf32>
    %33 = math.erf %32 : vector<196x1536xf32>
    %cst_16 = arith.constant 1.000000e+00 : f32
    %34 = vector.broadcast %cst_16 : f32 to vector<196x1536xf32>
    %35 = arith.addf %34, %33 : vector<196x1536xf32>
    %36 = arith.mulf %30, %35 : vector<196x1536xf32>
    %37 = arith.truncf %36 : vector<196x1536xf32> to vector<196x1536xbf16>
    %c0_17 = arith.constant 0 : index
    %c0_18 = arith.constant 0 : index
    %38 = vector.load %arg5[%c0_17, %c0_18] : memref<1536x384xbf16, #tpu.memory_space<vmem>>, vector<1536x384xbf16>
    %cst_19 = arith.constant dense<0.000000e+00> : vector<196x384xf32>
    %39 = tpu.matmul %37, %38, %cst_19 {dimension_numbers = #tpu.dot_dimension_numbers<[1], [0], [0], [1], [0, 0, 1, 1], [], []>} : vector<196x1536xbf16>, vector<1536x384xbf16>, vector<196x384xf32> -> vector<196x384xf32>
    %c0_20 = arith.constant 0 : index
    %c0_21 = arith.constant 0 : index
    %40 = vector.load %arg6[%c0_20, %c0_21] : memref<1x384xf32, #tpu.memory_space<vmem>>, vector<1x384xf32>
    %41 = vector.broadcast %40 : vector<1x384xf32> to vector<196x384xf32>
    %42 = arith.addf %39, %41 : vector<196x384xf32>
    %c0_22 = arith.constant 0 : index
    %c0_23 = arith.constant 0 : index
    %43 = vector.load %arg7[%c0_22, %c0_23] : memref<196x384xf32, #tpu.memory_space<vmem>>, vector<196x384xf32>
    tpu.vector_store %arg7[%c0_22, %c0_23], %42 {strides = array<i32>} : memref<196x384xf32, #tpu.memory_space<vmem>>, vector<196x384xf32>,
    return
  }
}

</mosaic_0001>

<bundles_post_ra>
// kernel: layernorm_mlp.1
= control target key start
LH: loop header
LB: loop body
LE: loop exit
PB: predicated region body
PF: predicated region fallthrough
CT: control target
= control target key end

     0   :  { %12 = vsyncpa [#allocation3], 0  ;;  %s12779_s24 = smov [#allocation2]   ;;  %s18478_s0 = inlined_call_operand.vmem [shape: f32[196,384], index: 0, kind: input, shape index: {}]   ;;  %s18479_s1 = inlined_call_operand.vmem [shape: f32[1,384], index: 1, kind: input, shape index: {}]   ;;  %s18480_s2 = inlined_call_operand.vmem [shape: f32[1,384], index: 2, kind: input, shape index: {}]   ;;  %s18481_s3 = inlined_call_operand.vmem [shape: bf16[384,1536], index: 3, kind: input, shape index: {}]   ;;  %s18482_s4 = inlined_call_operand.vmem [shape: f32[1,1536], index: 4, kind: input, shape index: {}]   ;;  %s18483_s5 = inlined_call_operand.hbm [shape: bf16[1536,384], index: 5, kind: input, shape index: {}]   ;;  %s18484_s6 = inlined_call_operand.vmem [shape: f32[1,384], index: 6, kind: input, shape index: {}]   ;;  %s18485_s7 = inlined_call_operand.vmem [shape: f32[196,384], index: 7, kind: output, shape index: {}]  }
   0x1   :  { %s28_s25 = sshll.u32 %s12779_s24, 4  ;;  %s29_s25 = int_to_ptr.vmem [resolvable:$true] %s28_s25 }
   0x2   :  { %s12765_s26 = scalar_lea.vmem %s29_s25, 36864  ;;  %p12770_p1 = scmp.lt.s32.totalorder %s29_s25, %s29_s25 }
   0x3   :  { %p12766_p0 = scmp.ne.s32.totalorder %s29_s25, %s12765_s26  ;;  %p12771_p2 = scmp.lt.s32.totalorder %s12765_s26, %s12765_s26 }
   0x5   :  { %p12772_p3 = por %p12771_p2, %p12770_p1 }
   0x7   :  { %p12773_p4 = pnand %p12772_p3, %p12766_p0 }
   0x9   :  { %12776 = shalt.err (!%p12773_p4)
}
   0xa   :  { %s12780_s27 = smov 192   ;;  %s12781_s28 = smov 12  }
   0xb   :  { %34 = dma.hbm_to_vmem [thread:$0]  %s18483_s5, 36864, %s29_s25, [#allocation3], %s12780_s27, %s12780_s27, %s12781_s28  }
   0xc   :  { %12777 = dma.done.wait [#allocation3], 36864  }
   0xd   :  { %12778 = vsyncadd [#allocation3], 4294930432  ;;  %v41_v0 = vld [vmem:[%s18478_s0] sm:$0xff]  ;;  %v42_v1 = vld [vmem:[%s18478_s0 + $0x8] sm:$0xff]  ;;  %vm212_vm0 = vcmask 1043456  }
   0xe   :  { %v43_v2 = vld [vmem:[%s18478_s0 + $0x10] sm:$0xff]  ;;  %v116_v3 = vadd.f32 %v42_v1, %v41_v0  ;;  %v44_v4 = vld [vmem:[%s18478_s0 + $0x18] sm:$0xff]  ;;  %v45_v5 = vld [vmem:[%s18478_s0 + $0x20] sm:$0xff] }
   0xf   :  { %v46_v6 = vld [vmem:[%s18478_s0 + $0x28] sm:$0xff]  ;;  %v120_v7 = vadd.f32 %v45_v5, %v44_v4  ;;  %v47_v8 = vld [vmem:[%s18478_s0 + $0x30] sm:$0xff]  ;;  %v48_v9 = vld [vmem:[%s18478_s0 + $0x38] sm:$0xff] }
  0x10   :  { %v49_v10 = vld [vmem:[%s18478_s0 + $0x40] sm:$0xff]  ;;  %v117_v11 = vadd.f32 %v116_v3, %v43_v2  ;;  %v124_v12 = vadd.f32 %v48_v9, %v47_v8  ;;  %v50_v13 = vld [vmem:[%s18478_s0 + $0x48] sm:$0xff]  ;;  %v51_v14 = vld [vmem:[%s18478_s0 + $0x50] sm:$0xff] }
  0x11   :  { %v52_v15 = vld [vmem:[%s18478_s0 + $0x58] sm:$0xff]  ;;  %v128_v16 = vadd.f32 %v51_v14, %v50_v13  ;;  %v57_v18 = vld [vmem:[%s18478_s0 + $0x80] sm:$0xff]  ;;  %v121_v19 = vadd.f32 %v120_v7, %v46_v6  ;;  %v54_v22 = vld [vmem:[%s18478_s0 + $0x68] sm:$0xff] }
  0x12   :  { %v56_v17 = vld [vmem:[%s18478_s0 + $0x78] sm:$0xff]  ;;  %118 = vadd.xlane.f32.xlu0 %v117_v11  ;;  %v125_v20 = vadd.f32 %v124_v12, %v49_v10  ;;  %v53_v21 = vld [vmem:[%s18478_s0 + $0x60] sm:$0xff]  ;;  %v55_v23 = vld [vmem:[%s18478_s0 + $0x70] sm:$0xff] }
  0x13   :  { %v132_v24 = vadd.f32 %v54_v22, %v53_v21  ;;  %v129_v25 = vadd.f32 %v128_v16, %v52_v15  ;;  %v136_v26 = vadd.f32 %v57_v18, %v56_v17  ;;  %v59_v27 = vld [vmem:[%s18478_s0 + $0x90] sm:$0xff]  ;;  %v60_v28 = vld [vmem:[%s18478_s0 + $0x98] sm:$0xff]  ;;  %v58_v29 = vld [vmem:[%s18478_s0 + $0x88] sm:$0xff] }
  0x14   :  { %126 = vadd.xlane.f32.xlu1 %v125_v20  ;;  %v62_v30 = vld [vmem:[%s18478_s0 + $0xa8] sm:$0xff]  ;;  %v63_v31 = vld [vmem:[%s18478_s0 + $0xb0] sm:$0xff]  ;;  %v140_v33 = vadd.f32 %v60_v28, %v59_v27  ;;  %v61_v34 = vld [vmem:[%s18478_s0 + $0xa0] sm:$0xff] }
  0x15   :  { %v133_v32 = vadd.f32 %v132_v24, %v55_v23  ;;  %v65_v35 = vld [vmem:[%s18478_s0 + $0xc0] sm:$0xff]  ;;  %v66_v36 = vld [vmem:[%s18478_s0 + $0xc8] sm:$0xff]  ;;  %v137_v37 = vadd.f32 %v136_v26, %v58_v29  ;;  %v144_v38 = vadd.f32 %v63_v31, %v62_v30  ;;  %v64_v39 = vld [vmem:[%s18478_s0 + $0xb8] sm:$0xff] }
  0x16   :  { %122 = vadd.xlane.f32.xlu0 %v121_v19  ;;  %v68_v40 = vld [vmem:[%s18478_s0 + $0xd8] sm:$0xff]  ;;  %v69_v41 = vld [vmem:[%s18478_s0 + $0xe0] sm:$0xff]  ;;  %v141_v42 = vadd.f32 %v140_v33, %v61_v34  ;;  %v148_v43 = vadd.f32 %v66_v36, %v65_v35  ;;  %v67_v44 = vld [vmem:[%s18478_s0 + $0xd0] sm:$0xff] }
  0x17   :  { %v71_v45 = vld [vmem:[%s18478_s0 + $0xf0] sm:$0xff]  ;;  %v72_v46 = vld [vmem:[%s18478_s0 + $0xf8] sm:$0xff]  ;;  %v145_v47 = vadd.f32 %v144_v38, %v64_v39  ;;  %v152_v48 = vadd.f32 %v69_v41, %v68_v40  ;;  %v70_v49 = vld [vmem:[%s18478_s0 + $0xe8] sm:$0xff] }
  0x18   :  { %130 = vadd.xlane.f32.xlu1 %v129_v25  ;;  %v74_v50 = vld [vmem:[%s18478_s0 + $0x108] sm:$0xff]  ;;  %v75_v51 = vld [vmem:[%s18478_s0 + $0x110] sm:$0xff]  ;;  %v149_v52 = vadd.f32 %v148_v43, %v67_v44  ;;  %v156_v53 = vadd.f32 %v72_v46, %v71_v45  ;;  %v73_v54 = vld [vmem:[%s18478_s0 + $0x100] sm:$0xff] }
  0x19   :  { %v77_v55 = vld [vmem:[%s18478_s0 + $0x120] sm:$0xff]  ;;  %v78_v56 = vld [vmem:[%s18478_s0 + $0x128] sm:$0xff]  ;;  %v153_v57 = vadd.f32 %v152_v48, %v70_v49  ;;  %v160_v58 = vadd.f32 %v75_v51, %v74_v50  ;;  %v76_v59 = vld [vmem:[%s18478_s0 + $0x118] sm:$0xff] }
  0x1a   :  { %134 = vadd.xlane.f32.xlu0 %v133_v32  ;;  %v80_v60 = vld [vmem:[%s18478_s0 + $0x138] sm:$0xff]  ;;  %v81_v61 = vld [vmem:[%s18478_s0 + $0x140] sm:$0xff]  ;;  %v157_v62 = vadd.f32 %v156_v53, %v73_v54  ;;  %v79_v63 = vld [vmem:[%s18478_s0 + $0x130] sm:$0xff]  ;;  %v164_v0 = vadd.f32 %v78_v56, %v77_v55 }
  0x1b   :  { %v83_v1 = vld [vmem:[%s18478_s0 + $0x150] sm:$0xff]  ;;  %v84_v2 = vld [vmem:[%s18478_s0 + $0x158] sm:$0xff]  ;;  %v82_v3 = vld [vmem:[%s18478_s0 + $0x148] sm:$0xff]  ;;  %v161_v6 = vadd.f32 %v160_v58, %v76_v59  ;;  %v168_v7 = vadd.f32 %v81_v61, %v80_v60 }
  0x1c   :  { %138 = vadd.xlane.f32.xlu1 %v137_v37  ;;  %v86_v4 = vld [vmem:[%s18478_s0 + $0x168] sm:$0xff]  ;;  %v87_v5 = vld [vmem:[%s18478_s0 + $0x170] sm:$0xff]  ;;  %v165_v8 = vadd.f32 %v164_v0, %v79_v63  ;;  %v85_v9 = vld [vmem:[%s18478_s0 + $0x160] sm:$0xff]  ;;  %v172_v10 = vadd.f32 %v84_v2, %v83_v1 }
  0x1d   :  { %v89_v11 = vld [vmem:[%s18478_s0 + $0x180] sm:$0xff]  ;;  %v88_v12 = vld [vmem:[%s18478_s0 + $0x178] sm:$0xff]  ;;  %v90_v15 = vld [vmem:[%s18478_s0 + $0x188] sm:$0xff]  ;;  %v169_v16 = vadd.f32 %v168_v7, %v82_v3  ;;  %v176_v17 = vadd.f32 %v87_v5, %v86_v4 }
  0x1e   :  { %142 = vadd.xlane.f32.xlu0 %v141_v42  ;;  %v92_v13 = vld [vmem:[%s18478_s0 + $0x198] sm:$0xff]  ;;  %v93_v14 = vld [vmem:[%s18478_s0 + $0x1a0] sm:$0xff]  ;;  %v91_v18 = vld [vmem:[%s18478_s0 + $0x190] sm:$0xff]  ;;  %v173_v19 = vadd.f32 %v172_v10, %v85_v9  ;;  %v180_v20 = vadd.f32 %v90_v15, %v89_v11 }
  0x1f   :  { %v95_v21 = vld [vmem:[%s18478_s0 + $0x1b0] sm:$0xff]  ;;  %v96_v22 = vld [vmem:[%s18478_s0 + $0x1b8] sm:$0xff]  ;;  %v94_v23 = vld [vmem:[%s18478_s0 + $0x1a8] sm:$0xff]  ;;  %v177_v25 = vadd.f32 %v176_v17, %v88_v12  ;;  %v184_v26 = vadd.f32 %v93_v14, %v92_v13 }
  0x20   :  { %146 = vadd.xlane.f32.xlu1 %v145_v47  ;;  %v98_v24 = vld [vmem:[%s18478_s0 + $0x1c8] sm:$0xff]  ;;  %v99_v27 = vld [vmem:[%s18478_s0 + $0x1d0] sm:$0xff]  ;;  %v97_v28 = vld [vmem:[%s18478_s0 + $0x1c0] sm:$0xff]  ;;  %v181_v30 = vadd.f32 %v180_v20, %v91_v18  ;;  %v188_v31 = vadd.f32 %v96_v22, %v95_v21 }
  0x21   :  { %v101_v29 = vld [vmem:[%s18478_s0 + $0x1e0] sm:$0xff]  ;;  %v100_v32 = vld [vmem:[%s18478_s0 + $0x1d8] sm:$0xff]  ;;  %v102_v35 = vld [vmem:[%s18478_s0 + $0x1e8] sm:$0xff]  ;;  %v185_v36 = vadd.f32 %v184_v26, %v94_v23  ;;  %v192_v37 = vadd.f32 %v99_v27, %v98_v24 }
  0x22   :  { %150 = vadd.xlane.f32.xlu0 %v149_v52  ;;  %v104_v33 = vld [vmem:[%s18478_s0 + $0x1f8] sm:$0xff]  ;;  %v105_v34 = vld [vmem:[%s18478_s0 + $0x200] sm:$0xff]  ;;  %v103_v38 = vld [vmem:[%s18478_s0 + $0x1f0] sm:$0xff]  ;;  %v189_v39 = vadd.f32 %v188_v31, %v97_v28  ;;  %v196_v40 = vadd.f32 %v102_v35, %v101_v29 }
  0x23   :  { %v106_v41 = vld [vmem:[%s18478_s0 + $0x208] sm:$0xff]  ;;  %v193_v42 = vadd.f32 %v192_v37, %v100_v32  ;;  %v200_v43 = vadd.f32 %v105_v34, %v104_v33  ;;  %v11211_v46 = vld [vmem:[%s18481_s3 + $0x2a4] ss:$48 sps:$4 sm:$0xff]   ;;  %v11213_v47 = vld [vmem:[%s18481_s3 + $0x2a0] ss:$48 sps:$4 sm:$0xff]  }
  0x24   :  { %154 = vadd.xlane.f32.xlu1 %v153_v57  ;;  %v197_v44 = vadd.f32 %v196_v40, %v103_v38  ;;  %v11214_v48 = vld [vmem:[%s18481_s3 + $0x244] ss:$48 sps:$4 sm:$0xff]   ;;  %2664 = vmatprep.subr.bf16.mxu0 %v11211_v46  ;;  %v11216_v49 = vld [vmem:[%s18481_s3 + $0x240] ss:$48 sps:$4 sm:$0xff]   ;;  %v114_v2 = vld [vmem:[%s18478_s0 + $0x248] sm:$0xf] }
  0x25   :  { %v201_v45 = vadd.f32 %v200_v43, %v106_v41  ;;  %2665 = vmatpush1.bf16.msra.mxu0 %v11213_v47  ;;  %v11217_v50 = vld [vmem:[%s18481_s3 + $0x1e4] ss:$48 sps:$4 sm:$0xff]   ;;  %v11219_v51 = vld [vmem:[%s18481_s3 + $0x1e0] ss:$48 sps:$4 sm:$0xff]   ;;  %v108_v4 = vld [vmem:[%s18478_s0 + $0x218] sm:$0xff]  ;;  %v214_v11 = vsel %vm212_vm0, %v114_v2, 0.0 }
  0x26   :  { %158 = vadd.xlane.f32.xlu0 %v157_v62  ;;  %2666 = vmatprep.subr.bf16.mxu0 %v11214_v48  ;;  %v11235_v52 = vld [vmem:[%s18481_s3 + $0x8a4] ss:$48 sps:$4 sm:$0xff]   ;;  %v11239_v54 = vld [vmem:[%s18481_s3 + $0x8a0] ss:$48 sps:$4 sm:$0xff]   ;;  %v110_v5 = vld [vmem:[%s18478_s0 + $0x228] sm:$0xff] }
  0x27   :  { %v11220_v53 = vld [vmem:[%s18481_s3 + $0x184] ss:$48 sps:$4 sm:$0xff]   ;;  %2825 = vmatprep.subr.bf16.mxu1 %v11235_v52  ;;  %v11222_v55 = vld [vmem:[%s18481_s3 + $0x180] ss:$48 sps:$4 sm:$0xff]   ;;  %v112_v9 = vld [vmem:[%s18478_s0 + $0x238] sm:$0xff] }
  0x28   :  { %162 = vadd.xlane.f32.xlu1 %v161_v6  ;;  %2826 = vmatpush1.bf16.msra.mxu1 %v11239_v54  ;;  %v11223_v56 = vld [vmem:[%s18481_s3 + $0x124] ss:$48 sps:$4 sm:$0xff]   ;;  %v11225_v57 = vld [vmem:[%s18481_s3 + $0x120] ss:$48 sps:$4 sm:$0xff]   ;;  %v12678_v21 = vld [vmem:[%s18478_s0 + $0x8] sm:$0xff] }
  0x29   :  { %2667 = vmatpush1.bf16.msra.mxu0 %v11216_v49  ;;  %v11226_v58 = vld [vmem:[%s18481_s3 + $0xc4] ss:$48 sps:$4 sm:$0xff]   ;;  %v11228_v59 = vld [vmem:[%s18481_s3 + $0xc0] ss:$48 sps:$4 sm:$0xff]   ;;  %v12681_v32 = vld [vmem:[%s18478_s0 + $0x38] sm:$0xff] }
  0x2a   :  { %166 = vadd.xlane.f32.xlu0 %v165_v8  ;;  %2668 = vmatprep.subr.bf16.mxu0 %v11217_v50  ;;  %v11229_v60 = vld [vmem:[%s18481_s3 + $0x64] ss:$48 sps:$4 sm:$0xff]   ;;  %v11231_v61 = vld [vmem:[%s18481_s3 + $0x60] ss:$48 sps:$4 sm:$0xff]   ;;  %v12683_v41 = vld [vmem:[%s18478_s0 + $0x18] sm:$0xff] }
  0x2b   :  { %v11232_v62 = vld [vmem:[%s18481_s3 + $0x4] ss:$48 sps:$4 sm:$0xff]   ;;  %v11234_v63 = vld [vmem:[%s18481_s3] ss:$48 sps:$4 sm:$0xff]  }
  0x2c   :  { %170 = vadd.xlane.f32.xlu1 %v169_v16  ;;  %v11237_v0 = vld [vmem:[%s18481_s3 + $0x5a4] ss:$48 sps:$4 sm:$0xff]   ;;  %v113_v1 = vld [vmem:[%s18478_s0 + $0x240] sm:$0xf]  ;;  %v115_v7 = vld [vmem:[%s18478_s0 + $0x250] sm:$0xf] }
  0x2d   :  { %2669 = vmatpush1.bf16.msra.mxu0 %v11219_v51  ;;  %v107_v3 = vld [vmem:[%s18478_s0 + $0x210] sm:$0xff]  ;;  %v109_v8 = vld [vmem:[%s18478_s0 + $0x220] sm:$0xff]  ;;  %v213_v10 = vsel %vm212_vm0, %v113_v1, 0.0  ;;  %v216_v18 = vsel %vm212_vm0, %v115_v7, 0.0 }
  0x2e   :  { %174 = vadd.xlane.f32.xlu0 %v173_v19  ;;  %2670 = vmatprep.subr.bf16.mxu0 %v11220_v53  ;;  %v111_v6 = vld [vmem:[%s18478_s0 + $0x230] sm:$0xff]  ;;  %v204_v13 = vadd.f32 %v108_v4, %v107_v3  ;;  %v215_v17 = vadd.f32 %v214_v11, %v213_v10  ;;  %v12677_v19 = vld [vmem:[%s18478_s0] sm:$0xff]  ;;  %v12686_v53 = vld [vmem:[%s18478_s0 + $0x48] sm:$0xff] }
  0x2f   :  { %v208_v14 = vadd.f32 %v111_v6, %v110_v5  ;;  %v12679_v23 = vld [vmem:[%s18478_s0 + $0x10] sm:$0xff]  ;;  %v12682_v34 = vld [vmem:[%s18478_s0 + $0x40] sm:$0xff] }
  0x30   :  { %178 = vadd.xlane.f32.xlu1 %v177_v25  ;;  %v13126_v27 = vadd.f32 %v204_v13, %v109_v8  ;;  %v13151_v40 = vadd.f32 %v216_v18, %v215_v17  ;;  %v12684_v43 = vld [vmem:[%s18478_s0 + $0x20] sm:$0xff]  ;;  %v12690_v8 = vld [vmem:[%s18478_s0 + $0x68] sm:$0xff]  ;;  %v12691_v10 = vld [vmem:[%s18478_s0 + $0x70] sm:$0xff] }
  0x31   :  { %2671 = vmatpush1.bf16.msra.mxu0 %v11222_v55  ;;  %v13128_v28 = vadd.f32 %v208_v14, %v112_v9  ;;  %v12687_v55 = vld [vmem:[%s18478_s0 + $0x50] sm:$0xff]  ;;  %v12689_v6 = vld [vmem:[%s18478_s0 + $0x60] sm:$0xff]  ;;  %v12692_v13 = vld [vmem:[%s18478_s0 + $0x78] sm:$0xff] }
  0x32   :  { %182 = vadd.xlane.f32.xlu0 %v181_v30  ;;  %2672 = vmatprep.subr.bf16.mxu0 %v11223_v56  ;;  %v12680_v30 = vld [vmem:[%s18478_s0 + $0x30] sm:$0xff]  ;;  %v12694_v17 = vld [vmem:[%s18478_s0 + $0x88] sm:$0xff] }
  0x34   :  { %186 = vadd.xlane.f32.xlu1 %v185_v36 }
  0x35   :  { %2673 = vmatpush1.bf16.msra.mxu0 %v11225_v57  ;;  %v12688_v57 = vld [vmem:[%s18478_s0 + $0x58] sm:$0xff] }
  0x36   :  { %190 = vadd.xlane.f32.xlu0 %v189_v39  ;;  %2674 = vmatprep.subr.bf16.mxu0 %v11226_v58 }
  0x38   :  { %194 = vadd.xlane.f32.xlu1 %v193_v42 }
  0x39   :  { %2675 = vmatpush1.bf16.msra.mxu0 %v11228_v59 }
  0x3a   :  { %198 = vadd.xlane.f32.xlu0 %v197_v44  ;;  %2676 = vmatprep.subr.bf16.mxu0 %v11229_v60 }
  0x3c   :  { %202 = vadd.xlane.f32.xlu1 %v201_v45  ;;  %v12685_v45 = vld [vmem:[%s18478_s0 + $0x28] sm:$0xff] }
  0x3d   :  { %2677 = vmatpush1.bf16.msra.mxu0 %v11231_v61 }
  0x3e   :  { %2678 = vmatprep.subr.bf16.mxu0 %v11232_v62 }
  0x41   :  { %2679 = vmatpush1.bf16.msra.mxu0 %v11234_v63 }
  0x42   :  { %2680 = vmatprep.subr.bf16.mxu0 %v11237_v0 }
  0x9b   :  { %v119_v12 = vpop.xlane.xlu0 %118 }
  0x9c   :  { %v221_v15 = vmul.f32 0.0026041667, %v119_v12 }
  0x9d   :  { %v127_v16 = vpop.xlane.xlu1 %126 }
  0x9e   :  { %v13114_v20 = vsub.f32 %v12677_v19, %v221_v15  ;;  %v13119_v22 = vsub.f32 %v12678_v21, %v221_v15  ;;  %v13124_v24 = vsub.f32 %v12679_v23, %v221_v15  ;;  %v223_v25 = vmul.f32 0.0026041667, %v127_v16  ;;  %v12693_v15 = vld [vmem:[%s18478_s0 + $0x80] sm:$0xff] }
  0x9f   :  { %v123_v26 = vpop.xlane.xlu0 %122 }
  0xa0   :  { %v222_v29 = vmul.f32 0.0026041667, %v123_v26  ;;  %v13133_v31 = vsub.f32 %v12680_v30, %v223_v25  ;;  %v13138_v33 = vsub.f32 %v12681_v32, %v223_v25  ;;  %v13143_v35 = vsub.f32 %v12682_v34, %v223_v25 }
  0xa1   :  { %v321_v36 = vmul.f32 %v13114_v20, %v13114_v20  ;;  %v322_v37 = vmul.f32 %v13119_v22, %v13119_v22  ;;  %v323_v38 = vmul.f32 %v13124_v24, %v13124_v24  ;;  %v131_v39 = vpop.xlane.xlu1 %130 }
  0xa2   :  { %v13156_v42 = vsub.f32 %v12683_v41, %v222_v29  ;;  %v13161_v44 = vsub.f32 %v12684_v43, %v222_v29  ;;  %v13166_v46 = vsub.f32 %v12685_v45, %v222_v29  ;;  %v224_v47 = vmul.f32 0.0026041667, %v131_v39  ;;  %v12696_v39 = vld [vmem:[%s18478_s0 + $0x98] sm:$0xff]  ;;  %v12697_v43 = vld [vmem:[%s18478_s0 + $0xa0] sm:$0xff] }
  0xa3   :  { %v396_v48 = vadd.f32 %v322_v37, %v321_v36  ;;  %v135_v49 = vpop.xlane.xlu0 %134  ;;  %v327_v50 = vmul.f32 %v13133_v31, %v13133_v31  ;;  %v328_v51 = vmul.f32 %v13138_v33, %v13138_v33  ;;  %v329_v52 = vmul.f32 %v13143_v35, %v13143_v35  ;;  %v12695_v37 = vld [vmem:[%s18478_s0 + $0x90] sm:$0xff] }
  0xa4   :  { %v13177_v54 = vsub.f32 %v12686_v53, %v224_v47  ;;  %v13182_v56 = vsub.f32 %v12687_v55, %v224_v47  ;;  %v13187_v58 = vsub.f32 %v12688_v57, %v224_v47  ;;  %v324_v59 = vmul.f32 %v13156_v42, %v13156_v42  ;;  %v12698_v47 = vld [vmem:[%s18478_s0 + $0xa8] sm:$0xff] }
  0xa5   :  { %v397_v60 = vadd.f32 %v396_v48, %v323_v38  ;;  %v325_v61 = vmul.f32 %v13161_v44, %v13161_v44  ;;  %v326_v62 = vmul.f32 %v13166_v46, %v13166_v46  ;;  %v139_v63 = vpop.xlane.xlu1 %138  ;;  %v225_v0 = vmul.f32 0.0026041667, %v135_v49  ;;  %v12699_v49 = vld [vmem:[%s18478_s0 + $0xb0] sm:$0xff] }
  0xa6   :  { %v226_v1 = vmul.f32 0.0026041667, %v139_v63  ;;  %v404_v2 = vadd.f32 %v328_v51, %v327_v50  ;;  %v330_v3 = vmul.f32 %v13177_v54, %v13177_v54  ;;  %v331_v4 = vmul.f32 %v13182_v56, %v13182_v56  ;;  %v12700_v51 = vld [vmem:[%s18478_s0 + $0xb8] sm:$0xff] }
  0xa7   :  { %398 = vadd.xlane.f32.xlu0 %v397_v60  ;;  %v400_v5 = vadd.f32 %v325_v61, %v324_v59  ;;  %v13202_v7 = vsub.f32 %v12689_v6, %v225_v0  ;;  %v13207_v9 = vsub.f32 %v12690_v8, %v225_v0  ;;  %v13212_v11 = vsub.f32 %v12691_v10, %v225_v0  ;;  %v143_v12 = vpop.xlane.xlu0 %142  ;;  %v12703_v6 = vld [vmem:[%s18478_s0 + $0xd0] sm:$0xff] }
  0xa8   :  { %v13217_v14 = vsub.f32 %v12692_v13, %v226_v1  ;;  %v13222_v16 = vsub.f32 %v12693_v15, %v226_v1  ;;  %v13227_v18 = vsub.f32 %v12694_v17, %v226_v1  ;;  %v405_v19 = vadd.f32 %v404_v2, %v329_v52  ;;  %v12701_v2 = vld [vmem:[%s18478_s0 + $0xc0] sm:$0xff]  ;;  %v12706_v17 = vld [vmem:[%s18478_s0 + $0xe8] sm:$0xff] }
  0xa9   :  { %v401_v21 = vadd.f32 %v400_v5, %v326_v62  ;;  %v147_v23 = vpop.xlane.xlu1 %146  ;;  %v227_v25 = vmul.f32 0.0026041667, %v143_v12  ;;  %v332_v26 = vmul.f32 %v13187_v58, %v13187_v58  ;;  %v408_v29 = vadd.f32 %v331_v4, %v330_v3  ;;  %v12702_v4 = vld [vmem:[%s18478_s0 + $0xc8] sm:$0xff]  ;;  %v12705_v13 = vld [vmem:[%s18478_s0 + $0xe0] sm:$0xff] }
  0xaa   :  { %v228_v30 = vmul.f32 0.0026041667, %v147_v23  ;;  %v336_v32 = vmul.f32 %v13217_v14, %v13217_v14  ;;  %v337_v34 = vmul.f32 %v13222_v16, %v13222_v16  ;;  %v338_v36 = vmul.f32 %v13227_v18, %v13227_v18 }
  0xab   :  { %206 = vadd.xlane.f32.xlu0 %v13126_v27  ;;  %402 = vadd.xlane.f32.xlu1 %v401_v21  ;;  %v13241_v38 = vsub.f32 %v12695_v37, %v227_v25  ;;  %v13246_v41 = vsub.f32 %v12696_v39, %v227_v25  ;;  %v13251_v45 = vsub.f32 %v12697_v43, %v227_v25  ;;  %v151_v27 = vpop.xlane.xlu0 %150 }
  0xac   :  { %v13256_v48 = vsub.f32 %v12698_v47, %v228_v30  ;;  %v13261_v50 = vsub.f32 %v12699_v49, %v228_v30  ;;  %v13266_v52 = vsub.f32 %v12700_v51, %v228_v30  ;;  %v409_v53 = vadd.f32 %v408_v29, %v332_v26  ;;  %v12708_v49 = vld [vmem:[%s18478_s0 + $0xf8] sm:$0xff] }
  0xad   :  { %v155_v55 = vpop.xlane.xlu1 %154  ;;  %v229_v57 = vmul.f32 0.0026041667, %v151_v27  ;;  %v416_v59 = vadd.f32 %v337_v34, %v336_v32  ;;  %v333_v60 = vmul.f32 %v13202_v7, %v13202_v7  ;;  %v334_v61 = vmul.f32 %v13207_v9, %v13207_v9  ;;  %v11240_v32 = vld [vmem:[%s18481_s3 + $0x5a0] ss:$48 sps:$4 sm:$0xff]  }
  0xae   :  { %v230_v62 = vmul.f32 0.0026041667, %v155_v55  ;;  %v335_v63 = vmul.f32 %v13212_v11, %v13212_v11  ;;  %v342_v0 = vmul.f32 %v13256_v48, %v13256_v48  ;;  %v343_v1 = vmul.f32 %v13261_v50, %v13261_v50  ;;  %v12707_v27 = vld [vmem:[%s18478_s0 + $0xf0] sm:$0xff]  ;;  %2681 = vmatpush2.bf16.msra.mxu0 %v11240_v32  ;;  %v12713_v32 = vld [vmem:[%s18478_s0 + $0x120] sm:$0xff] }
  0xaf   :  { %406 = vadd.xlane.f32.xlu0 %v405_v19  ;;  %210 = vadd.xlane.f32.xlu1 %v13128_v28  ;;  %v13282_v3 = vsub.f32 %v12701_v2, %v229_v57  ;;  %v13287_v5 = vsub.f32 %v12702_v4, %v229_v57  ;;  %v13292_v8 = vsub.f32 %v12703_v6, %v229_v57  ;;  %v159_v10 = vpop.xlane.xlu0 %158  ;;  %v12704_v28 = vld [vmem:[%s18478_s0 + $0xd8] sm:$0xff]  ;;  %v11241_v57 = vld [vmem:[%s18481_s3 + $0x844] ss:$48 sps:$4 sm:$0xff]   ;;  %v11245_v2 = vld [vmem:[%s18481_s3 + $0x840] ss:$48 sps:$4 sm:$0xff]  }
  0xb0   :  { %v13297_v12 = vsub.f32 %v12704_v28, %v230_v62  ;;  %v13302_v15 = vsub.f32 %v12705_v13, %v230_v62  ;;  %v13307_v19 = vsub.f32 %v12706_v17, %v230_v62  ;;  %v417_v21 = vadd.f32 %v416_v59, %v338_v36  ;;  %v12710_v59 = vld [vmem:[%s18478_s0 + $0x110] sm:$0xff]  ;;  %2827 = vmatprep.subr.bf16.mxu1 %v11241_v57  ;;  %v12717_v57 = vld [vmem:[%s18478_s0 + $0x148] sm:$0xff] }
  0xb1   :  { %v412_v23 = vadd.f32 %v334_v61, %v333_v60  ;;  %v163_v25 = vpop.xlane.xlu1 %162  ;;  %v231_v26 = vmul.f32 0.0026041667, %v159_v10  ;;  %v344_v29 = vmul.f32 %v13266_v52, %v13266_v52  ;;  %v424_v30 = vadd.f32 %v343_v1, %v342_v0  ;;  %v12711_v61 = vld [vmem:[%s18478_s0 + $0x118] sm:$0xff]  ;;  %v11243_v1 = vld [vmem:[%s18481_s3 + $0x544] ss:$48 sps:$4 sm:$0xff]   ;;  %2828 = vmatpush1.bf16.msra.mxu1 %v11245_v2 }
  0xb2   :  { %v232_v34 = vmul.f32 0.0026041667, %v163_v25  ;;  %v339_v37 = vmul.f32 %v13241_v38, %v13241_v38  ;;  %v340_v39 = vmul.f32 %v13246_v41, %v13246_v41  ;;  %v341_v36 = vmul.f32 %v13251_v45, %v13251_v45  ;;  %v11246_v17 = vld [vmem:[%s18481_s3 + $0x540] ss:$48 sps:$4 sm:$0xff]   ;;  %2682 = vmatprep.subr.bf16.mxu0 %v11243_v1 }
  0xb3   :  { %218 = vadd.xlane.f32.xlu0 %v13151_v40  ;;  %410 = vadd.xlane.f32.xlu1 %v409_v53  ;;  %v413_v43 = vadd.f32 %v412_v23, %v335_v63  ;;  %v13324_v47 = vsub.f32 %v12707_v27, %v231_v26  ;;  %v13329_v51 = vsub.f32 %v12708_v49, %v231_v26  ;;  %v167_v55 = vpop.xlane.xlu0 %166  ;;  %v12709_v40 = vld [vmem:[%s18478_s0 + $0x108] sm:$0xff]  ;;  %v12712_v63 = vld [vmem:[%s18478_s0 + $0x100] sm:$0xff] }
  0xb4   :  { %v13337_v53 = vsub.f32 %v12709_v40, %v232_v34  ;;  %v13342_v60 = vsub.f32 %v12710_v59, %v232_v34  ;;  %v13347_v62 = vsub.f32 %v12711_v61, %v232_v34  ;;  %v13352_v0 = vsub.f32 %v12712_v63, %v231_v26  ;;  %v11247_v49 = vld [vmem:[%s18481_s3 + $0x7e4] ss:$48 sps:$4 sm:$0xff]   ;;  %2683 = vmatpush2.bf16.msra.mxu0 %v11246_v17  ;;  %v11251_v1 = vld [vmem:[%s18481_s3 + $0x7e0] ss:$48 sps:$4 sm:$0xff]  }
  0xb5   :  { %18771 = vst [vmem:[#allocation5_spill] sm:$0xff] %v13324_v47  ;;  %18772 = vst [vmem:[#allocation6_spill] sm:$0xff] %v13329_v51  ;;  %v425_v4 = vadd.f32 %v424_v30, %v344_v29  ;;  %v420_v6 = vadd.f32 %v340_v39, %v339_v37  ;;  %v171_v10 = vpop.xlane.xlu1 %170  ;;  %v233_v28 = vmul.f32 0.0026041667, %v167_v55  ;;  %v348_v13 = vmul.f32 %v13297_v12, %v13297_v12  ;;  %v12714_v37 = vld [vmem:[%s18478_s0 + $0x128] sm:$0xff]  ;;  %v12718_v59 = vld [vmem:[%s18478_s0 + $0x130] sm:$0xff] }
  0xb6   :  { %18773 = vst [vmem:[#allocation7_spill] sm:$0xff] %v13337_v53  ;;  %18774 = vst [vmem:[#allocation8_spill] sm:$0xff] %v13342_v60  ;;  %v234_v23 = vmul.f32 0.0026041667, %v171_v10  ;;  %v349_v25 = vmul.f32 %v13302_v15, %v13302_v15  ;;  %v350_v26 = vmul.f32 %v13307_v19, %v13307_v19  ;;  %v345_v29 = vmul.f32 %v13282_v3, %v13282_v3  ;;  %v11249_v63 = vld [vmem:[%s18481_s3 + $0x4e4] ss:$48 sps:$4 sm:$0xff]  }
  0xb7   :  { %18775 = vst [vmem:[#allocation9_spill] sm:$0xff] %v13347_v62  ;;  %18776 = vst [vmem:[#allocation10_spill] sm:$0xff] %v13352_v0  ;;  %418 = vadd.xlane.f32.xlu0 %v417_v21  ;;  %414 = vadd.xlane.f32.xlu1 %v413_v43  ;;  %v421_v30 = vadd.f32 %v420_v6, %v341_v36  ;;  %v13374_v34 = vsub.f32 %v12713_v32, %v233_v28  ;;  %v175_v27 = vpop.xlane.xlu0 %174  ;;  %v12715_v21 = vld [vmem:[%s18478_s0 + $0x138] sm:$0xff]  ;;  %v12716_v43 = vld [vmem:[%s18478_s0 + $0x140] sm:$0xff] }
  0xb8   :  { %v13379_v39 = vsub.f32 %v12714_v37, %v233_v28  ;;  %v13387_v36 = vsub.f32 %v12715_v21, %v234_v23  ;;  %v13392_v55 = vsub.f32 %v12716_v43, %v234_v23  ;;  %v13397_v40 = vsub.f32 %v12717_v57, %v234_v23  ;;  %2829 = vmatprep.subr.bf16.mxu1 %v11247_v49  ;;  %v12719_v21 = vld [vmem:[%s18478_s0 + $0x150] sm:$0xff] }
  0xb9   :  { %18777 = vst [vmem:[#allocation11_spill] sm:$0xff] %v13374_v34  ;;  %v13402_v61 = vsub.f32 %v12718_v59, %v233_v28  ;;  %v432_v2 = vadd.f32 %v349_v25, %v348_v13  ;;  %v346_v6 = vmul.f32 %v13287_v5, %v13287_v5  ;;  %v347_v10 = vmul.f32 %v13292_v8, %v13292_v8  ;;  %v179_v23 = vpop.xlane.xlu1 %178  ;;  %v11252_v28 = vld [vmem:[%s18481_s3 + $0x4e0] ss:$48 sps:$4 sm:$0xff]   ;;  %v11253_v59 = vld [vmem:[%s18481_s3 + $0x784] ss:$48 sps:$4 sm:$0xff]  }
  0xba   :  { %18778 = vst [vmem:[#allocation12_spill] sm:$0xff] %v13379_v39  ;;  %18779 = vst [vmem:[#allocation13_spill] sm:$0xff] %v13387_v36  ;;  %v235_v32 = vmul.f32 0.0026041667, %v175_v27  ;;  %v236_v17 = vmul.f32 0.0026041667, %v179_v23  ;;  %v354_v37 = vmul.f32 %v13337_v53, %v13337_v53  ;;  %v355_v13 = vmul.f32 %v13342_v60, %v13342_v60  ;;  %2684 = vmatprep.subr.bf16.mxu0 %v11249_v63 }
  0xbb   :  { %18780 = vst [vmem:[#allocation14_spill] sm:$0xff] %v13392_v55  ;;  %18781 = vst [vmem:[#allocation15_spill] sm:$0xff] %v13397_v40  ;;  %v356_v25 = vmul.f32 %v13347_v62, %v13347_v62  ;;  %2830 = vmatpush1.bf16.msra.mxu1 %v11251_v1  ;;  %426 = vadd.xlane.f32.xlu0 %v425_v4  ;;  %v433_v27 = vadd.f32 %v432_v2, %v350_v26  ;;  %v183_v57 = vpop.xlane.xlu0 %182  ;;  %v12720_v63 = vld [vmem:[%s18478_s0 + $0x168] sm:$0xff]  ;;  %v12721_v4 = vld [vmem:[%s18478_s0 + $0x170] sm:$0xff] }
  0xbc   :  { %18782 = vst [vmem:[#allocation16_spill] sm:$0xff] %v13402_v61  ;;  %422 = vadd.xlane.f32.xlu1 %v421_v30  ;;  %v428_v49 = vadd.f32 %v346_v6, %v345_v29  ;;  %v13426_v43 = vsub.f32 %v12719_v21, %v235_v32  ;;  %v13434_v1 = vsub.f32 %v12720_v63, %v236_v17  ;;  %v12722_v29 = vld [vmem:[%s18478_s0 + $0x178] sm:$0xff]  ;;  %v11255_v23 = vld [vmem:[%s18481_s3 + $0x484] ss:$48 sps:$4 sm:$0xff]   ;;  %v11257_v21 = vld [vmem:[%s18481_s3 + $0x780] ss:$48 sps:$4 sm:$0xff]  }
  0xbd   :  { %v13439_v26 = vsub.f32 %v12721_v4, %v236_v17  ;;  %v13444_v30 = vsub.f32 %v12722_v29, %v236_v17  ;;  %v12723_v2 = vld [vmem:[%s18478_s0 + $0x158] sm:$0xff]  ;;  %2685 = vmatpush2.bf16.msra.mxu0 %v11252_v28  ;;  %v12724_v17 = vld [vmem:[%s18478_s0 + $0x160] sm:$0xff]  ;;  %v440_v29 = vadd.f32 %v355_v13, %v354_v37  ;;  %v187_v28 = vpop.xlane.xlu1 %186  ;;  %2831 = vmatprep.subr.bf16.mxu1 %v11253_v59  ;;  %v237_v60 = vmul.f32 0.0026041667, %v183_v57 }
  0xbe   :  { %18783 = vst [vmem:[#allocation17_spill] sm:$0xff] %v13426_v43  ;;  %18784 = vst [vmem:[#allocation18_spill] sm:$0xff] %v13434_v1  ;;  %v13449_v6 = vsub.f32 %v12723_v2, %v235_v32  ;;  %v429_v63 = vadd.f32 %v428_v49, %v347_v10  ;;  %v13460_v4 = vsub.f32 %v12724_v17, %v235_v32  ;;  %v11258_v53 = vld [vmem:[%s18481_s3 + $0x480] ss:$48 sps:$4 sm:$0xff]   ;;  %v238_v49 = vmul.f32 0.0026041667, %v187_v28 }
  0xbf   :  { %18785 = vst [vmem:[#allocation19_spill] sm:$0xff] %v13439_v26  ;;  %18786 = vst [vmem:[#allocation20_spill] sm:$0xff] %v13444_v30  ;;  %v351_v2 = vmul.f32 %v13324_v47, %v13324_v47  ;;  %v352_v62 = vmul.f32 %v13329_v51, %v13329_v51  ;;  %v353_v10 = vmul.f32 %v13352_v0, %v13352_v0  ;;  %2686 = vmatprep.subr.bf16.mxu0 %v11255_v23  ;;  %v191_v59 = vpop.xlane.xlu0 %190  ;;  %v11259_v17 = vld [vmem:[%s18481_s3 + $0x724] ss:$48 sps:$4 sm:$0xff]   ;;  %v12725_v57 = vld [vmem:[%s18478_s0 + $0x198] sm:$0xff] }
  0xc0   :  { %2832 = vmatpush1.bf16.msra.mxu1 %v11257_v21  ;;  %434 = vadd.xlane.f32.xlu0 %v433_v27  ;;  %v441_v32 = vadd.f32 %v440_v29, %v356_v25  ;;  %v360_v37 = vmul.f32 %v13387_v36, %v13387_v36  ;;  %v361_v13 = vmul.f32 %v13392_v55, %v13392_v55  ;;  %v12726_v25 = vld [vmem:[%s18478_s0 + $0x1a0] sm:$0xff]  ;;  %v12727_v21 = vld [vmem:[%s18478_s0 + $0x1a8] sm:$0xff] }
  0xc1   :  { %430 = vadd.xlane.f32.xlu1 %v429_v63  ;;  %v436_v47 = vadd.f32 %v352_v62, %v351_v2  ;;  %v13481_v23 = vsub.f32 %v12725_v57, %v238_v49  ;;  %v13486_v27 = vsub.f32 %v12726_v25, %v238_v49  ;;  %v13491_v63 = vsub.f32 %v12727_v21, %v238_v49  ;;  %v11261_v62 = vld [vmem:[%s18481_s3 + $0x424] ss:$48 sps:$4 sm:$0xff]   ;;  %v11263_v29 = vld [vmem:[%s18481_s3 + $0x720] ss:$48 sps:$4 sm:$0xff]   ;;  %v12729_v49 = vld [vmem:[%s18478_s0 + $0x188] sm:$0xff]  ;;  %v195_v36 = vpop.xlane.xlu1 %194 }
  0xc2   :  { %2687 = vmatpush2.bf16.msra.mxu0 %v11258_v53  ;;  %v12728_v2 = vld [vmem:[%s18478_s0 + $0x180] sm:$0xff]  ;;  %v13507_v57 = vsub.f32 %v12729_v49, %v237_v60  ;;  %v12730_v53 = vld [vmem:[%s18478_s0 + $0x190] sm:$0xff]  ;;  %v362_v21 = vmul.f32 %v13397_v40, %v13397_v40  ;;  %2833 = vmatprep.subr.bf16.mxu1 %v11259_v17  ;;  %v448_v0 = vadd.f32 %v361_v13, %v360_v37  ;;  %v239_v40 = vmul.f32 0.0026041667, %v191_v59 }
  0xc3   :  { %18787 = vst [vmem:[#allocation21_spill] sm:$0xff] %v13481_v23  ;;  %18788 = vst [vmem:[#allocation22_spill] sm:$0xff] %v13486_v27  ;;  %v13502_v28 = vsub.f32 %v12728_v2, %v237_v60  ;;  %v13512_v25 = vsub.f32 %v12730_v53, %v237_v60  ;;  %v11264_v2 = vld [vmem:[%s18481_s3 + $0x420] ss:$48 sps:$4 sm:$0xff]   ;;  %v437_v55 = vadd.f32 %v436_v47, %v353_v10  ;;  %2688 = vmatprep.subr.bf16.mxu0 %v11261_v62  ;;  %v11265_v47 = vld [vmem:[%s18481_s3 + $0x6c4] ss:$48 sps:$4 sm:$0xff]  }
  0xc4   :  { %18789 = vst [vmem:[#allocation23_spill] sm:$0xff] %v13491_v63  ;;  %v357_v49 = vmul.f32 %v13374_v34, %v13374_v34  ;;  %v358_v51 = vmul.f32 %v13379_v39, %v13379_v39  ;;  %442 = vadd.xlane.f32.xlu0 %v441_v32  ;;  %v359_v60 = vmul.f32 %v13402_v61, %v13402_v61  ;;  %v240_v53 = vmul.f32 0.0026041667, %v195_v36  ;;  %v11267_v36 = vld [vmem:[%s18481_s3 + $0x3c4] ss:$48 sps:$4 sm:$0xff]   ;;  %v12735_v34 = vld [vmem:[%s18478_s0 + $0x1b8] sm:$0xff] }
  0xc5   :  { %18790 = vst [vmem:[#allocation24_spill] sm:$0xff] %v13502_v28  ;;  %v366_v17 = vmul.f32 %v13434_v1, %v13434_v1  ;;  %2834 = vmatpush1.bf16.msra.mxu1 %v11263_v29  ;;  %438 = vadd.xlane.f32.xlu1 %v437_v55  ;;  %v449_v10 = vadd.f32 %v448_v0, %v362_v21  ;;  %v11269_v59 = vld [vmem:[%s18481_s3 + $0x6c0] ss:$48 sps:$4 sm:$0xff]   ;;  %v12731_v55 = vld [vmem:[%s18478_s0 + $0x1c8] sm:$0xff]  ;;  %v12733_v29 = vld [vmem:[%s18478_s0 + $0x1d8] sm:$0xff] }
  0xc6   :  { %v444_v37 = vadd.f32 %v358_v51, %v357_v49  ;;  %v367_v13 = vmul.f32 %v13439_v26, %v13439_v26  ;;  %v368_v32 = vmul.f32 %v13444_v30, %v13444_v30  ;;  %v13543_v0 = vsub.f32 %v12731_v55, %v240_v53  ;;  %v12732_v51 = vld [vmem:[%s18478_s0 + $0x1d0] sm:$0xff]  ;;  %v203_v55 = vpop.xlane.xlu1 %202  ;;  %v199_v30 = vpop.xlane.xlu0 %198  ;;  %2689 = vmatpush2.bf16.msra.mxu0 %v11264_v2 }
  0xc7   :  { %v13548_v62 = vsub.f32 %v12732_v51, %v240_v53  ;;  %v13553_v21 = vsub.f32 %v12733_v29, %v240_v53  ;;  %v12734_v49 = vld [vmem:[%s18478_s0 + $0x1b0] sm:$0xff]  ;;  %v13566_v53 = vsub.f32 %v12735_v34, %v239_v40  ;;  %v12736_v29 = vld [vmem:[%s18478_s0 + $0x1c0] sm:$0xff]  ;;  %2835 = vmatprep.subr.bf16.mxu1 %v11265_v47  ;;  %v363_v2 = vmul.f32 %v13426_v43, %v13426_v43 }
  0xc8   :  { %18791 = vst [vmem:[#allocation25_spill] sm:$0xff] %v13543_v0  ;;  %v13558_v1 = vsub.f32 %v12734_v49, %v239_v40  ;;  %v11270_v51 = vld [vmem:[%s18481_s3 + $0x3c0] ss:$48 sps:$4 sm:$0xff]   ;;  %v445_v26 = vadd.f32 %v444_v37, %v359_v60  ;;  %v13571_v49 = vsub.f32 %v12736_v29, %v239_v40  ;;  %v456_v61 = vadd.f32 %v367_v13, %v366_v17  ;;  %v11271_v39 = vld [vmem:[%s18481_s3 + $0x664] ss:$48 sps:$4 sm:$0xff]  }
  0xc9   :  { %18792 = vst [vmem:[#allocation26_spill] sm:$0xff] %v13548_v62  ;;  %18793 = vst [vmem:[#allocation27_spill] sm:$0xff] %v13553_v21  ;;  %450 = vadd.xlane.f32.xlu0 %v449_v10  ;;  %v364_v60 = vmul.f32 %v13449_v6, %v13449_v6  ;;  %v365_v37 = vmul.f32 %v13460_v4, %v13460_v4  ;;  %v242_v34 = vmul.f32 0.0026041667, %v203_v55  ;;  %2690 = vmatprep.subr.bf16.mxu0 %v11267_v36  ;;  %v11273_v13 = vld [vmem:[%s18481_s3 + $0x364] ss:$48 sps:$4 sm:$0xff]  }
  0xca   :  { %18794 = vst [vmem:[#allocation28_spill] sm:$0xff] %v13558_v1  ;;  %446 = vadd.xlane.f32.xlu1 %v445_v26  ;;  %v457_v40 = vadd.f32 %v456_v61, %v368_v32  ;;  %v241_v17 = vmul.f32 0.0026041667, %v199_v30  ;;  %v372_v47 = vmul.f32 %v13481_v23, %v13481_v23  ;;  %v373_v10 = vmul.f32 %v13486_v27, %v13486_v27  ;;  %v12737_v36 = vld [vmem:[%s18478_s0 + $0x1f8] sm:$0xff]  ;;  %v12738_v61 = vld [vmem:[%s18478_s0 + $0x200] sm:$0xff]  ;;  %v12739_v30 = vld [vmem:[%s18478_s0 + $0x208] sm:$0xff] }
  0xcb   :  { %2836 = vmatpush1.bf16.msra.mxu1 %v11269_v59  ;;  %v452_v55 = vadd.f32 %v364_v60, %v363_v2  ;;  %v13592_v29 = vsub.f32 %v12737_v36, %v242_v34  ;;  %v13597_v26 = vsub.f32 %v12738_v61, %v242_v34  ;;  %v13602_v32 = vsub.f32 %v12739_v30, %v242_v34  ;;  %v11275_v59 = vld [vmem:[%s18481_s3 + $0x660] ss:$48 sps:$4 sm:$0xff]   ;;  %v12741_v36 = vld [vmem:[%s18478_s0 + $0x1e8] sm:$0xff] }
  0xcc   :  { %2691 = vmatpush2.bf16.msra.mxu0 %v11270_v51  ;;  %v12740_v2 = vld [vmem:[%s18478_s0 + $0x1e0] sm:$0xff]  ;;  %v13615_v61 = vsub.f32 %v12741_v36, %v241_v17  ;;  %v12742_v51 = vld [vmem:[%s18478_s0 + $0x1f0] sm:$0xff]  ;;  %v374_v30 = vmul.f32 %v13491_v63, %v13491_v63  ;;  %2837 = vmatprep.subr.bf16.mxu1 %v11271_v39  ;;  %v369_v27 = vmul.f32 %v13502_v28, %v13502_v28 }
  0xcd   :  { %18795 = vst [vmem:[#allocation29_spill] sm:$0xff] %v13592_v29  ;;  %18796 = vst [vmem:[#allocation30_spill] sm:$0xff] %v13597_v26  ;;  %v13610_v60 = vsub.f32 %v12740_v2, %v241_v17  ;;  %v13620_v34 = vsub.f32 %v12742_v51, %v241_v17  ;;  %458 = vadd.xlane.f32.xlu0 %v457_v40  ;;  %v453_v23 = vadd.f32 %v452_v55, %v365_v37  ;;  %v11276_v43 = vld [vmem:[%s18481_s3 + $0x360] ss:$48 sps:$4 sm:$0xff]   ;;  %v11277_v40 = vld [vmem:[%s18481_s3 + $0x604] ss:$48 sps:$4 sm:$0xff]  }
  0xce   :  { %18797 = vst [vmem:[#allocation31_spill] sm:$0xff] %v13602_v32  ;;  %v464_v2 = vadd.f32 %v373_v10, %v372_v47  ;;  %v370_v36 = vmul.f32 %v13507_v57, %v13507_v57  ;;  %v371_v17 = vmul.f32 %v13512_v25, %v13512_v25  ;;  %v378_v51 = vmul.f32 %v13543_v0, %v13543_v0  ;;  %v11279_v47 = vld [vmem:[%s18481_s3 + $0x304] ss:$48 sps:$4 sm:$0xff]  }
  0xcf   :  { %18798 = vst [vmem:[#allocation32_spill] sm:$0xff] %v13610_v60  ;;  %18799 = vst [vmem:[#allocation33_spill] sm:$0xff] %v13620_v34  ;;  %v379_v39 = vmul.f32 %v13548_v62, %v13548_v62  ;;  %v380_v37 = vmul.f32 %v13553_v21, %v13553_v21  ;;  %2692 = vmatprep.subr.bf16.mxu0 %v11273_v13  ;;  %454 = vadd.xlane.f32.xlu1 %v453_v23  ;;  %v11281_v13 = vld [vmem:[%s18481_s3 + $0x600] ss:$48 sps:$4 sm:$0xff]  }
  0xd0   :  { %v465_v10 = vadd.f32 %v464_v2, %v374_v30  ;;  %v460_v55 = vadd.f32 %v370_v36, %v369_v27  ;;  %v375_v0 = vmul.f32 %v13558_v1, %v13558_v1  ;;  %v376_v62 = vmul.f32 %v13566_v53, %v13566_v53  ;;  %2838 = vmatpush1.bf16.msra.mxu1 %v11275_v59  ;;  %v11282_v27 = vld [vmem:[%s18481_s3 + $0x300] ss:$48 sps:$4 sm:$0xff]  }
  0xd1   :  { %v472_v21 = vadd.f32 %v379_v39, %v378_v51  ;;  %v377_v28 = vmul.f32 %v13571_v49, %v13571_v49  ;;  %v384_v63 = vmul.f32 %v13592_v29, %v13592_v29  ;;  %v385_v23 = vmul.f32 %v13597_v26, %v13597_v26  ;;  %2693 = vmatpush2.bf16.msra.mxu0 %v11276_v43  ;;  %v11285_v43 = vld [vmem:[%s18481_s3 + $0x2ac] ss:$48 sps:$4 sm:$0xff]  }
  0xd2   :  { %466 = vadd.xlane.f32.xlu0 %v465_v10  ;;  %v461_v30 = vadd.f32 %v460_v55, %v371_v17  ;;  %v468_v2 = vadd.f32 %v376_v62, %v375_v0  ;;  %v386_v36 = vmul.f32 %v13602_v32, %v13602_v32  ;;  %v381_v51 = vmul.f32 %v13610_v60, %v13610_v60 }
  0xd3   :  { %v473_v39 = vadd.f32 %v472_v21, %v380_v37  ;;  %v480_v1 = vadd.f32 %v385_v23, %v384_v63  ;;  %v382_v29 = vmul.f32 %v13615_v61, %v13615_v61  ;;  %v383_v26 = vmul.f32 %v13620_v34, %v13620_v34  ;;  %2839 = vmatprep.subr.bf16.mxu1 %v11277_v40  ;;  %v12743_v23 = vld [vmem:[%s18478_s0 + $0x210] sm:$0xff] }
  0xd4   :  { %462 = vadd.xlane.f32.xlu1 %v461_v30  ;;  %v469_v59 = vadd.f32 %v468_v2, %v377_v28  ;;  %2694 = vmatprep.subr.bf16.mxu0 %v11279_v47  ;;  %v18512_v62 = vmov 0   ;;  %v11300_v28 = vld [vmem:[%s18481_s3 + $0x8ac] ss:$48 sps:$4 sm:$0xff]  }
  0xd5   :  { %v476_v17 = vadd.f32 %v382_v29, %v381_v51  ;;  %2840 = vmatpush1.bf16.msra.mxu1 %v11281_v13  ;;  %v481_v0 = vadd.f32 %v480_v1, %v386_v36  ;;  %2857 = vmatprep.mubr.bf16.mxu1 %v18512_v62  ;;  %v651_v29 = vlaneseq  ;;  %v12744_v30 = vld [vmem:[%s18478_s0 + $0x218] sm:$0xff]  ;;  %v12745_v36 = vld [vmem:[%s18478_s0 + $0x220] sm:$0xff] }
  0xd6   :  { %474 = vadd.xlane.f32.xlu0 %v473_v39  ;;  %2695 = vmatpush2.bf16.msra.mxu0 %v11282_v27 }
  0xd7   :  { %v477_v63 = vadd.f32 %v476_v17, %v383_v26  ;;  %2986 = vmatprep.subr.bf16.mxu1 %v11285_v43  ;;  %3147 = vmatprep.subr.bf16.mxu0 %v11300_v28  ;;  %v13676_v55 = vshrl.u32 %v651_v29, 7 }
  0xd8   :  { %470 = vadd.xlane.f32.xlu1 %v469_v59 }
  0xd9   :  { %18800 = vst [vmem:[#allocation34_spill] sm:$0xff] %v13676_v55 }
  0xda   :  { %482 = vadd.xlane.f32.xlu0 %v481_v0 }
  0xdc   :  { %478 = vadd.xlane.f32.xlu1 %v477_v63 }
 0x130   :  { %v399_v21 = vpop.xlane.xlu0 %398 }
 0x131   :  { %v499_v1 = vmul.f32 0.0026041667, %v399_v21  ;;  %v13700_v21 = vsub.s32 1, %v13676_v55 }
 0x133   :  { %v524_v37 = vadd.f32 1e-06, %v499_v1  ;;  %18804 = vst [vmem:[#allocation38_spill] sm:$0xff] %v13700_v21  ;;  %v12746_v1 = vld [vmem:[%s18478_s0 + $0x228] sm:$0xff] }
 0x134   :  { %v403_v40 = vpop.xlane.xlu1 %402  ;;  %v207_v47 = vpop.xlane.xlu0 %206 }
 0x135   :  { %12027 = vrsqrt.f32 %v524_v37  ;;  %v500_v26 = vmul.f32 0.0026041667, %v403_v40  ;;  %v243_v10 = vmul.f32 0.0026041667, %v207_v47  ;;  %v12747_v37 = vld [vmem:[%s18478_s0 + $0x230] sm:$0xff] }
 0x137   :  { %v525_v13 = vadd.f32 1e-06, %v500_v26  ;;  %v13681_v27 = vsub.f32 %v12743_v23, %v243_v10  ;;  %v13686_v2 = vsub.f32 %v12744_v30, %v243_v10  ;;  %v13691_v51 = vsub.f32 %v12745_v36, %v243_v10  ;;  %v649_v26 = vld [vmem:[%s18479_s1] sm:$0x7] }
 0x138   :  { %v211_v39 = vpop.xlane.xlu1 %210  ;;  %v407_v59 = vpop.xlane.xlu0 %406  ;;  %v741_v10 = vld [vmem:[%s18480_s2] sm:$0x7] }
 0x139   :  { %18801 = vst [vmem:[#allocation35_spill] sm:$0xff] %v13681_v27  ;;  %18802 = vst [vmem:[#allocation36_spill] sm:$0xff] %v13686_v2  ;;  %12029 = vrsqrt.f32 %v525_v13  ;;  %v244_v17 = vmul.f32 0.0026041667, %v211_v39  ;;  %v501_v0 = vmul.f32 0.0026041667, %v407_v59  ;;  %v387_v63 = vmul.f32 %v13681_v27, %v13681_v27 }
 0x13a   :  { %18803 = vst [vmem:[#allocation37_spill] sm:$0xff] %v13691_v51  ;;  %v388_v43 = vmul.f32 %v13686_v2, %v13686_v2  ;;  %v389_v28 = vmul.f32 %v13691_v51, %v13691_v51  ;;  %v12748_v13 = vld [vmem:[%s18478_s0 + $0x238] sm:$0xff]  ;;  %v13724_v59 = vsub.s32 2, %v13676_v55 }
 0x13b   :  { %v13705_v29 = vsub.f32 %v12746_v1, %v244_v17  ;;  %v13710_v40 = vsub.f32 %v12747_v37, %v244_v17  ;;  %v526_v47 = vadd.f32 1e-06, %v501_v0  ;;  %v13721_v23 = vsub.f32 %v12748_v13, %v244_v17 }
 0x13c   :  { %v411_v30 = vpop.xlane.xlu1 %410  ;;  %v219_v36 = vpop.xlane.xlu0 %218  ;;  %v484_v39 = vadd.f32 %v388_v43, %v387_v63  ;;  %18808 = vst [vmem:[#allocation42_spill] sm:$0xff] %v13724_v59  ;;  %v13727_v0 = vsub.s32 0, %v13676_v55  ;;  %v13734_v13 = vrot.slane %v649_v26, %v13700_v21  ;;  %v13737_v63 = vrot.slane %v741_v10, %v13700_v21 }
 0x13d   :  { %18805 = vst [vmem:[#allocation39_spill] sm:$0xff] %v13705_v29  ;;  %18806 = vst [vmem:[#allocation40_spill] sm:$0xff] %v13710_v40  ;;  %12031 = vrsqrt.f32 %v526_v47  ;;  %v502_v1 = vmul.f32 0.0026041667, %v411_v30  ;;  %v245_v37 = vmul.f32 0.0026041667, %v219_v36  ;;  %v390_v62 = vmul.f32 %v13705_v29, %v13705_v29 }
 0x13e   :  { %18807 = vst [vmem:[#allocation41_spill] sm:$0xff] %v13721_v23  ;;  %18809 = vst [vmem:[#allocation43_spill] sm:$0xff] %v13727_v0  ;;  %v485_v27 = vadd.f32 %v484_v39, %v389_v28  ;;  %v391_v17 = vmul.f32 %v13710_v40, %v13710_v40  ;;  %v12749_v47 = vld [vmem:[%s18478_s0 + $0x240] sm:$0xf]  ;;  %v12750_v28 = vld [vmem:[%s18478_s0 + $0x248] sm:$0xf]  ;;  %v392_v29 = vmul.f32 %v13721_v23, %v13721_v23 }
 0x13f   :  { %v527_v43 = vadd.f32 1e-06, %v502_v1  ;;  %v13742_v30 = vsub.f32 %v12749_v47, %v245_v37  ;;  %v13747_v36 = vsub.f32 %v12750_v28, %v245_v37  ;;  %v12751_v39 = vld [vmem:[%s18478_s0 + $0x250] sm:$0xf]  ;;  %v13757_v40 = vrot.slane %v649_v26, %v13724_v59 }
 0x140   :  { %v13752_v55 = vsub.f32 %v12751_v39, %v245_v37  ;;  %486 = vadd.xlane.f32.xlu1 %v485_v27  ;;  %v415_v1 = vpop.xlane.xlu1 %414  ;;  %v419_v21 = vpop.xlane.xlu0 %418  ;;  %v488_v47 = vadd.f32 %v391_v17, %v390_v62  ;;  %v13760_v51 = vrot.slane %v741_v10, %v13724_v59  ;;  %v13769_v17 = vrot.slane %v649_v26, %v13727_v0 }
 0x141   :  { %18810 = vst [vmem:[#allocation44_spill] sm:$0xff] %v13742_v30  ;;  %18811 = vst [vmem:[#allocation45_spill] sm:$0xff] %v13747_v36  ;;  %12033 = vrsqrt.f32 %v527_v43  ;;  %v503_v28 = vmul.f32 0.0026041667, %v415_v1  ;;  %v504_v2 = vmul.f32 0.0026041667, %v419_v21  ;;  %v393_v37 = vmul.f32 %v13742_v30, %v13742_v30 }
 0x142   :  { %18812 = vst [vmem:[#allocation46_spill] sm:$0xff] %v13752_v55  ;;  %v12028_v39 = vpop.eup %12027  ;;  %v489_v27 = vadd.f32 %v488_v47, %v392_v29  ;;  %v394_v60 = vmul.f32 %v13747_v36, %v13747_v36  ;;  %v395_v62 = vmul.f32 %v13752_v55, %v13752_v55 }
 0x143   :  { %v528_v23 = vadd.f32 1e-06, %v503_v28  ;;  %v529_v59 = vadd.f32 1e-06, %v504_v2  ;;  %v492_v43 = vsel %vm212_vm0, %v393_v37, 0.0  ;;  %v575_v21 = vmul.f32 %v12028_v39, %v13119_v22 }
 0x144   :  { %490 = vadd.xlane.f32.xlu0 %v489_v27  ;;  %v427_v30 = vpop.xlane.xlu0 %426  ;;  %v493_v29 = vsel %vm212_vm0, %v394_v60, 0.0  ;;  %v495_v47 = vsel %vm212_vm0, %v395_v62, 0.0  ;;  %v576_v36 = vmul.f32 %v12028_v39, %v13124_v24  ;;  %v574_v55 = vmul.f32 %v12028_v39, %v13114_v20 }
 0x145   :  { %v423_v1 = vpop.xlane.xlu1 %422  ;;  %12035 = vrsqrt.f32 %v528_v23  ;;  %v506_v32 = vmul.f32 0.0026041667, %v427_v30  ;;  %v494_v28 = vadd.f32 %v493_v29, %v492_v43  ;;  %v667_v37 = vmul.f32 %v13734_v13, %v575_v21 }
 0x146   :  { %v505_v26 = vmul.f32 0.0026041667, %v423_v1  ;;  %v12030_v2 = vpop.eup %12029  ;;  %12037 = vrsqrt.f32 %v529_v59  ;;  %v668_v22 = vmul.f32 %v13757_v40, %v576_v36  ;;  %v13780_v27 = vrot.slane %v741_v10, %v13727_v0 }
 0x147   :  { %v496_v34 = vadd.f32 %v495_v47, %v494_v28  ;;  %v578_v62 = vmul.f32 %v12030_v2, %v13161_v44  ;;  %v666_v24 = vmul.f32 %v13769_v17, %v574_v55  ;;  %v579_v30 = vmul.f32 %v12030_v2, %v13166_v46 }
 0x148   :  { %v530_v60 = vadd.f32 1e-06, %v505_v26  ;;  %v577_v39 = vmul.f32 %v12030_v2, %v13156_v42  ;;  %v531_v59 = vadd.f32 1e-06, %v506_v32  ;;  %v759_v10 = vadd.f32 %v13737_v63, %v667_v37 }
 0x149   :  { %v435_v23 = vpop.xlane.xlu0 %434  ;;  %497 = vadd.xlane.f32.xlu1 %v496_v34  ;;  %v670_v36 = vmul.f32 %v13734_v13, %v578_v62  ;;  %v671_v29 = vmul.f32 %v13757_v40, %v579_v30  ;;  %v760_v44 = vadd.f32 %v13760_v51, %v668_v22  ;;  %v758_v42 = vadd.f32 %v13780_v27, %v666_v24 }
 0x14a   :  { %v431_v20 = vpop.xlane.xlu1 %430  ;;  %v12032_v21 = vpop.eup %12031  ;;  %v508_v1 = vmul.f32 0.0026041667, %v435_v23  ;;  %v669_v55 = vmul.f32 %v13769_v17, %v577_v39  ;;  %12039 = vrsqrt.f32 %v530_v60  ;;  %v11283_v60 = vld [vmem:[%s18481_s3 + $0x2a8] ss:$48 sps:$4 sm:$0xff]  }
 0x14b   :  { %v507_v43 = vmul.f32 0.0026041667, %v431_v20  ;;  %v762_v46 = vadd.f32 %v13737_v63, %v670_v36  ;;  %v581_v32 = vmul.f32 %v12032_v21, %v13138_v33  ;;  %v763_v47 = vadd.f32 %v13760_v51, %v671_v29  ;;  %v11288_v33 = vld [vmem:[%s18481_s3 + $0x24c] ss:$48 sps:$4 sm:$0xff]  }
 0x14c   :  { %v761_v26 = vadd.f32 %v13780_v27, %v669_v55  ;;  %v582_v28 = vmul.f32 %v12032_v21, %v13143_v35  ;;  %v580_v2 = vmul.f32 %v12032_v21, %v13133_v31  ;;  %12041 = vrsqrt.f32 %v531_v59  ;;  %v11298_v31 = vld [vmem:[%s18481_s3 + $0x8a8] ss:$48 sps:$4 sm:$0xff]   ;;  %v11309_v36 = vld [vmem:[%s18481_s3 + $0x84c] ss:$48 sps:$4 sm:$0xff]  }
 0x14d   :  { %v443_v34 = vpop.xlane.xlu0 %442  ;;  %v532_v37 = vadd.f32 1e-06, %v507_v43  ;;  %v13798_v62 = vpack.c.bf16 %v762_v46, %v759_v10  ;;  %v533_v20 = vadd.f32 1e-06, %v508_v1  ;;  %v13806_v30 = vpack.c.bf16 %v763_v47, %v760_v44  ;;  %v11291_v47 = vld [vmem:[%s18481_s3 + $0x1ec] ss:$48 sps:$4 sm:$0xff]  }
 0x14e   :  { %v439_v22 = vpop.xlane.xlu1 %438  ;;  %v12034_v24 = vpop.eup %12033  ;;  %v510_v23 = vmul.f32 0.0026041667, %v443_v34  ;;  %v13808_v35 = vpack.c.bf16 %v761_v26, %v758_v42  ;;  %v673_v59 = vmul.f32 %v13734_v13, %v581_v32  ;;  %v674_v21 = vmul.f32 %v13757_v40, %v582_v28  ;;  %v11286_v42 = vld [vmem:[%s18481_s3 + $0x248] ss:$48 sps:$4 sm:$0xff]  }
 0x14f   :  { %18813 = vst [vmem:[#allocation47_spill] sm:$0xff] %v13798_v62  ;;  %18814 = vst [vmem:[#allocation48_spill] sm:$0xff] %v13806_v30  ;;  %2696 = vmatprep.mubr.bf16.mxu0 %v13798_v62  ;;  %v584_v39 = vmul.f32 %v12034_v24, %v13182_v56  ;;  %v585_v43 = vmul.f32 %v12034_v24, %v13187_v58  ;;  %2858 = vmatmul.mubr.bf16.vlgmr.msra.gmra.mxu1 %v13806_v30  ;;  %12043 = vrsqrt.f32 %v532_v37  ;;  %v18816_v55 = vmov 0   ;;  %v11307_v26 = vld [vmem:[%s18481_s3 + $0x848] ss:$48 sps:$4 sm:$0xff]  }
 0x150   :  { %18815 = vst [vmem:[#allocation49_spill] sm:$0xff] %v13808_v35  ;;  %2697 = vmatmul.mubr.bf16.vlgmr.msra.gmra.mxu0 %v13808_v35  ;;  %v583_v1 = vmul.f32 %v12034_v24, %v13177_v54  ;;  %v672_v29 = vmul.f32 %v13769_v17, %v580_v2  ;;  %v509_v56 = vmul.f32 0.0026041667, %v439_v22  ;;  %2867 = vmatprep.mubr.bf16.mxu1 %v18816_v55  ;;  %12045 = vrsqrt.f32 %v533_v20 }
 0x151   :  { %v676_v58 = vmul.f32 %v13734_v13, %v584_v39  ;;  %v677_v46 = vmul.f32 %v13757_v40, %v585_v43  ;;  %2987 = vmatpush1.bf16.msra.mxu1 %v11283_v60  ;;  %v535_v34 = vadd.f32 1e-06, %v510_v23  ;;  %3148 = vmatpush1.bf16.msra.mxu0 %v11298_v31  ;;  %v765_v2 = vadd.f32 %v13737_v63, %v673_v59 }
 0x152   :  { %v451_v10 = vpop.xlane.xlu0 %450  ;;  %v12036_v32 = vpop.eup %12035  ;;  %v675_v54 = vmul.f32 %v13769_v17, %v583_v1  ;;  %2988 = vmatprep.subr.bf16.mxu1 %v11288_v33  ;;  %v766_v22 = vadd.f32 %v13760_v51, %v674_v21  ;;  %3149 = vmatprep.subr.bf16.mxu0 %v11309_v36  ;;  %v11318_v33 = vld [vmem:[%s18481_s3 + $0x7ec] ss:$48 sps:$4 sm:$0xff]   ;;  %v764_v20 = vadd.f32 %v13780_v27, %v672_v29  ;;  %v534_v59 = vadd.f32 1e-06, %v509_v56  ;;  %v11289_v36 = vld [vmem:[%s18481_s3 + $0x1e8] ss:$48 sps:$4 sm:$0xff]  }
 0x153   :  { %v447_v44 = vpop.xlane.xlu1 %446  ;;  %v12038_v28 = vpop.eup %12037  ;;  %v768_v37 = vadd.f32 %v13737_v63, %v676_v58  ;;  %v769_v60 = vadd.f32 %v13760_v51, %v677_v46  ;;  %v587_v31 = vmul.f32 %v12036_v32, %v13207_v9  ;;  %v512_v43 = vmul.f32 0.0026041667, %v451_v10 }
 0x154   :  { %v767_v23 = vadd.f32 %v13780_v27, %v675_v54  ;;  %v590_v39 = vmul.f32 %v12038_v28, %v13222_v16  ;;  %v11294_v16 = vld [vmem:[%s18481_s3 + $0x18c] ss:$48 sps:$4 sm:$0xff]   ;;  %v511_v10 = vmul.f32 0.0026041667, %v447_v44  ;;  %v588_v56 = vmul.f32 %v12036_v32, %v13212_v11  ;;  %v11316_v54 = vld [vmem:[%s18481_s3 + $0x7e8] ss:$48 sps:$4 sm:$0xff]  }
 0x155   :  { %v13849_v1 = vpack.c.bf16 %v768_v37, %v765_v2  ;;  %v13851_v21 = vpack.c.bf16 %v769_v60, %v766_v22  ;;  %2989 = vmatpush1.bf16.msra.mxu1 %v11286_v42  ;;  %v679_v29 = vmul.f32 %v13734_v13, %v587_v31  ;;  %3150 = vmatpush1.bf16.msra.mxu0 %v11307_v26  ;;  %12047 = vrsqrt.f32 %v535_v34  ;;  %v11327_v22 = vld [vmem:[%s18481_s3 + $0x78c] ss:$48 sps:$4 sm:$0xff]  }
 0x156   :  { %v459_v24 = vpop.xlane.xlu0 %458  ;;  %v13856_v46 = vpack.c.bf16 %v767_v23, %v764_v20  ;;  %v682_v9 = vmul.f32 %v13734_v13, %v590_v39  ;;  %2990 = vmatprep.subr.bf16.mxu1 %v11291_v47  ;;  %v591_v42 = vmul.f32 %v12038_v28, %v13227_v18  ;;  %3151 = vmatprep.subr.bf16.mxu0 %v11318_v33  ;;  %v11292_v18 = vld [vmem:[%s18481_s3 + $0x188] ss:$48 sps:$4 sm:$0xff]   ;;  %12049 = vrsqrt.f32 %v534_v59 }
 0x157   :  { %18817 = vst [vmem:[#allocation50_spill] sm:$0xff] %v13849_v1  ;;  %18818 = vst [vmem:[#allocation51_spill] sm:$0xff] %v13851_v21  ;;  %2706 = vmatprep.mubr.bf16.mxu0 %v13849_v1  ;;  %v13869_v2 = vpop.eup %12039  ;;  %2868 = vmatmul.mubr.bf16.gmra.mxu1 %v13851_v21  ;;  %v771_v44 = vadd.f32 %v13737_v63, %v679_v29  ;;  %v586_v11 = vmul.f32 %v12036_v32, %v13202_v7  ;;  %v537_v26 = vadd.f32 1e-06, %v512_v43  ;;  %v11325_v43 = vld [vmem:[%s18481_s3 + $0x788] ss:$48 sps:$4 sm:$0xff]  }
 0x158   :  { %v455_v58 = vpop.xlane.xlu1 %454  ;;  %18819 = vst [vmem:[#allocation52_spill] sm:$0xff] %v13856_v46  ;;  %2707 = vmatmul.mubr.bf16.gmra.mxu0 %v13856_v46  ;;  %v774_v47 = vadd.f32 %v13737_v63, %v682_v9  ;;  %v514_v37 = vmul.f32 0.0026041667, %v459_v24  ;;  %2877 = vmatprep.mubr.bf16.mxu1 %v18816_v55  ;;  %v680_v34 = vmul.f32 %v13757_v40, %v588_v56  ;;  %v11297_v24 = vld [vmem:[%s18481_s3 + $0x12c] ss:$48 sps:$4 sm:$0xff]  }
 0x159   :  { %2991 = vmatpush1.bf16.msra.mxu1 %v11289_v36  ;;  %v12042_v60 = vpop.eup %12041  ;;  %v683_v7 = vmul.f32 %v13757_v40, %v591_v42  ;;  %v589_v32 = vmul.f32 %v12038_v28, %v13217_v14  ;;  %v678_v23 = vmul.f32 %v13769_v17, %v586_v11  ;;  %v536_v31 = vadd.f32 1e-06, %v511_v10  ;;  %3152 = vmatpush1.bf16.msra.mxu0 %v11316_v54  ;;  %v11295_v56 = vld [vmem:[%s18481_s3 + $0x128] ss:$48 sps:$4 sm:$0xff]  }
 0x15a   :  { %v13884_v20 = vpack.c.bf16 %v774_v47, %v771_v44  ;;  %2992 = vmatprep.subr.bf16.mxu1 %v11294_v16  ;;  %v513_v39 = vmul.f32 0.0026041667, %v455_v58  ;;  %v772_v59 = vadd.f32 %v13760_v51, %v680_v34  ;;  %v593_v9 = vmul.f32 %v13869_v2, %v13246_v41  ;;  %3153 = vmatprep.subr.bf16.mxu0 %v11327_v22  ;;  %v11336_v34 = vld [vmem:[%s18481_s3 + $0x72c] ss:$48 sps:$4 sm:$0xff]  }
 0x15b   :  { %v467_v33 = vpop.xlane.xlu0 %466  ;;  %v775_v14 = vadd.f32 %v13760_v51, %v683_v7  ;;  %v681_v28 = vmul.f32 %v13769_v17, %v589_v32  ;;  %v770_v29 = vadd.f32 %v13780_v27, %v678_v23  ;;  %12051 = vrsqrt.f32 %v537_v26  ;;  %v11334_v32 = vld [vmem:[%s18481_s3 + $0x728] ss:$48 sps:$4 sm:$0xff]  }
 0x15c   :  { %18820 = vst [vmem:[#allocation53_spill] sm:$0xff] %v13884_v20  ;;  %2716 = vmatprep.mubr.bf16.mxu0 %v13884_v20  ;;  %v539_v58 = vadd.f32 1e-06, %v514_v37  ;;  %v516_v16 = vmul.f32 0.0026041667, %v467_v33  ;;  %v596_v10 = vmul.f32 %v12042_v60, %v13261_v50  ;;  %v13906_v42 = vpop.eup %12043  ;;  %v685_v47 = vmul.f32 %v13734_v13, %v593_v9 }
 0x15d   :  { %v463_v36 = vpop.xlane.xlu1 %462  ;;  %2993 = vmatpush1.bf16.msra.mxu1 %v11292_v18  ;;  %v13908_v54 = vpack.c.bf16 %v775_v14, %v772_v59  ;;  %v773_v44 = vadd.f32 %v13780_v27, %v681_v28  ;;  %v594_v41 = vmul.f32 %v13869_v2, %v13251_v45  ;;  %v11303_v50 = vld [vmem:[%s18481_s3 + $0xcc] ss:$48 sps:$4 sm:$0xff]   ;;  %v12046_v11 = vpop.eup %12045  ;;  %12053 = vrsqrt.f32 %v536_v31  ;;  %3154 = vmatpush1.bf16.msra.mxu0 %v11325_v43  ;;  %v11301_v31 = vld [vmem:[%s18481_s3 + $0xc8] ss:$48 sps:$4 sm:$0xff]  }
 0x15e   :  { %2994 = vmatprep.subr.bf16.mxu1 %v11297_v24  ;;  %v538_v18 = vadd.f32 1e-06, %v513_v39  ;;  %v515_v26 = vmul.f32 0.0026041667, %v463_v36  ;;  %v688_v37 = vmul.f32 %v13734_v13, %v596_v10  ;;  %v777_v45 = vadd.f32 %v13737_v63, %v685_v47  ;;  %v11306_v14 = vld [vmem:[%s18481_s3 + $0x6c] ss:$48 sps:$4 sm:$0xff]   ;;  %3155 = vmatprep.subr.bf16.mxu0 %v11336_v34 }
 0x15f   :  { %18821 = vst [vmem:[#allocation54_spill] sm:$0xff] %v13908_v54  ;;  %2878 = vmatmul.mubr.bf16.gmra.mxu1 %v13908_v54  ;;  %v13922_v22 = vpack.c.bf16 %v773_v44, %v770_v29  ;;  %v597_v33 = vmul.f32 %v12042_v60, %v13266_v52  ;;  %v686_v7 = vmul.f32 %v13757_v40, %v594_v41  ;;  %12055 = vrsqrt.f32 %v539_v58  ;;  %v475_v39 = vpop.xlane.xlu0 %474 }
 0x160   :  { %v541_v23 = vadd.f32 1e-06, %v516_v16  ;;  %v780_v24 = vadd.f32 %v13737_v63, %v688_v37  ;;  %2887 = vmatprep.mubr.bf16.mxu1 %v18816_v55  ;;  %v592_v43 = vmul.f32 %v13869_v2, %v13241_v38  ;;  %v595_v36 = vmul.f32 %v12042_v60, %v13256_v48 }
 0x161   :  { %18822 = vst [vmem:[#allocation55_spill] sm:$0xff] %v13922_v22  ;;  %2995 = vmatpush1.bf16.msra.mxu1 %v11295_v56  ;;  %2717 = vmatmul.mubr.bf16.gmra.mxu0 %v13922_v22  ;;  %v689_v52 = vmul.f32 %v13757_v40, %v597_v33  ;;  %v778_v59 = vadd.f32 %v13760_v51, %v686_v7  ;;  %12057 = vrsqrt.f32 %v538_v18  ;;  %v540_v28 = vadd.f32 1e-06, %v515_v26  ;;  %v471_v9 = vpop.xlane.xlu1 %470 }
 0x162   :  { %v13944_v29 = vpack.c.bf16 %v780_v24, %v777_v45  ;;  %2996 = vmatprep.subr.bf16.mxu1 %v11303_v50  ;;  %v684_v16 = vmul.f32 %v13769_v17, %v592_v43  ;;  %v687_v10 = vmul.f32 %v13769_v17, %v595_v36  ;;  %v599_v38 = vmul.f32 %v13906_v42, %v13287_v5  ;;  %v12048_v48 = vpop.eup %12047  ;;  %v11345_v36 = vld [vmem:[%s18481_s3 + $0x6cc] ss:$48 sps:$4 sm:$0xff]  }
 0x163   :  { %v781_v58 = vadd.f32 %v13760_v51, %v689_v52  ;;  %3156 = vmatpush1.bf16.msra.mxu0 %v11334_v32  ;;  %12059 = vrsqrt.f32 %v541_v23  ;;  %v518_v2 = vmul.f32 0.0026041667, %v475_v39  ;;  %v602_v60 = vmul.f32 %v12046_v11, %v13302_v15  ;;  %v12050_v44 = vpop.eup %12049 }
 0x164   :  { %18823 = vst [vmem:[#allocation56_spill] sm:$0xff] %v13944_v29  ;;  %2726 = vmatprep.mubr.bf16.mxu0 %v13944_v29  ;;  %v600_v56 = vmul.f32 %v13906_v42, %v13292_v8  ;;  %v776_v41 = vadd.f32 %v13780_v27, %v684_v16  ;;  %v779_v50 = vadd.f32 %v13780_v27, %v687_v10  ;;  %v517_v18 = vmul.f32 0.0026041667, %v471_v9  ;;  %v11304_v8 = vld [vmem:[%s18481_s3 + $0x68] ss:$48 sps:$4 sm:$0xff]   ;;  %v18830_v16 = vld [vmem:[#allocation9_spill] sm:$0xff] }
 0x165   :  { %2997 = vmatpush1.bf16.msra.mxu1 %v11301_v31  ;;  %v13955_v47 = vpack.c.bf16 %v781_v58, %v778_v59  ;;  %v691_v5 = vmul.f32 %v13734_v13, %v599_v38  ;;  %v694_v26 = vmul.f32 %v13734_v13, %v602_v60  ;;  %v603_v37 = vmul.f32 %v12046_v11, %v13307_v19  ;;  %v11312_v19 = vld [vmem:[%s18481_s3 + $0xc] ss:$48 sps:$4 sm:$0xff]   ;;  %v11310_v38 = vld [vmem:[%s18481_s3 + $0x8] ss:$48 sps:$4 sm:$0xff]  }
 0x166   :  { %2998 = vmatprep.subr.bf16.mxu1 %v11306_v14  ;;  %v692_v15 = vmul.f32 %v13757_v40, %v600_v56  ;;  %v13967_v34 = vpack.c.bf16 %v779_v50, %v776_v41  ;;  %v598_v33 = vmul.f32 %v13906_v42, %v13282_v3  ;;  %v601_v7 = vmul.f32 %v12046_v11, %v13297_v12  ;;  %v18826_v31 = vld [vmem:[#allocation6_spill] sm:$0xff]  ;;  %v18827_v42 = vld [vmem:[#allocation8_spill] sm:$0xff]  ;;  %v483_v56 = vpop.xlane.xlu0 %482 }
 0x167   :  { %18824 = vst [vmem:[#allocation57_spill] sm:$0xff] %v13955_v47  ;;  %2888 = vmatmul.mubr.bf16.gmra.mxu1 %v13955_v47  ;;  %v783_v45 = vadd.f32 %v13737_v63, %v691_v5  ;;  %v786_v32 = vadd.f32 %v13737_v63, %v694_v26  ;;  %v695_v23 = vmul.f32 %v13757_v40, %v603_v37  ;;  %v18828_v59 = vld [vmem:[#allocation10_spill] sm:$0xff]  ;;  %12061 = vrsqrt.f32 %v540_v28 }
 0x168   :  { %18825 = vst [vmem:[#allocation58_spill] sm:$0xff] %v13967_v34  ;;  %2897 = vmatprep.mubr.bf16.mxu1 %v18816_v55  ;;  %v784_v24 = vadd.f32 %v13760_v51, %v692_v15  ;;  %v605_v39 = vmul.f32 %v12050_v44, %v18826_v31  ;;  %v13981_v52 = vpop.eup %12051  ;;  %v690_v3 = vmul.f32 %v13769_v17, %v598_v33  ;;  %v543_v26 = vadd.f32 1e-06, %v518_v2 }
 0x169   :  { %2727 = vmatmul.mubr.bf16.gmra.mxu0 %v13967_v34  ;;  %v693_v12 = vmul.f32 %v13769_v17, %v601_v7  ;;  %v608_v11 = vmul.f32 %v12048_v48, %v18827_v42  ;;  %v606_v43 = vmul.f32 %v12050_v44, %v18828_v59  ;;  %v13991_v14 = vpack.c.bf16 %v786_v32, %v783_v45 }
 0x16a   :  { %v787_v9 = vadd.f32 %v13760_v51, %v695_v23  ;;  %v697_v58 = vmul.f32 %v13734_v13, %v605_v39  ;;  %v609_v10 = vmul.f32 %v12048_v48, %v18830_v16  ;;  %2999 = vmatpush1.bf16.msra.mxu1 %v11304_v8  ;;  %v12054_v60 = vpop.eup %12053  ;;  %v782_v41 = vadd.f32 %v13780_v27, %v690_v3  ;;  %v18831_v8 = vld [vmem:[#allocation5_spill] sm:$0xff]  ;;  %v18832_v23 = vld [vmem:[#allocation7_spill] sm:$0xff]  ;;  %v18833_v39 = vld [vmem:[#allocation12_spill] sm:$0xff] }
 0x16b   :  { %18829 = vst [vmem:[#allocation6_spill] sm:$0xff] %v13991_v14  ;;  %v785_v50 = vadd.f32 %v13780_v27, %v693_v12  ;;  %v700_v5 = vmul.f32 %v13734_v13, %v608_v11  ;;  %3000 = vmatprep.subr.bf16.mxu1 %v11312_v19  ;;  %2736 = vmatprep.mubr.bf16.mxu0 %v13991_v14  ;;  %v542_v2 = vadd.f32 1e-06, %v517_v18  ;;  %v520_v19 = vmul.f32 0.0026041667, %v483_v56  ;;  %v18834_v12 = vld [vmem:[#allocation14_spill] sm:$0xff]  ;;  %v479_v11 = vpop.xlane.xlu1 %478 }
 0x16c   :  { %v789_v37 = vadd.f32 %v13737_v63, %v697_v58  ;;  %v698_v15 = vmul.f32 %v13757_v40, %v606_v43  ;;  %v604_v45 = vmul.f32 %v12050_v44, %v18831_v8  ;;  %v14006_v33 = vpop.eup %12055  ;;  %v14008_v28 = vpack.c.bf16 %v787_v9, %v784_v24  ;;  %3157 = vmatprep.subr.bf16.mxu0 %v11345_v36  ;;  %v11315_v18 = vld [vmem:[%s18481_s3 + $0x5ac] ss:$48 sps:$4 sm:$0xff]   ;;  %v11313_v58 = vld [vmem:[%s18481_s3 + $0x5a8] ss:$48 sps:$4 sm:$0xff]  }
 0x16d   :  { %v792_v7 = vadd.f32 %v13737_v63, %v700_v5  ;;  %v701_v32 = vmul.f32 %v13757_v40, %v609_v10  ;;  %v607_v31 = vmul.f32 %v12048_v48, %v18832_v23  ;;  %v611_v3 = vmul.f32 %v12054_v60, %v18833_v39  ;;  %v18835_v56 = vld [vmem:[#allocation16_spill] sm:$0xff] }
 0x16e   :  { %v614_v42 = vmul.f32 %v13981_v52, %v18834_v12  ;;  %3001 = vmatpush1.bf16.msra.mxu1 %v11310_v38  ;;  %v14016_v44 = vpop.eup %12057  ;;  %v14019_v24 = vpack.c.bf16 %v785_v50, %v782_v41  ;;  %v696_v59 = vmul.f32 %v13769_v17, %v604_v45  ;;  %12063 = vrsqrt.f32 %v543_v26  ;;  %v18836_v50 = vld [vmem:[#allocation15_spill] sm:$0xff]  ;;  %v11321_v26 = vld [vmem:[%s18481_s3 + $0x54c] ss:$48 sps:$4 sm:$0xff]  }
 0x16f   :  { %2898 = vmatmul.mubr.bf16.gmra.mxu1 %v14008_v28  ;;  %v699_v48 = vmul.f32 %v13769_v17, %v607_v31  ;;  %v14026_v43 = vpack.c.bf16 %v792_v7, %v789_v37  ;;  %v703_v36 = vmul.f32 %v13734_v13, %v611_v3  ;;  %v790_v10 = vadd.f32 %v13760_v51, %v698_v15  ;;  %v11343_v15 = vld [vmem:[%s18481_s3 + $0x6c8] ss:$48 sps:$4 sm:$0xff]   ;;  %v18838_v31 = vld [vmem:[#allocation13_spill] sm:$0xff]  ;;  %v18839_v12 = vld [vmem:[#allocation19_spill] sm:$0xff] }
 0x170   :  { %2907 = vmatprep.mubr.bf16.mxu1 %v18816_v55  ;;  %v706_v9 = vmul.f32 %v13734_v13, %v614_v42  ;;  %v14034_v16 = vpop.eup %12059  ;;  %v793_v38 = vadd.f32 %v13760_v51, %v701_v32  ;;  %v612_v41 = vmul.f32 %v12054_v60, %v18835_v56  ;;  %v615_v5 = vmul.f32 %v13981_v52, %v18836_v50  ;;  %v18837_v32 = vld [vmem:[#allocation11_spill] sm:$0xff]  ;;  %v11324_v56 = vld [vmem:[%s18481_s3 + $0x4ec] ss:$48 sps:$4 sm:$0xff]  }
 0x171   :  { %2737 = vmatmul.mubr.bf16.gmra.mxu0 %v14019_v24  ;;  %12065 = vrsqrt.f32 %v542_v2  ;;  %v519_v37 = vmul.f32 0.0026041667, %v479_v11  ;;  %v545_v8 = vadd.f32 1e-06, %v520_v19  ;;  %v788_v45 = vadd.f32 %v13780_v27, %v696_v59  ;;  %3002 = vmatprep.subr.bf16.mxu1 %v11315_v18 }
 0x172   :  { %2746 = vmatprep.mubr.bf16.mxu0 %v14026_v43  ;;  %v791_v7 = vadd.f32 %v13780_v27, %v699_v48  ;;  %v610_v23 = vmul.f32 %v12054_v60, %v18837_v32  ;;  %v613_v39 = vmul.f32 %v13981_v52, %v18838_v31  ;;  %v795_v2 = vadd.f32 %v13737_v63, %v703_v36  ;;  %v11319_v36 = vld [vmem:[%s18481_s3 + $0x548] ss:$48 sps:$4 sm:$0xff]   ;;  %v18841_v32 = vld [vmem:[#allocation17_spill] sm:$0xff] }
 0x173   :  { %v798_v19 = vadd.f32 %v13737_v63, %v706_v9  ;;  %v617_v3 = vmul.f32 %v14016_v44, %v13449_v6  ;;  %v620_v42 = vmul.f32 %v14006_v33, %v18839_v12  ;;  %3003 = vmatpush2.bf16.msra.mxu1 %v11313_v58  ;;  %v14060_v11 = vpack.c.bf16 %v793_v38, %v790_v10 }
 0x174   :  { %v704_v59 = vmul.f32 %v13757_v40, %v612_v41  ;;  %v707_v60 = vmul.f32 %v13757_v40, %v615_v5  ;;  %3004 = vmatprep.subr.bf16.mxu1 %v11321_v26  ;;  %v544_v52 = vadd.f32 1e-06, %v519_v37  ;;  %3158 = vmatpush1.bf16.msra.mxu0 %v11343_v15  ;;  %v14065_v48 = vpack.c.bf16 %v791_v7, %v788_v45  ;;  %v12062_v9 = vpop.eup %12061  ;;  %v18840_v26 = vld [vmem:[#allocation20_spill] sm:$0xff] }
 0x175   :  { %v702_v18 = vmul.f32 %v13769_v17, %v610_v23  ;;  %v705_v6 = vmul.f32 %v13769_v17, %v613_v39  ;;  %12067 = vrsqrt.f32 %v545_v8  ;;  %v14072_v58 = vpack.c.bf16 %v798_v19, %v795_v2  ;;  %v11351_v8 = vld [vmem:[%s18481_s3 + $0x66c] ss:$48 sps:$4 sm:$0xff]   ;;  %v11349_v15 = vld [vmem:[%s18481_s3 + $0x668] ss:$48 sps:$4 sm:$0xff]  }
 0x176   :  { %v709_v10 = vmul.f32 %v13734_v13, %v617_v3  ;;  %v712_v38 = vmul.f32 %v13734_v13, %v620_v42  ;;  %v796_v41 = vadd.f32 %v13760_v51, %v704_v59  ;;  %v799_v50 = vadd.f32 %v13760_v51, %v707_v60  ;;  %v18842_v23 = vld [vmem:[#allocation18_spill] sm:$0xff]  ;;  %3159 = vmatprep.subr.bf16.mxu0 %v11351_v8 }
 0x177   :  { %2908 = vmatmul.mubr.bf16.gmra.mxu1 %v14060_v11  ;;  %v618_v5 = vmul.f32 %v14016_v44, %v13460_v4  ;;  %v621_v37 = vmul.f32 %v14006_v33, %v18840_v26  ;;  %12069 = vrsqrt.f32 %v544_v52  ;;  %v794_v45 = vadd.f32 %v13780_v27, %v702_v18  ;;  %v18843_v3 = vld [vmem:[#allocation22_spill] sm:$0xff]  ;;  %v18845_v26 = vld [vmem:[#allocation23_spill] sm:$0xff] }
 0x178   :  { %2917 = vmatprep.mubr.bf16.mxu1 %v18816_v55  ;;  %v797_v7 = vadd.f32 %v13780_v27, %v705_v6  ;;  %v616_v4 = vmul.f32 %v14016_v44, %v18841_v32  ;;  %v619_v31 = vmul.f32 %v14006_v33, %v18842_v23  ;;  %3005 = vmatpush2.bf16.msra.mxu1 %v11319_v36  ;;  %v11322_v6 = vld [vmem:[%s18481_s3 + $0x4e8] ss:$48 sps:$4 sm:$0xff]   ;;  %v11354_v8 = vld [vmem:[%s18481_s3 + $0x60c] ss:$48 sps:$4 sm:$0xff]  }
 0x179   :  { %2747 = vmatmul.mubr.bf16.gmra.mxu0 %v14065_v48  ;;  %v801_v39 = vadd.f32 %v13737_v63, %v709_v10  ;;  %v804_v2 = vadd.f32 %v13737_v63, %v712_v38  ;;  %v623_v19 = vmul.f32 %v12062_v9, %v13507_v57  ;;  %v626_v12 = vmul.f32 %v14034_v16, %v18843_v3 }
 0x17a   :  { %2756 = vmatprep.mubr.bf16.mxu0 %v14072_v58  ;;  %3006 = vmatprep.subr.bf16.mxu1 %v11324_v56  ;;  %v14107_v59 = vpack.c.bf16 %v799_v50, %v796_v41  ;;  %v710_v44 = vmul.f32 %v13757_v40, %v618_v5  ;;  %v713_v60 = vmul.f32 %v13757_v40, %v621_v37  ;;  %v11330_v56 = vld [vmem:[%s18481_s3 + $0x48c] ss:$48 sps:$4 sm:$0xff]  }
 0x17b   :  { %v14105_v42 = vpop.eup %12063  ;;  %3160 = vmatpush1.bf16.msra.mxu0 %v11349_v15  ;;  %v14112_v52 = vpack.c.bf16 %v797_v7, %v794_v45  ;;  %v708_v57 = vmul.f32 %v13769_v17, %v616_v4  ;;  %v711_v18 = vmul.f32 %v13769_v17, %v619_v31  ;;  %v14119_v36 = vpack.c.bf16 %v804_v2, %v801_v39  ;;  %v18846_v15 = vld [vmem:[#allocation24_spill] sm:$0xff]  ;;  %v18847_v7 = vld [vmem:[#allocation21_spill] sm:$0xff]  ;;  %v18848_v39 = vld [vmem:[#allocation26_spill] sm:$0xff] }
 0x17c   :  { %18844 = vst [vmem:[#allocation8_spill] sm:$0xff] %v14107_v59  ;;  %v715_v10 = vmul.f32 %v13734_v13, %v623_v19  ;;  %v718_v38 = vmul.f32 %v13734_v13, %v626_v12  ;;  %v802_v41 = vadd.f32 %v13760_v51, %v710_v44  ;;  %v805_v50 = vadd.f32 %v13760_v51, %v713_v60  ;;  %v11352_v4 = vld [vmem:[%s18481_s3 + $0x608] ss:$48 sps:$4 sm:$0xff]   ;;  %v11333_v60 = vld [vmem:[%s18481_s3 + $0x42c] ss:$48 sps:$4 sm:$0xff]  }
 0x17d   :  { %v624_v5 = vmul.f32 %v12062_v9, %v13512_v25  ;;  %v627_v37 = vmul.f32 %v14034_v16, %v18845_v26  ;;  %v622_v45 = vmul.f32 %v12062_v9, %v18846_v15  ;;  %v625_v32 = vmul.f32 %v14034_v16, %v18847_v7  ;;  %3007 = vmatpush2.bf16.msra.mxu1 %v11322_v6  ;;  %v11328_v16 = vld [vmem:[%s18481_s3 + $0x488] ss:$48 sps:$4 sm:$0xff]  }
 0x17e   :  { %v12066_v33 = vpop.eup %12065  ;;  %v800_v25 = vadd.f32 %v13780_v27, %v708_v57  ;;  %v803_v23 = vadd.f32 %v13780_v27, %v711_v18  ;;  %v632_v2 = vmul.f32 %v14105_v42, %v18848_v39  ;;  %v807_v19 = vadd.f32 %v13737_v63, %v715_v10  ;;  %3008 = vmatprep.subr.bf16.mxu1 %v11330_v56 }
 0x17f   :  { %2918 = vmatmul.mubr.bf16.gmra.mxu1 %v14107_v59  ;;  %v629_v31 = vmul.f32 %v12066_v33, %v13566_v53  ;;  %v810_v9 = vadd.f32 %v13737_v63, %v718_v38  ;;  %v14153_v12 = vpack.c.bf16 %v805_v50, %v802_v41  ;;  %v716_v44 = vmul.f32 %v13757_v40, %v624_v5  ;;  %v11331_v5 = vld [vmem:[%s18481_s3 + $0x428] ss:$48 sps:$4 sm:$0xff]  }
 0x180   :  { %2927 = vmatprep.mubr.bf16.mxu1 %v18816_v55  ;;  %v719_v53 = vmul.f32 %v13757_v40, %v627_v37  ;;  %3161 = vmatprep.subr.bf16.mxu0 %v11354_v8  ;;  %v714_v57 = vmul.f32 %v13769_v17, %v622_v45  ;;  %v717_v18 = vmul.f32 %v13769_v17, %v625_v32  ;;  %v18850_v8 = vld [vmem:[#allocation27_spill] sm:$0xff]  ;;  %v11339_v45 = vld [vmem:[%s18481_s3 + $0x3cc] ss:$48 sps:$4 sm:$0xff]  }
 0x181   :  { %2757 = vmatmul.mubr.bf16.gmra.mxu0 %v14112_v52  ;;  %18849 = vst [vmem:[#allocation10_spill] sm:$0xff] %v14153_v12  ;;  %v14163_v10 = vpack.c.bf16 %v803_v23, %v800_v25  ;;  %v721_v38 = vmul.f32 %v13734_v13, %v629_v31  ;;  %v724_v56 = vmul.f32 %v13734_v13, %v632_v2  ;;  %v18851_v25 = vld [vmem:[#allocation28_spill] sm:$0xff]  ;;  %v18852_v31 = vld [vmem:[#allocation25_spill] sm:$0xff] }
 0x182   :  { %2766 = vmatprep.mubr.bf16.mxu0 %v14119_v36  ;;  %v12068_v3 = vpop.eup %12067  ;;  %3162 = vmatpush1.bf16.msra.mxu0 %v11352_v4  ;;  %v14167_v41 = vpack.c.bf16 %v810_v9, %v807_v19  ;;  %v630_v50 = vmul.f32 %v12066_v33, %v13571_v49  ;;  %v808_v26 = vadd.f32 %v13760_v51, %v716_v44  ;;  %v18853_v9 = vld [vmem:[#allocation30_spill] sm:$0xff] }
 0x183   :  { %3009 = vmatpush2.bf16.msra.mxu1 %v11328_v16  ;;  %v811_v37 = vadd.f32 %v13760_v51, %v719_v53  ;;  %v633_v15 = vmul.f32 %v14105_v42, %v18850_v8  ;;  %v806_v49 = vadd.f32 %v13780_v27, %v714_v57  ;;  %v809_v7 = vadd.f32 %v13780_v27, %v717_v18  ;;  %v11337_v44 = vld [vmem:[%s18481_s3 + $0x3c8] ss:$48 sps:$4 sm:$0xff]  }
 0x184   :  { %v12070_v6 = vpop.eup %12069  ;;  %3010 = vmatprep.subr.bf16.mxu1 %v11333_v60  ;;  %v813_v32 = vadd.f32 %v13737_v63, %v721_v38  ;;  %v816_v4 = vadd.f32 %v13737_v63, %v724_v56  ;;  %v628_v23 = vmul.f32 %v12066_v33, %v18851_v25  ;;  %v631_v39 = vmul.f32 %v14105_v42, %v18852_v31  ;;  %v11342_v42 = vld [vmem:[%s18481_s3 + $0x36c] ss:$48 sps:$4 sm:$0xff]  }
 0x185   :  { %v722_v2 = vmul.f32 %v13757_v40, %v630_v50  ;;  %v635_v19 = vmul.f32 %v12070_v6, %v13615_v61  ;;  %v638_v16 = vmul.f32 %v12068_v3, %v18853_v9  ;;  %v14196_v53 = vpack.c.bf16 %v811_v37, %v808_v26  ;;  %v18856_v37 = vld [vmem:[#allocation33_spill] sm:$0xff] }
 0x186   :  { %v725_v60 = vmul.f32 %v13757_v40, %v633_v15  ;;  %v14203_v33 = vpack.c.bf16 %v809_v7, %v806_v49  ;;  %v14205_v61 = vpack.c.bf16 %v816_v4, %v813_v32  ;;  %v720_v57 = vmul.f32 %v13769_v17, %v628_v23  ;;  %v18857_v15 = vld [vmem:[#allocation31_spill] sm:$0xff]  ;;  %v11348_v49 = vld [vmem:[%s18481_s3 + $0x30c] ss:$48 sps:$4 sm:$0xff]   ;;  %v18859_v23 = vld [vmem:[#allocation29_spill] sm:$0xff] }
 0x187   :  { %2928 = vmatmul.mubr.bf16.gmra.mxu1 %v14153_v12  ;;  %18854 = vst [vmem:[#allocation9_spill] sm:$0xff] %v14196_v53  ;;  %v723_v18 = vmul.f32 %v13769_v17, %v631_v39  ;;  %v814_v38 = vadd.f32 %v13760_v51, %v722_v2  ;;  %v727_v56 = vmul.f32 %v13734_v13, %v635_v19  ;;  %v18858_v4 = vld [vmem:[#allocation32_spill] sm:$0xff] }
 0x188   :  { %2937 = vmatprep.mubr.bf16.mxu1 %v18816_v55  ;;  %3011 = vmatpush2.bf16.msra.mxu1 %v11331_v5  ;;  %18855 = vst [vmem:[#allocation5_spill] sm:$0xff] %v14205_v61  ;;  %v730_v50 = vmul.f32 %v13734_v13, %v638_v16  ;;  %v11340_v5 = vld [vmem:[%s18481_s3 + $0x368] ss:$48 sps:$4 sm:$0xff]   ;;  %v817_v26 = vadd.f32 %v13760_v51, %v725_v60 }
 0x189   :  { %2767 = vmatmul.mubr.bf16.gmra.mxu0 %v14163_v10  ;;  %3012 = vmatprep.subr.bf16.mxu1 %v11339_v45  ;;  %v636_v8 = vmul.f32 %v12070_v6, %v18856_v37  ;;  %v639_v45 = vmul.f32 %v12068_v3, %v18857_v15  ;;  %v812_v7 = vadd.f32 %v13780_v27, %v720_v57  ;;  %v11346_v19 = vld [vmem:[%s18481_s3 + $0x308] ss:$48 sps:$4 sm:$0xff]   ;;  %v11372_v37 = vld [vmem:[%s18481_s3 + $0x8b4] ss:$48 sps:$4 sm:$0xff]  }
 0x18a   :  { %2776 = vmatprep.mubr.bf16.mxu0 %v14167_v41  ;;  %v815_v32 = vadd.f32 %v13780_v27, %v723_v18  ;;  %v634_v25 = vmul.f32 %v12070_v6, %v18858_v4  ;;  %v637_v31 = vmul.f32 %v12068_v3, %v18859_v23  ;;  %v819_v39 = vadd.f32 %v13737_v63, %v727_v56  ;;  %v11357_v3 = vld [vmem:[%s18481_s3 + $0x2b4] ss:$48 sps:$4 sm:$0xff]  }
 0x18b   :  { %v822_v2 = vadd.f32 %v13737_v63, %v730_v50  ;;  %v14233_v9 = vpack.c.bf16 %v817_v26, %v814_v38  ;;  %v728_v16 = vmul.f32 %v13757_v40, %v636_v8  ;;  %3469 = vmatprep.subr.bf16.mxu0 %v11372_v37 }
 0x18c   :  { %3013 = vmatpush2.bf16.msra.mxu1 %v11337_v44  ;;  %v731_v44 = vmul.f32 %v13757_v40, %v639_v45  ;;  %v14241_v6 = vpack.c.bf16 %v815_v32, %v812_v7  ;;  %v726_v60 = vmul.f32 %v13769_v17, %v634_v25 }
 0x18d   :  { %3014 = vmatprep.subr.bf16.mxu1 %v11342_v42  ;;  %18860 = vst [vmem:[#allocation7_spill] sm:$0xff] %v14233_v9  ;;  %v729_v42 = vmul.f32 %v13769_v17, %v637_v31  ;;  %v14245_v57 = vpack.c.bf16 %v822_v2, %v819_v39  ;;  %v820_v18 = vadd.f32 %v13760_v51, %v728_v16  ;;  %v18865_v39 = vld [vmem:[#allocation36_spill] sm:$0xff] }
 0x18e   :  { %18861 = vst [vmem:[#allocation12_spill] sm:$0xff] %v14241_v6  ;;  %v823_v38 = vadd.f32 %v13760_v51, %v731_v44  ;;  %v818_v56 = vadd.f32 %v13780_v27, %v726_v60  ;;  %v18867_v44 = vld [vmem:[#allocation35_spill] sm:$0xff] }
 0x18f   :  { %2938 = vmatmul.mubr.bf16.gmra.mxu1 %v14196_v53  ;;  %18862 = vst [vmem:[#allocation14_spill] sm:$0xff] %v14245_v57  ;;  %v821_v50 = vadd.f32 %v13780_v27, %v729_v42 }
 0x190   :  { %2947 = vmatprep.mubr.bf16.mxu1 %v18816_v55  ;;  %3015 = vmatpush2.bf16.msra.mxu1 %v11340_v5  ;;  %v14254_v5 = vpack.c.bf16 %v823_v38, %v820_v18  ;;  %v18868_v18 = vld [vmem:[#allocation40_spill] sm:$0xff] }
 0x191   :  { %2777 = vmatmul.mubr.bf16.gmra.mxu0 %v14203_v33  ;;  %3016 = vmatprep.subr.bf16.mxu1 %v11348_v49  ;;  %v14257_v26 = vpack.c.bf16 %v821_v50, %v818_v56  ;;  %v18869_v56 = vld [vmem:[#allocation41_spill] sm:$0xff] }
 0x192   :  { %2786 = vmatprep.mubr.bf16.mxu0 %v14205_v61  ;;  %18863 = vst [vmem:[#allocation16_spill] sm:$0xff] %v14254_v5 }
 0x193   :  { %18864 = vst [vmem:[#allocation15_spill] sm:$0xff] %v14257_v26 }
 0x194   :  { %3017 = vmatpush2.bf16.msra.mxu1 %v11346_v19  ;;  %v18866_v19 = vld [vmem:[#allocation37_spill] sm:$0xff] }
 0x195   :  { %3308 = vmatprep.subr.bf16.mxu1 %v11357_v3 }
 0x197   :  { %2948 = vmatmul.mubr.bf16.gmra.mxu1 %v14233_v9 }
 0x198   :  { %2957 = vmatprep.mubr.bf16.mxu1 %v18816_v55 }
 0x199   :  { %2787 = vmatmul.mubr.bf16.gmra.mxu0 %v14241_v6 }
 0x19a   :  { %2796 = vmatprep.mubr.bf16.mxu0 %v14245_v57 }
 0x19f   :  { %2958 = vmatmul.mubr.bf16.gmra.mxu1 %v14254_v5 }
 0x1a0   :  { %2967 = vmatprep.mubr.bf16.mxu1 %v18816_v55 }
 0x1a1   :  { %2797 = vmatmul.mubr.bf16.gmra.mxu0 %v14257_v26 }
 0x1c9   :  { %v487_v8 = vpop.xlane.xlu1 %486 }
 0x1ca   :  { %v521_v15 = vmul.f32 0.0026041667, %v487_v8 }
 0x1cc   :  { %v546_v45 = vadd.f32 1e-06, %v521_v15  ;;  %v18870_v15 = vld [vmem:[#allocation39_spill] sm:$0xff] }
 0x1cd   :  { %v491_v49 = vpop.xlane.xlu0 %490 }
 0x1ce   :  { %12071 = vrsqrt.f32 %v546_v45  ;;  %v522_v7 = vmul.f32 0.0026041667, %v491_v49 }
 0x1d0   :  { %v547_v32 = vadd.f32 1e-06, %v522_v7 }
 0x1d2   :  { %12073 = vrsqrt.f32 %v547_v32  ;;  %v498_v4 = vpop.xlane.xlu1 %497 }
 0x1d3   :  { %v523_v25 = vmul.f32 0.0026041667, %v498_v4 }
 0x1d5   :  { %v548_v23 = vadd.f32 1e-06, %v523_v25 }
 0x1d7   :  { %12075 = vrsqrt.f32 %v548_v23 }
 0x1db   :  { %v12072_v31 = vpop.eup %12071 }
 0x1dc   :  { %v641_v2 = vmul.f32 %v12072_v31, %v18865_v39  ;;  %v642_v16 = vmul.f32 %v12072_v31, %v18866_v19  ;;  %v640_v3 = vmul.f32 %v12072_v31, %v18867_v44 }
 0x1de   :  { %v733_v42 = vmul.f32 %v13734_v13, %v641_v2  ;;  %v734_v37 = vmul.f32 %v13757_v40, %v642_v16  ;;  %v732_v8 = vmul.f32 %v13769_v17, %v640_v3  ;;  %v18871_v16 = vld [vmem:[#allocation45_spill] sm:$0xff]  ;;  %v18872_v3 = vld [vmem:[#allocation46_spill] sm:$0xff] }
 0x1df   :  { %v12074_v60 = vpop.eup %12073 }
 0x1e0   :  { %v644_v38 = vmul.f32 %v12074_v60, %v18868_v18  ;;  %v645_v50 = vmul.f32 %v12074_v60, %v18869_v56  ;;  %v643_v45 = vmul.f32 %v12074_v60, %v18870_v15  ;;  %v825_v32 = vadd.f32 %v13737_v63, %v733_v42  ;;  %v18873_v18 = vld [vmem:[#allocation44_spill] sm:$0xff] }
 0x1e1   :  { %v826_v31 = vadd.f32 %v13760_v51, %v734_v37  ;;  %v824_v2 = vadd.f32 %v13780_v27, %v732_v8 }
 0x1e2   :  { %v736_v49 = vmul.f32 %v13734_v13, %v644_v38  ;;  %v737_v7 = vmul.f32 %v13757_v40, %v645_v50  ;;  %v735_v4 = vmul.f32 %v13769_v17, %v643_v45 }
 0x1e4   :  { %v12076_v25 = vpop.eup %12075  ;;  %v828_v23 = vadd.f32 %v13737_v63, %v736_v49  ;;  %v829_v39 = vadd.f32 %v13760_v51, %v737_v7  ;;  %v827_v19 = vadd.f32 %v13780_v27, %v735_v4  ;;  %v11358_v4 = vld [vmem:[%s18481_s3 + $0x250] ss:$48 sps:$4 sm:$0xff]  }
 0x1e5   :  { %v647_v44 = vmul.f32 %v12076_v25, %v18871_v16  ;;  %v648_v60 = vmul.f32 %v12076_v25, %v18872_v3  ;;  %v646_v38 = vmul.f32 %v12076_v25, %v18873_v18  ;;  %v11363_v25 = vld [vmem:[%s18481_s3 + $0x1f4] ss:$48 sps:$4 sm:$0xff]  }
 0x1e6   :  { %v14285_v42 = vpack.c.bf16 %v828_v23, %v825_v32  ;;  %v14287_v56 = vpack.c.bf16 %v829_v39, %v826_v31  ;;  %v14289_v50 = vpack.c.bf16 %v827_v19, %v824_v2  ;;  %v11381_v32 = vld [vmem:[%s18481_s3 + $0x854] ss:$48 sps:$4 sm:$0xff]   ;;  %v11379_v23 = vld [vmem:[%s18481_s3 + $0x850] ss:$48 sps:$4 sm:$0xff]  }
 0x1e7   :  { %v739_v37 = vmul.f32 %v13734_v13, %v647_v44  ;;  %v740_v15 = vmul.f32 %v13757_v40, %v648_v60  ;;  %v738_v8 = vmul.f32 %v13769_v17, %v646_v38  ;;  %v11390_v31 = vld [vmem:[%s18481_s3 + $0x7f4] ss:$48 sps:$4 sm:$0xff]   ;;  %v11361_v39 = vld [vmem:[%s18481_s3 + $0x1f0] ss:$48 sps:$4 sm:$0xff]  }
 0x1e8   :  { %18874 = vst [vmem:[#allocation11_spill] sm:$0xff] %v14285_v42  ;;  %18875 = vst [vmem:[#allocation13_spill] sm:$0xff] %v14287_v56  ;;  %2806 = vmatprep.mubr.bf16.mxu0 %v14285_v42  ;;  %2968 = vmatmul.mubr.bf16.gmra.mxu1 %v14287_v56  ;;  %v11366_v2 = vld [vmem:[%s18481_s3 + $0x194] ss:$48 sps:$4 sm:$0xff]   ;;  %v11388_v19 = vld [vmem:[%s18481_s3 + $0x7f0] ss:$48 sps:$4 sm:$0xff]  }
 0x1e9   :  { %18876 = vst [vmem:[#allocation19_spill] sm:$0xff] %v14289_v50  ;;  %2807 = vmatmul.mubr.bf16.gmra.mxu0 %v14289_v50  ;;  %v831_v45 = vadd.f32 %v13737_v63, %v739_v37  ;;  %2977 = vmatprep.mubr.bf16.mxu1 %v18816_v55  ;;  %v832_v49 = vadd.f32 %v13760_v51, %v740_v15  ;;  %v11355_v51 = vld [vmem:[%s18481_s3 + $0x2b0] ss:$48 sps:$4 sm:$0xff]   ;;  %v11360_v63 = vld [vmem:[%s18481_s3 + $0x254] ss:$48 sps:$4 sm:$0xff]  }
 0x1ea   :  { %v830_v13 = vadd.f32 %v13780_v27, %v738_v8  ;;  %v11370_v27 = vld [vmem:[%s18481_s3 + $0x8b0] ss:$48 sps:$4 sm:$0xff]   ;;  %v11399_v16 = vld [vmem:[%s18481_s3 + $0x794] ss:$48 sps:$4 sm:$0xff]  }
 0x1eb   :  { %v14300_v7 = vpack.c.bf16 %v831_v45, %v831_v45  ;;  %v14304_v40 = vpack.c.bf16 %v832_v49, %v832_v49  ;;  %v11364_v44 = vld [vmem:[%s18481_s3 + $0x190] ss:$48 sps:$4 sm:$0xff]   ;;  %v11369_v3 = vld [vmem:[%s18481_s3 + $0x134] ss:$48 sps:$4 sm:$0xff]  }
 0x1ec   :  { %v14306_v17 = vpack.c.bf16 %v830_v13, %v830_v13  ;;  %v11397_v60 = vld [vmem:[%s18481_s3 + $0x790] ss:$48 sps:$4 sm:$0xff]   ;;  %v11408_v18 = vld [vmem:[%s18481_s3 + $0x734] ss:$48 sps:$4 sm:$0xff]  }
 0x1ed   :  { %18877 = vst [vmem:[#allocation20_spill] sm:$0xff] %v14300_v7  ;;  %2816 = vmatprep.mubr.bf16.mxu0 %v14300_v7  ;;  %18878 = vst [vmem:[#allocation17_spill] sm:$0xff] %v14304_v40  ;;  %v11367_v38 = vld [vmem:[%s18481_s3 + $0x130] ss:$48 sps:$4 sm:$0xff]   ;;  %v11375_v37 = vld [vmem:[%s18481_s3 + $0xd4] ss:$48 sps:$4 sm:$0xff]  }
 0x1ee   :  { %18879 = vst [vmem:[#allocation18_spill] sm:$0xff] %v14306_v17  ;;  %v11406_v15 = vld [vmem:[%s18481_s3 + $0x730] ss:$48 sps:$4 sm:$0xff]   ;;  %v11417_v8 = vld [vmem:[%s18481_s3 + $0x6d4] ss:$48 sps:$4 sm:$0xff]  }
 0x1ef   :  { %v11373_v45 = vld [vmem:[%s18481_s3 + $0xd0] ss:$48 sps:$4 sm:$0xff]   ;;  %v11378_v13 = vld [vmem:[%s18481_s3 + $0x74] ss:$48 sps:$4 sm:$0xff]  }
 0x1f0   :  { %2978 = vmatmul.mubr.bf16.gmra.mxu1 %v14304_v40  ;;  %v1160_v49 = vld [vmem:[%s18482_s4] sm:$0xff] }
 0x1f1   :  { %2817 = vmatmul.mubr.bf16.gmra.mxu0 %v14306_v17  ;;  %3018 = vmatprep.mubr.bf16.mxu1 %v13798_v62 }
 0x1f2   :  { %3179 = vmatprep.mubr.bf16.mxu0 %v18816_v55 }
 0x1f8   :  { %3019 = vmatmul.mubr.bf16.vlgmr.msra.gmra.mxu1 %v13808_v35 }
 0x1f9   :  { %3309 = vmatpush1.bf16.msra.mxu1 %v11355_v51  ;;  %3028 = vmatprep.mubr.bf16.mxu1 %v13849_v1  ;;  %v11415_v51 = vld [vmem:[%s18481_s3 + $0x6d0] ss:$48 sps:$4 sm:$0xff]  }
 0x1fa   :  { %3180 = vmatmul.mubr.bf16.vlgmr.msra.gmra.mxu0 %v13806_v30  ;;  %3310 = vmatprep.subr.bf16.mxu1 %v11360_v63  ;;  %v11423_v63 = vld [vmem:[%s18481_s3 + $0x674] ss:$48 sps:$4 sm:$0xff]  }
 0x1fb   :  { %3189 = vmatprep.mubr.bf16.mxu0 %v18816_v55  ;;  %3470 = vmatpush1.bf16.msra.mxu0 %v11370_v27  ;;  %v14400_v27 = vrot.slane %v1160_v49, %v13727_v0 }
 0x1fc   :  { %3471 = vmatprep.subr.bf16.mxu0 %v11381_v32  ;;  %v11376_v32 = vld [vmem:[%s18481_s3 + $0x70] ss:$48 sps:$4 sm:$0xff]  }
 0x1fd   :  { %3311 = vmatpush1.bf16.msra.mxu1 %v11358_v4  ;;  %v11384_v4 = vld [vmem:[%s18481_s3 + $0x14] ss:$48 sps:$4 sm:$0xff]  }
 0x1fe   :  { %3312 = vmatprep.subr.bf16.mxu1 %v11363_v25  ;;  %v18880_v25 = vld [vmem:[#allocation38_spill] sm:$0xff] }
 0x1ff   :  { %3472 = vmatpush1.bf16.msra.mxu0 %v11379_v23  ;;  %v14409_v23 = vrot.slane %v1160_v49, %v18880_v25  ;;  %v11444_v49 = vld [vmem:[%s18481_s3 + $0x8bc] ss:$48 sps:$4 sm:$0xff]  }
 0x200   :  { %3029 = vmatmul.mubr.bf16.gmra.mxu1 %v13856_v46  ;;  %3473 = vmatprep.subr.bf16.mxu0 %v11390_v31  ;;  %v11421_v31 = vld [vmem:[%s18481_s3 + $0x670] ss:$48 sps:$4 sm:$0xff]  }
 0x201   :  { %3038 = vmatprep.mubr.bf16.mxu1 %v13884_v20  ;;  %3313 = vmatpush1.bf16.msra.mxu1 %v11361_v39 }
 0x202   :  { %3190 = vmatmul.mubr.bf16.gmra.mxu0 %v13851_v21  ;;  %3314 = vmatprep.subr.bf16.mxu1 %v11366_v2 }
 0x203   :  { %3199 = vmatprep.mubr.bf16.mxu0 %v18816_v55  ;;  %3474 = vmatpush1.bf16.msra.mxu0 %v11388_v19  ;;  %v11426_v19 = vld [vmem:[%s18481_s3 + $0x614] ss:$48 sps:$4 sm:$0xff]  }
 0x204   :  { %3475 = vmatprep.subr.bf16.mxu0 %v11399_v16 }
 0x205   :  { %3315 = vmatpush1.bf16.msra.mxu1 %v11364_v44  ;;  %v11382_v44 = vld [vmem:[%s18481_s3 + $0x10] ss:$48 sps:$4 sm:$0xff]  }
 0x206   :  { %3316 = vmatprep.subr.bf16.mxu1 %v11369_v3 }
 0x207   :  { %3476 = vmatpush1.bf16.msra.mxu0 %v11397_v60 }
 0x208   :  { %3039 = vmatmul.mubr.bf16.gmra.mxu1 %v13922_v22  ;;  %3477 = vmatprep.subr.bf16.mxu0 %v11408_v18  ;;  %v11387_v18 = vld [vmem:[%s18481_s3 + $0x5b4] ss:$48 sps:$4 sm:$0xff]  }
 0x209   :  { %3048 = vmatprep.mubr.bf16.mxu1 %v13944_v29  ;;  %3317 = vmatpush1.bf16.msra.mxu1 %v11367_v38 }
 0x20a   :  { %3200 = vmatmul.mubr.bf16.gmra.mxu0 %v13908_v54  ;;  %3318 = vmatprep.subr.bf16.mxu1 %v11375_v37 }
 0x20b   :  { %3209 = vmatprep.mubr.bf16.mxu0 %v18816_v55  ;;  %3478 = vmatpush1.bf16.msra.mxu0 %v11406_v15  ;;  %v11424_v15 = vld [vmem:[%s18481_s3 + $0x610] ss:$48 sps:$4 sm:$0xff]  }
 0x20c   :  { %3479 = vmatprep.subr.bf16.mxu0 %v11417_v8 }
 0x20d   :  { %3319 = vmatpush1.bf16.msra.mxu1 %v11373_v45 }
 0x20e   :  { %3320 = vmatprep.subr.bf16.mxu1 %v11378_v13 }
 0x20f   :  { %3480 = vmatpush1.bf16.msra.mxu0 %v11415_v51  ;;  %v2859_v39 = vpop.f32.mrf.mxu1 }
 0x210   :  { %3049 = vmatmul.mubr.bf16.gmra.mxu1 %v13967_v34  ;;  %v2698_v2 = vpop.f32.mrf.mxu0  ;;  %3481 = vmatprep.subr.bf16.mxu0 %v11423_v63 }
 0x211   :  { %v2699_v16 = vadd.f32 %v2698_v2, %v14400_v27  ;;  %3058 = vmatprep.mubr.bf16.mxu1 %v13991_v14  ;;  %3321 = vmatpush1.bf16.msra.mxu1 %v11376_v32  ;;  %v2861_v3 = vpop.f32.mrf.mxu1  ;;  %v11385_v32 = vld [vmem:[%s18481_s3 + $0x5b0] ss:$48 sps:$4 sm:$0xff]  }
 0x212   :  { %3210 = vmatmul.mubr.bf16.gmra.mxu0 %v13955_v47  ;;  %v2700_v60 = vpop.f32.mrf.mxu0  ;;  %3322 = vmatprep.subr.bf16.mxu1 %v11384_v4 }
 0x213   :  { %v14427_v38 = vadd.f32 %v2859_v39, %v2699_v16  ;;  %v2701_v37 = vadd.f32 %v2700_v60, %v14409_v23  ;;  %3219 = vmatprep.mubr.bf16.mxu0 %v18816_v55  ;;  %3482 = vmatpush1.bf16.msra.mxu0 %v11421_v31  ;;  %v2863_v8 = vpop.f32.mrf.mxu1  ;;  %v11393_v39 = vld [vmem:[%s18481_s3 + $0x554] ss:$48 sps:$4 sm:$0xff]   ;;  %v11391_v60 = vld [vmem:[%s18481_s3 + $0x550] ss:$48 sps:$4 sm:$0xff]  }
 0x214   :  { %v2702_v45 = vpop.f32.mrf.mxu0  ;;  %3483 = vmatprep.subr.bf16.mxu0 %v11426_v19 }
 0x215   :  { %v4896_v13 = vmul.f32 0.70710677, %v14427_v38  ;;  %v14438_v51 = vadd.f32 %v2861_v3, %v2701_v37  ;;  %v2703_v63 = vadd.f32 %v2702_v45, %v14400_v27  ;;  %3323 = vmatpush1.bf16.msra.mxu1 %v11382_v44  ;;  %v14444_v4 = vpop.f32.mrf.mxu1 }
 0x216   :  { %18882 = vst [vmem:[#allocation23_spill] sm:$0xff] %v14444_v4  ;;  %v14446_v31 = vpop.f32.mrf.mxu0  ;;  %3324 = vmatprep.subr.bf16.mxu1 %v11387_v18 }
 0x217   :  { %18881 = vst [vmem:[#allocation22_spill] sm:$0xff] %v14438_v51  ;;  %18883 = vst [vmem:[#allocation24_spill] sm:$0xff] %v14446_v31  ;;  %12077 = verf.f32 %v4896_v13  ;;  %v14451_v2 = vadd.f32 %v2863_v8, %v2703_v63  ;;  %3484 = vmatpush1.bf16.msra.mxu0 %v11424_v15  ;;  %v2869_v19 = vpop.f32.mrf.mxu1  ;;  %v11396_v15 = vld [vmem:[%s18481_s3 + $0x4f4] ss:$48 sps:$4 sm:$0xff]  }
 0x218   :  { %3059 = vmatmul.mubr.bf16.gmra.mxu1 %v14019_v24  ;;  %v2708_v16 = vpop.f32.mrf.mxu0  ;;  %3791 = vmatprep.subr.bf16.mxu0 %v11444_v49 }
 0x219   :  { %v4908_v44 = vmul.f32 0.70710677, %v14451_v2  ;;  %v2709_v3 = vadd.f32 %v2708_v16, %v14400_v27  ;;  %3068 = vmatprep.mubr.bf16.mxu1 %v14026_v43  ;;  %3325 = vmatpush2.bf16.msra.mxu1 %v11385_v32  ;;  %v2871_v18 = vpop.f32.mrf.mxu1 }
 0x21a   :  { %3220 = vmatmul.mubr.bf16.gmra.mxu0 %v14008_v28  ;;  %v2710_v37 = vpop.f32.mrf.mxu0  ;;  %3326 = vmatprep.subr.bf16.mxu1 %v11393_v39  ;;  %v11394_v39 = vld [vmem:[%s18481_s3 + $0x4f0] ss:$48 sps:$4 sm:$0xff]  }
 0x21b   :  { %12079 = verf.f32 %v4908_v44  ;;  %v14464_v8 = vadd.f32 %v2869_v19, %v2709_v3  ;;  %v2711_v45 = vadd.f32 %v2710_v37, %v14409_v23  ;;  %3229 = vmatprep.mubr.bf16.mxu0 %v18816_v55  ;;  %v2873_v49 = vpop.f32.mrf.mxu1  ;;  %v11402_v3 = vld [vmem:[%s18481_s3 + $0x494] ss:$48 sps:$4 sm:$0xff]  }
 0x21c   :  { %v2712_v13 = vpop.f32.mrf.mxu0 }
 0x21d   :  { %v4920_v63 = vmul.f32 0.70710677, %v14464_v8  ;;  %v14469_v32 = vadd.f32 %v2871_v18, %v2711_v45  ;;  %v2713_v16 = vadd.f32 %v2712_v13, %v14400_v27  ;;  %3327 = vmatpush2.bf16.msra.mxu1 %v11391_v60  ;;  %v14475_v44 = vpop.f32.mrf.mxu1  ;;  %v11400_v45 = vld [vmem:[%s18481_s3 + $0x490] ss:$48 sps:$4 sm:$0xff]  }
 0x21e   :  { %18885 = vst [vmem:[#allocation26_spill] sm:$0xff] %v14475_v44  ;;  %v14477_v19 = vpop.f32.mrf.mxu0  ;;  %3328 = vmatprep.subr.bf16.mxu1 %v11396_v15 }
 0x21f   :  { %18884 = vst [vmem:[#allocation21_spill] sm:$0xff] %v14469_v32  ;;  %18886 = vst [vmem:[#allocation27_spill] sm:$0xff] %v14477_v19  ;;  %12081 = verf.f32 %v4920_v63  ;;  %v14482_v37 = vadd.f32 %v2873_v49, %v2713_v16  ;;  %v2879_v18 = vpop.f32.mrf.mxu1  ;;  %v11405_v49 = vld [vmem:[%s18481_s3 + $0x434] ss:$48 sps:$4 sm:$0xff]  }
 0x220   :  { %3069 = vmatmul.mubr.bf16.gmra.mxu1 %v14065_v48 }
 0x221   :  { %v4932_v60 = vmul.f32 0.70710677, %v14482_v37  ;;  %3078 = vmatprep.mubr.bf16.mxu1 %v14072_v58  ;;  %3329 = vmatpush2.bf16.msra.mxu1 %v11394_v39  ;;  %v2718_v15 = vpop.f32.mrf.mxu0  ;;  %v2881_v13 = vpop.f32.mrf.mxu1 }
 0x222   :  { %3230 = vmatmul.mubr.bf16.gmra.mxu0 %v14060_v11  ;;  %3330 = vmatprep.subr.bf16.mxu1 %v11402_v3  ;;  %v2719_v63 = vadd.f32 %v2718_v15, %v14400_v27  ;;  %v11403_v3 = vld [vmem:[%s18481_s3 + $0x430] ss:$48 sps:$4 sm:$0xff]  }
 0x223   :  { %12083 = verf.f32 %v4932_v60  ;;  %3239 = vmatprep.mubr.bf16.mxu0 %v18816_v55  ;;  %v2720_v39 = vpop.f32.mrf.mxu0  ;;  %v2883_v25 = vpop.f32.mrf.mxu1  ;;  %v11411_v60 = vld [vmem:[%s18481_s3 + $0x3d4] ss:$48 sps:$4 sm:$0xff]  }
 0x224   :  { %v12078_v16 = vpop.eup %12077  ;;  %v14496_v0 = vadd.f32 %v2879_v18, %v2719_v63  ;;  %v2721_v44 = vadd.f32 %v2720_v39, %v14409_v23 }
 0x225   :  { %3331 = vmatpush2.bf16.msra.mxu1 %v11400_v45  ;;  %v2722_v19 = vpop.f32.mrf.mxu0  ;;  %v14502_v32 = vpop.f32.mrf.mxu1  ;;  %v5496_v15 = vadd.f32 1.0, %v12078_v16 }
 0x226   :  { %18887 = vst [vmem:[#allocation28_spill] sm:$0xff] %v14502_v32  ;;  %3332 = vmatprep.subr.bf16.mxu1 %v11405_v49  ;;  %v4944_v4 = vmul.f32 0.70710677, %v14496_v0  ;;  %v14508_v18 = vadd.f32 %v2881_v13, %v2721_v44  ;;  %v2723_v45 = vadd.f32 %v2722_v19, %v14400_v27  ;;  %v4596_v32 = vmul.f32 0.5, %v14427_v38  ;;  %v11409_v44 = vld [vmem:[%s18481_s3 + $0x3d0] ss:$48 sps:$4 sm:$0xff]  }
 0x227   :  { %v14511_v39 = vpop.f32.mrf.mxu0  ;;  %v2889_v51 = vpop.f32.mrf.mxu1  ;;  %v4608_v49 = vmul.f32 0.5, %v14451_v2  ;;  %v11414_v38 = vld [vmem:[%s18481_s3 + $0x374] ss:$48 sps:$4 sm:$0xff]  }
 0x228   :  { %18888 = vst [vmem:[#allocation25_spill] sm:$0xff] %v14508_v18  ;;  %v12080_v63 = vpop.eup %12079  ;;  %18889 = vst [vmem:[#allocation30_spill] sm:$0xff] %v14511_v39  ;;  %3079 = vmatmul.mubr.bf16.gmra.mxu1 %v14112_v52  ;;  %12085 = verf.f32 %v4944_v4  ;;  %v14520_v13 = vadd.f32 %v2883_v25, %v2723_v45  ;;  %v5796_v2 = vmul.f32 %v5496_v15, %v4596_v32 }
 0x229   :  { %v5508_v31 = vadd.f32 1.0, %v12080_v63  ;;  %3088 = vmatprep.mubr.bf16.mxu1 %v14119_v36  ;;  %3333 = vmatpush2.bf16.msra.mxu1 %v11403_v3  ;;  %v2728_v19 = vpop.f32.mrf.mxu0  ;;  %v2891_v16 = vpop.f32.mrf.mxu1 }
 0x22a   :  { %3240 = vmatmul.mubr.bf16.gmra.mxu0 %v14107_v59  ;;  %3334 = vmatprep.subr.bf16.mxu1 %v11411_v60  ;;  %v2729_v3 = vadd.f32 %v2728_v19, %v14400_v27  ;;  %v4956_v4 = vmul.f32 0.70710677, %v14520_v13 }
 0x22b   :  { %v5808_v63 = vmul.f32 %v5508_v31, %v4608_v49  ;;  %3249 = vmatprep.mubr.bf16.mxu0 %v18816_v55  ;;  %v2730_v25 = vpop.f32.mrf.mxu0  ;;  %v2893_v45 = vpop.f32.mrf.mxu1  ;;  %v11412_v31 = vld [vmem:[%s18481_s3 + $0x370] ss:$48 sps:$4 sm:$0xff]   ;;  %v11420_v49 = vld [vmem:[%s18481_s3 + $0x314] ss:$48 sps:$4 sm:$0xff]  }
 0x22c   :  { %v12082_v18 = vpop.eup %12081  ;;  %v14531_v59 = vadd.f32 %v2889_v51, %v2729_v3  ;;  %v2731_v60 = vadd.f32 %v2730_v25, %v14409_v23  ;;  %12087 = verf.f32 %v4956_v4  ;;  %v4620_v4 = vmul.f32 0.5, %v14464_v8  ;;  %v11429_v8 = vld [vmem:[%s18481_s3 + $0x2bc] ss:$48 sps:$4 sm:$0xff]  }
 0x22d   :  { %v14529_v39 = vpack.c.bf16 %v5808_v63, %v5796_v2  ;;  %3335 = vmatpush2.bf16.msra.mxu1 %v11409_v44  ;;  %v2732_v32 = vpop.f32.mrf.mxu0  ;;  %v14537_v15 = vpop.f32.mrf.mxu1  ;;  %v5520_v19 = vadd.f32 1.0, %v12082_v18  ;;  %v11418_v18 = vld [vmem:[%s18481_s3 + $0x310] ss:$48 sps:$4 sm:$0xff]  }
 0x22e   :  { %18891 = vst [vmem:[#allocation31_spill] sm:$0xff] %v14537_v15  ;;  %3336 = vmatprep.subr.bf16.mxu1 %v11414_v38  ;;  %v4968_v51 = vmul.f32 0.70710677, %v14531_v59  ;;  %v14543_v2 = vadd.f32 %v2891_v16, %v2731_v60  ;;  %v2733_v44 = vadd.f32 %v2732_v32, %v14400_v27  ;;  %v4632_v38 = vmul.f32 0.5, %v14482_v37 }
 0x22f   :  { %18890 = vst [vmem:[#allocation33_spill] sm:$0xff] %v14529_v39  ;;  %v14546_v3 = vpop.f32.mrf.mxu0  ;;  %v2899_v25 = vpop.f32.mrf.mxu1  ;;  %v5820_v37 = vmul.f32 %v5520_v19, %v4620_v4 }
 0x230   :  { %18892 = vst [vmem:[#allocation32_spill] sm:$0xff] %v14543_v2  ;;  %v12084_v63 = vpop.eup %12083  ;;  %18893 = vst [vmem:[#allocation29_spill] sm:$0xff] %v14546_v3  ;;  %3089 = vmatmul.mubr.bf16.gmra.mxu1 %v14163_v10  ;;  %12089 = verf.f32 %v4968_v51  ;;  %v14555_v16 = vadd.f32 %v2893_v45, %v2733_v44 }
 0x231   :  { %v5532_v39 = vadd.f32 1.0, %v12084_v63  ;;  %3098 = vmatprep.mubr.bf16.mxu1 %v14167_v41  ;;  %3337 = vmatpush2.bf16.msra.mxu1 %v11412_v31  ;;  %v2738_v60 = vpop.f32.mrf.mxu0  ;;  %v2901_v32 = vpop.f32.mrf.mxu1 }
 0x232   :  { %3250 = vmatmul.mubr.bf16.gmra.mxu0 %v14153_v12  ;;  %3338 = vmatprep.subr.bf16.mxu1 %v11420_v49  ;;  %v2739_v31 = vadd.f32 %v2738_v60, %v14400_v27  ;;  %v4980_v15 = vmul.f32 0.70710677, %v14555_v16 }
 0x233   :  { %v5832_v63 = vmul.f32 %v5532_v39, %v4632_v38  ;;  %3259 = vmatprep.mubr.bf16.mxu0 %v18816_v55  ;;  %v2740_v51 = vpop.f32.mrf.mxu0  ;;  %v2903_v45 = vpop.f32.mrf.mxu1 }
 0x234   :  { %v14564_v44 = vadd.f32 %v2899_v25, %v2739_v31  ;;  %v2741_v2 = vadd.f32 %v2740_v51, %v14409_v23  ;;  %12091 = verf.f32 %v4980_v15 }
 0x235   :  { %3339 = vmatpush2.bf16.msra.mxu1 %v11418_v18  ;;  %v14567_v49 = vpack.c.bf16 %v5832_v63, %v5820_v37  ;;  %v2742_v3 = vpop.f32.mrf.mxu0  ;;  %v14569_v12 = vpop.f32.mrf.mxu1 }
 0x236   :  { %18895 = vst [vmem:[#allocation37_spill] sm:$0xff] %v14569_v12  ;;  %3630 = vmatprep.subr.bf16.mxu1 %v11429_v8  ;;  %v12086_v39 = vpop.eup %12085  ;;  %v14571_v19 = vadd.f32 %v2901_v32, %v2741_v2  ;;  %v4992_v4 = vmul.f32 0.70710677, %v14564_v44  ;;  %v2743_v38 = vadd.f32 %v2742_v3, %v14400_v27  ;;  %v4644_v32 = vmul.f32 0.5, %v14496_v0 }
 0x237   :  { %18894 = vst [vmem:[#allocation36_spill] sm:$0xff] %v14567_v49  ;;  %v14575_v60 = vpop.f32.mrf.mxu0  ;;  %v2909_v25 = vpop.f32.mrf.mxu1  ;;  %v5544_v18 = vadd.f32 1.0, %v12086_v39  ;;  %v4656_v3 = vmul.f32 0.5, %v14520_v13 }
 0x238   :  { %18896 = vst [vmem:[#allocation35_spill] sm:$0xff] %v14571_v19  ;;  %18897 = vst [vmem:[#allocation40_spill] sm:$0xff] %v14575_v60  ;;  %3099 = vmatmul.mubr.bf16.gmra.mxu1 %v14203_v33  ;;  %v14579_v15 = vadd.f32 %v2903_v45, %v2743_v38  ;;  %12093 = verf.f32 %v4992_v4 }
 0x239   :  { %3108 = vmatprep.mubr.bf16.mxu1 %v14205_v61  ;;  %v2748_v37 = vpop.f32.mrf.mxu0  ;;  %v2911_v8 = vpop.f32.mrf.mxu1  ;;  %v5844_v19 = vmul.f32 %v5544_v18, %v4644_v32 }
 0x23a   :  { %3260 = vmatmul.mubr.bf16.gmra.mxu0 %v14196_v53  ;;  %v12088_v2 = vpop.eup %12087  ;;  %v2749_v63 = vadd.f32 %v2748_v37, %v14400_v27  ;;  %v5004_v51 = vmul.f32 0.70710677, %v14579_v15 }
 0x23b   :  { %3269 = vmatprep.mubr.bf16.mxu0 %v18816_v55  ;;  %v5556_v31 = vadd.f32 1.0, %v12088_v2  ;;  %v2750_v39 = vpop.f32.mrf.mxu0  ;;  %v2913_v45 = vpop.f32.mrf.mxu1 }
 0x23c   :  { %v14587_v38 = vadd.f32 %v2909_v25, %v2749_v63  ;;  %v2751_v49 = vadd.f32 %v2750_v39, %v14409_v23  ;;  %12095 = verf.f32 %v5004_v51 }
 0x23d   :  { %v5856_v12 = vmul.f32 %v5556_v31, %v4656_v3  ;;  %v2752_v0 = vpop.f32.mrf.mxu0  ;;  %v14590_v60 = vpop.f32.mrf.mxu1  ;;  %v4668_v31 = vmul.f32 0.5, %v14531_v59 }
 0x23e   :  { %18898 = vst [vmem:[#allocation41_spill] sm:$0xff] %v14590_v60  ;;  %v12090_v37 = vpop.eup %12089  ;;  %v5016_v53 = vmul.f32 0.70710677, %v14587_v38  ;;  %v14593_v13 = vadd.f32 %v2911_v8, %v2751_v49  ;;  %v2753_v4 = vadd.f32 %v2752_v0, %v14400_v27 }
 0x23f   :  { %v14596_v2 = vpop.f32.mrf.mxu0  ;;  %v2919_v61 = vpop.f32.mrf.mxu1  ;;  %v14599_v25 = vpack.c.bf16 %v5856_v12, %v5844_v19  ;;  %v5568_v18 = vadd.f32 1.0, %v12090_v37  ;;  %v4680_v12 = vmul.f32 0.5, %v14555_v16 }
 0x240   :  { %18899 = vst [vmem:[#allocation39_spill] sm:$0xff] %v14593_v13  ;;  %18900 = vst [vmem:[#allocation45_spill] sm:$0xff] %v14596_v2  ;;  %3109 = vmatmul.mubr.bf16.gmra.mxu1 %v14241_v6  ;;  %12097 = verf.f32 %v5016_v53  ;;  %v14602_v32 = vadd.f32 %v2913_v45, %v2753_v4 }
 0x241   :  { %18901 = vst [vmem:[#allocation46_spill] sm:$0xff] %v14599_v25  ;;  %3118 = vmatprep.mubr.bf16.mxu1 %v14245_v57  ;;  %v2758_v63 = vpop.f32.mrf.mxu0  ;;  %v2921_v49 = vpop.f32.mrf.mxu1  ;;  %v5868_v37 = vmul.f32 %v5568_v18, %v4668_v31 }
 0x242   :  { %3270 = vmatmul.mubr.bf16.gmra.mxu0 %v14233_v9  ;;  %v12092_v8 = vpop.eup %12091  ;;  %v2759_v3 = vadd.f32 %v2758_v63, %v14400_v27  ;;  %v5028_v51 = vmul.f32 0.70710677, %v14602_v32 }
 0x243   :  { %3279 = vmatprep.mubr.bf16.mxu0 %v18816_v55  ;;  %v5580_v19 = vadd.f32 1.0, %v12092_v8  ;;  %v2760_v39 = vpop.f32.mrf.mxu0  ;;  %v2923_v53 = vpop.f32.mrf.mxu1 }
 0x244   :  { %v14610_v45 = vadd.f32 %v2919_v61, %v2759_v3  ;;  %v2761_v0 = vadd.f32 %v2760_v39, %v14409_v23  ;;  %12099 = verf.f32 %v5028_v51  ;;  %v4704_v51 = vmul.f32 0.5, %v14579_v15 }
 0x245   :  { %v5880_v4 = vmul.f32 %v5580_v19, %v4680_v12  ;;  %v2762_v25 = vpop.f32.mrf.mxu0  ;;  %v14613_v63 = vpop.f32.mrf.mxu1 }
 0x246   :  { %18902 = vst [vmem:[#allocation44_spill] sm:$0xff] %v14613_v63  ;;  %v5040_v60 = vmul.f32 0.70710677, %v14610_v45  ;;  %v14616_v59 = vadd.f32 %v2921_v49, %v2761_v0  ;;  %v2763_v16 = vadd.f32 %v2762_v25, %v14400_v27  ;;  %v12094_v3 = vpop.eup %12093 }
 0x247   :  { %v14619_v8 = vpop.f32.mrf.mxu0  ;;  %v2929_v2 = vpop.f32.mrf.mxu1  ;;  %v14622_v61 = vpack.c.bf16 %v5880_v4, %v5868_v37  ;;  %v5592_v19 = vadd.f32 1.0, %v12094_v3 }
 0x248   :  { %18903 = vst [vmem:[#allocation59_spill] sm:$0xff] %v14616_v59  ;;  %18904 = vst [vmem:[#allocation60_spill] sm:$0xff] %v14619_v8  ;;  %3119 = vmatmul.mubr.bf16.gmra.mxu1 %v14257_v26  ;;  %12101 = verf.f32 %v5040_v60  ;;  %v14625_v18 = vadd.f32 %v2923_v53, %v2763_v16  ;;  %v4692_v16 = vmul.f32 0.5, %v14564_v44 }
 0x249   :  { %18905 = vst [vmem:[#allocation61_spill] sm:$0xff] %v14622_v61  ;;  %3128 = vmatprep.mubr.bf16.mxu1 %v14285_v42  ;;  %v2768_v31 = vpop.f32.mrf.mxu0  ;;  %v2931_v49 = vpop.f32.mrf.mxu1 }
 0x24a   :  { %3280 = vmatmul.mubr.bf16.gmra.mxu0 %v14254_v5  ;;  %v12096_v12 = vpop.eup %12095  ;;  %v2769_v25 = vadd.f32 %v2768_v31, %v14400_v27  ;;  %v5052_v0 = vmul.f32 0.70710677, %v14625_v18 }
 0x24b   :  { %3289 = vmatprep.mubr.bf16.mxu0 %v18816_v55  ;;  %v5604_v39 = vadd.f32 1.0, %v12096_v12  ;;  %v2770_v37 = vpop.f32.mrf.mxu0  ;;  %v2933_v4 = vpop.f32.mrf.mxu1  ;;  %v5892_v12 = vmul.f32 %v5592_v19, %v4692_v16 }
 0x24c   :  { %v14632_v60 = vadd.f32 %v2929_v2, %v2769_v25  ;;  %v2771_v53 = vadd.f32 %v2770_v37, %v14409_v23  ;;  %12103 = verf.f32 %v5052_v0  ;;  %v4716_v0 = vmul.f32 0.5, %v14587_v38 }
 0x24d   :  { %v5904_v61 = vmul.f32 %v5604_v39, %v4704_v51  ;;  %v2772_v59 = vpop.f32.mrf.mxu0  ;;  %v14636_v31 = vpop.f32.mrf.mxu1  ;;  %v4728_v37 = vmul.f32 0.5, %v14602_v32 }
 0x24e   :  { %18906 = vst [vmem:[#allocation62_spill] sm:$0xff] %v14636_v31  ;;  %v12098_v63 = vpop.eup %12097  ;;  %v5064_v3 = vmul.f32 0.70710677, %v14632_v60  ;;  %v14639_v15 = vadd.f32 %v2931_v49, %v2771_v53  ;;  %v2773_v8 = vadd.f32 %v2772_v59, %v14400_v27 }
 0x24f   :  { %v14642_v13 = vpop.f32.mrf.mxu0  ;;  %v2939_v2 = vpop.f32.mrf.mxu1  ;;  %v5616_v44 = vadd.f32 1.0, %v12098_v63  ;;  %v14649_v49 = vpack.c.bf16 %v5904_v61, %v5892_v12 }
 0x250   :  { %18907 = vst [vmem:[#allocation63_spill] sm:$0xff] %v14639_v15  ;;  %18908 = vst [vmem:[#allocation64_spill] sm:$0xff] %v14642_v13  ;;  %3129 = vmatmul.mubr.bf16.gmra.mxu1 %v14289_v50  ;;  %12105 = verf.f32 %v5064_v3  ;;  %v14646_v25 = vadd.f32 %v2933_v4, %v2773_v8 }
 0x251   :  { %3138 = vmatprep.mubr.bf16.mxu1 %v14300_v7  ;;  %v2778_v51 = vpop.f32.mrf.mxu0  ;;  %v2941_v39 = vpop.f32.mrf.mxu1  ;;  %18909 = vst [vmem:[#allocation65_spill] sm:$0xff] %v14649_v49  ;;  %v5916_v61 = vmul.f32 %v5616_v44, %v4716_v0 }
 0x252   :  { %3290 = vmatmul.mubr.bf16.gmra.mxu0 %v14287_v56  ;;  %v12100_v19 = vpop.eup %12099  ;;  %v2779_v59 = vadd.f32 %v2778_v51, %v14400_v27  ;;  %v5076_v63 = vmul.f32 0.70710677, %v14646_v25 }
 0x253   :  { %3299 = vmatprep.mubr.bf16.mxu0 %v18816_v55  ;;  %v5628_v53 = vadd.f32 1.0, %v12100_v19  ;;  %v2780_v8 = vpop.f32.mrf.mxu0  ;;  %v2943_v4 = vpop.f32.mrf.mxu1 }
 0x254   :  { %v14656_v16 = vadd.f32 %v2939_v2, %v2779_v59  ;;  %v2781_v3 = vadd.f32 %v2780_v8, %v14409_v23  ;;  %12107 = verf.f32 %v5076_v63  ;;  %v4752_v63 = vmul.f32 0.5, %v14625_v18  ;;  %v11432_v18 = vld [vmem:[%s18481_s3 + $0x25c] ss:$48 sps:$4 sm:$0xff]  }
 0x255   :  { %v5928_v12 = vmul.f32 %v5628_v53, %v4728_v37  ;;  %v2782_v49 = vpop.f32.mrf.mxu0  ;;  %v14659_v51 = vpop.f32.mrf.mxu1  ;;  %v4740_v53 = vmul.f32 0.5, %v14610_v45 }
 0x256   :  { %18910 = vst [vmem:[#allocation66_spill] sm:$0xff] %v14659_v51  ;;  %v12102_v31 = vpop.eup %12101  ;;  %v5088_v38 = vmul.f32 0.70710677, %v14656_v16  ;;  %v14662_v13 = vadd.f32 %v2941_v39, %v2781_v3  ;;  %v2783_v32 = vadd.f32 %v2782_v49, %v14400_v27  ;;  %v11433_v51 = vld [vmem:[%s18481_s3 + $0x1f8] ss:$48 sps:$4 sm:$0xff]  }
 0x257   :  { %v14665_v19 = vpop.f32.mrf.mxu0  ;;  %v2949_v15 = vpop.f32.mrf.mxu1  ;;  %v14668_v2 = vpack.c.bf16 %v5928_v12, %v5916_v61  ;;  %v5640_v44 = vadd.f32 1.0, %v12102_v31 }
 0x258   :  { %18911 = vst [vmem:[#allocation67_spill] sm:$0xff] %v14662_v13  ;;  %18912 = vst [vmem:[#allocation68_spill] sm:$0xff] %v14665_v19  ;;  %3139 = vmatmul.mubr.bf16.gmra.mxu1 %v14306_v17  ;;  %12109 = verf.f32 %v5088_v38  ;;  %v14671_v59 = vadd.f32 %v2943_v4, %v2783_v32  ;;  %v11427_v38 = vld [vmem:[%s18481_s3 + $0x2b8] ss:$48 sps:$4 sm:$0xff]  }
 0x259   :  { %18913 = vst [vmem:[#allocation69_spill] sm:$0xff] %v14668_v2  ;;  %3340 = vmatprep.mubr.bf16.mxu1 %v13798_v62  ;;  %v2788_v0 = vpop.f32.mrf.mxu0  ;;  %v2951_v39 = vpop.f32.mrf.mxu1  ;;  %v5940_v32 = vmul.f32 %v5640_v44, %v4740_v53 }
 0x25a   :  { %3300 = vmatmul.mubr.bf16.gmra.mxu0 %v14304_v40  ;;  %v12104_v37 = vpop.eup %12103  ;;  %v2789_v49 = vadd.f32 %v2788_v0, %v14400_v27  ;;  %v5100_v3 = vmul.f32 0.70710677, %v14671_v59 }
 0x25b   :  { %3501 = vmatprep.mubr.bf16.mxu0 %v18816_v55  ;;  %v5652_v8 = vadd.f32 1.0, %v12104_v37  ;;  %v2790_v31 = vpop.f32.mrf.mxu0  ;;  %v2953_v61 = vpop.f32.mrf.mxu1 }
 0x25c   :  { %v14679_v4 = vadd.f32 %v2949_v15, %v2789_v49  ;;  %v2791_v12 = vadd.f32 %v2790_v31, %v14409_v23  ;;  %12111 = verf.f32 %v5100_v3  ;;  %v11442_v31 = vld [vmem:[%s18481_s3 + $0x8b8] ss:$48 sps:$4 sm:$0xff]  }
 0x25d   :  { %v5952_v0 = vmul.f32 %v5652_v8, %v4752_v63  ;;  %v2792_v2 = vpop.f32.mrf.mxu0  ;;  %v14685_v45 = vpop.f32.mrf.mxu1  ;;  %v11453_v63 = vld [vmem:[%s18481_s3 + $0x85c] ss:$48 sps:$4 sm:$0xff]  }
 0x25e   :  { %18914 = vst [vmem:[#allocation70_spill] sm:$0xff] %v14685_v45  ;;  %v12106_v37 = vpop.eup %12105  ;;  %v5112_v15 = vmul.f32 0.70710677, %v14679_v4  ;;  %v14691_v49 = vadd.f32 %v2951_v39, %v2791_v12  ;;  %v2793_v44 = vadd.f32 %v2792_v2, %v14400_v27  ;;  %v11430_v39 = vld [vmem:[%s18481_s3 + $0x258] ss:$48 sps:$4 sm:$0xff]  }
 0x25f   :  { %v14697_v53 = vpop.f32.mrf.mxu0  ;;  %v14703_v8 = vpack.c.bf16 %v5952_v0, %v5940_v32  ;;  %v2959_v3 = vpop.f32.mrf.mxu1  ;;  %v5664_v12 = vadd.f32 1.0, %v12106_v37  ;;  %v11435_v32 = vld [vmem:[%s18481_s3 + $0x1fc] ss:$48 sps:$4 sm:$0xff]   ;;  %v11451_v37 = vld [vmem:[%s18481_s3 + $0x858] ss:$48 sps:$4 sm:$0xff]  }
 0x260   :  { %18915 = vst [vmem:[#allocation71_spill] sm:$0xff] %v14691_v49  ;;  %18916 = vst [vmem:[#allocation72_spill] sm:$0xff] %v14697_v53  ;;  %3341 = vmatmul.mubr.bf16.vlgmr.msra.gmra.mxu1 %v13808_v35  ;;  %12113 = verf.f32 %v5112_v15  ;;  %v14709_v2 = vadd.f32 %v2953_v61, %v2793_v44  ;;  %v11462_v61 = vld [vmem:[%s18481_s3 + $0x7fc] ss:$48 sps:$4 sm:$0xff]   ;;  %v4776_v15 = vmul.f32 0.5, %v14646_v25 }
 0x261   :  { %18917 = vst [vmem:[#allocation73_spill] sm:$0xff] %v14703_v8  ;;  %3631 = vmatpush1.bf16.msra.mxu1 %v11427_v38  ;;  %3350 = vmatprep.mubr.bf16.mxu1 %v13849_v1  ;;  %v2798_v45 = vpop.f32.mrf.mxu0  ;;  %v12108_v0 = vpop.eup %12107  ;;  %v11438_v25 = vld [vmem:[%s18481_s3 + $0x19c] ss:$48 sps:$4 sm:$0xff]  }
 0x262   :  { %3502 = vmatmul.mubr.bf16.vlgmr.msra.gmra.mxu0 %v13806_v30  ;;  %3632 = vmatprep.subr.bf16.mxu1 %v11432_v18  ;;  %v2799_v38 = vadd.f32 %v2798_v45, %v14400_v27  ;;  %v4764_v18 = vmul.f32 0.5, %v14632_v60  ;;  %v5676_v44 = vadd.f32 1.0, %v12108_v0  ;;  %v5124_v8 = vmul.f32 0.70710677, %v14709_v2 }
 0x263   :  { %3511 = vmatprep.mubr.bf16.mxu0 %v18816_v55  ;;  %3792 = vmatpush1.bf16.msra.mxu0 %v11442_v31  ;;  %v2800_v49 = vpop.f32.mrf.mxu0  ;;  %v2961_v31 = vpop.f32.mrf.mxu1 }
 0x264   :  { %3793 = vmatprep.subr.bf16.mxu0 %v11453_v63  ;;  %v14726_v45 = vadd.f32 %v2959_v3, %v2799_v38  ;;  %v2801_v53 = vadd.f32 %v2800_v49, %v14409_v23  ;;  %v5964_v19 = vmul.f32 %v5664_v12, %v4764_v18  ;;  %v5976_v13 = vmul.f32 %v5676_v44, %v4776_v15  ;;  %v11460_v49 = vld [vmem:[%s18481_s3 + $0x7f8] ss:$48 sps:$4 sm:$0xff]  }
 0x265   :  { %3633 = vmatpush1.bf16.msra.mxu1 %v11430_v39  ;;  %12115 = verf.f32 %v5124_v8  ;;  %v2802_v60 = vpop.f32.mrf.mxu0  ;;  %v12110_v63 = vpop.eup %12109  ;;  %v11471_v8 = vld [vmem:[%s18481_s3 + $0x79c] ss:$48 sps:$4 sm:$0xff]   ;;  %v4788_v18 = vmul.f32 0.5, %v14656_v16  ;;  %v4800_v15 = vmul.f32 0.5, %v14671_v59  ;;  %v11478_v59 = vld [vmem:[%s18481_s3 + $0x738] ss:$48 sps:$4 sm:$0xff]  }
 0x266   :  { %3634 = vmatprep.subr.bf16.mxu1 %v11435_v32  ;;  %v5136_v3 = vmul.f32 0.70710677, %v14726_v45  ;;  %v14736_v0 = vadd.f32 %v2961_v31, %v2801_v53  ;;  %v2803_v39 = vadd.f32 %v2802_v60, %v14400_v27  ;;  %v14746_v12 = vpack.c.bf16 %v5976_v13, %v5964_v19  ;;  %v2963_v32 = vpop.f32.mrf.mxu1  ;;  %v11436_v53 = vld [vmem:[%s18481_s3 + $0x198] ss:$48 sps:$4 sm:$0xff]   ;;  %v11441_v13 = vld [vmem:[%s18481_s3 + $0x13c] ss:$48 sps:$4 sm:$0xff]  }
 0x267   :  { %3794 = vmatpush1.bf16.msra.mxu0 %v11451_v37  ;;  %v5688_v38 = vadd.f32 1.0, %v12110_v63  ;;  %v11439_v60 = vld [vmem:[%s18481_s3 + $0x138] ss:$48 sps:$4 sm:$0xff]  }
 0x268   :  { %18918 = vst [vmem:[#allocation74_spill] sm:$0xff] %v14736_v0  ;;  %3351 = vmatmul.mubr.bf16.gmra.mxu1 %v13856_v46  ;;  %3795 = vmatprep.subr.bf16.mxu0 %v11462_v61  ;;  %18919 = vst [vmem:[#allocation75_spill] sm:$0xff] %v14746_v12  ;;  %12117 = verf.f32 %v5136_v3  ;;  %v14752_v37 = vadd.f32 %v2963_v32, %v2803_v39  ;;  %v11480_v61 = vld [vmem:[%s18481_s3 + $0x73c] ss:$48 sps:$4 sm:$0xff]  }
 0x269   :  { %3360 = vmatprep.mubr.bf16.mxu1 %v13884_v20  ;;  %3635 = vmatpush1.bf16.msra.mxu1 %v11433_v51  ;;  %v12112_v19 = vpop.eup %12111  ;;  %v11469_v51 = vld [vmem:[%s18481_s3 + $0x798] ss:$48 sps:$4 sm:$0xff]   ;;  %v11447_v3 = vld [vmem:[%s18481_s3 + $0xdc] ss:$48 sps:$4 sm:$0xff]  }
 0x26a   :  { %3512 = vmatmul.mubr.bf16.gmra.mxu0 %v13851_v21  ;;  %3636 = vmatprep.subr.bf16.mxu1 %v11438_v25  ;;  %v5700_v44 = vadd.f32 1.0, %v12112_v19  ;;  %v5148_v31 = vmul.f32 0.70710677, %v14752_v37  ;;  %v5988_v25 = vmul.f32 %v5688_v38, %v4788_v18  ;;  %v4812_v19 = vmul.f32 0.5, %v14679_v4  ;;  %v11495_v18 = vld [vmem:[%s18481_s3 + $0x67c] ss:$48 sps:$4 sm:$0xff]  }
 0x26b   :  { %3521 = vmatprep.mubr.bf16.mxu0 %v18816_v55  ;;  %3796 = vmatpush1.bf16.msra.mxu0 %v11460_v49  ;;  %v11489_v49 = vld [vmem:[%s18481_s3 + $0x6dc] ss:$48 sps:$4 sm:$0xff]  }
 0x26c   :  { %3797 = vmatprep.subr.bf16.mxu0 %v11471_v8  ;;  %v6000_v63 = vmul.f32 %v5700_v44, %v4800_v15  ;;  %12119 = verf.f32 %v5148_v31  ;;  %v11445_v8 = vld [vmem:[%s18481_s3 + $0xd8] ss:$48 sps:$4 sm:$0xff]   ;;  %v11456_v4 = vld [vmem:[%s18481_s3 + $0x1c] ss:$48 sps:$4 sm:$0xff]  }
 0x26d   :  { %3637 = vmatpush1.bf16.msra.mxu1 %v11436_v53  ;;  %v12114_v16 = vpop.eup %12113  ;;  %v11450_v53 = vld [vmem:[%s18481_s3 + $0x7c] ss:$48 sps:$4 sm:$0xff]   ;;  %v11448_v15 = vld [vmem:[%s18481_s3 + $0x78] ss:$48 sps:$4 sm:$0xff]  }
 0x26e   :  { %3638 = vmatprep.subr.bf16.mxu1 %v11441_v13  ;;  %v14781_v39 = vpack.c.bf16 %v6000_v63, %v5988_v25  ;;  %v5712_v32 = vadd.f32 1.0, %v12114_v16  ;;  %v11487_v13 = vld [vmem:[%s18481_s3 + $0x6d8] ss:$48 sps:$4 sm:$0xff]   ;;  %v11498_v25 = vld [vmem:[%s18481_s3 + $0x61c] ss:$48 sps:$4 sm:$0xff]  }
 0x26f   :  { %3798 = vmatpush1.bf16.msra.mxu0 %v11469_v51  ;;  %v4824_v51 = vmul.f32 0.5, %v14709_v2  ;;  %v11493_v2 = vld [vmem:[%s18481_s3 + $0x678] ss:$48 sps:$4 sm:$0xff]  }
 0x270   :  { %3361 = vmatmul.mubr.bf16.gmra.mxu1 %v13922_v22  ;;  %3799 = vmatprep.subr.bf16.mxu0 %v11480_v61  ;;  %18920 = vst [vmem:[#allocation76_spill] sm:$0xff] %v14781_v39  ;;  %v6012_v44 = vmul.f32 %v5712_v32, %v4812_v19  ;;  %v4836_v32 = vmul.f32 0.5, %v14726_v45  ;;  %v11457_v19 = vld [vmem:[%s18481_s3 + $0x5b8] ss:$48 sps:$4 sm:$0xff]   ;;  %v11465_v45 = vld [vmem:[%s18481_s3 + $0x55c] ss:$48 sps:$4 sm:$0xff]  }
 0x271   :  { %3370 = vmatprep.mubr.bf16.mxu1 %v13944_v29  ;;  %3639 = vmatpush1.bf16.msra.mxu1 %v11439_v60 }
 0x272   :  { %3522 = vmatmul.mubr.bf16.gmra.mxu0 %v13908_v54  ;;  %3640 = vmatprep.subr.bf16.mxu1 %v11447_v3  ;;  %v12116_v38 = vpop.eup %12115  ;;  %v11454_v3 = vld [vmem:[%s18481_s3 + $0x18] ss:$48 sps:$4 sm:$0xff]  }
 0x273   :  { %3531 = vmatprep.mubr.bf16.mxu0 %v18816_v55  ;;  %3800 = vmatpush1.bf16.msra.mxu0 %v11478_v59  ;;  %v5724_v61 = vadd.f32 1.0, %v12116_v38  ;;  %v11459_v59 = vld [vmem:[%s18481_s3 + $0x5bc] ss:$48 sps:$4 sm:$0xff]  }
 0x274   :  { %3801 = vmatprep.subr.bf16.mxu0 %v11489_v49 }
 0x275   :  { %3641 = vmatpush1.bf16.msra.mxu1 %v11445_v8  ;;  %v6024_v31 = vmul.f32 %v5724_v61, %v4824_v51  ;;  %v12118_v60 = vpop.eup %12117  ;;  %v11496_v8 = vld [vmem:[%s18481_s3 + $0x618] ss:$48 sps:$4 sm:$0xff]  }
 0x276   :  { %3642 = vmatprep.subr.bf16.mxu1 %v11450_v53  ;;  %v5736_v16 = vadd.f32 1.0, %v12118_v60  ;;  %v4848_v53 = vmul.f32 0.5, %v14752_v37  ;;  %v11477_v60 = vld [vmem:[%s18481_s3 + $0x43c] ss:$48 sps:$4 sm:$0xff]  }
 0x277   :  { %3802 = vmatpush1.bf16.msra.mxu0 %v11487_v13  ;;  %v14813_v63 = vpack.c.bf16 %v6024_v31, %v6012_v44  ;;  %v11516_v13 = vld [vmem:[%s18481_s3 + $0x8c4] ss:$48 sps:$4 sm:$0xff]   ;;  %v11466_v44 = vld [vmem:[%s18481_s3 + $0x4f8] ss:$48 sps:$4 sm:$0xff]   ;;  %v11474_v31 = vld [vmem:[%s18481_s3 + $0x49c] ss:$48 sps:$4 sm:$0xff]  }
 0x278   :  { %3371 = vmatmul.mubr.bf16.gmra.mxu1 %v13967_v34  ;;  %3803 = vmatprep.subr.bf16.mxu0 %v11495_v18  ;;  %v6036_v51 = vmul.f32 %v5736_v16, %v4836_v32  ;;  %v11463_v18 = vld [vmem:[%s18481_s3 + $0x558] ss:$48 sps:$4 sm:$0xff]  }
 0x279   :  { %18921 = vst [vmem:[#allocation77_spill] sm:$0xff] %v14813_v63  ;;  %3380 = vmatprep.mubr.bf16.mxu1 %v13991_v14  ;;  %3643 = vmatpush1.bf16.msra.mxu1 %v11448_v15  ;;  %v12120_v49 = vpop.eup %12119  ;;  %v11468_v15 = vld [vmem:[%s18481_s3 + $0x4fc] ss:$48 sps:$4 sm:$0xff]   ;;  %v11490_v32 = vld [vmem:[%s18481_s3 + $0x318] ss:$48 sps:$4 sm:$0xff]  }
 0x27a   :  { %3532 = vmatmul.mubr.bf16.gmra.mxu0 %v13955_v47  ;;  %3644 = vmatprep.subr.bf16.mxu1 %v11456_v4  ;;  %v5748_v38 = vadd.f32 1.0, %v12120_v49  ;;  %v11472_v4 = vld [vmem:[%s18481_s3 + $0x498] ss:$48 sps:$4 sm:$0xff]  }
 0x27b   :  { %3541 = vmatprep.mubr.bf16.mxu0 %v18816_v55  ;;  %3804 = vmatpush1.bf16.msra.mxu0 %v11493_v2  ;;  %v11475_v2 = vld [vmem:[%s18481_s3 + $0x438] ss:$48 sps:$4 sm:$0xff]  }
 0x27c   :  { %3805 = vmatprep.subr.bf16.mxu0 %v11498_v25  ;;  %v6048_v61 = vmul.f32 %v5748_v38, %v4848_v53  ;;  %v11483_v25 = vld [vmem:[%s18481_s3 + $0x3dc] ss:$48 sps:$4 sm:$0xff]   ;;  %v11484_v49 = vld [vmem:[%s18481_s3 + $0x378] ss:$48 sps:$4 sm:$0xff]   ;;  %v11501_v38 = vld [vmem:[%s18481_s3 + $0x2c4] ss:$48 sps:$4 sm:$0xff]  }
 0x27d   :  { %3645 = vmatpush1.bf16.msra.mxu1 %v11454_v3  ;;  %v11481_v3 = vld [vmem:[%s18481_s3 + $0x3d8] ss:$48 sps:$4 sm:$0xff]  }
 0x27e   :  { %3646 = vmatprep.subr.bf16.mxu1 %v11459_v59  ;;  %v14839_v37 = vpack.c.bf16 %v6048_v61, %v6036_v51  ;;  %v18923_v16 = vld [vmem:[#allocation8_spill] sm:$0xff]  ;;  %v18924_v53 = vld [vmem:[#allocation10_spill] sm:$0xff]  ;;  %v14902_v51 = vpop.f32.mrf.mxu1  ;;  %v14904_v61 = vpop.f32.mrf.mxu0 }
 0x27f   :  { %3806 = vmatpush1.bf16.msra.mxu0 %v11496_v8  ;;  %v11486_v59 = vld [vmem:[%s18481_s3 + $0x37c] ss:$48 sps:$4 sm:$0xff]   ;;  %18927 = vst [vmem:[#allocation79_spill] sm:$0xff] %v14902_v51  ;;  %18928 = vst [vmem:[#allocation80_spill] sm:$0xff] %v14904_v61 }
 0x280   :  { %3381 = vmatmul.mubr.bf16.gmra.mxu1 %v14019_v24  ;;  %4113 = vmatprep.subr.bf16.mxu0 %v11516_v13  ;;  %18922 = vst [vmem:[#allocation78_spill] sm:$0xff] %v14839_v37  ;;  %v11492_v8 = vld [vmem:[%s18481_s3 + $0x31c] ss:$48 sps:$4 sm:$0xff]   ;;  %v18925_v13 = vld [vmem:[#allocation5_spill] sm:$0xff] }
 0x281   :  { %3390 = vmatprep.mubr.bf16.mxu1 %v14026_v43  ;;  %3647 = vmatpush2.bf16.msra.mxu1 %v11457_v19  ;;  %v18926_v19 = vld [vmem:[#allocation9_spill] sm:$0xff] }
 0x282   :  { %3542 = vmatmul.mubr.bf16.gmra.mxu0 %v14008_v28  ;;  %3648 = vmatprep.subr.bf16.mxu1 %v11465_v45 }
 0x283   :  { %3551 = vmatprep.mubr.bf16.mxu0 %v18816_v55 }
 0x285   :  { %3649 = vmatpush2.bf16.msra.mxu1 %v11463_v18 }
 0x286   :  { %3650 = vmatprep.subr.bf16.mxu1 %v11468_v15 }
 0x288   :  { %3391 = vmatmul.mubr.bf16.gmra.mxu1 %v14065_v48 }
 0x289   :  { %3400 = vmatprep.mubr.bf16.mxu1 %v14072_v58  ;;  %3651 = vmatpush2.bf16.msra.mxu1 %v11466_v44 }
 0x28a   :  { %3552 = vmatmul.mubr.bf16.gmra.mxu0 %v14060_v11  ;;  %3652 = vmatprep.subr.bf16.mxu1 %v11474_v31 }
 0x28b   :  { %3561 = vmatprep.mubr.bf16.mxu0 %v18816_v55 }
 0x28d   :  { %3653 = vmatpush2.bf16.msra.mxu1 %v11472_v4 }
 0x28e   :  { %3654 = vmatprep.subr.bf16.mxu1 %v11477_v60 }
 0x290   :  { %3401 = vmatmul.mubr.bf16.gmra.mxu1 %v14112_v52 }
 0x291   :  { %3410 = vmatprep.mubr.bf16.mxu1 %v14119_v36  ;;  %3655 = vmatpush2.bf16.msra.mxu1 %v11475_v2 }
 0x292   :  { %3562 = vmatmul.mubr.bf16.gmra.mxu0 %v18923_v16  ;;  %3656 = vmatprep.subr.bf16.mxu1 %v11483_v25 }
 0x293   :  { %3571 = vmatprep.mubr.bf16.mxu0 %v18816_v55 }
 0x295   :  { %3657 = vmatpush2.bf16.msra.mxu1 %v11481_v3 }
 0x296   :  { %3658 = vmatprep.subr.bf16.mxu1 %v11486_v59 }
 0x298   :  { %3411 = vmatmul.mubr.bf16.gmra.mxu1 %v14163_v10 }
 0x299   :  { %3420 = vmatprep.mubr.bf16.mxu1 %v14167_v41  ;;  %3659 = vmatpush2.bf16.msra.mxu1 %v11484_v49 }
 0x29a   :  { %3572 = vmatmul.mubr.bf16.gmra.mxu0 %v18924_v53  ;;  %3660 = vmatprep.subr.bf16.mxu1 %v11492_v8 }
 0x29b   :  { %3581 = vmatprep.mubr.bf16.mxu0 %v18816_v55 }
 0x29d   :  { %3661 = vmatpush2.bf16.msra.mxu1 %v11490_v32 }
 0x29e   :  { %3952 = vmatprep.subr.bf16.mxu1 %v11501_v38 }
 0x2a0   :  { %3421 = vmatmul.mubr.bf16.gmra.mxu1 %v14203_v33 }
 0x2a1   :  { %3430 = vmatprep.mubr.bf16.mxu1 %v18925_v13 }
 0x2a2   :  { %3582 = vmatmul.mubr.bf16.gmra.mxu0 %v18926_v19 }
 0x2a3   :  { %3591 = vmatprep.mubr.bf16.mxu0 %v18816_v55 }
 0x2a8   :  { %v2969_v45 = vpop.f32.mrf.mxu1  ;;  %3431 = vmatmul.mubr.bf16.gmra.mxu1 %v14241_v6 }
 0x2a9   :  { %v2808_v18 = vpop.f32.mrf.mxu0  ;;  %3440 = vmatprep.mubr.bf16.mxu1 %v14245_v57 }
 0x2aa   :  { %v2809_v15 = vadd.f32 %v2808_v18, %v14400_v27  ;;  %3592 = vmatmul.mubr.bf16.gmra.mxu0 %v14233_v9  ;;  %v2971_v44 = vpop.f32.mrf.mxu1 }
 0x2ab   :  { %v2810_v31 = vpop.f32.mrf.mxu0  ;;  %3601 = vmatprep.mubr.bf16.mxu0 %v18816_v55 }
 0x2ac   :  { %v14911_v4 = vadd.f32 %v2969_v45, %v2809_v15  ;;  %v2811_v60 = vadd.f32 %v2810_v31, %v14409_v23  ;;  %v2973_v2 = vpop.f32.mrf.mxu1 }
 0x2ad   :  { %v2812_v25 = vpop.f32.mrf.mxu0 }
 0x2ae   :  { %v5160_v3 = vmul.f32 0.70710677, %v14911_v4  ;;  %v14915_v59 = vadd.f32 %v2971_v44, %v2811_v60  ;;  %v2813_v49 = vadd.f32 %v2812_v25, %v14400_v27  ;;  %v2975_v8 = vpop.f32.mrf.mxu1 }
 0x2af   :  { %v2814_v32 = vpop.f32.mrf.mxu0 }
 0x2b0   :  { %12121 = verf.f32 %v5160_v3  ;;  %v5161_v38 = vmul.f32 0.70710677, %v14915_v59  ;;  %v2974_v18 = vadd.f32 %v2973_v2, %v2813_v49  ;;  %v2979_v37 = vpop.f32.mrf.mxu1  ;;  %3441 = vmatmul.mubr.bf16.gmra.mxu1 %v14257_v26  ;;  %v2815_v45 = vadd.f32 %v2814_v32, %v14409_v23  ;;  %v18929_v2 = vld [vmem:[#allocation34_spill] sm:$0xff] }
 0x2b1   :  { %v2818_v15 = vpop.f32.mrf.mxu0  ;;  %3450 = vmatprep.mubr.bf16.mxu1 %v14285_v42  ;;  %v18563_v49 = vsub.s32 3, %v18929_v2 }
 0x2b2   :  { %v5172_v31 = vmul.f32 0.70710677, %v2974_v18  ;;  %v2819_v44 = vadd.f32 %v2818_v15, %v14400_v27  ;;  %3602 = vmatmul.mubr.bf16.gmra.mxu0 %v14254_v5  ;;  %v2981_v60 = vpop.f32.mrf.mxu1  ;;  %12123 = verf.f32 %v5161_v38  ;;  %v14924_v25 = vadd.f32 %v2975_v8, %v2815_v45  ;;  %v12752_v38 = vld [vmem:[%s18482_s4] sm:$0xff]  ;;  %v18931_v8 = vld [vmem:[#allocation42_spill] sm:$0xff] }
 0x2b3   :  { %v2820_v3 = vpop.f32.mrf.mxu0  ;;  %3611 = vmatprep.mubr.bf16.mxu0 %v18816_v55  ;;  %v14936_v45 = vrot.slane %v12752_v38, %v18931_v8 }
 0x2b4   :  { %12125 = verf.f32 %v5172_v31  ;;  %v14928_v63 = vadd.f32 %v2979_v37, %v2819_v44  ;;  %v2821_v32 = vadd.f32 %v2820_v3, %v14409_v23  ;;  %v2983_v39 = vpop.f32.mrf.mxu1  ;;  %v5173_v12 = vmul.f32 0.70710677, %v14924_v25 }
 0x2b5   :  { %v2822_v27 = vpop.f32.mrf.mxu0  ;;  %v14942_v37 = vrot.slane %v12752_v38, %v18563_v49 }
 0x2b6   :  { %18930 = vst [vmem:[#allocation81_spill] sm:$0xff] %v14928_v63  ;;  %v14938_v15 = vadd.f32 %v2981_v60, %v2821_v32  ;;  %v2984_v51 = vpop.f32.mrf.mxu1  ;;  %12127 = verf.f32 %v5173_v12 }
 0x2b7   :  { %v2823_v31 = vpop.f32.mrf.mxu0 }
 0x2b8   :  { %18932 = vst [vmem:[#allocation82_spill] sm:$0xff] %v14938_v15  ;;  %v3020_v39 = vpop.f32.mrf.mxu1  ;;  %3451 = vmatmul.mubr.bf16.gmra.mxu1 %v14289_v50 }
 0x2b9   :  { %v3021_v44 = vadd.f32 %v3020_v39, %v14936_v45  ;;  %3460 = vmatprep.mubr.bf16.mxu1 %v14300_v7 }
 0x2ba   :  { %v3181_v3 = vpop.f32.mrf.mxu0  ;;  %3612 = vmatmul.mubr.bf16.gmra.mxu0 %v14287_v56  ;;  %v3022_v27 = vpop.f32.mrf.mxu1 }
 0x2bb   :  { %v14948_v60 = vadd.f32 %v3181_v3, %v3021_v44  ;;  %v3023_v12 = vadd.f32 %v3022_v27, %v14942_v37  ;;  %3621 = vmatprep.mubr.bf16.mxu0 %v18816_v55 }
 0x2bc   :  { %v3183_v51 = vpop.f32.mrf.mxu0  ;;  %v3024_v32 = vpop.f32.mrf.mxu1 }
 0x2bd   :  { %v12122_v38 = vpop.eup %12121  ;;  %v4898_v31 = vmul.f32 0.70710677, %v14948_v60  ;;  %v14953_v49 = vadd.f32 %v3183_v51, %v3023_v12  ;;  %v3025_v39 = vadd.f32 %v3024_v32, %v14936_v45  ;;  %v4860_v32 = vmul.f32 0.5, %v14911_v4 }
 0x2be   :  { %v3185_v8 = vpop.f32.mrf.mxu0  ;;  %v3026_v15 = vpop.f32.mrf.mxu1  ;;  %v5760_v27 = vadd.f32 1.0, %v12122_v38 }
 0x2bf   :  { %12129 = verf.f32 %v4898_v31  ;;  %v4899_v63 = vmul.f32 0.70710677, %v14953_v49  ;;  %v14957_v44 = vadd.f32 %v3185_v8, %v3025_v39  ;;  %v12124_v3 = vpop.eup %12123  ;;  %v3027_v61 = vadd.f32 %v3026_v15, %v14942_v37 }
 0x2c0   :  { %v3187_v0 = vpop.f32.mrf.mxu0  ;;  %v3030_v56 = vpop.f32.mrf.mxu1  ;;  %3461 = vmatmul.mubr.bf16.gmra.mxu1 %v14306_v17  ;;  %v4872_v8 = vmul.f32 0.5, %v2974_v18  ;;  %v6060_v50 = vmul.f32 %v5760_v27, %v4860_v32  ;;  %v4873_v27 = vmul.f32 0.5, %v14924_v25 }
 0x2c1   :  { %v12126_v7 = vpop.eup %12125  ;;  %12131 = verf.f32 %v4899_v63  ;;  %v4910_v12 = vmul.f32 0.70710677, %v14957_v44  ;;  %v3031_v51 = vadd.f32 %v3030_v56, %v14936_v45  ;;  %3662 = vmatprep.mubr.bf16.mxu1 %v13798_v62  ;;  %v14965_v39 = vadd.f32 %v3187_v0, %v3027_v61 }
 0x2c2   :  { %v5772_v31 = vadd.f32 1.0, %v12126_v7  ;;  %v3191_v38 = vpop.f32.mrf.mxu0  ;;  %3622 = vmatmul.mubr.bf16.gmra.mxu0 %v14304_v40  ;;  %v3032_v15 = vpop.f32.mrf.mxu1  ;;  %v5761_v0 = vadd.f32 1.0, %v12124_v3  ;;  %v4861_v61 = vmul.f32 0.5, %v14915_v59  ;;  %v11504_v3 = vld [vmem:[%s18481_s3 + $0x264] ss:$48 sps:$4 sm:$0xff]  }
 0x2c3   :  { %12133 = verf.f32 %v4910_v12  ;;  %v14968_v17 = vadd.f32 %v3191_v38, %v3031_v51  ;;  %v3033_v63 = vadd.f32 %v3032_v15, %v14942_v37  ;;  %3823 = vmatprep.mubr.bf16.mxu0 %v18816_v55  ;;  %v12128_v56 = vpop.eup %12127  ;;  %v4911_v4 = vmul.f32 0.70710677, %v14965_v39  ;;  %v11499_v51 = vld [vmem:[%s18481_s3 + $0x2c0] ss:$48 sps:$4 sm:$0xff]  }
 0x2c4   :  { %v6072_v62 = vmul.f32 %v5772_v31, %v4872_v8  ;;  %v3193_v18 = vpop.f32.mrf.mxu0  ;;  %v3034_v7 = vpop.f32.mrf.mxu1  ;;  %v5773_v59 = vadd.f32 1.0, %v12128_v56  ;;  %v11514_v15 = vld [vmem:[%s18481_s3 + $0x8c0] ss:$48 sps:$4 sm:$0xff]  }
 0x2c5   :  { %v4922_v40 = vmul.f32 0.70710677, %v14968_v17  ;;  %v14975_v5 = vadd.f32 %v3193_v18, %v3033_v63  ;;  %v3035_v12 = vadd.f32 %v3034_v7, %v14936_v45  ;;  %12135 = verf.f32 %v4911_v4 }
 0x2c6   :  { %v3195_v32 = vpop.f32.mrf.mxu0  ;;  %v3036_v8 = vpop.f32.mrf.mxu1  ;;  %v14985_v31 = vpack.c.bf16 %v6072_v62, %v6060_v50  ;;  %v11525_v62 = vld [vmem:[%s18481_s3 + $0x864] ss:$48 sps:$4 sm:$0xff]   ;;  %v6061_v50 = vmul.f32 %v5761_v0, %v4861_v61 }
 0x2c7   :  { %12137 = verf.f32 %v4922_v40  ;;  %v14987_v38 = vadd.f32 %v3195_v32, %v3035_v12  ;;  %v4923_v63 = vmul.f32 0.70710677, %v14975_v5  ;;  %v3037_v25 = vadd.f32 %v3036_v8, %v14942_v37  ;;  %v11502_v12 = vld [vmem:[%s18481_s3 + $0x260] ss:$48 sps:$4 sm:$0xff]   ;;  %v11507_v0 = vld [vmem:[%s18481_s3 + $0x204] ss:$48 sps:$4 sm:$0xff]  }
 0x2c8   :  { %18933 = vst [vmem:[#allocation83_spill] sm:$0xff] %v14985_v31  ;;  %v3197_v4 = vpop.f32.mrf.mxu0  ;;  %v3040_v18 = vpop.f32.mrf.mxu1  ;;  %3663 = vmatmul.mubr.bf16.vlgmr.msra.gmra.mxu1 %v13808_v35  ;;  %v6073_v40 = vmul.f32 %v5773_v59, %v4873_v27  ;;  %v11523_v59 = vld [vmem:[%s18481_s3 + $0x860] ss:$48 sps:$4 sm:$0xff]  }
 0x2c9   :  { %v4934_v56 = vmul.f32 0.70710677, %v14987_v38  ;;  %v3041_v7 = vadd.f32 %v3040_v18, %v14936_v45  ;;  %3953 = vmatpush1.bf16.msra.mxu1 %v11499_v51  ;;  %3672 = vmatprep.mubr.bf16.mxu1 %v13849_v1  ;;  %v15004_v32 = vadd.f32 %v3197_v4, %v3037_v25  ;;  %v4610_v1 = vmul.f32 0.5, %v14957_v44 }
 0x2ca   :  { %v3201_v8 = vpop.f32.mrf.mxu0  ;;  %3824 = vmatmul.mubr.bf16.vlgmr.msra.gmra.mxu0 %v13806_v30  ;;  %v3042_v31 = vpop.f32.mrf.mxu1  ;;  %3954 = vmatprep.subr.bf16.mxu1 %v11504_v3  ;;  %v15010_v61 = vpack.c.bf16 %v6073_v40, %v6061_v50  ;;  %v11534_v50 = vld [vmem:[%s18481_s3 + $0x804] ss:$48 sps:$4 sm:$0xff]  }
 0x2cb   :  { %12139 = verf.f32 %v4934_v56  ;;  %v15012_v51 = vadd.f32 %v3201_v8, %v3041_v7  ;;  %v3043_v27 = vadd.f32 %v3042_v31, %v14942_v37  ;;  %3833 = vmatprep.mubr.bf16.mxu0 %v18816_v55  ;;  %4114 = vmatpush1.bf16.msra.mxu0 %v11514_v15  ;;  %v4935_v3 = vmul.f32 0.70710677, %v15004_v32  ;;  %v11505_v15 = vld [vmem:[%s18481_s3 + $0x200] ss:$48 sps:$4 sm:$0xff]  }
 0x2cc   :  { %18934 = vst [vmem:[#allocation84_spill] sm:$0xff] %v15010_v61  ;;  %v12130_v25 = vpop.eup %12129  ;;  %12141 = verf.f32 %v4923_v63  ;;  %v3203_v4 = vpop.f32.mrf.mxu0  ;;  %4115 = vmatprep.subr.bf16.mxu0 %v11525_v62  ;;  %v11510_v61 = vld [vmem:[%s18481_s3 + $0x1a4] ss:$48 sps:$4 sm:$0xff]  }
 0x2cd   :  { %v3044_v18 = vpop.f32.mrf.mxu1  ;;  %v4946_v31 = vmul.f32 0.70710677, %v15012_v51  ;;  %v15024_v40 = vadd.f32 %v3203_v4, %v3043_v27  ;;  %3955 = vmatpush1.bf16.msra.mxu1 %v11502_v12  ;;  %v5498_v63 = vadd.f32 1.0, %v12130_v25  ;;  %12143 = verf.f32 %v4935_v3  ;;  %v11532_v12 = vld [vmem:[%s18481_s3 + $0x800] ss:$48 sps:$4 sm:$0xff]  }
 0x2ce   :  { %v12132_v56 = vpop.eup %12131  ;;  %v3045_v7 = vadd.f32 %v3044_v18, %v14936_v45  ;;  %v3205_v8 = vpop.f32.mrf.mxu0  ;;  %3956 = vmatprep.subr.bf16.mxu1 %v11507_v0  ;;  %v4598_v4 = vmul.f32 0.5, %v14948_v60 }
 0x2cf   :  { %v3046_v62 = vpop.f32.mrf.mxu1  ;;  %12145 = verf.f32 %v4946_v31  ;;  %4116 = vmatpush1.bf16.msra.mxu0 %v11523_v59  ;;  %v4947_v25 = vmul.f32 0.70710677, %v15024_v40  ;;  %v11543_v59 = vld [vmem:[%s18481_s3 + $0x7a4] ss:$48 sps:$4 sm:$0xff]   ;;  %v5499_v31 = vadd.f32 1.0, %v12132_v56  ;;  %v4599_v56 = vmul.f32 0.5, %v14953_v49 }
 0x2d0   :  { %v12134_v27 = vpop.eup %12133  ;;  %v15038_v3 = vadd.f32 %v3205_v8, %v3045_v7  ;;  %v3047_v18 = vadd.f32 %v3046_v62, %v14942_v37  ;;  %v3207_v0 = vpop.f32.mrf.mxu0  ;;  %3673 = vmatmul.mubr.bf16.gmra.mxu1 %v13856_v46  ;;  %4117 = vmatprep.subr.bf16.mxu0 %v11534_v50  ;;  %v11508_v7 = vld [vmem:[%s18481_s3 + $0x1a0] ss:$48 sps:$4 sm:$0xff]   ;;  %v5798_v8 = vmul.f32 %v5498_v63, %v4598_v4 }
 0x2d1   :  { %v3050_v30 = vpop.f32.mrf.mxu1  ;;  %v5510_v35 = vadd.f32 1.0, %v12134_v27  ;;  %3682 = vmatprep.mubr.bf16.mxu1 %v13884_v20  ;;  %3957 = vmatpush1.bf16.msra.mxu1 %v11505_v15  ;;  %12147 = verf.f32 %v4947_v25  ;;  %v11541_v4 = vld [vmem:[%s18481_s3 + $0x7a0] ss:$48 sps:$4 sm:$0xff]   ;;  %v4611_v25 = vmul.f32 0.5, %v14965_v39 }
 0x2d2   :  { %v3051_v60 = vadd.f32 %v3050_v30, %v14936_v45  ;;  %v4958_v50 = vmul.f32 0.70710677, %v15038_v3  ;;  %v15052_v62 = vadd.f32 %v3207_v0, %v3047_v18  ;;  %v3211_v46 = vpop.f32.mrf.mxu0  ;;  %3834 = vmatmul.mubr.bf16.gmra.mxu0 %v13851_v21  ;;  %3958 = vmatprep.subr.bf16.mxu1 %v11510_v61  ;;  %v11513_v30 = vld [vmem:[%s18481_s3 + $0x144] ss:$48 sps:$4 sm:$0xff]   ;;  %v12136_v15 = vpop.eup %12135  ;;  %v11511_v39 = vld [vmem:[%s18481_s3 + $0x140] ss:$48 sps:$4 sm:$0xff]  }
 0x2d3   :  { %v3052_v44 = vpop.f32.mrf.mxu1  ;;  %v5810_v27 = vmul.f32 %v5510_v35, %v4610_v1  ;;  %3843 = vmatprep.mubr.bf16.mxu0 %v18816_v55  ;;  %4118 = vmatpush1.bf16.msra.mxu0 %v11532_v12  ;;  %v5511_v18 = vadd.f32 1.0, %v12136_v15  ;;  %v11552_v1 = vld [vmem:[%s18481_s3 + $0x744] ss:$48 sps:$4 sm:$0xff]  }
 0x2d4   :  { %v15059_v20 = vadd.f32 %v3211_v46, %v3051_v60  ;;  %v3053_v63 = vadd.f32 %v3052_v44, %v14942_v37  ;;  %v12138_v61 = vpop.eup %12137  ;;  %12149 = verf.f32 %v4958_v50  ;;  %v4959_v0 = vmul.f32 0.70710677, %v15052_v62  ;;  %v3213_v49 = vpop.f32.mrf.mxu0  ;;  %4119 = vmatprep.subr.bf16.mxu0 %v11543_v59 }
 0x2d5   :  { %v3054_v35 = vpop.f32.mrf.mxu1  ;;  %v5799_v46 = vmul.f32 %v5499_v31, %v4599_v56  ;;  %v15071_v12 = vpack.c.bf16 %v5810_v27, %v5798_v8  ;;  %3959 = vmatpush1.bf16.msra.mxu1 %v11508_v7  ;;  %v5811_v50 = vmul.f32 %v5511_v18, %v4611_v25  ;;  %v11519_v31 = vld [vmem:[%s18481_s3 + $0xe4] ss:$48 sps:$4 sm:$0xff]   ;;  %v4622_v8 = vmul.f32 0.5, %v14968_v17  ;;  %v11550_v27 = vld [vmem:[%s18481_s3 + $0x740] ss:$48 sps:$4 sm:$0xff]  }
 0x2d6   :  { %v4970_v60 = vmul.f32 0.70710677, %v15059_v20  ;;  %12151 = verf.f32 %v4959_v0  ;;  %v15077_v44 = vadd.f32 %v3213_v49, %v3053_v63  ;;  %v3055_v59 = vadd.f32 %v3054_v35, %v14936_v45  ;;  %v3215_v15 = vpop.f32.mrf.mxu0  ;;  %3960 = vmatprep.subr.bf16.mxu1 %v11513_v30 }
 0x2d7   :  { %18935 = vst [vmem:[#allocation85_spill] sm:$0xff] %v15071_v12  ;;  %v3056_v21 = vpop.f32.mrf.mxu1  ;;  %v5522_v7 = vadd.f32 1.0, %v12138_v61  ;;  %4120 = vmatpush1.bf16.msra.mxu0 %v11541_v4  ;;  %v15095_v17 = vpack.c.bf16 %v5811_v50, %v5799_v46  ;;  %v4634_v61 = vmul.f32 0.5, %v14987_v38 }
 0x2d8   :  { %v3057_v56 = vadd.f32 %v3056_v21, %v14942_v37  ;;  %v12140_v63 = vpop.eup %12139  ;;  %12153 = verf.f32 %v4970_v60  ;;  %v4971_v25 = vmul.f32 0.70710677, %v15077_v44  ;;  %v15089_v18 = vadd.f32 %v3215_v15, %v3055_v59  ;;  %v3217_v30 = vpop.f32.mrf.mxu0  ;;  %3683 = vmatmul.mubr.bf16.gmra.mxu1 %v13922_v22  ;;  %4121 = vmatprep.subr.bf16.mxu0 %v11552_v1  ;;  %v11561_v21 = vld [vmem:[%s18481_s3 + $0x6e4] ss:$48 sps:$4 sm:$0xff]   ;;  %v11517_v1 = vld [vmem:[%s18481_s3 + $0xe0] ss:$48 sps:$4 sm:$0xff]  }
 0x2d9   :  { %v3060_v0 = vpop.f32.mrf.mxu1  ;;  %18936 = vst [vmem:[#allocation86_spill] sm:$0xff] %v15095_v17  ;;  %v12142_v4 = vpop.eup %12141  ;;  %v5534_v49 = vadd.f32 1.0, %v12140_v63  ;;  %3692 = vmatprep.mubr.bf16.mxu1 %v13944_v29  ;;  %3961 = vmatpush1.bf16.msra.mxu1 %v11511_v39  ;;  %v4635_v59 = vmul.f32 0.5, %v15004_v32  ;;  %v11522_v15 = vld [vmem:[%s18481_s3 + $0x84] ss:$48 sps:$4 sm:$0xff]   ;;  %v5822_v39 = vmul.f32 %v5522_v7, %v4622_v8 }
 0x2da   :  { %v15098_v35 = vadd.f32 %v3217_v30, %v3057_v56  ;;  %v3061_v60 = vadd.f32 %v3060_v0, %v14936_v45  ;;  %12155 = verf.f32 %v4971_v25  ;;  %v4982_v46 = vmul.f32 0.70710677, %v15089_v18  ;;  %v3221_v50 = vpop.f32.mrf.mxu0  ;;  %3844 = vmatmul.mubr.bf16.gmra.mxu0 %v13908_v54  ;;  %3962 = vmatprep.subr.bf16.mxu1 %v11519_v31  ;;  %v12144_v56 = vpop.eup %12143  ;;  %v11559_v32 = vld [vmem:[%s18481_s3 + $0x6e0] ss:$48 sps:$4 sm:$0xff]   ;;  %v11567_v7 = vld [vmem:[%s18481_s3 + $0x684] ss:$48 sps:$4 sm:$0xff]  }
 0x2db   :  { %v3062_v38 = vpop.f32.mrf.mxu1  ;;  %v5834_v63 = vmul.f32 %v5534_v49, %v4634_v61  ;;  %3853 = vmatprep.mubr.bf16.mxu0 %v18816_v55  ;;  %4122 = vmatpush1.bf16.msra.mxu0 %v11550_v27  ;;  %v5523_v31 = vadd.f32 1.0, %v12142_v4  ;;  %v5535_v12 = vadd.f32 1.0, %v12144_v56  ;;  %v4623_v61 = vmul.f32 0.5, %v14975_v5  ;;  %v11520_v4 = vld [vmem:[%s18481_s3 + $0x80] ss:$48 sps:$4 sm:$0xff]  }
 0x2dc   :  { %v4983_v30 = vmul.f32 0.70710677, %v15098_v35  ;;  %v15112_v0 = vadd.f32 %v3221_v50, %v3061_v60  ;;  %v12146_v25 = vpop.eup %12145  ;;  %12157 = verf.f32 %v4982_v46  ;;  %v3063_v17 = vadd.f32 %v3062_v38, %v14942_v37  ;;  %v3223_v54 = vpop.f32.mrf.mxu0  ;;  %4123 = vmatprep.subr.bf16.mxu0 %v11561_v21  ;;  %v11528_v5 = vld [vmem:[%s18481_s3 + $0x24] ss:$48 sps:$4 sm:$0xff]  }
 0x2dd   :  { %v3064_v8 = vpop.f32.mrf.mxu1  ;;  %v15123_v27 = vpack.c.bf16 %v5834_v63, %v5822_v39  ;;  %3963 = vmatpush1.bf16.msra.mxu1 %v11517_v1  ;;  %v5835_v49 = vmul.f32 %v5535_v12, %v4635_v59  ;;  %v18938_v1 = vld [vmem:[#allocation24_spill] sm:$0xff]  ;;  %v4646_v63 = vmul.f32 0.5, %v15012_v51  ;;  %v5546_v12 = vadd.f32 1.0, %v12146_v25  ;;  %v11570_v51 = vld [vmem:[%s18481_s3 + $0x624] ss:$48 sps:$4 sm:$0xff]  }
 0x2de   :  { %12159 = verf.f32 %v4983_v30  ;;  %v4994_v60 = vmul.f32 0.70710677, %v15112_v0  ;;  %v15129_v46 = vadd.f32 %v3223_v54, %v3063_v17  ;;  %v3065_v21 = vadd.f32 %v3064_v8, %v14936_v45  ;;  %v3225_v50 = vpop.f32.mrf.mxu0  ;;  %3964 = vmatprep.subr.bf16.mxu1 %v11522_v15  ;;  %v12148_v56 = vpop.eup %12147  ;;  %v11565_v54 = vld [vmem:[%s18481_s3 + $0x680] ss:$48 sps:$4 sm:$0xff]  }
 0x2df   :  { %18937 = vst [vmem:[#allocation87_spill] sm:$0xff] %v15123_v27  ;;  %v3066_v38 = vpop.f32.mrf.mxu1  ;;  %v2705_v39 = vadd.f32 %v18938_v1, %v14409_v23  ;;  %4124 = vmatpush1.bf16.msra.mxu0 %v11559_v32  ;;  %v5823_v17 = vmul.f32 %v5523_v31, %v4623_v61  ;;  %v4647_v15 = vmul.f32 0.5, %v15024_v40  ;;  %v4658_v30 = vmul.f32 0.5, %v15038_v3  ;;  %v11526_v3 = vld [vmem:[%s18481_s3 + $0x20] ss:$48 sps:$4 sm:$0xff]  }
 0x2e0   :  { %v3067_v59 = vadd.f32 %v3066_v38, %v14942_v37  ;;  %v4995_v8 = vmul.f32 0.70710677, %v15129_v46  ;;  %v3227_v27 = vpop.f32.mrf.mxu0  ;;  %3693 = vmatmul.mubr.bf16.gmra.mxu1 %v13967_v34  ;;  %4125 = vmatprep.subr.bf16.mxu0 %v11567_v7  ;;  %12161 = verf.f32 %v4994_v60  ;;  %v15149_v25 = vadd.f32 %v3225_v50, %v3065_v21 }
 0x2e1   :  { %v3070_v29 = vpop.f32.mrf.mxu1  ;;  %v12150_v32 = vpop.eup %12149  ;;  %3702 = vmatprep.mubr.bf16.mxu1 %v13991_v14  ;;  %3965 = vmatpush1.bf16.msra.mxu1 %v11520_v4  ;;  %v5547_v7 = vadd.f32 1.0, %v12148_v56  ;;  %v4659_v38 = vmul.f32 0.5, %v15052_v62  ;;  %v5846_v21 = vmul.f32 %v5546_v12, %v4646_v63  ;;  %v11568_v62 = vld [vmem:[%s18481_s3 + $0x620] ss:$48 sps:$4 sm:$0xff]   ;;  %v11588_v12 = vld [vmem:[%s18481_s3 + $0x8cc] ss:$48 sps:$4 sm:$0xff]  }
 0x2e2   :  { %v15151_v31 = vadd.f32 %v3227_v27, %v3067_v59  ;;  %v3071_v40 = vadd.f32 %v3070_v29, %v14936_v45  ;;  %v5558_v61 = vadd.f32 1.0, %v12150_v32  ;;  %v3231_v1 = vpop.f32.mrf.mxu0  ;;  %3854 = vmatmul.mubr.bf16.gmra.mxu0 %v13955_v47  ;;  %3966 = vmatprep.subr.bf16.mxu1 %v11528_v5  ;;  %v11531_v29 = vld [vmem:[%s18481_s3 + $0x5c4] ss:$48 sps:$4 sm:$0xff]   ;;  %v15163_v27 = vpack.c.bf16 %v5835_v49, %v5823_v17 }
 0x2e3   :  { %v3072_v60 = vpop.f32.mrf.mxu1  ;;  %v12152_v4 = vpop.eup %12151  ;;  %12163 = verf.f32 %v4995_v8  ;;  %v5006_v50 = vmul.f32 0.70710677, %v15149_v25  ;;  %3863 = vmatprep.mubr.bf16.mxu0 %v18816_v55  ;;  %4126 = vmatpush1.bf16.msra.mxu0 %v11565_v54  ;;  %v18941_v47 = vld [vmem:[#allocation23_spill] sm:$0xff] }
 0x2e4   :  { %18939 = vst [vmem:[#allocation24_spill] sm:$0xff] %v15163_v27  ;;  %v5007_v56 = vmul.f32 0.70710677, %v15151_v31  ;;  %v5858_v5 = vmul.f32 %v5558_v61, %v4658_v30  ;;  %v5559_v59 = vadd.f32 1.0, %v12152_v4  ;;  %v15171_v32 = vadd.f32 %v3231_v1, %v3071_v40  ;;  %v3233_v17 = vpop.f32.mrf.mxu0  ;;  %4127 = vmatprep.subr.bf16.mxu0 %v11570_v51  ;;  %v18940_v27 = vld [vmem:[#allocation22_spill] sm:$0xff] }
 0x2e5   :  { %v3073_v49 = vadd.f32 %v3072_v60, %v14942_v37  ;;  %v3074_v63 = vpop.f32.mrf.mxu1  ;;  %v12154_v8 = vpop.eup %12153  ;;  %v15178_v54 = vmul.f32 0.70710677, %v18940_v27  ;;  %v15181_v14 = vadd.f32 %v18941_v47, %v2705_v39  ;;  %12165 = verf.f32 %v5006_v50  ;;  %3967 = vmatpush1.bf16.msra.mxu1 %v11526_v3  ;;  %v11529_v40 = vld [vmem:[%s18481_s3 + $0x5c0] ss:$48 sps:$4 sm:$0xff]   ;;  %v11537_v47 = vld [vmem:[%s18481_s3 + $0x564] ss:$48 sps:$4 sm:$0xff]  }
 0x2e6   :  { %v3075_v30 = vadd.f32 %v3074_v63, %v14936_v45  ;;  %v5847_v51 = vmul.f32 %v5547_v7, %v4647_v15  ;;  %v15187_v61 = vpack.c.bf16 %v5858_v5, %v5846_v21  ;;  %v5859_v1 = vmul.f32 %v5559_v59, %v4659_v38  ;;  %v3235_v60 = vpop.f32.mrf.mxu0  ;;  %3968 = vmatprep.subr.bf16.mxu1 %v11531_v29 }
 0x2e7   :  { %12167 = verf.f32 %v5007_v56  ;;  %v3076_v4 = vpop.f32.mrf.mxu1  ;;  %v12156_v39 = vpop.eup %12155  ;;  %v4670_v50 = vmul.f32 0.5, %v15059_v20  ;;  %v5018_v3 = vmul.f32 0.70710677, %v15171_v32  ;;  %v15194_v63 = vadd.f32 %v3233_v17, %v3073_v49  ;;  %4128 = vmatpush1.bf16.msra.mxu0 %v11568_v62 }
 0x2e8   :  { %18942 = vst [vmem:[#allocation22_spill] sm:$0xff] %v15187_v61  ;;  %v15196_v34 = vadd.f32 %v3235_v60, %v3075_v30  ;;  %v5570_v15 = vadd.f32 1.0, %v12154_v8  ;;  %v4671_v7 = vmul.f32 0.5, %v15077_v44  ;;  %v3077_v38 = vadd.f32 %v3076_v4, %v14942_v37  ;;  %v3237_v29 = vpop.f32.mrf.mxu0  ;;  %3703 = vmatmul.mubr.bf16.gmra.mxu1 %v14019_v24  ;;  %4435 = vmatprep.subr.bf16.mxu0 %v11588_v12  ;;  %v11535_v44 = vld [vmem:[%s18481_s3 + $0x560] ss:$48 sps:$4 sm:$0xff]  }
 0x2e9   :  { %v3080_v21 = vpop.f32.mrf.mxu1  ;;  %v15201_v56 = vpack.c.bf16 %v5859_v1, %v5847_v51  ;;  %v12158_v20 = vpop.eup %12157  ;;  %v4682_v5 = vmul.f32 0.5, %v15089_v18  ;;  %v4683_v59 = vmul.f32 0.5, %v15098_v35  ;;  %12169 = verf.f32 %v5018_v3  ;;  %3712 = vmatprep.mubr.bf16.mxu1 %v14026_v43  ;;  %3969 = vmatpush2.bf16.msra.mxu1 %v11529_v40  ;;  %v11540_v40 = vld [vmem:[%s18481_s3 + $0x504] ss:$48 sps:$4 sm:$0xff]  }
 0x2ea   :  { %v5019_v62 = vmul.f32 0.70710677, %v15194_v63  ;;  %v5571_v17 = vadd.f32 1.0, %v12156_v39  ;;  %v5582_v12 = vadd.f32 1.0, %v12158_v20  ;;  %v5030_v8 = vmul.f32 0.70710677, %v15196_v34  ;;  %v3241_v18 = vpop.f32.mrf.mxu0  ;;  %3864 = vmatmul.mubr.bf16.gmra.mxu0 %v14008_v28  ;;  %3970 = vmatprep.subr.bf16.mxu1 %v11537_v47 }
 0x2eb   :  { %18943 = vst [vmem:[#allocation23_spill] sm:$0xff] %v15201_v56  ;;  %v12160_v49 = vpop.eup %12159  ;;  %v15211_v30 = vadd.f32 %v3237_v29, %v3077_v38  ;;  %v3082_v35 = vpop.f32.mrf.mxu1  ;;  %v3081_v1 = vadd.f32 %v3080_v21, %v14936_v45  ;;  %3873 = vmatprep.mubr.bf16.mxu0 %v18816_v55  ;;  %v5870_v4 = vmul.f32 %v5570_v15, %v4670_v50  ;;  %v11538_v21 = vld [vmem:[%s18481_s3 + $0x500] ss:$48 sps:$4 sm:$0xff]  }
 0x2ec   :  { %v5583_v51 = vadd.f32 1.0, %v12160_v49  ;;  %12171 = verf.f32 %v5019_v62  ;;  %v3083_v60 = vadd.f32 %v3082_v35, %v14942_v37  ;;  %v5882_v39 = vmul.f32 %v5582_v12, %v4682_v5  ;;  %v3243_v38 = vpop.f32.mrf.mxu0 }
 0x2ed   :  { %12173 = verf.f32 %v5030_v8  ;;  %v5031_v3 = vmul.f32 0.70710677, %v15211_v30  ;;  %v3084_v29 = vpop.f32.mrf.mxu1  ;;  %v15221_v20 = vadd.f32 %v3241_v18, %v3081_v1  ;;  %3971 = vmatpush2.bf16.msra.mxu1 %v11535_v44  ;;  %v12162_v49 = vpop.eup %12161  ;;  %v5871_v12 = vmul.f32 %v5571_v17, %v4671_v7  ;;  %v11544_v17 = vld [vmem:[%s18481_s3 + $0x4a0] ss:$48 sps:$4 sm:$0xff]  }
 0x2ee   :  { %v5883_v47 = vmul.f32 %v5583_v51, %v4683_v59  ;;  %v15223_v61 = vadd.f32 %v3243_v38, %v3083_v60  ;;  %v3085_v62 = vadd.f32 %v3084_v29, %v14936_v45  ;;  %v15229_v50 = vpack.c.bf16 %v5882_v39, %v5870_v4  ;;  %v3245_v15 = vpop.f32.mrf.mxu0  ;;  %3972 = vmatprep.subr.bf16.mxu1 %v11540_v40  ;;  %v11546_v59 = vld [vmem:[%s18481_s3 + $0x4a4] ss:$48 sps:$4 sm:$0xff]  }
 0x2ef   :  { %12175 = verf.f32 %v5031_v3  ;;  %v3086_v5 = vpop.f32.mrf.mxu1  ;;  %v5042_v44 = vmul.f32 0.70710677, %v15221_v20  ;;  %v15238_v35 = vmul.f32 0.70710677, %v15181_v14  ;;  %v4694_v51 = vmul.f32 0.5, %v15112_v0 }
 0x2f0   :  { %18944 = vst [vmem:[#allocation88_spill] sm:$0xff] %v15229_v50  ;;  %12177 = verf.f32 %v15178_v54  ;;  %v5043_v8 = vmul.f32 0.70710677, %v15223_v61  ;;  %v12164_v18 = vpop.eup %12163  ;;  %v15241_v1 = vadd.f32 %v3245_v15, %v3085_v62  ;;  %v3087_v40 = vadd.f32 %v3086_v5, %v14942_v37  ;;  %v3247_v60 = vpop.f32.mrf.mxu0  ;;  %3713 = vmatmul.mubr.bf16.gmra.mxu1 %v14065_v48 }
 0x2f1   :  { %v3090_v4 = vpop.f32.mrf.mxu1  ;;  %v5594_v54 = vadd.f32 1.0, %v12162_v49  ;;  %12179 = verf.f32 %v5042_v44  ;;  %3722 = vmatprep.mubr.bf16.mxu1 %v14072_v58  ;;  %3973 = vmatpush2.bf16.msra.mxu1 %v11538_v21  ;;  %v15250_v0 = vpack.c.bf16 %v5883_v47, %v5871_v12  ;;  %v15253_v3 = vmul.f32 0.5, %v15129_v46  ;;  %v11549_v21 = vld [vmem:[%s18481_s3 + $0x444] ss:$48 sps:$4 sm:$0xff]  }
 0x2f2   :  { %v3091_v7 = vadd.f32 %v3090_v4, %v14936_v45  ;;  %v12166_v39 = vpop.eup %12165  ;;  %v4706_v38 = vmul.f32 0.5, %v15149_v25  ;;  %12181 = verf.f32 %v5043_v8  ;;  %v5054_v29 = vmul.f32 0.70710677, %v15241_v1  ;;  %v3251_v62 = vpop.f32.mrf.mxu0  ;;  %3874 = vmatmul.mubr.bf16.gmra.mxu0 %v14060_v11  ;;  %3974 = vmatprep.subr.bf16.mxu1 %v11546_v59 }
 0x2f3   :  { %18945 = vst [vmem:[#allocation89_spill] sm:$0xff] %v15250_v0  ;;  %v3092_v49 = vpop.f32.mrf.mxu1  ;;  %v5606_v15 = vadd.f32 1.0, %v12166_v39  ;;  %v15261_v5 = vadd.f32 %v3247_v60, %v3087_v40  ;;  %3883 = vmatprep.mubr.bf16.mxu0 %v18816_v55  ;;  %v4707_v12 = vmul.f32 0.5, %v15151_v31  ;;  %v4718_v44 = vmul.f32 0.5, %v15171_v32  ;;  %v11547_v60 = vld [vmem:[%s18481_s3 + $0x440] ss:$48 sps:$4 sm:$0xff]  }
 0x2f4   :  { %v12168_v47 = vpop.eup %12167  ;;  %v15263_v46 = vadd.f32 %v3251_v62, %v3091_v7  ;;  %v3093_v25 = vadd.f32 %v3092_v49, %v14942_v37  ;;  %v4719_v59 = vmul.f32 0.5, %v15194_v63  ;;  %12183 = verf.f32 %v5054_v29  ;;  %v3253_v8 = vpop.f32.mrf.mxu0 }
 0x2f5   :  { %v3094_v4 = vpop.f32.mrf.mxu1  ;;  %v5894_v50 = vmul.f32 %v5594_v54, %v4694_v51  ;;  %v5595_v0 = vadd.f32 1.0, %v12164_v18  ;;  %v5906_v39 = vmul.f32 %v5606_v15, %v4706_v38  ;;  %v5055_v40 = vmul.f32 0.70710677, %v15261_v5  ;;  %3975 = vmatpush2.bf16.msra.mxu1 %v11544_v17  ;;  %v11555_v18 = vld [vmem:[%s18481_s3 + $0x3e4] ss:$48 sps:$4 sm:$0xff]  }
 0x2f6   :  { %v12170_v7 = vpop.eup %12169  ;;  %v5607_v62 = vadd.f32 1.0, %v12168_v47  ;;  %v5066_v31 = vmul.f32 0.70710677, %v15263_v46  ;;  %v15275_v32 = vadd.f32 %v3253_v8, %v3093_v25  ;;  %v3095_v63 = vadd.f32 %v3094_v4, %v14936_v45  ;;  %v3255_v29 = vpop.f32.mrf.mxu0  ;;  %3976 = vmatprep.subr.bf16.mxu1 %v11549_v21 }
 0x2f7   :  { %v3096_v49 = vpop.f32.mrf.mxu1  ;;  %v15281_v51 = vpack.c.bf16 %v5906_v39, %v5894_v50  ;;  %v5618_v54 = vadd.f32 1.0, %v12170_v7  ;;  %12185 = verf.f32 %v5055_v40  ;;  %v4730_v47 = vmul.f32 0.5, %v15196_v34  ;;  %v11553_v34 = vld [vmem:[%s18481_s3 + $0x3e0] ss:$48 sps:$4 sm:$0xff]  }
 0x2f8   :  { %v3097_v17 = vadd.f32 %v3096_v49, %v14942_v37  ;;  %12187 = verf.f32 %v5066_v31  ;;  %v5067_v15 = vmul.f32 0.70710677, %v15275_v32  ;;  %v15286_v25 = vadd.f32 %v3255_v29, %v3095_v63  ;;  %v3257_v8 = vpop.f32.mrf.mxu0  ;;  %3723 = vmatmul.mubr.bf16.gmra.mxu1 %v14112_v52  ;;  %v11558_v49 = vld [vmem:[%s18481_s3 + $0x384] ss:$48 sps:$4 sm:$0xff]  }
 0x2f9   :  { %18946 = vst [vmem:[#allocation90_spill] sm:$0xff] %v15281_v51  ;;  %v12172_v38 = vpop.eup %12171  ;;  %v3100_v21 = vpop.f32.mrf.mxu1  ;;  %v4731_v50 = vmul.f32 0.5, %v15211_v30  ;;  %3732 = vmatprep.mubr.bf16.mxu1 %v14119_v36  ;;  %3977 = vmatpush2.bf16.msra.mxu1 %v11547_v60  ;;  %v5907_v7 = vmul.f32 %v5607_v62, %v4707_v12  ;;  %v5895_v60 = vmul.f32 %v5595_v0, %v15253_v3 }
 0x2fa   :  { %v12174_v4 = vpop.eup %12173  ;;  %v5619_v56 = vadd.f32 1.0, %v12172_v38  ;;  %v15290_v39 = vadd.f32 %v3257_v8, %v3097_v17  ;;  %v3101_v40 = vadd.f32 %v3100_v21, %v14936_v45  ;;  %12189 = verf.f32 %v5067_v15  ;;  %v3261_v29 = vpop.f32.mrf.mxu0  ;;  %3884 = vmatmul.mubr.bf16.gmra.mxu0 %v18923_v16  ;;  %3978 = vmatprep.subr.bf16.mxu1 %v11555_v18 }
 0x2fb   :  { %v5630_v31 = vadd.f32 1.0, %v12174_v4  ;;  %v5078_v63 = vmul.f32 0.70710677, %v15286_v25  ;;  %v3102_v30 = vpop.f32.mrf.mxu1  ;;  %v5918_v38 = vmul.f32 %v5618_v54, %v4718_v44  ;;  %3893 = vmatprep.mubr.bf16.mxu0 %v18816_v55  ;;  %v11556_v44 = vld [vmem:[%s18481_s3 + $0x380] ss:$48 sps:$4 sm:$0xff]  }
 0x2fc   :  { %v12176_v17 = vpop.eup %12175  ;;  %v5079_v8 = vmul.f32 0.70710677, %v15290_v39  ;;  %v15304_v12 = vadd.f32 %v3261_v29, %v3101_v40  ;;  %v3103_v18 = vadd.f32 %v3102_v30, %v14942_v37  ;;  %v3263_v4 = vpop.f32.mrf.mxu0  ;;  %v5919_v16 = vmul.f32 %v5619_v56, %v4719_v59  ;;  %v11564_v56 = vld [vmem:[%s18481_s3 + $0x324] ss:$48 sps:$4 sm:$0xff]  }
 0x2fd   :  { %v15307_v62 = vpop.eup %12177  ;;  %v5930_v15 = vmul.f32 %v5630_v31, %v4730_v47  ;;  %v5631_v21 = vadd.f32 1.0, %v12176_v17  ;;  %12191 = verf.f32 %v5078_v63  ;;  %v3104_v51 = vpop.f32.mrf.mxu1  ;;  %3979 = vmatpush2.bf16.msra.mxu1 %v11553_v34  ;;  %v15322_v59 = vpack.c.bf16 %v5907_v7, %v5895_v60 }
 0x2fe   :  { %12193 = verf.f32 %v5079_v8  ;;  %v5090_v0 = vmul.f32 0.70710677, %v15304_v12  ;;  %v3105_v3 = vadd.f32 %v3104_v51, %v14936_v45  ;;  %v12180_v54 = vpop.eup %12179  ;;  %v15317_v31 = vadd.f32 %v3263_v4, %v3103_v18  ;;  %v3265_v63 = vpop.f32.mrf.mxu0  ;;  %3980 = vmatprep.subr.bf16.mxu1 %v11558_v49 }
 0x2ff   :  { %v15315_v40 = vpack.c.bf16 %v5930_v15, %v5918_v38  ;;  %v5931_v47 = vmul.f32 %v5631_v21, %v4731_v50  ;;  %v3106_v29 = vpop.f32.mrf.mxu1  ;;  %18948 = vst [vmem:[#allocation92_spill] sm:$0xff] %v15322_v59  ;;  %v12182_v51 = vpop.eup %12181  ;;  %v5642_v50 = vadd.f32 1.0, %v12180_v54  ;;  %v4742_v7 = vmul.f32 0.5, %v15221_v20 }
 0x300   :  { %12195 = verf.f32 %v5090_v0  ;;  %v15324_v34 = vadd.f32 %v3265_v63, %v3105_v3  ;;  %v3107_v30 = vadd.f32 %v3106_v29, %v14942_v37  ;;  %v5091_v17 = vmul.f32 0.70710677, %v15317_v31  ;;  %v3267_v38 = vpop.f32.mrf.mxu0  ;;  %3733 = vmatmul.mubr.bf16.gmra.mxu1 %v14163_v10  ;;  %v11573_v3 = vld [vmem:[%s18481_s3 + $0x2cc] ss:$48 sps:$4 sm:$0xff]  }
 0x301   :  { %18947 = vst [vmem:[#allocation91_spill] sm:$0xff] %v15315_v40  ;;  %12197 = verf.f32 %v15238_v35  ;;  %v3110_v8 = vpop.f32.mrf.mxu1  ;;  %v15330_v49 = vpack.c.bf16 %v5931_v47, %v5919_v16  ;;  %v12184_v15 = vpop.eup %12183  ;;  %v4743_v60 = vmul.f32 0.5, %v15223_v61  ;;  %3742 = vmatprep.mubr.bf16.mxu1 %v14167_v41  ;;  %3981 = vmatpush2.bf16.msra.mxu1 %v11556_v44  ;;  %v11562_v35 = vld [vmem:[%s18481_s3 + $0x320] ss:$48 sps:$4 sm:$0xff]   ;;  %v4754_v4 = vmul.f32 0.5, %v15241_v1 }
 0x302   :  { %v5102_v21 = vmul.f32 0.70710677, %v15324_v34  ;;  %v15335_v18 = vadd.f32 %v3267_v38, %v3107_v30  ;;  %v5654_v16 = vadd.f32 1.0, %v12184_v15  ;;  %12199 = verf.f32 %v5091_v17  ;;  %v3271_v20 = vpop.f32.mrf.mxu0  ;;  %3894 = vmatmul.mubr.bf16.gmra.mxu0 %v18924_v53  ;;  %3982 = vmatprep.subr.bf16.mxu1 %v11564_v56 }
 0x303   :  { %18949 = vst [vmem:[#allocation93_spill] sm:$0xff] %v15330_v49  ;;  %v3111_v0 = vadd.f32 %v3110_v8, %v14936_v45  ;;  %v3112_v61 = vpop.f32.mrf.mxu1  ;;  %v4755_v44 = vmul.f32 0.5, %v15261_v5  ;;  %3903 = vmatprep.mubr.bf16.mxu0 %v18816_v55  ;;  %v5942_v63 = vmul.f32 %v5642_v50, %v4742_v7  ;;  %v5643_v29 = vadd.f32 1.0, %v12182_v51 }
 0x304   :  { %12201 = verf.f32 %v5102_v21  ;;  %v5103_v54 = vmul.f32 0.70710677, %v15335_v18  ;;  %v3113_v1 = vadd.f32 %v3112_v61, %v14942_v37  ;;  %v12186_v47 = vpop.eup %12185  ;;  %v5954_v30 = vmul.f32 %v5654_v16, %v4754_v4  ;;  %v3273_v56 = vpop.f32.mrf.mxu0 }
 0x305   :  { %v15351_v17 = vadd.f32 %v3271_v20, %v3111_v0  ;;  %v3114_v38 = vpop.f32.mrf.mxu1  ;;  %v12188_v8 = vpop.eup %12187  ;;  %v5655_v15 = vadd.f32 1.0, %v12186_v47  ;;  %3983 = vmatpush2.bf16.msra.mxu1 %v11562_v35  ;;  %v4766_v61 = vmul.f32 0.5, %v15263_v46  ;;  %v4767_v50 = vmul.f32 0.5, %v15275_v32 }
 0x306   :  { %12203 = verf.f32 %v5103_v54  ;;  %v15353_v40 = vadd.f32 %v3273_v56, %v3113_v1  ;;  %v3115_v5 = vadd.f32 %v3114_v38, %v14936_v45  ;;  %v15356_v21 = vpack.c.bf16 %v5954_v30, %v5942_v63  ;;  %v3275_v7 = vpop.f32.mrf.mxu0  ;;  %4274 = vmatprep.subr.bf16.mxu1 %v11573_v3 }
 0x307   :  { %v5114_v51 = vmul.f32 0.70710677, %v15351_v17  ;;  %v3116_v4 = vpop.f32.mrf.mxu1  ;;  %v12190_v16 = vpop.eup %12189  ;;  %v5955_v0 = vmul.f32 %v5655_v15, %v4755_v44  ;;  %v4778_v20 = vmul.f32 0.5, %v15286_v25  ;;  %v5943_v35 = vmul.f32 %v5643_v29, %v4743_v60 }
 0x308   :  { %18950 = vst [vmem:[#allocation94_spill] sm:$0xff] %v15356_v21  ;;  %v5115_v54 = vmul.f32 0.70710677, %v15353_v40  ;;  %v15363_v1 = vadd.f32 %v3275_v7, %v3115_v5  ;;  %v5666_v47 = vadd.f32 1.0, %v12188_v8  ;;  %v3117_v46 = vadd.f32 %v3116_v4, %v14942_v37  ;;  %v3277_v63 = vpop.f32.mrf.mxu0  ;;  %3743 = vmatmul.mubr.bf16.gmra.mxu1 %v14203_v33 }
 0x309   :  { %12205 = verf.f32 %v5114_v51  ;;  %v3120_v32 = vpop.f32.mrf.mxu1  ;;  %v5667_v56 = vadd.f32 1.0, %v12190_v16  ;;  %v4779_v3 = vmul.f32 0.5, %v15290_v39  ;;  %3752 = vmatprep.mubr.bf16.mxu1 %v18925_v13  ;;  %v15374_v5 = vpack.c.bf16 %v5955_v0, %v5943_v35  ;;  %v18952_v16 = vld [vmem:[#allocation21_spill] sm:$0xff]  ;;  %v18953_v35 = vld [vmem:[#allocation27_spill] sm:$0xff] }
 0x30a   :  { %v12192_v30 = vpop.eup %12191  ;;  %v5126_v44 = vmul.f32 0.70710677, %v15363_v1  ;;  %v3121_v25 = vadd.f32 %v3120_v32, %v14936_v45  ;;  %12207 = verf.f32 %v5115_v54  ;;  %v15371_v29 = vadd.f32 %v3277_v63, %v3117_v46  ;;  %v3281_v8 = vpop.f32.mrf.mxu0  ;;  %3904 = vmatmul.mubr.bf16.gmra.mxu0 %v18926_v19 }
 0x30b   :  { %v12194_v38 = vpop.eup %12193  ;;  %v5678_v60 = vadd.f32 1.0, %v12192_v30  ;;  %v3122_v15 = vpop.f32.mrf.mxu1  ;;  %18951 = vst [vmem:[#allocation95_spill] sm:$0xff] %v15374_v5  ;;  %3913 = vmatprep.mubr.bf16.mxu0 %v18816_v55  ;;  %v15381_v32 = vmul.f32 0.70710677, %v18952_v16  ;;  %v5966_v54 = vmul.f32 %v5666_v47, %v4766_v61  ;;  %v4790_v49 = vmul.f32 0.5, %v15304_v12 }
 0x30c   :  { %v5679_v51 = vadd.f32 1.0, %v12194_v38  ;;  %12209 = verf.f32 %v5126_v44  ;;  %v15376_v39 = vadd.f32 %v3281_v8, %v3121_v25  ;;  %v3123_v7 = vadd.f32 %v3122_v15, %v14942_v37  ;;  %v3283_v30 = vpop.f32.mrf.mxu0 }
 0x30d   :  { %v12196_v4 = vpop.eup %12195  ;;  %v5978_v46 = vmul.f32 %v5678_v60, %v4778_v20  ;;  %v5127_v63 = vmul.f32 0.70710677, %v15371_v29  ;;  %v3124_v21 = vpop.f32.mrf.mxu1  ;;  %v2715_v44 = vadd.f32 %v18953_v35, %v14409_v23  ;;  %v5967_v25 = vmul.f32 %v5667_v56, %v4767_v50 }
 0x30e   :  { %v15384_v0 = vpop.eup %12197  ;;  %v5979_v38 = vmul.f32 %v5679_v51, %v4779_v3  ;;  %v5138_v8 = vmul.f32 0.70710677, %v15376_v39  ;;  %v15391_v5 = vadd.f32 %v3283_v30, %v3123_v7  ;;  %v3125_v61 = vadd.f32 %v3124_v21, %v14936_v45  ;;  %v3285_v20 = vpop.f32.mrf.mxu0 }
 0x30f   :  { %v15389_v15 = vpack.c.bf16 %v5978_v46, %v5966_v54  ;;  %12211 = verf.f32 %v5127_v63  ;;  %v3126_v47 = vpop.f32.mrf.mxu1  ;;  %v12200_v60 = vpop.eup %12199  ;;  %v5690_v59 = vadd.f32 1.0, %v12196_v4  ;;  %v4802_v21 = vmul.f32 0.5, %v15324_v34 }
 0x310   :  { %v3127_v19 = vadd.f32 %v3126_v47, %v14942_v37  ;;  %v15396_v35 = vpack.c.bf16 %v5979_v38, %v5967_v25  ;;  %v5691_v56 = vadd.f32 1.0, %v12200_v60  ;;  %12213 = verf.f32 %v5138_v8  ;;  %v3287_v7 = vpop.f32.mrf.mxu0  ;;  %3753 = vmatmul.mubr.bf16.gmra.mxu1 %v14241_v6 }
 0x311   :  { %18954 = vst [vmem:[#allocation21_spill] sm:$0xff] %v15389_v15  ;;  %v12202_v50 = vpop.eup %12201  ;;  %v5139_v3 = vmul.f32 0.70710677, %v15391_v5  ;;  %v15399_v51 = vadd.f32 %v3285_v20, %v3125_v61  ;;  %v3130_v54 = vpop.f32.mrf.mxu1  ;;  %3762 = vmatprep.mubr.bf16.mxu1 %v14245_v57  ;;  %v4791_v30 = vmul.f32 0.5, %v15317_v31  ;;  %v4803_v25 = vmul.f32 0.5, %v15335_v18 }
 0x312   :  { %18955 = vst [vmem:[#allocation27_spill] sm:$0xff] %v15396_v35  ;;  %v5702_v46 = vadd.f32 1.0, %v12202_v50  ;;  %v15403_v12 = vadd.f32 %v3287_v7, %v3127_v19  ;;  %v3131_v4 = vadd.f32 %v3130_v54, %v14936_v45  ;;  %v3291_v8 = vpop.f32.mrf.mxu0  ;;  %3914 = vmatmul.mubr.bf16.gmra.mxu0 %v14233_v9  ;;  %v5990_v34 = vmul.f32 %v5690_v59, %v4790_v49  ;;  %v18957_v49 = vld [vmem:[#allocation26_spill] sm:$0xff] }
 0x313   :  { %v12204_v63 = vpop.eup %12203  ;;  %12215 = verf.f32 %v5139_v3  ;;  %v5150_v38 = vmul.f32 0.70710677, %v15399_v51  ;;  %v3132_v61 = vpop.f32.mrf.mxu1  ;;  %3923 = vmatprep.mubr.bf16.mxu0 %v18816_v55  ;;  %v5991_v60 = vmul.f32 %v5691_v56, %v4791_v30  ;;  %v1182_v30 = vsub.s32 4, %v18929_v2 }
 0x314   :  { %v6002_v20 = vmul.f32 %v5702_v46, %v4802_v21  ;;  %v5703_v19 = vadd.f32 1.0, %v12204_v63  ;;  %v5151_v47 = vmul.f32 0.70710677, %v15403_v12  ;;  %v15413_v50 = vadd.f32 %v3291_v8, %v3131_v4  ;;  %v3293_v18 = vpop.f32.mrf.mxu0 }
 0x315   :  { %12217 = verf.f32 %v5150_v38  ;;  %v3133_v31 = vadd.f32 %v3132_v61, %v14942_v37  ;;  %v3134_v3 = vpop.f32.mrf.mxu1  ;;  %v15420_v21 = vadd.f32 %v18957_v49, %v2715_v44  ;;  %v4814_v44 = vmul.f32 0.5, %v15351_v17 }
 0x316   :  { %v12206_v7 = vpop.eup %12205  ;;  %v15416_v54 = vpack.c.bf16 %v6002_v20, %v5990_v34  ;;  %v6003_v15 = vmul.f32 %v5703_v19, %v4803_v25  ;;  %12219 = verf.f32 %v5151_v47  ;;  %v3135_v59 = vadd.f32 %v3134_v3, %v14936_v45  ;;  %v3295_v4 = vpop.f32.mrf.mxu0 }
 0x317   :  { %v5162_v46 = vmul.f32 0.70710677, %v15413_v50  ;;  %v15423_v56 = vadd.f32 %v3293_v18, %v3133_v31  ;;  %v3136_v63 = vpop.f32.mrf.mxu1  ;;  %v12208_v38 = vpop.eup %12207  ;;  %v5714_v8 = vadd.f32 1.0, %v12206_v7  ;;  %v1186_v18 = vsub.s32 5, %v18929_v2 }
 0x318   :  { %18956 = vst [vmem:[#allocation96_spill] sm:$0xff] %v15416_v54  ;;  %v15426_v61 = vadd.f32 %v3295_v4, %v3135_v59  ;;  %v3137_v25 = vadd.f32 %v3136_v63, %v14942_v37  ;;  %v15429_v34 = vpack.c.bf16 %v6003_v15, %v5991_v60  ;;  %v3297_v47 = vpop.f32.mrf.mxu0  ;;  %3763 = vmatmul.mubr.bf16.gmra.mxu1 %v14257_v26  ;;  %v4815_v3 = vmul.f32 0.5, %v15353_v40  ;;  %v18959_v4 = vld [vmem:[#allocation16_spill] sm:$0xff] }
 0x319   :  { %v12210_v20 = vpop.eup %12209  ;;  %12221 = verf.f32 %v5162_v46  ;;  %v5163_v19 = vmul.f32 0.70710677, %v15423_v56  ;;  %v3140_v31 = vpop.f32.mrf.mxu1  ;;  %v4826_v7 = vmul.f32 0.5, %v15363_v1  ;;  %3772 = vmatprep.mubr.bf16.mxu1 %v14285_v42  ;;  %v5715_v60 = vadd.f32 1.0, %v12208_v38 }
 0x31a   :  { %18958 = vst [vmem:[#allocation26_spill] sm:$0xff] %v15429_v34  ;;  %v5726_v59 = vadd.f32 1.0, %v12210_v20  ;;  %v5174_v15 = vmul.f32 0.70710677, %v15426_v61  ;;  %v15439_v17 = vadd.f32 %v3297_v47, %v3137_v25  ;;  %v3141_v49 = vadd.f32 %v3140_v31, %v14936_v45  ;;  %v3301_v46 = vpop.f32.mrf.mxu0  ;;  %3924 = vmatmul.mubr.bf16.gmra.mxu0 %v18959_v4 }
 0x31b   :  { %12223 = verf.f32 %v5163_v19  ;;  %v3142_v63 = vpop.f32.mrf.mxu1  ;;  %v6014_v34 = vmul.f32 %v5714_v8, %v4814_v44  ;;  %3933 = vmatprep.mubr.bf16.mxu0 %v18816_v55  ;;  %v4827_v20 = vmul.f32 0.5, %v15371_v29  ;;  %v4933_v35 = vmul.f32 0.70710677, %v15420_v21 }
 0x31c   :  { %v12212_v54 = vpop.eup %12211  ;;  %v6026_v40 = vmul.f32 %v5726_v59, %v4826_v7  ;;  %12225 = verf.f32 %v5174_v15  ;;  %v3143_v1 = vadd.f32 %v3142_v63, %v14942_v37  ;;  %v5175_v25 = vmul.f32 0.70710677, %v15439_v17  ;;  %v3303_v45 = vpop.f32.mrf.mxu0  ;;  %v12753_v37 = vld [vmem:[%s18482_s4] sm:$0xff] }
 0x31d   :  { %v5727_v38 = vadd.f32 1.0, %v12212_v54  ;;  %v15447_v19 = vadd.f32 %v3301_v46, %v3141_v49  ;;  %v3144_v47 = vpop.f32.mrf.mxu1  ;;  %v12214_v31 = vpop.eup %12213  ;;  %v15457_v44 = vrot.slane %v12753_v37, %v1182_v30  ;;  %v6015_v29 = vmul.f32 %v5715_v60, %v4815_v3 }
 0x31e   :  { %v15450_v4 = vpack.c.bf16 %v6026_v40, %v6014_v34  ;;  %v15452_v8 = vadd.f32 %v3303_v45, %v3143_v1  ;;  %12227 = verf.f32 %v5175_v25  ;;  %v3305_v7 = vpop.f32.mrf.mxu0  ;;  %v15460_v49 = vmul.f32 0.5, %v18940_v27  ;;  %v18963_v40 = vld [vmem:[#allocation19_spill] sm:$0xff] }
 0x31f   :  { %18960 = vst [vmem:[#allocation97_spill] sm:$0xff] %v15447_v19  ;;  %v6027_v54 = vmul.f32 %v5727_v38, %v4827_v20  ;;  %v3145_v59 = vpop.f32.mrf.mxu1  ;;  %v15463_v34 = vmul.f32 0.5, %v15181_v14  ;;  %v15465_v46 = vrot.slane %v12753_v37, %v1186_v18  ;;  %v15468_v63 = vmul.f32 0.5, %v18952_v16  ;;  %v18965_v14 = vld [vmem:[#allocation30_spill] sm:$0xff]  ;;  %v18966_v38 = vld [vmem:[#allocation20_spill] sm:$0xff] }
 0x320   :  { %18961 = vst [vmem:[#allocation98_spill] sm:$0xff] %v15450_v4  ;;  %18962 = vst [vmem:[#allocation99_spill] sm:$0xff] %v15452_v8  ;;  %v12216_v15 = vpop.eup %12215  ;;  %12229 = verf.f32 %v15381_v32  ;;  %v5738_v30 = vadd.f32 1.0, %v12214_v31  ;;  %v3306_v3 = vpop.f32.mrf.mxu0  ;;  %3773 = vmatmul.mubr.bf16.gmra.mxu1 %v18963_v40  ;;  %v15475_v27 = vmul.f32 0.5, %v15420_v21  ;;  %v2725_v18 = vadd.f32 %v18965_v14, %v14409_v23  ;;  %v18968_v4 = vld [vmem:[#allocation28_spill] sm:$0xff] }
 0x321   :  { %v3342_v60 = vpop.f32.mrf.mxu1  ;;  %v15472_v1 = vpack.c.bf16 %v6027_v54, %v6015_v29  ;;  %12231 = verf.f32 %v4933_v35  ;;  %3782 = vmatprep.mubr.bf16.mxu1 %v18966_v38  ;;  %v4838_v25 = vmul.f32 0.5, %v15376_v39  ;;  %v5739_v45 = vadd.f32 1.0, %v12216_v15  ;;  %v18967_v29 = vld [vmem:[#allocation13_spill] sm:$0xff]  ;;  %v18987_v38 = vld [vmem:[#allocation52_spill] sm:$0xff] }
 0x322   :  { %v12218_v20 = vpop.eup %12217  ;;  %v3343_v16 = vadd.f32 %v3342_v60, %v15457_v44  ;;  %v4850_v47 = vmul.f32 0.5, %v15399_v51  ;;  %v3503_v37 = vpop.f32.mrf.mxu0  ;;  %3934 = vmatmul.mubr.bf16.gmra.mxu0 %v18967_v29  ;;  %v4851_v35 = vmul.f32 0.5, %v15403_v12  ;;  %v4839_v39 = vmul.f32 0.5, %v15391_v5 }
 0x323   :  { %18964 = vst [vmem:[#allocation100_spill] sm:$0xff] %v15472_v1  ;;  %v12220_v32 = vpop.eup %12219  ;;  %v5750_v31 = vadd.f32 1.0, %v12218_v20  ;;  %v3344_v21 = vpop.f32.mrf.mxu1  ;;  %3943 = vmatprep.mubr.bf16.mxu0 %v18816_v55  ;;  %v6038_v3 = vmul.f32 %v5738_v30, %v4838_v25  ;;  %v15491_v20 = vadd.f32 1.0, %v15307_v62  ;;  %v15494_v1 = vadd.f32 %v18968_v4, %v2725_v18  ;;  %v18970_v62 = vld [vmem:[#allocation25_spill] sm:$0xff] }
 0x324   :  { %v5751_v54 = vadd.f32 1.0, %v12220_v32  ;;  %v15485_v7 = vadd.f32 %v3503_v37, %v3343_v16  ;;  %v3345_v59 = vadd.f32 %v3344_v21, %v15465_v46  ;;  %v3505_v60 = vpop.f32.mrf.mxu0  ;;  %v6039_v37 = vmul.f32 %v5739_v45, %v4839_v39  ;;  %v18971_v39 = vld [vmem:[#allocation18_spill] sm:$0xff] }
 0x325   :  { %v6050_v15 = vmul.f32 %v5750_v31, %v4850_v47  ;;  %v3346_v51 = vpop.f32.mrf.mxu1  ;;  %v4945_v19 = vmul.f32 0.70710677, %v18970_v62  ;;  %v4862_v8 = vmul.f32 0.5, %v15413_v50 }
 0x326   :  { %v12222_v14 = vpop.eup %12221  ;;  %v6051_v12 = vmul.f32 %v5751_v54, %v4851_v35  ;;  %v4900_v16 = vmul.f32 0.70710677, %v15485_v7  ;;  %v15497_v32 = vadd.f32 %v3505_v60, %v3345_v59  ;;  %v3347_v5 = vadd.f32 %v3346_v51, %v15457_v44  ;;  %v3507_v25 = vpop.f32.mrf.mxu0 }
 0x327   :  { %v15499_v21 = vpack.c.bf16 %v6050_v15, %v6038_v3  ;;  %v5762_v30 = vadd.f32 1.0, %v12222_v14  ;;  %v3348_v47 = vpop.f32.mrf.mxu1  ;;  %v4874_v54 = vmul.f32 0.5, %v15426_v61  ;;  %v18973_v14 = vld [vmem:[#allocation47_spill] sm:$0xff] }
 0x328   :  { %v12224_v31 = vpop.eup %12223  ;;  %v4901_v4 = vmul.f32 0.70710677, %v15497_v32  ;;  %v3349_v18 = vadd.f32 %v3348_v47, %v15465_v46  ;;  %12233 = verf.f32 %v4900_v16  ;;  %v15507_v45 = vadd.f32 %v3507_v25, %v3347_v5  ;;  %v3509_v59 = vpop.f32.mrf.mxu0  ;;  %3783 = vmatmul.mubr.bf16.gmra.mxu1 %v18971_v39  ;;  %v18974_v25 = vld [vmem:[#allocation17_spill] sm:$0xff] }
 0x329   :  { %18969 = vst [vmem:[#allocation30_spill] sm:$0xff] %v15499_v21  ;;  %v12226_v35 = vpop.eup %12225  ;;  %v3352_v3 = vpop.f32.mrf.mxu1  ;;  %v15510_v15 = vpack.c.bf16 %v6051_v12, %v6039_v37  ;;  %3984 = vmatprep.mubr.bf16.mxu1 %v18973_v14  ;;  %v4957_v47 = vmul.f32 0.70710677, %v15494_v1  ;;  %v6062_v61 = vmul.f32 %v5762_v30, %v4862_v8  ;;  %v5509_v12 = vadd.f32 1.0, %v15384_v0 }
 0x32a   :  { %v5774_v60 = vadd.f32 1.0, %v12226_v35  ;;  %12235 = verf.f32 %v4901_v4  ;;  %v15512_v51 = vadd.f32 %v3509_v59, %v3349_v18  ;;  %v3353_v50 = vadd.f32 %v3352_v3, %v15457_v44  ;;  %v3513_v5 = vpop.f32.mrf.mxu0  ;;  %3944 = vmatmul.mubr.bf16.gmra.mxu0 %v18974_v25 }
 0x32b   :  { %18972 = vst [vmem:[#allocation28_spill] sm:$0xff] %v15510_v15  ;;  %v4912_v16 = vmul.f32 0.70710677, %v15507_v45  ;;  %v3354_v21 = vpop.f32.mrf.mxu1  ;;  %v12228_v37 = vpop.eup %12227  ;;  %v5763_v35 = vadd.f32 1.0, %v12224_v31  ;;  %4145 = vmatprep.mubr.bf16.mxu0 %v18816_v55  ;;  %v4875_v3 = vmul.f32 0.5, %v15439_v17  ;;  %v4863_v0 = vmul.f32 0.5, %v15423_v56 }
 0x32c   :  { %v6074_v4 = vmul.f32 %v5774_v60, %v4874_v54  ;;  %v4913_v18 = vmul.f32 0.70710677, %v15512_v51  ;;  %v15521_v59 = vadd.f32 %v3513_v5, %v3353_v50  ;;  %v5775_v8 = vadd.f32 1.0, %v12228_v37  ;;  %v3515_v15 = vpop.f32.mrf.mxu0  ;;  %v11571_v54 = vld [vmem:[%s18481_s3 + $0x2c8] ss:$48 sps:$4 sm:$0xff]  }
 0x32d   :  { %12237 = verf.f32 %v4912_v16  ;;  %v3355_v30 = vadd.f32 %v3354_v21, %v15465_v46  ;;  %v3356_v25 = vpop.f32.mrf.mxu1  ;;  %v12230_v14 = vpop.eup %12229  ;;  %v11576_v56 = vld [vmem:[%s18481_s3 + $0x26c] ss:$48 sps:$4 sm:$0xff]  }
 0x32e   :  { %v15527_v39 = vpack.c.bf16 %v6074_v4, %v6062_v61  ;;  %12239 = verf.f32 %v4913_v18  ;;  %v4924_v31 = vmul.f32 0.70710677, %v15521_v59  ;;  %v15533_v60 = vpop.eup %12231  ;;  %v6075_v17 = vmul.f32 %v5775_v8, %v4875_v3  ;;  %v3517_v16 = vpop.f32.mrf.mxu0  ;;  %v18976_v61 = vld [vmem:[#allocation29_spill] sm:$0xff] }
 0x32f   :  { %12241 = verf.f32 %v4945_v19  ;;  %v15535_v50 = vadd.f32 %v3515_v15, %v3355_v30  ;;  %v3357_v21 = vadd.f32 %v3356_v25, %v15457_v44  ;;  %v3358_v5 = vpop.f32.mrf.mxu1  ;;  %v2735_v37 = vadd.f32 %v18976_v61, %v14409_v23  ;;  %v11586_v19 = vld [vmem:[%s18481_s3 + $0x8c8] ss:$48 sps:$4 sm:$0xff]   ;;  %v18977_v30 = vld [vmem:[#allocation49_spill] sm:$0xff] }
 0x330   :  { %18975 = vst [vmem:[#allocation25_spill] sm:$0xff] %v15527_v39  ;;  %v6063_v4 = vmul.f32 %v5763_v35, %v4863_v0  ;;  %12243 = verf.f32 %v4924_v31  ;;  %v3359_v18 = vadd.f32 %v3358_v5, %v15465_v46  ;;  %v3519_v3 = vpop.f32.mrf.mxu0  ;;  %3985 = vmatmul.mubr.bf16.vlgmr.msra.gmra.mxu1 %v18977_v30  ;;  %v11597_v35 = vld [vmem:[%s18481_s3 + $0x86c] ss:$48 sps:$4 sm:$0xff]   ;;  %v5809_v0 = vmul.f32 %v5509_v12, %v15463_v34 }
 0x331   :  { %12245 = verf.f32 %v4957_v47  ;;  %v4925_v15 = vmul.f32 0.70710677, %v15535_v50  ;;  %v15548_v25 = vadd.f32 %v3517_v16, %v3357_v21  ;;  %v3362_v8 = vpop.f32.mrf.mxu1  ;;  %4275 = vmatpush1.bf16.msra.mxu1 %v11571_v54  ;;  %v18978_v47 = vld [vmem:[#allocation50_spill] sm:$0xff]  ;;  %v5521_v16 = vadd.f32 1.0, %v12230_v14  ;;  %v18980_v39 = vld [vmem:[#allocation32_spill] sm:$0xff]  ;;  %v18982_v14 = vld [vmem:[#allocation31_spill] sm:$0xff] }
 0x332   :  { %v15555_v31 = vadd.f32 %v3519_v3, %v3359_v18  ;;  %v3363_v5 = vadd.f32 %v3362_v8, %v15457_v44  ;;  %3994 = vmatprep.mubr.bf16.mxu1 %v18978_v47  ;;  %v11574_v21 = vld [vmem:[%s18481_s3 + $0x268] ss:$48 sps:$4 sm:$0xff]   ;;  %v15562_v61 = vpack.c.bf16 %v6075_v17, %v6063_v4  ;;  %v4969_v30 = vmul.f32 0.70710677, %v18980_v39  ;;  %v3523_v34 = vpop.f32.mrf.mxu0  ;;  %4276 = vmatprep.subr.bf16.mxu1 %v11576_v56  ;;  %v11579_v54 = vld [vmem:[%s18481_s3 + $0x20c] ss:$48 sps:$4 sm:$0xff]  }
 0x333   :  { %12247 = verf.f32 %v4925_v15  ;;  %v4936_v29 = vmul.f32 0.70710677, %v15548_v25  ;;  %v18981_v12 = vld [vmem:[#allocation48_spill] sm:$0xff]  ;;  %v3364_v18 = vpop.f32.mrf.mxu1  ;;  %v5797_v3 = vmul.f32 %v15491_v20, %v15460_v49  ;;  %v15573_v17 = vadd.f32 %v18982_v14, %v2735_v37 }
 0x334   :  { %18979 = vst [vmem:[#allocation29_spill] sm:$0xff] %v15562_v61  ;;  %4146 = vmatmul.mubr.bf16.vlgmr.msra.gmra.mxu0 %v18981_v12  ;;  %v4937_v4 = vmul.f32 0.70710677, %v15555_v31  ;;  %v15576_v15 = vadd.f32 %v3523_v34, %v3363_v5  ;;  %v3365_v8 = vadd.f32 %v3364_v18, %v15465_v46  ;;  %v11595_v56 = vld [vmem:[%s18481_s3 + $0x868] ss:$48 sps:$4 sm:$0xff]   ;;  %v15584_v61 = vmul.f32 0.5, %v18970_v62  ;;  %v3525_v20 = vpop.f32.mrf.mxu0 }
 0x335   :  { %4155 = vmatprep.mubr.bf16.mxu0 %v18816_v55  ;;  %4436 = vmatpush1.bf16.msra.mxu0 %v11586_v19  ;;  %v15587_v49 = vmul.f32 0.5, %v15494_v1  ;;  %12249 = verf.f32 %v4936_v29  ;;  %v3366_v37 = vpop.f32.mrf.mxu1  ;;  %v11606_v5 = vld [vmem:[%s18481_s3 + $0x80c] ss:$48 sps:$4 sm:$0xff]   ;;  %v15592_v34 = vpack.c.bf16 %v5809_v0, %v5797_v3  ;;  %v12234_v19 = vpop.eup %12233  ;;  %v15595_v18 = vmul.f32 0.5, %v18980_v39  ;;  %v11577_v1 = vld [vmem:[%s18481_s3 + $0x208] ss:$48 sps:$4 sm:$0xff]  }
 0x336   :  { %4437 = vmatprep.subr.bf16.mxu0 %v11597_v35  ;;  %12251 = verf.f32 %v4937_v4  ;;  %v4948_v62 = vmul.f32 0.70710677, %v15576_v15  ;;  %4277 = vmatpush1.bf16.msra.mxu1 %v11574_v21  ;;  %v15602_v29 = vmul.f32 %v5521_v16, %v15468_v63  ;;  %v15604_v14 = vadd.f32 %v3525_v20, %v3365_v8  ;;  %v3527_v3 = vpop.f32.mrf.mxu0  ;;  %v11582_v21 = vld [vmem:[%s18481_s3 + $0x1ac] ss:$48 sps:$4 sm:$0xff]  }
 0x337   :  { %18983 = vst [vmem:[#allocation32_spill] sm:$0xff] %v15587_v49  ;;  %18984 = vst [vmem:[#allocation31_spill] sm:$0xff] %v15592_v34  ;;  %v12236_v35 = vpop.eup %12235  ;;  %12253 = verf.f32 %v4969_v30  ;;  %v3367_v0 = vadd.f32 %v3366_v37, %v15457_v44  ;;  %v3368_v39 = vpop.f32.mrf.mxu1  ;;  %4278 = vmatprep.subr.bf16.mxu1 %v11579_v54  ;;  %v15611_v4 = vadd.f32 1.0, %v15533_v60  ;;  %v15614_v34 = vmul.f32 0.70710677, %v15573_v17  ;;  %v18986_v63 = vld [vmem:[#allocation40_spill] sm:$0xff] }
 0x338   :  { %18985 = vst [vmem:[#allocation101_spill] sm:$0xff] %v15595_v18  ;;  %v15618_v30 = vadd.f32 %v18986_v63, %v14409_v23  ;;  %v4600_v16 = vmul.f32 0.5, %v15485_v7  ;;  %v3369_v8 = vadd.f32 %v3368_v39, %v15465_v46  ;;  %v11604_v54 = vld [vmem:[%s18481_s3 + $0x808] ss:$48 sps:$4 sm:$0xff]   ;;  %v5500_v20 = vadd.f32 1.0, %v12234_v19  ;;  %v3529_v12 = vpop.f32.mrf.mxu0  ;;  %3995 = vmatmul.mubr.bf16.gmra.mxu1 %v18987_v38 }
 0x339   :  { %4438 = vmatpush1.bf16.msra.mxu0 %v11595_v56  ;;  %12255 = verf.f32 %v4948_v62  ;;  %v4949_v60 = vmul.f32 0.70710677, %v15604_v14  ;;  %v15626_v37 = vadd.f32 %v3527_v3, %v3367_v0  ;;  %v3372_v47 = vpop.f32.mrf.mxu1  ;;  %v11615_v7 = vld [vmem:[%s18481_s3 + $0x7ac] ss:$48 sps:$4 sm:$0xff]   ;;  %v4601_v39 = vmul.f32 0.5, %v15497_v32  ;;  %v18988_v62 = vld [vmem:[#allocation53_spill] sm:$0xff] }
 0x33a   :  { %4439 = vmatprep.subr.bf16.mxu0 %v11606_v5  ;;  %v12238_v56 = vpop.eup %12237  ;;  %v5501_v63 = vadd.f32 1.0, %v12236_v35  ;;  %v15633_v18 = vadd.f32 %v3529_v12, %v3369_v8  ;;  %v3373_v19 = vadd.f32 %v3372_v47, %v15457_v44  ;;  %4004 = vmatprep.mubr.bf16.mxu1 %v18988_v62  ;;  %v11580_v0 = vld [vmem:[%s18481_s3 + $0x1a8] ss:$48 sps:$4 sm:$0xff]   ;;  %v11585_v5 = vld [vmem:[%s18481_s3 + $0x14c] ss:$48 sps:$4 sm:$0xff]   ;;  %v4612_v38 = vmul.f32 0.5, %v15507_v45  ;;  %v3533_v47 = vpop.f32.mrf.mxu0 }
 0x33b   :  { %4279 = vmatpush1.bf16.msra.mxu1 %v11577_v1  ;;  %v12240_v3 = vpop.eup %12239  ;;  %v5512_v32 = vadd.f32 1.0, %v12238_v56  ;;  %v4613_v12 = vmul.f32 0.5, %v15512_v51  ;;  %v4960_v35 = vmul.f32 0.70710677, %v15626_v37  ;;  %v18989_v8 = vld [vmem:[#allocation51_spill] sm:$0xff]  ;;  %v3374_v1 = vpop.f32.mrf.mxu1  ;;  %12257 = verf.f32 %v4949_v60 }
 0x33c   :  { %4156 = vmatmul.mubr.bf16.gmra.mxu0 %v18989_v8  ;;  %4280 = vmatprep.subr.bf16.mxu1 %v11582_v21  ;;  %v15647_v62 = vpop.eup %12241  ;;  %v5513_v40 = vadd.f32 1.0, %v12240_v3  ;;  %v4961_v49 = vmul.f32 0.70710677, %v15633_v18  ;;  %v15650_v42 = vadd.f32 %v3533_v47, %v3373_v19  ;;  %v11613_v45 = vld [vmem:[%s18481_s3 + $0x7a8] ss:$48 sps:$4 sm:$0xff]   ;;  %v5800_v56 = vmul.f32 %v5500_v20, %v4600_v16  ;;  %v3535_v26 = vpop.f32.mrf.mxu0 }
 0x33d   :  { %4165 = vmatprep.mubr.bf16.mxu0 %v18816_v55  ;;  %4440 = vmatpush1.bf16.msra.mxu0 %v11604_v54  ;;  %v12244_v51 = vpop.eup %12243  ;;  %v5812_v8 = vmul.f32 %v5512_v32, %v4612_v38  ;;  %12259 = verf.f32 %v4960_v35  ;;  %v3375_v21 = vadd.f32 %v3374_v1, %v15465_v46  ;;  %v3376_v3 = vpop.f32.mrf.mxu1  ;;  %v11624_v60 = vld [vmem:[%s18481_s3 + $0x74c] ss:$48 sps:$4 sm:$0xff]   ;;  %v15663_v54 = vmul.f32 0.5, %v15573_v17  ;;  %v11583_v38 = vld [vmem:[%s18481_s3 + $0x148] ss:$48 sps:$4 sm:$0xff]  }
 0x33e   :  { %4441 = vmatprep.subr.bf16.mxu0 %v11615_v7  ;;  %v15660_v19 = vpop.eup %12245  ;;  %v5801_v47 = vmul.f32 %v5501_v63, %v4601_v39  ;;  %v5813_v2 = vmul.f32 %v5513_v40, %v4613_v12  ;;  %12261 = verf.f32 %v4961_v49  ;;  %v4972_v20 = vmul.f32 0.70710677, %v15650_v42  ;;  %v3537_v35 = vpop.f32.mrf.mxu0  ;;  %v11591_v40 = vld [vmem:[%s18481_s3 + $0xec] ss:$48 sps:$4 sm:$0xff]  }
 0x33f   :  { %18990 = vst [vmem:[#allocation40_spill] sm:$0xff] %v15663_v54  ;;  %4281 = vmatpush1.bf16.msra.mxu1 %v11580_v0  ;;  %v15668_v16 = vpack.c.bf16 %v5812_v8, %v5800_v56  ;;  %v15671_v7 = vadd.f32 %v3535_v26, %v3375_v21  ;;  %v3377_v32 = vadd.f32 %v3376_v3, %v15457_v44  ;;  %v3378_v1 = vpop.f32.mrf.mxu1  ;;  %12263 = verf.f32 %v15614_v34  ;;  %v11622_v26 = vld [vmem:[%s18481_s3 + $0x748] ss:$48 sps:$4 sm:$0xff]   ;;  %v18993_v0 = vld [vmem:[#allocation37_spill] sm:$0xff] }
 0x340   :  { %4282 = vmatprep.subr.bf16.mxu1 %v11585_v5  ;;  %v12248_v17 = vpop.eup %12247  ;;  %v5524_v49 = vadd.f32 1.0, %v12244_v51  ;;  %v3379_v39 = vadd.f32 %v3378_v1, %v15465_v46  ;;  %v15682_v63 = vpack.c.bf16 %v5813_v2, %v5801_v47  ;;  %v15686_v5 = vadd.f32 %v18993_v0, %v15618_v30  ;;  %v3539_v51 = vpop.f32.mrf.mxu0  ;;  %4005 = vmatmul.mubr.bf16.gmra.mxu1 %v13922_v22  ;;  %v11633_v2 = vld [vmem:[%s18481_s3 + $0x6ec] ss:$48 sps:$4 sm:$0xff]   ;;  %v11589_v3 = vld [vmem:[%s18481_s3 + $0xe8] ss:$48 sps:$4 sm:$0xff]  }
 0x341   :  { %18991 = vst [vmem:[#allocation102_spill] sm:$0xff] %v15668_v16  ;;  %4442 = vmatpush1.bf16.msra.mxu0 %v11613_v45  ;;  %v4624_v12 = vmul.f32 0.5, %v15521_v59  ;;  %v4625_v8 = vmul.f32 0.5, %v15535_v50  ;;  %v4973_v34 = vmul.f32 0.70710677, %v15671_v7  ;;  %v3382_v56 = vpop.f32.mrf.mxu1  ;;  %12265 = verf.f32 %v4972_v20  ;;  %v18994_v50 = vld [vmem:[#allocation56_spill] sm:$0xff] }
 0x342   :  { %18992 = vst [vmem:[#allocation103_spill] sm:$0xff] %v15682_v63  ;;  %4443 = vmatprep.subr.bf16.mxu0 %v11624_v60  ;;  %v12250_v45 = vpop.eup %12249  ;;  %v15695_v21 = vadd.f32 %v3537_v35, %v3377_v32  ;;  %v15697_v30 = vadd.f32 %v3539_v51, %v3379_v39  ;;  %v3383_v59 = vadd.f32 %v3382_v56, %v15457_v44  ;;  %v5525_v47 = vadd.f32 1.0, %v12248_v17  ;;  %v3543_v32 = vpop.f32.mrf.mxu0  ;;  %v18995_v35 = vld [vmem:[#allocation54_spill] sm:$0xff] }
 0x343   :  { %4014 = vmatprep.mubr.bf16.mxu1 %v18994_v50  ;;  %4283 = vmatpush1.bf16.msra.mxu1 %v11583_v38  ;;  %v12252_v60 = vpop.eup %12251  ;;  %v4636_v1 = vmul.f32 0.5, %v15548_v25  ;;  %v5536_v0 = vadd.f32 1.0, %v12250_v45  ;;  %v4637_v20 = vmul.f32 0.5, %v15555_v31  ;;  %v3384_v39 = vpop.f32.mrf.mxu1  ;;  %v11594_v38 = vld [vmem:[%s18481_s3 + $0x8c] ss:$48 sps:$4 sm:$0xff]   ;;  %v5824_v56 = vmul.f32 %v5524_v49, %v4624_v12 }
 0x344   :  { %4166 = vmatmul.mubr.bf16.gmra.mxu0 %v18995_v35  ;;  %4284 = vmatprep.subr.bf16.mxu1 %v11591_v40  ;;  %v15710_v51 = vpop.eup %12253  ;;  %v5537_v16 = vadd.f32 1.0, %v12252_v60  ;;  %12267 = verf.f32 %v4973_v34  ;;  %v4984_v17 = vmul.f32 0.70710677, %v15695_v21  ;;  %v11631_v25 = vld [vmem:[%s18481_s3 + $0x6e8] ss:$48 sps:$4 sm:$0xff]   ;;  %v15718_v45 = vadd.f32 %v3543_v32, %v3383_v59  ;;  %v3545_v35 = vpop.f32.mrf.mxu0 }
 0x345   :  { %4175 = vmatprep.mubr.bf16.mxu0 %v18816_v55  ;;  %4444 = vmatpush1.bf16.msra.mxu0 %v11622_v26  ;;  %v5836_v31 = vmul.f32 %v5536_v0, %v4636_v1  ;;  %v4985_v40 = vmul.f32 0.70710677, %v15697_v30  ;;  %v3385_v63 = vadd.f32 %v3384_v39, %v15465_v46  ;;  %v3386_v49 = vpop.f32.mrf.mxu1  ;;  %v11639_v12 = vld [vmem:[%s18481_s3 + $0x68c] ss:$48 sps:$4 sm:$0xff]   ;;  %v18996_v26 = vld [vmem:[#allocation35_spill] sm:$0xff]  ;;  %v5825_v0 = vmul.f32 %v5525_v47, %v4625_v8 }
 0x346   :  { %4445 = vmatprep.subr.bf16.mxu0 %v11633_v2  ;;  %v12256_v34 = vpop.eup %12255  ;;  %v15725_v60 = vmul.f32 0.70710677, %v18996_v26  ;;  %v5837_v50 = vmul.f32 %v5537_v16, %v4637_v20  ;;  %12269 = verf.f32 %v4984_v17  ;;  %v3387_v1 = vadd.f32 %v3386_v49, %v15457_v44  ;;  %v11592_v59 = vld [vmem:[%s18481_s3 + $0x88] ss:$48 sps:$4 sm:$0xff]   ;;  %v3547_v39 = vpop.f32.mrf.mxu0  ;;  %v11600_v16 = vld [vmem:[%s18481_s3 + $0x2c] ss:$48 sps:$4 sm:$0xff]  }
 0x347   :  { %4285 = vmatpush1.bf16.msra.mxu1 %v11589_v3  ;;  %v15731_v32 = vpack.c.bf16 %v5836_v31, %v5824_v56  ;;  %12271 = verf.f32 %v4985_v40  ;;  %v4996_v2 = vmul.f32 0.70710677, %v15718_v45  ;;  %v3388_v22 = vpop.f32.mrf.mxu1  ;;  %v15738_v20 = vmul.f32 0.70710677, %v15686_v5  ;;  %v11637_v47 = vld [vmem:[%s18481_s3 + $0x688] ss:$48 sps:$4 sm:$0xff]  }
 0x348   :  { %4286 = vmatprep.subr.bf16.mxu1 %v11594_v38  ;;  %v15740_v3 = vadd.f32 %v3545_v35, %v3385_v63  ;;  %v15742_v17 = vadd.f32 %v3547_v39, %v3387_v1  ;;  %v3389_v8 = vadd.f32 %v3388_v22, %v15465_v46  ;;  %v12258_v56 = vpop.eup %12257  ;;  %v4648_v38 = vmul.f32 0.5, %v15576_v15  ;;  %v3549_v40 = vpop.f32.mrf.mxu0  ;;  %v11598_v63 = vld [vmem:[%s18481_s3 + $0x28] ss:$48 sps:$4 sm:$0xff]   ;;  %v11642_v22 = vld [vmem:[%s18481_s3 + $0x62c] ss:$48 sps:$4 sm:$0xff]  }
 0x349   :  { %18997 = vst [vmem:[#allocation37_spill] sm:$0xff] %v15731_v32  ;;  %4446 = vmatpush1.bf16.msra.mxu0 %v11631_v25  ;;  %v5548_v31 = vadd.f32 1.0, %v12256_v34  ;;  %12273 = verf.f32 %v4996_v2  ;;  %v3392_v49 = vpop.f32.mrf.mxu1  ;;  %v18998_v32 = vld [vmem:[#allocation58_spill] sm:$0xff]  ;;  %v15756_v35 = vpack.c.bf16 %v5837_v50, %v5825_v0  ;;  %v4649_v15 = vmul.f32 0.5, %v15604_v14 }
 0x34a   :  { %4015 = vmatmul.mubr.bf16.gmra.mxu1 %v18998_v32  ;;  %4447 = vmatprep.subr.bf16.mxu0 %v11639_v12  ;;  %v12260_v25 = vpop.eup %12259  ;;  %v4660_v34 = vmul.f32 0.5, %v15626_v37  ;;  %v4997_v1 = vmul.f32 0.70710677, %v15740_v3  ;;  %v5008_v2 = vmul.f32 0.70710677, %v15742_v17  ;;  %v19000_v39 = vld [vmem:[#allocation6_spill] sm:$0xff]  ;;  %v15764_v9 = vadd.f32 %v3549_v40, %v3389_v8  ;;  %v3553_v0 = vpop.f32.mrf.mxu0 }
 0x34b   :  { %18999 = vst [vmem:[#allocation35_spill] sm:$0xff] %v15756_v35  ;;  %4024 = vmatprep.mubr.bf16.mxu1 %v19000_v39  ;;  %4287 = vmatpush1.bf16.msra.mxu1 %v11592_v59  ;;  %v12262_v32 = vpop.eup %12261  ;;  %v5560_v12 = vadd.f32 1.0, %v12260_v25  ;;  %v4661_v54 = vmul.f32 0.5, %v15633_v18  ;;  %v3393_v50 = vadd.f32 %v3392_v49, %v15457_v44  ;;  %v19001_v35 = vld [vmem:[#allocation57_spill] sm:$0xff]  ;;  %v3394_v14 = vpop.f32.mrf.mxu1  ;;  %v11603_v37 = vld [vmem:[%s18481_s3 + $0x5cc] ss:$48 sps:$4 sm:$0xff]   ;;  %v5848_v40 = vmul.f32 %v5548_v31, %v4648_v38 }
 0x34c   :  { %4176 = vmatmul.mubr.bf16.gmra.mxu0 %v19001_v35  ;;  %4288 = vmatprep.subr.bf16.mxu1 %v11600_v16  ;;  %v5549_v57 = vadd.f32 1.0, %v12258_v56  ;;  %v5561_v39 = vadd.f32 1.0, %v12262_v32  ;;  %12275 = verf.f32 %v4997_v1  ;;  %v3395_v59 = vadd.f32 %v3394_v14, %v15465_v46  ;;  %v11640_v18 = vld [vmem:[%s18481_s3 + $0x628] ss:$48 sps:$4 sm:$0xff]   ;;  %v15776_v8 = vpop.eup %12263  ;;  %v3555_v25 = vpop.f32.mrf.mxu0 }
 0x34d   :  { %4185 = vmatprep.mubr.bf16.mxu0 %v18816_v55  ;;  %4448 = vmatpush1.bf16.msra.mxu0 %v11637_v47  ;;  %v5860_v16 = vmul.f32 %v5560_v12, %v4660_v34  ;;  %12277 = verf.f32 %v5008_v2  ;;  %v5009_v49 = vmul.f32 0.70710677, %v15764_v9  ;;  %v3396_v56 = vpop.f32.mrf.mxu1  ;;  %v11660_v32 = vld [vmem:[#allocation2 + $0x22c] ss:$12 sps:$4 sm:$0xff]   ;;  %v15779_v14 = vadd.f32 %v3553_v0, %v3393_v50 }
 0x34e   :  { %4449 = vmatprep.subr.bf16.mxu0 %v11642_v22  ;;  %v5861_v1 = vmul.f32 %v5561_v39, %v4661_v54  ;;  %v15781_v35 = vadd.f32 %v3555_v25, %v3395_v59  ;;  %v3397_v47 = vadd.f32 %v3396_v56, %v15457_v44  ;;  %v11601_v38 = vld [vmem:[%s18481_s3 + $0x5c8] ss:$48 sps:$4 sm:$0xff]   ;;  %v12266_v31 = vpop.eup %12265  ;;  %v15788_v34 = vmul.f32 0.5, %v18996_v26  ;;  %v3557_v22 = vpop.f32.mrf.mxu0  ;;  %v11609_v39 = vld [vmem:[%s18481_s3 + $0x56c] ss:$48 sps:$4 sm:$0xff]  }
 0x34f   :  { %4289 = vmatpush1.bf16.msra.mxu1 %v11598_v63  ;;  %v15790_v2 = vpack.c.bf16 %v5860_v16, %v5848_v40  ;;  %12279 = verf.f32 %v5009_v49  ;;  %v3398_v54 = vpop.f32.mrf.mxu1  ;;  %v15797_v63 = vmul.f32 %v15611_v4, %v15475_v27  ;;  %v5849_v12 = vmul.f32 %v5549_v57, %v4649_v15 }
 0x350   :  { %4290 = vmatprep.subr.bf16.mxu1 %v11603_v37  ;;  %12281 = verf.f32 %v15725_v60  ;;  %v5020_v26 = vmul.f32 0.70710677, %v15779_v14  ;;  %v5021_v50 = vmul.f32 0.70710677, %v15781_v35  ;;  %v15803_v37 = vadd.f32 %v3557_v22, %v3397_v47  ;;  %v3559_v40 = vpop.f32.mrf.mxu0  ;;  %v11607_v60 = vld [vmem:[%s18481_s3 + $0x568] ss:$48 sps:$4 sm:$0xff]  }
 0x351   :  { %19002 = vst [vmem:[#allocation104_spill] sm:$0xff] %v15790_v2  ;;  %4450 = vmatpush1.bf16.msra.mxu0 %v11640_v18  ;;  %v12268_v0 = vpop.eup %12267  ;;  %12283 = verf.f32 %v15738_v20  ;;  %v3399_v59 = vadd.f32 %v3398_v54, %v15465_v46  ;;  %v3402_v16 = vpop.f32.mrf.mxu1  ;;  %v15808_v27 = vadd.f32 1.0, %v15647_v62  ;;  %v5572_v57 = vadd.f32 1.0, %v12266_v31 }
 0x352   :  { %4025 = vmatmul.mubr.bf16.gmra.mxu1 %v14019_v24  ;;  %8350 = vmatprep.subr.bf16.mxu0 %v11660_v32  ;;  %12285 = verf.f32 %v5020_v26  ;;  %v3403_v4 = vadd.f32 %v3402_v16, %v15457_v44  ;;  %v15815_v20 = vpack.c.bf16 %v5861_v1, %v5849_v12  ;;  %v4672_v18 = vmul.f32 0.5, %v15650_v42  ;;  %v3563_v25 = vpop.f32.mrf.mxu0  ;;  %v11612_v32 = vld [vmem:[%s18481_s3 + $0x50c] ss:$48 sps:$4 sm:$0xff]  }
 0x353   :  { %4034 = vmatprep.mubr.bf16.mxu1 %v14026_v43  ;;  %4291 = vmatpush2.bf16.msra.mxu1 %v11601_v38  ;;  %v12270_v15 = vpop.eup %12269  ;;  %v4684_v49 = vmul.f32 0.5, %v15695_v21  ;;  %12287 = verf.f32 %v5021_v50  ;;  %v5032_v62 = vmul.f32 0.70710677, %v15803_v37  ;;  %v3404_v56 = vpop.f32.mrf.mxu1  ;;  %v15824_v38 = vadd.f32 %v3559_v40, %v3399_v59  ;;  %v11610_v40 = vld [vmem:[%s18481_s3 + $0x508] ss:$48 sps:$4 sm:$0xff]  }
 0x354   :  { %19003 = vst [vmem:[#allocation105_spill] sm:$0xff] %v15815_v20  ;;  %4186 = vmatmul.mubr.bf16.gmra.mxu0 %v14008_v28  ;;  %4292 = vmatprep.subr.bf16.mxu1 %v11609_v39  ;;  %v12272_v47 = vpop.eup %12271  ;;  %v5584_v1 = vadd.f32 1.0, %v12270_v15  ;;  %v15826_v31 = vadd.f32 %v3563_v25, %v3403_v4  ;;  %v3405_v42 = vadd.f32 %v3404_v56, %v15465_v46  ;;  %v5573_v21 = vadd.f32 1.0, %v12268_v0  ;;  %v3565_v39 = vpop.f32.mrf.mxu0 }
 0x355   :  { %4195 = vmatprep.mubr.bf16.mxu0 %v18816_v55  ;;  %v4685_v22 = vmul.f32 0.5, %v15697_v30  ;;  %v5585_v54 = vadd.f32 1.0, %v12272_v47  ;;  %12289 = verf.f32 %v5032_v62  ;;  %v3406_v12 = vpop.f32.mrf.mxu1  ;;  %v5872_v50 = vmul.f32 %v5572_v57, %v4672_v18 }
 0x356   :  { %v12274_v26 = vpop.eup %12273  ;;  %v4673_v16 = vmul.f32 0.5, %v15671_v7  ;;  %v5884_v15 = vmul.f32 %v5584_v1, %v4684_v49  ;;  %v5033_v59 = vmul.f32 0.70710677, %v15824_v38  ;;  %v5044_v30 = vmul.f32 0.70710677, %v15826_v31  ;;  %v3567_v62 = vpop.f32.mrf.mxu0 }
 0x357   :  { %4293 = vmatpush2.bf16.msra.mxu1 %v11607_v60  ;;  %v5885_v4 = vmul.f32 %v5585_v54, %v4685_v22  ;;  %v5596_v0 = vadd.f32 1.0, %v12274_v26  ;;  %v15837_v25 = vadd.f32 %v3565_v39, %v3405_v42  ;;  %v3408_v56 = vpop.f32.mrf.mxu1  ;;  %v11618_v7 = vld [vmem:[%s18481_s3 + $0x4ac] ss:$48 sps:$4 sm:$0xff]   ;;  %v3407_v60 = vadd.f32 %v3406_v12, %v15457_v44 }
 0x358   :  { %4294 = vmatprep.subr.bf16.mxu1 %v11612_v32  ;;  %v15842_v57 = vpack.c.bf16 %v5884_v15, %v5872_v50  ;;  %12291 = verf.f32 %v5033_v59  ;;  %v3409_v18 = vadd.f32 %v3408_v56, %v15465_v46  ;;  %v5873_v47 = vmul.f32 %v5573_v21, %v4673_v16  ;;  %v3569_v22 = vpop.f32.mrf.mxu0 }
 0x359   :  { %v12276_v49 = vpop.eup %12275  ;;  %v4696_v1 = vmul.f32 0.5, %v15718_v45  ;;  %12293 = verf.f32 %v5044_v30  ;;  %v5045_v42 = vmul.f32 0.70710677, %v15837_v25  ;;  %v3412_v32 = vpop.f32.mrf.mxu1  ;;  %v4697_v39 = vmul.f32 0.5, %v15740_v3  ;;  %v11616_v45 = vld [vmem:[%s18481_s3 + $0x4a8] ss:$48 sps:$4 sm:$0xff]  }
 0x35a   :  { %19004 = vst [vmem:[#allocation106_spill] sm:$0xff] %v15842_v57  ;;  %4035 = vmatmul.mubr.bf16.gmra.mxu1 %v14065_v48  ;;  %v12278_v54 = vpop.eup %12277  ;;  %v15850_v26 = vadd.f32 %v3567_v62, %v3407_v60  ;;  %v15852_v50 = vadd.f32 %v3569_v22, %v3409_v18  ;;  %v3413_v12 = vadd.f32 %v3412_v32, %v15457_v44  ;;  %v5597_v21 = vadd.f32 1.0, %v12276_v49  ;;  %v3573_v59 = vpop.f32.mrf.mxu0  ;;  %v11621_v30 = vld [vmem:[%s18481_s3 + $0x44c] ss:$48 sps:$4 sm:$0xff]  }
 0x35b   :  { %4044 = vmatprep.mubr.bf16.mxu1 %v14072_v58  ;;  %4295 = vmatpush2.bf16.msra.mxu1 %v11610_v40  ;;  %v4708_v16 = vmul.f32 0.5, %v15742_v17  ;;  %v5608_v15 = vadd.f32 1.0, %v12278_v54  ;;  %v3414_v3 = vpop.f32.mrf.mxu1  ;;  %v15864_v62 = vpack.c.bf16 %v5885_v4, %v5873_v47  ;;  %v5896_v56 = vmul.f32 %v5596_v0, %v4696_v1 }
 0x35c   :  { %4196 = vmatmul.mubr.bf16.gmra.mxu0 %v14060_v11  ;;  %4296 = vmatprep.subr.bf16.mxu1 %v11618_v7  ;;  %v12280_v40 = vpop.eup %12279  ;;  %v4709_v60 = vmul.f32 0.5, %v15764_v9  ;;  %12295 = verf.f32 %v5045_v42  ;;  %v5056_v18 = vmul.f32 0.70710677, %v15850_v26  ;;  %v5057_v7 = vmul.f32 0.70710677, %v15852_v50  ;;  %v3575_v54 = vpop.f32.mrf.mxu0 }
 0x35d   :  { %19005 = vst [vmem:[#allocation107_spill] sm:$0xff] %v15864_v62  ;;  %4205 = vmatprep.mubr.bf16.mxu0 %v18816_v55  ;;  %v15869_v17 = vpop.eup %12281  ;;  %v5908_v49 = vmul.f32 %v5608_v15, %v4708_v16  ;;  %v5609_v22 = vadd.f32 1.0, %v12280_v40  ;;  %v15872_v32 = vadd.f32 %v3573_v59, %v3413_v12  ;;  %v3416_v4 = vpop.f32.mrf.mxu1  ;;  %v15877_v0 = vmul.f32 0.5, %v15686_v5  ;;  %v11619_v42 = vld [vmem:[%s18481_s3 + $0x448] ss:$48 sps:$4 sm:$0xff]  }
 0x35e   :  { %v15874_v47 = vpop.eup %12283  ;;  %12297 = verf.f32 %v5056_v18  ;;  %v3415_v9 = vadd.f32 %v3414_v3, %v15465_v46  ;;  %v3417_v1 = vadd.f32 %v3416_v4, %v15457_v44  ;;  %v5897_v12 = vmul.f32 %v5597_v21, %v4697_v39  ;;  %v3577_v40 = vpop.f32.mrf.mxu0  ;;  %v11627_v5 = vld [vmem:[%s18481_s3 + $0x3ec] ss:$48 sps:$4 sm:$0xff]   ;;  %v19007_v21 = vld [vmem:[#allocation39_spill] sm:$0xff] }
 0x35f   :  { %4297 = vmatpush2.bf16.msra.mxu1 %v11616_v45  ;;  %v12286_v16 = vpop.eup %12285  ;;  %v15884_v15 = vpack.c.bf16 %v5908_v49, %v5896_v56  ;;  %v5909_v59 = vmul.f32 %v5609_v22, %v4709_v60  ;;  %12299 = verf.f32 %v5057_v7  ;;  %v3418_v57 = vpop.f32.mrf.mxu1  ;;  %v5068_v45 = vmul.f32 0.70710677, %v15872_v32 }
 0x360   :  { %4298 = vmatprep.subr.bf16.mxu1 %v11621_v30  ;;  %v12288_v3 = vpop.eup %12287  ;;  %v15890_v18 = vadd.f32 %v3575_v54, %v3415_v9  ;;  %v15892_v4 = vadd.f32 %v3577_v40, %v3417_v1  ;;  %v15895_v39 = vadd.f32 1.0, %v15660_v19  ;;  %v15898_v56 = vmul.f32 0.5, %v19007_v21  ;;  %v3579_v49 = vpop.f32.mrf.mxu0  ;;  %v11625_v19 = vld [vmem:[%s18481_s3 + $0x3e8] ss:$48 sps:$4 sm:$0xff]  }
 0x361   :  { %19006 = vst [vmem:[#allocation108_spill] sm:$0xff] %v15884_v15  ;;  %v5620_v60 = vadd.f32 1.0, %v12286_v16  ;;  %v3419_v30 = vadd.f32 %v3418_v57, %v15465_v46  ;;  %v3422_v22 = vpop.f32.mrf.mxu1  ;;  %v15902_v7 = vpack.c.bf16 %v5909_v59, %v5897_v12  ;;  %12301 = verf.f32 %v5068_v45  ;;  %v11630_v57 = vld [vmem:[%s18481_s3 + $0x38c] ss:$48 sps:$4 sm:$0xff]  }
 0x362   :  { %4045 = vmatmul.mubr.bf16.gmra.mxu1 %v14112_v52  ;;  %v12290_v15 = vpop.eup %12289  ;;  %v5069_v54 = vmul.f32 0.70710677, %v15890_v18  ;;  %v15914_v9 = vpack.c.bf16 %v15797_v63, %v15602_v29  ;;  %v15918_v1 = vmul.f32 %v15808_v27, %v15584_v61  ;;  %v4720_v16 = vmul.f32 0.5, %v15779_v14  ;;  %v3583_v40 = vpop.f32.mrf.mxu0  ;;  %v19010_v45 = vld [vmem:[#allocation8_spill] sm:$0xff] }
 0x363   :  { %19008 = vst [vmem:[#allocation39_spill] sm:$0xff] %v15902_v7  ;;  %4054 = vmatprep.mubr.bf16.mxu1 %v14119_v36  ;;  %4299 = vmatpush2.bf16.msra.mxu1 %v11619_v42  ;;  %v4732_v42 = vmul.f32 0.5, %v15803_v37  ;;  %v5632_v12 = vadd.f32 1.0, %v12290_v15  ;;  %v5080_v59 = vmul.f32 0.70710677, %v15892_v4  ;;  %v3424_v7 = vpop.f32.mrf.mxu1  ;;  %v15924_v62 = vadd.f32 %v3579_v49, %v3419_v30 }
 0x364   :  { %19009 = vst [vmem:[#allocation109_spill] sm:$0xff] %v15914_v9  ;;  %4206 = vmatmul.mubr.bf16.gmra.mxu0 %v19010_v45  ;;  %4300 = vmatprep.subr.bf16.mxu1 %v11627_v5  ;;  %12303 = verf.f32 %v5069_v54  ;;  %v3423_v29 = vadd.f32 %v3422_v22, %v15457_v44  ;;  %v3425_v61 = vadd.f32 %v3424_v7, %v15465_v46  ;;  %v5621_v37 = vadd.f32 1.0, %v12288_v3  ;;  %v3585_v15 = vpop.f32.mrf.mxu0  ;;  %v11628_v22 = vld [vmem:[%s18481_s3 + $0x388] ss:$48 sps:$4 sm:$0xff]  }
 0x365   :  { %4215 = vmatprep.mubr.bf16.mxu0 %v18816_v55  ;;  %v12292_v14 = vpop.eup %12291  ;;  %v5920_v63 = vmul.f32 %v5620_v60, %v4720_v16  ;;  %v5932_v27 = vmul.f32 %v5632_v12, %v4732_v42  ;;  %12305 = verf.f32 %v5080_v59  ;;  %v3426_v2 = vpop.f32.mrf.mxu1  ;;  %v4733_v9 = vmul.f32 0.5, %v15824_v38  ;;  %v11636_v42 = vld [vmem:[%s18481_s3 + $0x32c] ss:$48 sps:$4 sm:$0xff]  }
 0x366   :  { %v12294_v20 = vpop.eup %12293  ;;  %v5633_v5 = vadd.f32 1.0, %v12292_v14  ;;  %v5081_v30 = vmul.f32 0.70710677, %v15924_v62  ;;  %v15931_v49 = vadd.f32 %v3583_v40, %v3423_v29  ;;  %v4721_v60 = vmul.f32 0.5, %v15781_v35  ;;  %v3587_v16 = vpop.f32.mrf.mxu0 }
 0x367   :  { %4301 = vmatpush2.bf16.msra.mxu1 %v11625_v19  ;;  %v15937_v3 = vpack.c.bf16 %v5932_v27, %v5920_v63  ;;  %v15939_v7 = vadd.f32 %v3585_v15, %v3425_v61  ;;  %v3427_v54 = vadd.f32 %v3426_v2, %v15457_v44  ;;  %v3428_v38 = vpop.f32.mrf.mxu1  ;;  %v15946_v19 = vmul.f32 0.70710677, %v19007_v21 }
 0x368   :  { %4302 = vmatprep.subr.bf16.mxu1 %v11630_v57  ;;  %v5933_v12 = vmul.f32 %v5633_v5, %v4733_v9  ;;  %12307 = verf.f32 %v5081_v30  ;;  %v5092_v35 = vmul.f32 0.70710677, %v15931_v49  ;;  %v5921_v40 = vmul.f32 %v5621_v37, %v4721_v60  ;;  %v3589_v14 = vpop.f32.mrf.mxu0  ;;  %v11645_v60 = vld [vmem:[#allocation2 + $0xac] ss:$12 sps:$4 sm:$0xff]  }
 0x369   :  { %19011 = vst [vmem:[#allocation8_spill] sm:$0xff] %v15937_v3  ;;  %v12296_v59 = vpop.eup %12295  ;;  %v4744_v29 = vmul.f32 0.5, %v15826_v31  ;;  %v5644_v61 = vadd.f32 1.0, %v12294_v20  ;;  %v5093_v2 = vmul.f32 0.70710677, %v15939_v7  ;;  %v3432_v57 = vpop.f32.mrf.mxu1  ;;  %v15952_v63 = vadd.f32 %v3587_v16, %v3427_v54 }
 0x36a   :  { %4055 = vmatmul.mubr.bf16.gmra.mxu1 %v14163_v10  ;;  %12309 = verf.f32 %v5092_v35  ;;  %v3429_v21 = vadd.f32 %v3428_v38, %v15465_v46  ;;  %v3433_v9 = vadd.f32 %v3432_v57, %v15457_v44  ;;  %v11634_v20 = vld [vmem:[%s18481_s3 + $0x328] ss:$48 sps:$4 sm:$0xff]   ;;  %v4745_v37 = vmul.f32 0.5, %v15837_v25  ;;  %v3593_v5 = vpop.f32.mrf.mxu0 }
 0x36b   :  { %4064 = vmatprep.mubr.bf16.mxu1 %v14167_v41  ;;  %4303 = vmatpush2.bf16.msra.mxu1 %v11628_v22  ;;  %v12298_v31 = vpop.eup %12297  ;;  %v4756_v27 = vmul.f32 0.5, %v15850_v26  ;;  %v4757_v15 = vmul.f32 0.5, %v15852_v50  ;;  %v3434_v30 = vpop.f32.mrf.mxu1  ;;  %v15964_v54 = vpack.c.bf16 %v5933_v12, %v5921_v40  ;;  %v5645_v16 = vadd.f32 1.0, %v12296_v59 }
 0x36c   :  { %4216 = vmatmul.mubr.bf16.gmra.mxu0 %v18924_v53  ;;  %4304 = vmatprep.subr.bf16.mxu1 %v11636_v42  ;;  %v12300_v22 = vpop.eup %12299  ;;  %v5656_v38 = vadd.f32 1.0, %v12298_v31  ;;  %v5104_v35 = vmul.f32 0.70710677, %v15952_v63  ;;  %v15967_v57 = vadd.f32 %v3589_v14, %v3429_v21  ;;  %12311 = verf.f32 %v5093_v2  ;;  %v3595_v3 = vpop.f32.mrf.mxu0  ;;  %v19013_v14 = vld [vmem:[#allocation45_spill] sm:$0xff] }
 0x36d   :  { %19012 = vst [vmem:[#allocation110_spill] sm:$0xff] %v15964_v54  ;;  %4225 = vmatprep.mubr.bf16.mxu0 %v18816_v55  ;;  %v5657_v25 = vadd.f32 1.0, %v12300_v22  ;;  %v15970_v26 = vadd.f32 %v3593_v5, %v3433_v9  ;;  %v3435_v50 = vadd.f32 %v3434_v30, %v15465_v46  ;;  %v3436_v42 = vpop.f32.mrf.mxu1  ;;  %v5944_v53 = vmul.f32 %v5644_v61, %v4744_v29 }
 0x36e   :  { %v5956_v12 = vmul.f32 %v5656_v38, %v4756_v27  ;;  %12313 = verf.f32 %v5104_v35  ;;  %v5105_v59 = vmul.f32 0.70710677, %v15967_v57  ;;  %v12302_v40 = vpop.eup %12301  ;;  %v2755_v21 = vadd.f32 %v19013_v14, %v14409_v23  ;;  %v3597_v9 = vpop.f32.mrf.mxu0 }
 0x36f   :  { %4305 = vmatpush2.bf16.msra.mxu1 %v11634_v20  ;;  %v5957_v31 = vmul.f32 %v5657_v25, %v4757_v15  ;;  %v5116_v22 = vmul.f32 0.70710677, %v15970_v26  ;;  %v15977_v2 = vadd.f32 %v3595_v3, %v3435_v50  ;;  %v3438_v5 = vpop.f32.mrf.mxu1  ;;  %v5945_v30 = vmul.f32 %v5645_v16, %v4745_v37 }
 0x370   :  { %8189 = vmatprep.subr.bf16.mxu1 %v11645_v60  ;;  %v15979_v54 = vpack.c.bf16 %v5956_v12, %v5944_v53  ;;  %12315 = verf.f32 %v5105_v59  ;;  %v3437_v29 = vadd.f32 %v3436_v42, %v15457_v44  ;;  %v5668_v20 = vadd.f32 1.0, %v12302_v40  ;;  %v3599_v38 = vpop.f32.mrf.mxu0  ;;  %v19015_v12 = vld [vmem:[#allocation9_spill] sm:$0xff] }
 0x371   :  { %v12304_v61 = vpop.eup %12303  ;;  %12317 = verf.f32 %v5116_v22  ;;  %v5117_v27 = vmul.f32 0.70710677, %v15977_v2  ;;  %v3439_v15 = vadd.f32 %v3438_v5, %v15465_v46  ;;  %v3442_v35 = vpop.f32.mrf.mxu1  ;;  %v4768_v60 = vmul.f32 0.5, %v15872_v32 }
 0x372   :  { %19014 = vst [vmem:[#allocation45_spill] sm:$0xff] %v15979_v54  ;;  %4065 = vmatmul.mubr.bf16.gmra.mxu1 %v14203_v33  ;;  %v12306_v3 = vpop.eup %12305  ;;  %v4780_v53 = vmul.f32 0.5, %v15892_v4  ;;  %v15987_v37 = vadd.f32 %v3597_v9, %v3437_v29  ;;  %v3443_v16 = vadd.f32 %v3442_v35, %v15457_v44  ;;  %v3603_v42 = vpop.f32.mrf.mxu0  ;;  %v15994_v40 = vpack.c.bf16 %v5957_v31, %v5945_v30 }
 0x373   :  { %4074 = vmatprep.mubr.bf16.mxu1 %v18925_v13  ;;  %v5680_v25 = vadd.f32 1.0, %v12306_v3  ;;  %12319 = verf.f32 %v5117_v27  ;;  %v15991_v50 = vadd.f32 %v3599_v38, %v3439_v15  ;;  %v3444_v59 = vpop.f32.mrf.mxu1  ;;  %v4769_v32 = vmul.f32 0.5, %v15890_v18 }
 0x374   :  { %4226 = vmatmul.mubr.bf16.gmra.mxu0 %v19015_v12  ;;  %19016 = vst [vmem:[#allocation111_spill] sm:$0xff] %v15994_v40  ;;  %v5669_v14 = vadd.f32 1.0, %v12304_v61  ;;  %v5128_v4 = vmul.f32 0.70710677, %v15987_v37  ;;  %v15998_v22 = vadd.f32 %v3603_v42, %v3443_v16  ;;  %v5968_v5 = vmul.f32 %v5668_v20, %v4768_v60  ;;  %v3605_v38 = vpop.f32.mrf.mxu0 }
 0x375   :  { %4235 = vmatprep.mubr.bf16.mxu0 %v18816_v55  ;;  %v12308_v9 = vpop.eup %12307  ;;  %v5980_v29 = vmul.f32 %v5680_v25, %v4780_v53  ;;  %v5129_v27 = vmul.f32 0.70710677, %v15991_v50  ;;  %v3445_v15 = vadd.f32 %v3444_v59, %v15465_v46  ;;  %v3446_v35 = vpop.f32.mrf.mxu1  ;;  %v4781_v31 = vmul.f32 0.5, %v15924_v62 }
 0x376   :  { %v5681_v30 = vadd.f32 1.0, %v12308_v9  ;;  %12321 = verf.f32 %v5128_v4  ;;  %v5140_v18 = vmul.f32 0.70710677, %v15998_v22  ;;  %v3447_v20 = vadd.f32 %v3446_v35, %v15457_v44  ;;  %v3607_v60 = vpop.f32.mrf.mxu0  ;;  %v19018_v4 = vld [vmem:[#allocation41_spill] sm:$0xff] }
 0x377   :  { %v12310_v61 = vpop.eup %12309  ;;  %v16005_v3 = vpack.c.bf16 %v5980_v29, %v5968_v5  ;;  %12323 = verf.f32 %v5129_v27  ;;  %v16007_v16 = vadd.f32 %v3605_v38, %v3445_v15  ;;  %v3448_v53 = vpop.f32.mrf.mxu1  ;;  %v5969_v25 = vmul.f32 %v5669_v14, %v4769_v32 }
 0x378   :  { %v5981_v42 = vmul.f32 %v5681_v30, %v4781_v31  ;;  %v3449_v59 = vadd.f32 %v3448_v53, %v15465_v46  ;;  %v16012_v62 = vadd.f32 1.0, %v15710_v51  ;;  %v16015_v9 = vadd.f32 %v19018_v4, %v2755_v21  ;;  %v3609_v27 = vpop.f32.mrf.mxu0  ;;  %v19019_v51 = vld [vmem:[#allocation14_spill] sm:$0xff] }
 0x379   :  { %19017 = vst [vmem:[#allocation112_spill] sm:$0xff] %v16005_v3  ;;  %12325 = verf.f32 %v5140_v18  ;;  %v5141_v5 = vmul.f32 0.70710677, %v16007_v16  ;;  %v16018_v29 = vadd.f32 %v3607_v60, %v3447_v20  ;;  %v3452_v15 = vpop.f32.mrf.mxu1  ;;  %v12312_v38 = vpop.eup %12311  ;;  %v5692_v32 = vadd.f32 1.0, %v12310_v61  ;;  %v19021_v60 = vld [vmem:[#allocation7_spill] sm:$0xff]  ;;  %v19022_v4 = vld [vmem:[#allocation34_spill] sm:$0xff] }
 0x37a   :  { %4075 = vmatmul.mubr.bf16.gmra.mxu1 %v14241_v6  ;;  %v16021_v14 = vadd.f32 %v3609_v27, %v3449_v59  ;;  %v3453_v35 = vadd.f32 %v3452_v15, %v15457_v44  ;;  %v16025_v31 = vpack.c.bf16 %v5981_v42, %v5969_v25  ;;  %v4792_v30 = vmul.f32 0.5, %v15931_v49  ;;  %v3613_v20 = vpop.f32.mrf.mxu0 }
 0x37b   :  { %4084 = vmatprep.mubr.bf16.mxu1 %v19019_v51  ;;  %v12314_v21 = vpop.eup %12313  ;;  %12327 = verf.f32 %v5141_v5  ;;  %v5152_v18 = vmul.f32 0.70710677, %v16018_v29  ;;  %v3454_v53 = vpop.f32.mrf.mxu1  ;;  %v1190_v61 = vsub.s32 6, %v19022_v4  ;;  %v4804_v59 = vmul.f32 0.5, %v15952_v63 }
 0x37c   :  { %19020 = vst [vmem:[#allocation41_spill] sm:$0xff] %v16025_v31  ;;  %4236 = vmatmul.mubr.bf16.gmra.mxu0 %v19021_v60  ;;  %v5704_v27 = vadd.f32 1.0, %v12314_v21  ;;  %v5153_v15 = vmul.f32 0.70710677, %v16021_v14  ;;  %v16033_v3 = vadd.f32 %v3613_v20, %v3453_v35  ;;  %v5693_v49 = vadd.f32 1.0, %v12312_v38  ;;  %v3615_v31 = vpop.f32.mrf.mxu0 }
 0x37d   :  { %4245 = vmatprep.mubr.bf16.mxu0 %v18816_v55  ;;  %v12316_v25 = vpop.eup %12315  ;;  %v4805_v42 = vmul.f32 0.5, %v15967_v57  ;;  %12329 = verf.f32 %v5152_v18  ;;  %v3455_v5 = vadd.f32 %v3454_v53, %v15465_v46  ;;  %v3456_v54 = vpop.f32.mrf.mxu1  ;;  %v5992_v60 = vmul.f32 %v5692_v32, %v4792_v30 }
 0x37e   :  { %v12318_v40 = vpop.eup %12317  ;;  %v6004_v51 = vmul.f32 %v5704_v27, %v4804_v59  ;;  %v5705_v63 = vadd.f32 1.0, %v12316_v25  ;;  %12331 = verf.f32 %v5153_v15  ;;  %v4793_v21 = vmul.f32 0.5, %v15939_v7  ;;  %v3617_v6 = vpop.f32.mrf.mxu0  ;;  %v19024_v15 = vld [vmem:[#allocation15_spill] sm:$0xff] }
 0x37f   :  { %v5164_v35 = vmul.f32 0.70710677, %v16033_v3  ;;  %v16040_v20 = vadd.f32 %v3615_v31, %v3455_v5  ;;  %v3457_v38 = vadd.f32 %v3456_v54, %v15457_v44  ;;  %v3458_v57 = vpop.f32.mrf.mxu1  ;;  %v1194_v32 = vsub.s32 7, %v19022_v4  ;;  %v12754_v54 = vld [vmem:[%s18482_s4] sm:$0xff] }
 0x380   :  { %v12320_v18 = vpop.eup %12319  ;;  %v16043_v12 = vpack.c.bf16 %v6004_v51, %v5992_v60  ;;  %v6005_v53 = vmul.f32 %v5705_v63, %v4805_v42  ;;  %v3459_v13 = vadd.f32 %v3458_v57, %v15465_v46  ;;  %v5993_v30 = vmul.f32 %v5693_v49, %v4793_v21  ;;  %v3619_v7 = vpop.f32.mrf.mxu0  ;;  %v19026_v57 = vld [vmem:[#allocation16_spill] sm:$0xff] }
 0x381   :  { %v5716_v59 = vadd.f32 1.0, %v12318_v40  ;;  %12333 = verf.f32 %v5164_v35  ;;  %v3462_v27 = vpop.f32.mrf.mxu1  ;;  %v16051_v31 = vrot.slane %v12754_v54, %v1190_v61  ;;  %v5165_v51 = vmul.f32 0.70710677, %v16040_v20  ;;  %v19025_v40 = vld [vmem:[#allocation11_spill] sm:$0xff] }
 0x382   :  { %19023 = vst [vmem:[#allocation113_spill] sm:$0xff] %v16043_v12  ;;  %4085 = vmatmul.mubr.bf16.gmra.mxu1 %v19024_v15  ;;  %v16054_v60 = vadd.f32 %v3617_v6, %v3457_v38  ;;  %v16056_v25 = vadd.f32 %v3619_v7, %v3459_v13  ;;  %v3463_v49 = vadd.f32 %v3462_v27, %v15457_v44  ;;  %v4816_v5 = vmul.f32 0.5, %v15970_v26  ;;  %v3623_v35 = vpop.f32.mrf.mxu0  ;;  %v19029_v15 = vld [vmem:[#allocation32_spill] sm:$0xff] }
 0x383   :  { %4094 = vmatprep.mubr.bf16.mxu1 %v19025_v40  ;;  %v12322_v42 = vpop.eup %12321  ;;  %v4817_v63 = vmul.f32 0.5, %v15977_v2  ;;  %v5717_v21 = vadd.f32 1.0, %v12320_v18  ;;  %v3464_v61 = vpop.f32.mrf.mxu1  ;;  %v16063_v12 = vpack.c.bf16 %v6005_v53, %v5993_v30  ;;  %v4828_v13 = vmul.f32 0.5, %v15987_v37 }
 0x384   :  { %4246 = vmatmul.mubr.bf16.gmra.mxu0 %v19026_v57  ;;  %v12324_v6 = vpop.eup %12323  ;;  %v5728_v38 = vadd.f32 1.0, %v12322_v42  ;;  %12335 = verf.f32 %v5165_v51  ;;  %v5176_v44 = vmul.f32 0.70710677, %v16054_v60  ;;  %v4829_v26 = vmul.f32 0.5, %v15991_v50  ;;  %v3625_v27 = vpop.f32.mrf.mxu0 }
 0x385   :  { %19027 = vst [vmem:[#allocation114_spill] sm:$0xff] %v16063_v12  ;;  %4255 = vmatprep.mubr.bf16.mxu0 %v18816_v55  ;;  %v5729_v7 = vadd.f32 1.0, %v12324_v6  ;;  %v5177_v2 = vmul.f32 0.70710677, %v16056_v25  ;;  %v16070_v18 = vadd.f32 %v3623_v35, %v3463_v49  ;;  %v3466_v4 = vpop.f32.mrf.mxu1  ;;  %v6016_v30 = vmul.f32 %v5716_v59, %v4816_v5 }
 0x386   :  { %v12326_v53 = vpop.eup %12325  ;;  %v6028_v12 = vmul.f32 %v5728_v38, %v4828_v13  ;;  %12337 = verf.f32 %v5176_v44  ;;  %v3465_v37 = vadd.f32 %v3464_v61, %v15465_v46  ;;  %v6017_v51 = vmul.f32 %v5717_v21, %v4817_v63  ;;  %v3627_v57 = vpop.f32.mrf.mxu0  ;;  %v19032_v46 = vld [vmem:[#allocation60_spill] sm:$0xff] }
 0x387   :  { %19028 = vst [vmem:[#allocation115_spill] sm:$0xff] %v16070_v18  ;;  %v6029_v42 = vmul.f32 %v5729_v7, %v4829_v26  ;;  %12339 = verf.f32 %v5177_v2  ;;  %v3467_v40 = vpop.f32.mrf.mxu1  ;;  %v16075_v50 = vmul.f32 %v15895_v39, %v19029_v15  ;;  %v16082_v59 = vrot.slane %v12754_v54, %v1194_v32  ;;  %v19034_v57 = vld [vmem:[#allocation101_spill] sm:$0xff]  ;;  %v19036_v61 = vld [vmem:[#allocation20_spill] sm:$0xff] }
 0x388   :  { %v12328_v6 = vpop.eup %12327  ;;  %12341 = verf.f32 %v15946_v19  ;;  %v16078_v49 = vpack.c.bf16 %v6028_v12, %v6016_v30  ;;  %v16080_v4 = vadd.f32 %v3625_v27, %v3465_v37  ;;  %v2765_v5 = vadd.f32 %v19032_v46, %v14409_v23  ;;  %v3628_v21 = vpop.f32.mrf.mxu0  ;;  %v19033_v40 = vld [vmem:[#allocation19_spill] sm:$0xff]  ;;  %v19037_v27 = vld [vmem:[#allocation13_spill] sm:$0xff] }
 0x389   :  { %v5740_v63 = vadd.f32 1.0, %v12326_v53  ;;  %v3664_v35 = vpop.f32.mrf.mxu1  ;;  %v16089_v39 = vmul.f32 %v16012_v62, %v19034_v57  ;;  %v16091_v15 = vpack.c.bf16 %v6029_v42, %v6017_v51  ;;  %v16094_v12 = vmul.f32 0.5, %v16015_v9 }
 0x38a   :  { %19030 = vst [vmem:[#allocation32_spill] sm:$0xff] %v16078_v49  ;;  %19031 = vst [vmem:[#allocation116_spill] sm:$0xff] %v16080_v4  ;;  %4095 = vmatmul.mubr.bf16.gmra.mxu1 %v19033_v40  ;;  %v12330_v19 = vpop.eup %12329  ;;  %v5029_v32 = vmul.f32 0.70710677, %v16015_v9  ;;  %v3665_v54 = vadd.f32 %v3664_v35, %v16051_v31  ;;  %v5581_v13 = vadd.f32 1.0, %v15776_v8  ;;  %v4840_v44 = vmul.f32 0.5, %v15998_v22  ;;  %v3825_v2 = vpop.f32.mrf.mxu0 }
 0x38b   :  { %19035 = vst [vmem:[#allocation60_spill] sm:$0xff] %v16091_v15  ;;  %4104 = vmatprep.mubr.bf16.mxu1 %v19036_v61  ;;  %v12332_v38 = vpop.eup %12331  ;;  %v5741_v26 = vadd.f32 1.0, %v12328_v6  ;;  %v4852_v62 = vmul.f32 0.5, %v16018_v29  ;;  %v5752_v7 = vadd.f32 1.0, %v12330_v19  ;;  %v3666_v53 = vpop.f32.mrf.mxu1  ;;  %v4853_v30 = vmul.f32 0.5, %v16021_v14  ;;  %v19038_v8 = vld [vmem:[#allocation44_spill] sm:$0xff] }
 0x38c   :  { %4256 = vmatmul.mubr.bf16.gmra.mxu0 %v19037_v27  ;;  %v5753_v9 = vadd.f32 1.0, %v12332_v38  ;;  %v16104_v37 = vadd.f32 %v3825_v2, %v3665_v54  ;;  %v3667_v51 = vadd.f32 %v3666_v53, %v16082_v59  ;;  %v16109_v42 = vadd.f32 %v19038_v8, %v2765_v5  ;;  %v3827_v46 = vpop.f32.mrf.mxu0  ;;  %v19039_v54 = vld [vmem:[#allocation59_spill] sm:$0xff]  ;;  %v19045_v49 = vld [vmem:[#allocation17_spill] sm:$0xff] }
 0x38d   :  { %4265 = vmatprep.mubr.bf16.mxu0 %v18816_v55  ;;  %v6040_v22 = vmul.f32 %v5740_v63, %v4840_v44  ;;  %v4841_v29 = vmul.f32 0.5, %v16007_v16  ;;  %v6052_v6 = vmul.f32 %v5752_v7, %v4852_v62  ;;  %v3668_v21 = vpop.f32.mrf.mxu1  ;;  %12343 = verf.f32 %v5029_v32  ;;  %v19041_v7 = vld [vmem:[#allocation40_spill] sm:$0xff] }
 0x38e   :  { %v12334_v35 = vpop.eup %12333  ;;  %v6053_v57 = vmul.f32 %v5753_v9, %v4853_v30  ;;  %v4902_v14 = vmul.f32 0.70710677, %v16104_v37  ;;  %v16113_v19 = vadd.f32 %v3827_v46, %v3667_v51  ;;  %v16116_v38 = vmul.f32 0.5, %v19039_v54  ;;  %v3829_v63 = vpop.f32.mrf.mxu0 }
 0x38f   :  { %v6041_v2 = vmul.f32 %v5741_v26, %v4841_v29  ;;  %v16118_v53 = vpack.c.bf16 %v6052_v6, %v6040_v22  ;;  %v3669_v5 = vadd.f32 %v3668_v21, %v16051_v31  ;;  %v3670_v16 = vpop.f32.mrf.mxu1  ;;  %v16122_v44 = vmul.f32 0.70710677, %v19039_v54  ;;  %v19042_v29 = vld [vmem:[#allocation18_spill] sm:$0xff]  ;;  %v19044_v54 = vld [vmem:[#allocation47_spill] sm:$0xff] }
 0x390   :  { %v4903_v32 = vmul.f32 0.70710677, %v16113_v19  ;;  %v3671_v62 = vadd.f32 %v3670_v16, %v16082_v59  ;;  %v16127_v30 = vmul.f32 %v5581_v13, %v19041_v7  ;;  %v16130_v51 = vmul.f32 0.70710677, %v16109_v42  ;;  %v3831_v8 = vpop.f32.mrf.mxu0 }
 0x391   :  { %19040 = vst [vmem:[#allocation19_spill] sm:$0xff] %v16118_v53  ;;  %v12336_v9 = vpop.eup %12335  ;;  %12345 = verf.f32 %v4902_v14  ;;  %v16132_v26 = vadd.f32 %v3829_v63, %v3669_v5  ;;  %v3674_v22 = vpop.f32.mrf.mxu1  ;;  %v16135_v6 = vpack.c.bf16 %v6053_v57, %v6041_v2  ;;  %v5764_v46 = vadd.f32 1.0, %v12334_v35 }
 0x392   :  { %4105 = vmatmul.mubr.bf16.gmra.mxu1 %v19042_v29  ;;  %12347 = verf.f32 %v4903_v32  ;;  %v16137_v21 = vadd.f32 %v3831_v8, %v3671_v62  ;;  %v3675_v13 = vadd.f32 %v3674_v22, %v16051_v31  ;;  %v4864_v7 = vmul.f32 0.5, %v16033_v3  ;;  %v3835_v53 = vpop.f32.mrf.mxu0 }
 0x393   :  { %19043 = vst [vmem:[#allocation101_spill] sm:$0xff] %v16135_v6  ;;  %4306 = vmatprep.mubr.bf16.mxu1 %v19044_v54  ;;  %v12338_v16 = vpop.eup %12337  ;;  %v4865_v14 = vmul.f32 0.5, %v16040_v20  ;;  %v5765_v5 = vadd.f32 1.0, %v12336_v9  ;;  %v4914_v63 = vmul.f32 0.70710677, %v16132_v26  ;;  %v3676_v57 = vpop.f32.mrf.mxu1  ;;  %v4876_v2 = vmul.f32 0.5, %v16054_v60 }
 0x394   :  { %4266 = vmatmul.mubr.bf16.gmra.mxu0 %v19045_v49  ;;  %v12340_v35 = vpop.eup %12339  ;;  %v5776_v32 = vadd.f32 1.0, %v12338_v16  ;;  %v4877_v62 = vmul.f32 0.5, %v16056_v25  ;;  %v4915_v8 = vmul.f32 0.70710677, %v16137_v21  ;;  %v16151_v9 = vadd.f32 %v3835_v53, %v3675_v13  ;;  %v3837_v54 = vpop.f32.mrf.mxu0  ;;  %v11643_v25 = vld [vmem:[#allocation2 + $0xa8] ss:$12 sps:$4 sm:$0xff]  }
 0x395   :  { %4467 = vmatprep.mubr.bf16.mxu0 %v18816_v55  ;;  %v16149_v3 = vpop.eup %12341  ;;  %v5777_v20 = vadd.f32 1.0, %v12340_v35  ;;  %12349 = verf.f32 %v4914_v63  ;;  %v3677_v22 = vadd.f32 %v3676_v57, %v16082_v59  ;;  %v3678_v6 = vpop.f32.mrf.mxu1  ;;  %v6064_v15 = vmul.f32 %v5764_v46, %v4864_v7  ;;  %v11648_v35 = vld [vmem:[#allocation2 + $0x94] ss:$12 sps:$4 sm:$0xff]  }
 0x396   :  { %v6076_v4 = vmul.f32 %v5776_v32, %v4876_v2  ;;  %12351 = verf.f32 %v4915_v8  ;;  %v3679_v60 = vadd.f32 %v3678_v6, %v16051_v31  ;;  %v6065_v16 = vmul.f32 %v5765_v5, %v4865_v14  ;;  %v3839_v29 = vpop.f32.mrf.mxu0  ;;  %v11658_v7 = vld [vmem:[#allocation2 + $0x228] ss:$12 sps:$4 sm:$0xff]   ;;  %v19048_v32 = vld [vmem:[#allocation49_spill] sm:$0xff] }
 0x397   :  { %v6077_v18 = vmul.f32 %v5777_v20, %v4877_v62  ;;  %v4926_v49 = vmul.f32 0.70710677, %v16151_v9  ;;  %v3680_v27 = vpop.f32.mrf.mxu1  ;;  %v5605_v53 = vadd.f32 1.0, %v15874_v47  ;;  %v16159_v63 = vadd.f32 %v3837_v54, %v3677_v22  ;;  %v19047_v6 = vld [vmem:[#allocation63_spill] sm:$0xff]  ;;  %v19052_v22 = vld [vmem:[#allocation48_spill] sm:$0xff] }
 0x398   :  { %v16157_v13 = vpack.c.bf16 %v6076_v4, %v6064_v15  ;;  %v16161_v57 = vadd.f32 %v3839_v29, %v3679_v60  ;;  %v3681_v46 = vadd.f32 %v3680_v27, %v16082_v59  ;;  %v5065_v2 = vmul.f32 0.70710677, %v19047_v6  ;;  %v3841_v14 = vpop.f32.mrf.mxu0  ;;  %v11666_v62 = vld [vmem:[#allocation2 + $0x214] ss:$12 sps:$4 sm:$0xff]   ;;  %v19050_v27 = vld [vmem:[#allocation50_spill] sm:$0xff] }
 0x399   :  { %12353 = verf.f32 %v4926_v49  ;;  %v3684_v5 = vpop.f32.mrf.mxu1  ;;  %v5593_v8 = vadd.f32 1.0, %v15869_v17  ;;  %v16167_v47 = vpack.c.bf16 %v6077_v18, %v6065_v16  ;;  %v4927_v4 = vmul.f32 0.70710677, %v16159_v63  ;;  %v11646_v29 = vld [vmem:[#allocation2 + $0x90] ss:$12 sps:$4 sm:$0xff]  }
 0x39a   :  { %19046 = vst [vmem:[#allocation20_spill] sm:$0xff] %v16157_v13  ;;  %4307 = vmatmul.mubr.bf16.vlgmr.msra.gmra.mxu1 %v19048_v32  ;;  %12355 = verf.f32 %v16122_v44  ;;  %v4938_v15 = vmul.f32 0.70710677, %v16161_v57  ;;  %v16175_v49 = vpack.c.bf16 %v16075_v50, %v15918_v1  ;;  %v16177_v20 = vpop.eup %12343  ;;  %v16180_v17 = vadd.f32 %v3841_v14, %v3681_v46  ;;  %v3845_v44 = vpop.f32.mrf.mxu0  ;;  %v11651_v60 = vld [vmem:[#allocation2 + $0x7c] ss:$12 sps:$4 sm:$0xff]  }
 0x39b   :  { %19049 = vst [vmem:[#allocation44_spill] sm:$0xff] %v16167_v47  ;;  %8190 = vmatpush1.bf16.msra.mxu1 %v11643_v25  ;;  %4316 = vmatprep.mubr.bf16.mxu1 %v19050_v27  ;;  %12357 = verf.f32 %v16130_v51  ;;  %v3685_v18 = vadd.f32 %v3684_v5, %v16051_v31  ;;  %v3686_v54 = vpop.f32.mrf.mxu1  ;;  %v16186_v25 = vpack.c.bf16 %v16127_v30, %v16089_v39  ;;  %v19054_v1 = vld [vmem:[#allocation64_spill] sm:$0xff]  ;;  %v16194_v14 = vmul.f32 0.5, %v16109_v42 }
 0x39c   :  { %19051 = vst [vmem:[#allocation59_spill] sm:$0xff] %v16175_v49  ;;  %4468 = vmatmul.mubr.bf16.vlgmr.msra.gmra.mxu0 %v19052_v22  ;;  %8191 = vmatprep.subr.bf16.mxu1 %v11648_v35  ;;  %v2775_v50 = vadd.f32 %v19054_v1, %v14409_v23  ;;  %12359 = verf.f32 %v4927_v4  ;;  %v3687_v51 = vadd.f32 %v3686_v54, %v16082_v59  ;;  %v11664_v16 = vld [vmem:[#allocation2 + $0x210] ss:$12 sps:$4 sm:$0xff]   ;;  %v4939_v35 = vmul.f32 0.70710677, %v16180_v17  ;;  %v3847_v30 = vpop.f32.mrf.mxu0  ;;  %v19056_v54 = vld [vmem:[#allocation62_spill] sm:$0xff] }
 0x39d   :  { %19053 = vst [vmem:[#allocation40_spill] sm:$0xff] %v16186_v25  ;;  %4477 = vmatprep.mubr.bf16.mxu0 %v18816_v55  ;;  %8351 = vmatpush1.bf16.msra.mxu0 %v11658_v7  ;;  %v5905_v46 = vmul.f32 %v5605_v53, %v15877_v0  ;;  %12361 = verf.f32 %v4938_v15  ;;  %v16197_v39 = vadd.f32 %v3845_v44, %v3685_v18  ;;  %v3688_v5 = vpop.f32.mrf.mxu1  ;;  %v11672_v32 = vld [vmem:[#allocation2 + $0x1fc] ss:$12 sps:$4 sm:$0xff]   ;;  %v11649_v0 = vld [vmem:[#allocation2 + $0x78] ss:$12 sps:$4 sm:$0xff]   ;;  %v16204_v15 = vmul.f32 0.5, %v19047_v6 }
 0x39e   :  { %8352 = vmatprep.subr.bf16.mxu0 %v11666_v62  ;;  %v12346_v4 = vpop.eup %12345  ;;  %12363 = verf.f32 %v5065_v2  ;;  %v16199_v27 = vadd.f32 %v3847_v30, %v3687_v51  ;;  %v3689_v7 = vadd.f32 %v3688_v5, %v16051_v31  ;;  %v5893_v42 = vmul.f32 %v5593_v8, %v15788_v34  ;;  %v3849_v44 = vpop.f32.mrf.mxu0  ;;  %v11654_v22 = vld [vmem:[#allocation2 + $0x64] ss:$12 sps:$4 sm:$0xff]  }
 0x39f   :  { %8192 = vmatpush1.bf16.msra.mxu1 %v11646_v29  ;;  %v12348_v53 = vpop.eup %12347  ;;  %19055 = vst [vmem:[#allocation47_spill] sm:$0xff] %v16204_v15  ;;  %12365 = verf.f32 %v4939_v35  ;;  %v4950_v18 = vmul.f32 0.70710677, %v16197_v39  ;;  %v3690_v62 = vpop.f32.mrf.mxu1  ;;  %v5617_v2 = vadd.f32 1.0, %v16149_v3  ;;  %v16209_v1 = vadd.f32 %v19056_v54, %v2775_v50  ;;  %v11670_v8 = vld [vmem:[#allocation2 + $0x1f8] ss:$12 sps:$4 sm:$0xff]  }
 0x3a0   :  { %8193 = vmatprep.subr.bf16.mxu1 %v11651_v60  ;;  %v4602_v29 = vmul.f32 0.5, %v16104_v37  ;;  %v4951_v34 = vmul.f32 0.70710677, %v16199_v27  ;;  %v16213_v6 = vpack.c.bf16 %v5905_v46, %v5893_v42  ;;  %v5502_v51 = vadd.f32 1.0, %v12346_v4  ;;  %v3851_v30 = vpop.f32.mrf.mxu0  ;;  %v19058_v3 = vld [vmem:[#allocation52_spill] sm:$0xff]  ;;  %v19059_v4 = vld [vmem:[#allocation53_spill] sm:$0xff] }
 0x3a1   :  { %8353 = vmatpush1.bf16.msra.mxu0 %v11664_v16  ;;  %12367 = verf.f32 %v4950_v18  ;;  %v16215_v35 = vadd.f32 %v3849_v44, %v3689_v7  ;;  %v3691_v60 = vadd.f32 %v3690_v62, %v16082_v59  ;;  %v3694_v5 = vpop.f32.mrf.mxu1  ;;  %v11678_v50 = vld [vmem:[#allocation2 + $0x1e4] ss:$12 sps:$4 sm:$0xff]   ;;  %v4603_v37 = vmul.f32 0.5, %v16113_v19  ;;  %v11652_v7 = vld [vmem:[#allocation2 + $0x60] ss:$12 sps:$4 sm:$0xff]  }
 0x3a2   :  { %19057 = vst [vmem:[#allocation63_spill] sm:$0xff] %v16213_v6  ;;  %4317 = vmatmul.mubr.bf16.gmra.mxu1 %v19058_v3  ;;  %8354 = vmatprep.subr.bf16.mxu0 %v11672_v32  ;;  %v12350_v54 = vpop.eup %12349  ;;  %v5503_v13 = vadd.f32 1.0, %v12348_v53  ;;  %v4614_v16 = vmul.f32 0.5, %v16132_v26  ;;  %v3695_v46 = vadd.f32 %v3694_v5, %v16051_v31  ;;  %12369 = verf.f32 %v4951_v34  ;;  %v3855_v32 = vpop.f32.mrf.mxu0  ;;  %v19060_v3 = vld [vmem:[#allocation51_spill] sm:$0xff]  ;;  %v11657_v53 = vld [vmem:[#allocation2 + $0x4c] ss:$12 sps:$4 sm:$0xff]  }
 0x3a3   :  { %4326 = vmatprep.mubr.bf16.mxu1 %v19059_v4  ;;  %8194 = vmatpush1.bf16.msra.mxu1 %v11649_v0  ;;  %v12352_v42 = vpop.eup %12351  ;;  %v5514_v18 = vadd.f32 1.0, %v12350_v54  ;;  %v4962_v44 = vmul.f32 0.70710677, %v16215_v35  ;;  %v16224_v62 = vadd.f32 %v3851_v30, %v3691_v60  ;;  %v3696_v19 = vpop.f32.mrf.mxu1  ;;  %v4615_v26 = vmul.f32 0.5, %v16137_v21  ;;  %v11676_v34 = vld [vmem:[#allocation2 + $0x1e0] ss:$12 sps:$4 sm:$0xff]  }
 0x3a4   :  { %4478 = vmatmul.mubr.bf16.gmra.mxu0 %v19060_v3  ;;  %8195 = vmatprep.subr.bf16.mxu1 %v11654_v22  ;;  %v5515_v5 = vadd.f32 1.0, %v12352_v42  ;;  %v16228_v47 = vadd.f32 %v3855_v32, %v3695_v46  ;;  %v3697_v0 = vadd.f32 %v3696_v19, %v16082_v59  ;;  %v5802_v54 = vmul.f32 %v5502_v51, %v4602_v29  ;;  %v3857_v4 = vpop.f32.mrf.mxu0  ;;  %v11684_v22 = vld [vmem:[#allocation2 + $0x1cc] ss:$12 sps:$4 sm:$0xff]   ;;  %v11655_v32 = vld [vmem:[#allocation2 + $0x48] ss:$12 sps:$4 sm:$0xff]  }
 0x3a5   :  { %4487 = vmatprep.mubr.bf16.mxu0 %v18816_v55  ;;  %8355 = vmatpush1.bf16.msra.mxu0 %v11670_v8  ;;  %v5814_v60 = vmul.f32 %v5514_v18, %v4614_v16  ;;  %12371 = verf.f32 %v4962_v44  ;;  %v4963_v30 = vmul.f32 0.70710677, %v16224_v62  ;;  %v3698_v3 = vpop.f32.mrf.mxu1  ;;  %v16237_v8 = vmul.f32 %v5617_v2, %v15898_v56  ;;  %v11663_v19 = vld [vmem:[#allocation2 + $0x34] ss:$12 sps:$4 sm:$0xff]  }
 0x3a6   :  { %8356 = vmatprep.subr.bf16.mxu0 %v11678_v50  ;;  %v12354_v6 = vpop.eup %12353  ;;  %v5815_v21 = vmul.f32 %v5515_v5, %v4615_v26  ;;  %v4974_v46 = vmul.f32 0.70710677, %v16228_v47  ;;  %v16234_v42 = vadd.f32 %v3857_v4, %v3697_v0  ;;  %v5803_v51 = vmul.f32 %v5503_v13, %v4603_v37  ;;  %v3859_v18 = vpop.f32.mrf.mxu0  ;;  %v11682_v2 = vld [vmem:[#allocation2 + $0x1c8] ss:$12 sps:$4 sm:$0xff]  }
 0x3a7   :  { %8196 = vmatpush1.bf16.msra.mxu1 %v11652_v7  ;;  %v16239_v29 = vpop.eup %12355  ;;  %v16241_v16 = vpack.c.bf16 %v5814_v60, %v5802_v54  ;;  %12373 = verf.f32 %v4963_v30  ;;  %v3699_v50 = vadd.f32 %v3698_v3, %v16051_v31  ;;  %v3700_v44 = vpop.f32.mrf.mxu1  ;;  %v5526_v5 = vadd.f32 1.0, %v12354_v6  ;;  %v19063_v30 = vld [vmem:[#allocation55_spill] sm:$0xff] }
 0x3a8   :  { %8197 = vmatprep.subr.bf16.mxu1 %v11657_v53  ;;  %v16244_v26 = vpop.eup %12357  ;;  %12375 = verf.f32 %v4974_v46  ;;  %v4975_v7 = vmul.f32 0.70710677, %v16234_v42  ;;  %v3701_v56 = vadd.f32 %v3700_v44, %v16082_v59  ;;  %v16249_v37 = vmul.f32 0.5, %v16209_v1  ;;  %v3861_v53 = vpop.f32.mrf.mxu0  ;;  %v11690_v6 = vld [vmem:[#allocation2 + $0x1b4] ss:$12 sps:$4 sm:$0xff]  }
 0x3a9   :  { %19061 = vst [vmem:[#allocation49_spill] sm:$0xff] %v16241_v16  ;;  %8357 = vmatpush1.bf16.msra.mxu0 %v11676_v34  ;;  %v12360_v13 = vpop.eup %12359  ;;  %v4626_v0 = vmul.f32 0.5, %v16151_v9  ;;  %v16252_v54 = vadd.f32 %v3859_v18, %v3699_v50  ;;  %v3704_v60 = vpop.f32.mrf.mxu1  ;;  %v16255_v4 = vpack.c.bf16 %v5815_v21, %v5803_v51  ;;  %v4627_v34 = vmul.f32 0.5, %v16159_v63  ;;  %v19065_v16 = vld [vmem:[#allocation56_spill] sm:$0xff]  ;;  %v19067_v63 = vld [vmem:[#allocation54_spill] sm:$0xff] }
 0x3aa   :  { %19062 = vst [vmem:[#allocation50_spill] sm:$0xff] %v16249_v37  ;;  %4327 = vmatmul.mubr.bf16.gmra.mxu1 %v19063_v30  ;;  %8358 = vmatprep.subr.bf16.mxu0 %v11684_v22  ;;  %v12362_v3 = vpop.eup %12361  ;;  %12377 = verf.f32 %v4975_v7  ;;  %v16258_v46 = vadd.f32 %v3861_v53, %v3701_v56  ;;  %v3705_v44 = vadd.f32 %v3704_v60, %v16051_v31  ;;  %v11661_v9 = vld [vmem:[#allocation2 + $0x30] ss:$12 sps:$4 sm:$0xff]   ;;  %v5527_v30 = vadd.f32 1.0, %v12360_v13 }
 0x3ab   :  { %19064 = vst [vmem:[#allocation48_spill] sm:$0xff] %v16255_v4  ;;  %4336 = vmatprep.mubr.bf16.mxu1 %v19065_v16  ;;  %8198 = vmatpush1.bf16.msra.mxu1 %v11655_v32  ;;  %v11669_v50 = vld [vmem:[#allocation2 + $0x1c] ss:$12 sps:$4 sm:$0xff]   ;;  %v16262_v18 = vpop.eup %12363  ;;  %v4638_v22 = vmul.f32 0.5, %v16161_v57  ;;  %v5538_v21 = vadd.f32 1.0, %v12362_v3  ;;  %v3865_v4 = vpop.f32.mrf.mxu0  ;;  %v5826_v53 = vmul.f32 %v5526_v5, %v4626_v0  ;;  %v4639_v16 = vmul.f32 0.5, %v16180_v17 }
 0x3ac   :  { %19066 = vst [vmem:[#allocation64_spill] sm:$0xff] %v16262_v18  ;;  %v4986_v51 = vmul.f32 0.70710677, %v16252_v54  ;;  %4488 = vmatmul.mubr.bf16.gmra.mxu0 %v19067_v63  ;;  %v3706_v7 = vpop.f32.mrf.mxu1  ;;  %8199 = vmatprep.subr.bf16.mxu1 %v11663_v19  ;;  %v12366_v56 = vpop.eup %12365  ;;  %v4987_v32 = vmul.f32 0.70710677, %v16258_v46  ;;  %v16269_v60 = vadd.f32 %v3865_v4, %v3705_v44  ;;  %v5827_v44 = vmul.f32 %v5527_v30, %v4627_v34 }
 0x3ad   :  { %4497 = vmatprep.mubr.bf16.mxu0 %v18816_v55  ;;  %8359 = vmatpush1.bf16.msra.mxu0 %v11682_v2  ;;  %v11688_v57 = vld [vmem:[#allocation2 + $0x1b0] ss:$12 sps:$4 sm:$0xff]   ;;  %v5838_v13 = vmul.f32 %v5538_v21, %v4638_v22  ;;  %v5539_v3 = vadd.f32 1.0, %v12366_v56  ;;  %v3707_v25 = vadd.f32 %v3706_v7, %v16082_v59  ;;  %v3867_v63 = vpop.f32.mrf.mxu0  ;;  %v16274_v17 = vmul.f32 0.70710677, %v16209_v1 }
 0x3ae   :  { %12379 = verf.f32 %v4986_v51  ;;  %v3708_v49 = vpop.f32.mrf.mxu1  ;;  %8360 = vmatprep.subr.bf16.mxu0 %v11690_v6  ;;  %v11696_v19 = vld [vmem:[#allocation2 + $0x19c] ss:$12 sps:$4 sm:$0xff]   ;;  %v12368_v5 = vpop.eup %12367  ;;  %v4998_v0 = vmul.f32 0.70710677, %v16269_v60  ;;  %v11667_v2 = vld [vmem:[#allocation2 + $0x18] ss:$12 sps:$4 sm:$0xff]  }
 0x3af   :  { %12381 = verf.f32 %v4987_v32  ;;  %v3709_v4 = vadd.f32 %v3708_v49, %v16051_v31  ;;  %8200 = vmatpush1.bf16.msra.mxu1 %v11661_v9  ;;  %v16278_v22 = vpack.c.bf16 %v5838_v13, %v5826_v53  ;;  %v5839_v21 = vmul.f32 %v5539_v3, %v4639_v16  ;;  %v3869_v7 = vpop.f32.mrf.mxu0  ;;  %v11675_v56 = vld [vmem:[#allocation2 + $0x4] ss:$12 sps:$4 sm:$0xff]   ;;  %v12370_v37 = vpop.eup %12369 }
 0x3b0   :  { %v16280_v51 = vadd.f32 %v3867_v63, %v3707_v25  ;;  %v3710_v6 = vpop.f32.mrf.mxu1  ;;  %8201 = vmatprep.subr.bf16.mxu1 %v11669_v50  ;;  %12383 = verf.f32 %v4998_v0  ;;  %v11694_v49 = vld [vmem:[#allocation2 + $0x198] ss:$12 sps:$4 sm:$0xff]   ;;  %v16286_v9 = vadd.f32 1.0, %v16177_v20  ;;  %v4650_v34 = vmul.f32 0.5, %v16197_v39  ;;  %v19069_v50 = vld [vmem:[#allocation58_spill] sm:$0xff] }
 0x3b1   :  { %19068 = vst [vmem:[#allocation62_spill] sm:$0xff] %v16278_v22  ;;  %v16282_v1 = vadd.f32 %v3869_v7, %v3709_v4  ;;  %v3711_v32 = vadd.f32 %v3710_v6, %v16082_v59  ;;  %8361 = vmatpush1.bf16.msra.mxu0 %v11688_v57  ;;  %v5550_v30 = vadd.f32 1.0, %v12368_v5  ;;  %v3871_v53 = vpop.f32.mrf.mxu0  ;;  %v11699_v13 = vld [vmem:[#allocation2 + $0x184] ss:$12 sps:$4 sm:$0xff]   ;;  %v16291_v3 = vpack.c.bf16 %v5839_v21, %v5827_v44  ;;  %v19071_v39 = vld [vmem:[#allocation6_spill] sm:$0xff] }
 0x3b2   :  { %v4999_v25 = vmul.f32 0.70710677, %v16280_v51  ;;  %v3714_v16 = vpop.f32.mrf.mxu1  ;;  %4337 = vmatmul.mubr.bf16.gmra.mxu1 %v19069_v50  ;;  %8362 = vmatprep.subr.bf16.mxu0 %v11696_v19  ;;  %v12372_v63 = vpop.eup %12371  ;;  %v4651_v57 = vmul.f32 0.5, %v16199_v27  ;;  %v4662_v0 = vmul.f32 0.5, %v16215_v35  ;;  %v11673_v5 = vld [vmem:[#allocation2] ss:$12 sps:$4 sm:$0xff]  }
 0x3b3   :  { %19070 = vst [vmem:[#allocation52_spill] sm:$0xff] %v16291_v3  ;;  %v5010_v20 = vmul.f32 0.70710677, %v16282_v1  ;;  %v16296_v4 = vadd.f32 %v3871_v53, %v3711_v32  ;;  %4346 = vmatprep.mubr.bf16.mxu1 %v19071_v39  ;;  %8202 = vmatpush1.bf16.msra.mxu1 %v11667_v2  ;;  %v5551_v7 = vadd.f32 1.0, %v12370_v37  ;;  %v5562_v6 = vadd.f32 1.0, %v12372_v63  ;;  %v3875_v44 = vpop.f32.mrf.mxu0  ;;  %v19072_v21 = vld [vmem:[#allocation57_spill] sm:$0xff] }
 0x3b4   :  { %12385 = verf.f32 %v4999_v25  ;;  %v3715_v19 = vadd.f32 %v3714_v16, %v16051_v31  ;;  %4498 = vmatmul.mubr.bf16.gmra.mxu0 %v19072_v21  ;;  %v3716_v50 = vpop.f32.mrf.mxu1  ;;  %8203 = vmatprep.subr.bf16.mxu1 %v11675_v56  ;;  %v11681_v27 = vld [vmem:[#allocation2 + $0x16c] ss:$12 sps:$4 sm:$0xff]   ;;  %v12374_v35 = vpop.eup %12373  ;;  %v4663_v22 = vmul.f32 0.5, %v16224_v62  ;;  %v5850_v53 = vmul.f32 %v5550_v30, %v4650_v34  ;;  %v19073_v62 = vld [vmem:[#allocation67_spill] sm:$0xff] }
 0x3b5   :  { %12387 = verf.f32 %v5010_v20  ;;  %v5011_v32 = vmul.f32 0.70710677, %v16296_v4  ;;  %v3717_v2 = vadd.f32 %v3716_v50, %v16082_v59  ;;  %4507 = vmatprep.mubr.bf16.mxu0 %v18816_v55  ;;  %8363 = vmatpush1.bf16.msra.mxu0 %v11694_v49  ;;  %v11697_v37 = vld [vmem:[#allocation2 + $0x180] ss:$12 sps:$4 sm:$0xff]   ;;  %v12376_v25 = vpop.eup %12375  ;;  %v5862_v16 = vmul.f32 %v5562_v6, %v4662_v0  ;;  %v3877_v56 = vpop.f32.mrf.mxu0  ;;  %v11679_v49 = vld [vmem:[#allocation2 + $0x168] ss:$12 sps:$4 sm:$0xff]  }
 0x3b6   :  { %v5563_v63 = vadd.f32 1.0, %v12374_v35  ;;  %v16305_v39 = vadd.f32 %v3875_v44, %v3715_v19  ;;  %v3718_v21 = vpop.f32.mrf.mxu1  ;;  %8364 = vmatprep.subr.bf16.mxu0 %v11699_v13  ;;  %v11705_v3 = vld [vmem:[#allocation2 + $0x2ec] ss:$12 sps:$4 sm:$0xff]   ;;  %v16308_v20 = vmul.f32 0.5, %v19073_v62  ;;  %v5851_v34 = vmul.f32 %v5551_v7, %v4651_v57  ;;  %v11687_v44 = vld [vmem:[#allocation2 + $0x154] ss:$12 sps:$4 sm:$0xff]  }
 0x3b7   :  { %12389 = verf.f32 %v5011_v32  ;;  %v16310_v15 = vadd.f32 %v3877_v56, %v3717_v2  ;;  %v3719_v50 = vadd.f32 %v3718_v21, %v16051_v31  ;;  %8204 = vmatpush1.bf16.msra.mxu1 %v11673_v5  ;;  %v12378_v18 = vpop.eup %12377  ;;  %v16313_v30 = vpack.c.bf16 %v5862_v16, %v5850_v53  ;;  %v3879_v19 = vpop.f32.mrf.mxu0  ;;  %v11703_v5 = vld [vmem:[#allocation2 + $0x2e8] ss:$12 sps:$4 sm:$0xff]   ;;  %v11685_v56 = vld [vmem:[#allocation2 + $0x150] ss:$12 sps:$4 sm:$0xff]  }
 0x3b8   :  { %v5863_v0 = vmul.f32 %v5563_v63, %v4663_v22  ;;  %v5022_v6 = vmul.f32 0.70710677, %v16305_v39  ;;  %v3720_v13 = vpop.f32.mrf.mxu1  ;;  %8205 = vmatprep.subr.bf16.mxu1 %v11681_v27  ;;  %12391 = verf.f32 %v16274_v17  ;;  %v4674_v35 = vmul.f32 0.5, %v16228_v47  ;;  %v11711_v27 = vld [vmem:[#allocation2 + $0x2d4] ss:$12 sps:$4 sm:$0xff]  }
 0x3b9   :  { %19074 = vst [vmem:[#allocation53_spill] sm:$0xff] %v16313_v30  ;;  %v5574_v32 = vadd.f32 1.0, %v12376_v25  ;;  %v5023_v2 = vmul.f32 0.70710677, %v16310_v15  ;;  %8365 = vmatpush1.bf16.msra.mxu0 %v11697_v37  ;;  %v16319_v57 = vadd.f32 %v3879_v19, %v3719_v50  ;;  %v3721_v22 = vadd.f32 %v3720_v13, %v16082_v59  ;;  %v3881_v7 = vpop.f32.mrf.mxu0 }
 0x3ba   :  { %12393 = verf.f32 %v5022_v6  ;;  %v3724_v53 = vpop.f32.mrf.mxu1  ;;  %4347 = vmatmul.mubr.bf16.gmra.mxu1 %v14019_v24  ;;  %8366 = vmatprep.subr.bf16.mxu0 %v11705_v3  ;;  %v16323_v16 = vpack.c.bf16 %v5863_v0, %v5851_v34  ;;  %v4675_v47 = vmul.f32 0.5, %v16234_v42  ;;  %v5575_v25 = vadd.f32 1.0, %v12378_v18  ;;  %v11693_v18 = vld [vmem:[#allocation2 + $0x13c] ss:$12 sps:$4 sm:$0xff]  }
 0x3bb   :  { %v12380_v17 = vpop.eup %12379  ;;  %v4686_v37 = vmul.f32 0.5, %v16252_v54  ;;  %v3725_v63 = vadd.f32 %v3724_v53, %v16051_v31  ;;  %4356 = vmatprep.mubr.bf16.mxu1 %v14026_v43  ;;  %8206 = vmatpush2.bf16.msra.mxu1 %v11679_v49  ;;  %12395 = verf.f32 %v5023_v2  ;;  %v5034_v24 = vmul.f32 0.70710677, %v16319_v57  ;;  %v3885_v34 = vpop.f32.mrf.mxu0  ;;  %v11709_v49 = vld [vmem:[#allocation2 + $0x2d0] ss:$12 sps:$4 sm:$0xff]  }
 0x3bc   :  { %19075 = vst [vmem:[#allocation51_spill] sm:$0xff] %v16323_v16  ;;  %v12382_v21 = vpop.eup %12381  ;;  %v5586_v50 = vadd.f32 1.0, %v12380_v17  ;;  %v16330_v3 = vadd.f32 %v3881_v7, %v3721_v22  ;;  %4508 = vmatmul.mubr.bf16.gmra.mxu0 %v14008_v28  ;;  %v3726_v42 = vpop.f32.mrf.mxu1  ;;  %8207 = vmatprep.subr.bf16.mxu1 %v11687_v44  ;;  %v4687_v54 = vmul.f32 0.5, %v16258_v46  ;;  %v5874_v13 = vmul.f32 %v5574_v32, %v4674_v35  ;;  %v11714_v7 = vld [vmem:[#allocation2 + $0x2bc] ss:$12 sps:$4 sm:$0xff]  }
 0x3bd   :  { %v5587_v0 = vadd.f32 1.0, %v12382_v21  ;;  %v16334_v6 = vadd.f32 %v3885_v34, %v3725_v63  ;;  %v3727_v43 = vadd.f32 %v3726_v42, %v16082_v59  ;;  %4517 = vmatprep.mubr.bf16.mxu0 %v18816_v55  ;;  %8367 = vmatpush2.bf16.msra.mxu0 %v11703_v5  ;;  %v12384_v19 = vpop.eup %12383  ;;  %12397 = verf.f32 %v5034_v24  ;;  %v3887_v22 = vpop.f32.mrf.mxu0  ;;  %v11691_v5 = vld [vmem:[#allocation2 + $0x138] ss:$12 sps:$4 sm:$0xff]  }
 0x3be   :  { %v5886_v2 = vmul.f32 %v5586_v50, %v4686_v37  ;;  %v5035_v28 = vmul.f32 0.70710677, %v16330_v3  ;;  %v3728_v44 = vpop.f32.mrf.mxu1  ;;  %8368 = vmatprep.subr.bf16.mxu0 %v11711_v27  ;;  %v16340_v46 = vmul.f32 0.70710677, %v19073_v62  ;;  %v5875_v53 = vmul.f32 %v5575_v25, %v4675_v47  ;;  %v11702_v27 = vld [vmem:[#allocation2 + $0x124] ss:$12 sps:$4 sm:$0xff]  }
 0x3bf   :  { %v5887_v17 = vmul.f32 %v5587_v0, %v4687_v54  ;;  %v5046_v63 = vmul.f32 0.70710677, %v16334_v6  ;;  %8208 = vmatpush2.bf16.msra.mxu1 %v11685_v56  ;;  %v16345_v35 = vadd.f32 %v3887_v22, %v3727_v43  ;;  %v3729_v32 = vadd.f32 %v3728_v44, %v16051_v31  ;;  %v3889_v37 = vpop.f32.mrf.mxu0  ;;  %v11712_v56 = vld [vmem:[#allocation2 + $0x2b8] ss:$12 sps:$4 sm:$0xff]   ;;  %v11700_v22 = vld [vmem:[#allocation2 + $0x120] ss:$12 sps:$4 sm:$0xff]  }
 0x3c0   :  { %v16343_v21 = vpack.c.bf16 %v5886_v2, %v5874_v13  ;;  %12399 = verf.f32 %v5035_v28  ;;  %v3730_v50 = vpop.f32.mrf.mxu1  ;;  %8209 = vmatprep.subr.bf16.mxu1 %v11693_v18  ;;  %v4698_v62 = vmul.f32 0.5, %v16269_v60  ;;  %v5598_v47 = vadd.f32 1.0, %v12384_v19  ;;  %v11720_v60 = vld [vmem:[#allocation2 + $0x2a4] ss:$12 sps:$4 sm:$0xff]  }
 0x3c1   :  { %v12386_v24 = vpop.eup %12385  ;;  %v3731_v25 = vadd.f32 %v3730_v50, %v16082_v59  ;;  %8369 = vmatpush2.bf16.msra.mxu0 %v11709_v49  ;;  %v16350_v34 = vpack.c.bf16 %v5887_v17, %v5875_v53  ;;  %12401 = verf.f32 %v5046_v63  ;;  %v5047_v0 = vmul.f32 0.70710677, %v16345_v35  ;;  %v3891_v13 = vpop.f32.mrf.mxu0  ;;  %v11708_v63 = vld [vmem:[#allocation2 + $0x10c] ss:$12 sps:$4 sm:$0xff]  }
 0x3c2   :  { %19076 = vst [vmem:[#allocation55_spill] sm:$0xff] %v16343_v21  ;;  %v12388_v42 = vpop.eup %12387  ;;  %v5599_v54 = vadd.f32 1.0, %v12386_v24  ;;  %v16353_v43 = vadd.f32 %v3889_v37, %v3729_v32  ;;  %v3734_v18 = vpop.f32.mrf.mxu1  ;;  %4357 = vmatmul.mubr.bf16.gmra.mxu1 %v14065_v48  ;;  %8370 = vmatprep.subr.bf16.mxu0 %v11714_v7  ;;  %v4710_v19 = vmul.f32 0.5, %v16282_v1  ;;  %v4699_v53 = vmul.f32 0.5, %v16280_v51  ;;  %v11718_v51 = vld [vmem:[#allocation2 + $0x2a0] ss:$12 sps:$4 sm:$0xff]  }
 0x3c3   :  { %19077 = vst [vmem:[#allocation56_spill] sm:$0xff] %v16350_v34  ;;  %v5610_v2 = vadd.f32 1.0, %v12388_v42  ;;  %v16357_v49 = vadd.f32 %v3891_v13, %v3731_v25  ;;  %v3735_v28 = vadd.f32 %v3734_v18, %v16051_v31  ;;  %4366 = vmatprep.mubr.bf16.mxu1 %v14072_v58  ;;  %8210 = vmatpush2.bf16.msra.mxu1 %v11691_v5  ;;  %v4711_v17 = vmul.f32 0.5, %v16296_v4  ;;  %v3895_v7 = vpop.f32.mrf.mxu0  ;;  %v11706_v13 = vld [vmem:[#allocation2 + $0x108] ss:$12 sps:$4 sm:$0xff]  }
 0x3c4   :  { %v12390_v44 = vpop.eup %12389  ;;  %12403 = verf.f32 %v5047_v0  ;;  %v5058_v48 = vmul.f32 0.70710677, %v16353_v43  ;;  %4518 = vmatmul.mubr.bf16.gmra.mxu0 %v14060_v11  ;;  %v3736_v1 = vpop.f32.mrf.mxu1  ;;  %8211 = vmatprep.subr.bf16.mxu1 %v11702_v27  ;;  %v5898_v32 = vmul.f32 %v5598_v47, %v4698_v62  ;;  %v5899_v4 = vmul.f32 %v5599_v54, %v4699_v53  ;;  %v11723_v62 = vld [vmem:[#allocation2 + $0x28c] ss:$12 sps:$4 sm:$0xff]  }
 0x3c5   :  { %v5910_v37 = vmul.f32 %v5610_v2, %v4710_v19  ;;  %v5611_v50 = vadd.f32 1.0, %v12390_v44  ;;  %v5059_v58 = vmul.f32 0.70710677, %v16357_v49  ;;  %4527 = vmatprep.mubr.bf16.mxu0 %v18816_v55  ;;  %8371 = vmatpush2.bf16.msra.mxu0 %v11712_v56  ;;  %v16367_v5 = vpop.eup %12391  ;;  %v16369_v24 = vadd.f32 %v3895_v7, %v3735_v28  ;;  %v3897_v25 = vpop.f32.mrf.mxu0  ;;  %v19079_v54 = vld [vmem:[#allocation68_spill] sm:$0xff]  ;;  %v11717_v44 = vld [vmem:[#allocation2 + $0xf4] ss:$12 sps:$4 sm:$0xff]  }
 0x3c6   :  { %12405 = verf.f32 %v5058_v48  ;;  %v3737_v11 = vadd.f32 %v3736_v1, %v16082_v59  ;;  %v3738_v27 = vpop.f32.mrf.mxu1  ;;  %8372 = vmatprep.subr.bf16.mxu0 %v11720_v60  ;;  %v16377_v18 = vadd.f32 %v19079_v54, %v14409_v23  ;;  %v16384_v53 = vmul.f32 %v16286_v9, %v16094_v12  ;;  %v11721_v7 = vld [vmem:[#allocation2 + $0x288] ss:$12 sps:$4 sm:$0xff]  }
 0x3c7   :  { %v12394_v47 = vpop.eup %12393  ;;  %v16372_v42 = vpack.c.bf16 %v5910_v37, %v5898_v32  ;;  %v5911_v0 = vmul.f32 %v5611_v50, %v4711_v17  ;;  %12407 = verf.f32 %v5059_v58  ;;  %v3739_v56 = vadd.f32 %v3738_v27, %v16051_v31  ;;  %8212 = vmatpush2.bf16.msra.mxu1 %v11700_v22  ;;  %v3899_v28 = vpop.f32.mrf.mxu0  ;;  %v11729_v9 = vld [vmem:[#allocation2 + $0x274] ss:$12 sps:$4 sm:$0xff]  }
 0x3c8   :  { %v5070_v19 = vmul.f32 0.70710677, %v16369_v24  ;;  %v16380_v2 = vadd.f32 %v3897_v25, %v3737_v11  ;;  %v3740_v60 = vpop.f32.mrf.mxu1  ;;  %8213 = vmatprep.subr.bf16.mxu1 %v11708_v63  ;;  %v12396_v17 = vpop.eup %12395  ;;  %12409 = verf.f32 %v16340_v46  ;;  %v4722_v32 = vmul.f32 0.5, %v16305_v39  ;;  %v11715_v39 = vld [vmem:[#allocation2 + $0xf0] ss:$12 sps:$4 sm:$0xff]  }
 0x3c9   :  { %19078 = vst [vmem:[#allocation54_spill] sm:$0xff] %v16372_v42  ;;  %v16387_v22 = vadd.f32 %v3899_v28, %v3739_v56  ;;  %v3741_v48 = vadd.f32 %v3740_v60, %v16082_v59  ;;  %8373 = vmatpush2.bf16.msra.mxu0 %v11718_v51  ;;  %v16390_v1 = vpack.c.bf16 %v5911_v0, %v5899_v4  ;;  %v5622_v37 = vadd.f32 1.0, %v12394_v47  ;;  %v3901_v50 = vpop.f32.mrf.mxu0 }
 0x3ca   :  { %12411 = verf.f32 %v5070_v19  ;;  %v5071_v63 = vmul.f32 0.70710677, %v16380_v2  ;;  %v3744_v12 = vpop.f32.mrf.mxu1  ;;  %4367 = vmatmul.mubr.bf16.gmra.mxu1 %v14112_v52  ;;  %8374 = vmatprep.subr.bf16.mxu0 %v11723_v62  ;;  %v12398_v46 = vpop.eup %12397  ;;  %v4723_v58 = vmul.f32 0.5, %v16310_v15  ;;  %v4734_v51 = vmul.f32 0.5, %v16319_v57  ;;  %v11726_v15 = vld [vmem:[#allocation2 + $0xdc] ss:$12 sps:$4 sm:$0xff]  }
 0x3cb   :  { %19080 = vst [vmem:[#allocation58_spill] sm:$0xff] %v16390_v1  ;;  %v5082_v4 = vmul.f32 0.70710677, %v16387_v22  ;;  %v16398_v11 = vadd.f32 %v3901_v50, %v3741_v48  ;;  %4376 = vmatprep.mubr.bf16.mxu1 %v14119_v36  ;;  %8214 = vmatpush2.bf16.msra.mxu1 %v11706_v13  ;;  %v5623_v25 = vadd.f32 1.0, %v12396_v17  ;;  %v5634_v27 = vadd.f32 1.0, %v12398_v46  ;;  %v3905_v62 = vpop.f32.mrf.mxu0 }
 0x3cc   :  { %12413 = verf.f32 %v5071_v63  ;;  %v3745_v52 = vadd.f32 %v3744_v12, %v16051_v31  ;;  %4528 = vmatmul.mubr.bf16.gmra.mxu0 %v19010_v45  ;;  %v3746_v47 = vpop.f32.mrf.mxu1  ;;  %8215 = vmatprep.subr.bf16.mxu1 %v11717_v44  ;;  %v4735_v0 = vmul.f32 0.5, %v16330_v3  ;;  %v11727_v13 = vld [vmem:[#allocation2 + $0x270] ss:$12 sps:$4 sm:$0xff]   ;;  %v5922_v54 = vmul.f32 %v5622_v37, %v4722_v32  ;;  %v11724_v50 = vld [vmem:[#allocation2 + $0xd8] ss:$12 sps:$4 sm:$0xff]  }
 0x3cd   :  { %v12400_v57 = vpop.eup %12399  ;;  %12415 = verf.f32 %v5082_v4  ;;  %v5083_v56 = vmul.f32 0.70710677, %v16398_v11  ;;  %v3747_v36 = vadd.f32 %v3746_v47, %v16082_v59  ;;  %4537 = vmatprep.mubr.bf16.mxu0 %v18816_v55  ;;  %8375 = vmatpush2.bf16.msra.mxu0 %v11721_v7  ;;  %v5934_v19 = vmul.f32 %v5634_v27, %v4734_v51  ;;  %v3907_v45 = vpop.f32.mrf.mxu0  ;;  %v11735_v17 = vld [vmem:[#allocation2 + $0x25c] ss:$12 sps:$4 sm:$0xff]   ;;  %v11732_v4 = vld [vmem:[#allocation2 + $0xc4] ss:$12 sps:$4 sm:$0xff]  }
 0x3ce   :  { %v5635_v28 = vadd.f32 1.0, %v12400_v57  ;;  %v16407_v60 = vadd.f32 %v3905_v62, %v3745_v52  ;;  %v3748_v44 = vpop.f32.mrf.mxu1  ;;  %8376 = vmatprep.subr.bf16.mxu0 %v11729_v9  ;;  %v12402_v48 = vpop.eup %12401  ;;  %v16413_v7 = vadd.f32 1.0, %v16239_v29  ;;  %v5923_v32 = vmul.f32 %v5623_v25, %v4723_v58  ;;  %v19082_v52 = vld [vmem:[#allocation66_spill] sm:$0xff]  ;;  %v11733_v58 = vld [vmem:[#allocation2 + $0x258] ss:$12 sps:$4 sm:$0xff]  }
 0x3cf   :  { %12417 = verf.f32 %v5083_v56  ;;  %v16409_v3 = vadd.f32 %v3907_v45, %v3747_v36  ;;  %v3749_v63 = vadd.f32 %v3748_v44, %v16051_v31  ;;  %8216 = vmatpush2.bf16.msra.mxu1 %v11715_v39  ;;  %v16415_v37 = vpack.c.bf16 %v5934_v19, %v5922_v54  ;;  %v3909_v51 = vpop.f32.mrf.mxu0  ;;  %v11738_v56 = vld [vmem:[#allocation2 + $0x244] ss:$12 sps:$4 sm:$0xff]  }
 0x3d0   :  { %v5935_v12 = vmul.f32 %v5635_v28, %v4735_v0  ;;  %v5094_v46 = vmul.f32 0.70710677, %v16407_v60  ;;  %v3750_v9 = vpop.f32.mrf.mxu1  ;;  %8217 = vmatprep.subr.bf16.mxu1 %v11726_v15  ;;  %v16420_v62 = vadd.f32 %v19082_v52, %v16377_v18  ;;  %v4746_v39 = vmul.f32 0.5, %v16334_v6  ;;  %v11730_v28 = vld [vmem:[#allocation2 + $0xc0] ss:$12 sps:$4 sm:$0xff]  }
 0x3d1   :  { %19081 = vst [vmem:[#allocation6_spill] sm:$0xff] %v16415_v37  ;;  %v12404_v27 = vpop.eup %12403  ;;  %v5095_v29 = vmul.f32 0.70710677, %v16409_v3  ;;  %v16424_v47 = vadd.f32 %v3909_v51, %v3749_v63  ;;  %8377 = vmatpush2.bf16.msra.mxu0 %v11727_v13  ;;  %v5646_v25 = vadd.f32 1.0, %v12402_v48  ;;  %v3751_v57 = vadd.f32 %v3750_v9, %v16082_v59  ;;  %v3911_v0 = vpop.f32.mrf.mxu0  ;;  %v19084_v63 = vld [vmem:[#allocation10_spill] sm:$0xff] }
 0x3d2   :  { %12419 = verf.f32 %v5094_v46  ;;  %v3754_v15 = vpop.f32.mrf.mxu1  ;;  %4377 = vmatmul.mubr.bf16.gmra.mxu1 %v14163_v10  ;;  %8378 = vmatprep.subr.bf16.mxu0 %v11735_v17  ;;  %v16428_v18 = vpack.c.bf16 %v5935_v12, %v5923_v32  ;;  %v4758_v6 = vmul.f32 0.5, %v16353_v43  ;;  %v4759_v54 = vmul.f32 0.5, %v16357_v49  ;;  %v11741_v49 = vld [vmem:[#allocation2 + $0x3ac] ss:$12 sps:$4 sm:$0xff]  }
 0x3d3   :  { %v12406_v36 = vpop.eup %12405  ;;  %v5106_v13 = vmul.f32 0.70710677, %v16424_v47  ;;  %v3755_v19 = vadd.f32 %v3754_v15, %v16051_v31  ;;  %4386 = vmatprep.mubr.bf16.mxu1 %v14167_v41  ;;  %8218 = vmatpush2.bf16.msra.mxu1 %v11724_v50  ;;  %v5647_v44 = vadd.f32 1.0, %v12404_v27  ;;  %12421 = verf.f32 %v5095_v29  ;;  %v3915_v48 = vpop.f32.mrf.mxu0  ;;  %v11736_v50 = vld [vmem:[#allocation2 + $0x240] ss:$12 sps:$4 sm:$0xff]  }
 0x3d4   :  { %19083 = vst [vmem:[#allocation57_spill] sm:$0xff] %v16428_v18  ;;  %v12408_v45 = vpop.eup %12407  ;;  %v5658_v10 = vadd.f32 1.0, %v12406_v36  ;;  %v16435_v17 = vadd.f32 %v3911_v0, %v3751_v57  ;;  %4538 = vmatmul.mubr.bf16.gmra.mxu0 %v19084_v63  ;;  %v3756_v43 = vpop.f32.mrf.mxu1  ;;  %8219 = vmatprep.subr.bf16.mxu1 %v11732_v4  ;;  %v5946_v51 = vmul.f32 %v5646_v25, %v4746_v39  ;;  %v4747_v9 = vmul.f32 0.5, %v16345_v35  ;;  %v11756_v57 = vld [vmem:[#allocation2 + $0x52c] ss:$12 sps:$4 sm:$0xff]  }
 0x3d5   :  { %v5659_v32 = vadd.f32 1.0, %v12408_v45  ;;  %12423 = verf.f32 %v5106_v13  ;;  %v16438_v12 = vadd.f32 %v3915_v48, %v3755_v19  ;;  %v3757_v41 = vadd.f32 %v3756_v43, %v16082_v59  ;;  %4547 = vmatprep.mubr.bf16.mxu0 %v18816_v55  ;;  %8379 = vmatpush2.bf16.msra.mxu0 %v11733_v58  ;;  %v16442_v46 = vpop.eup %12409  ;;  %v3917_v4 = vpop.f32.mrf.mxu0 }
 0x3d6   :  { %v5958_v27 = vmul.f32 %v5658_v10, %v4758_v6  ;;  %v5107_v52 = vmul.f32 0.70710677, %v16435_v17  ;;  %v3758_v29 = vpop.f32.mrf.mxu1  ;;  %8380 = vmatprep.subr.bf16.mxu0 %v11738_v56  ;;  %v4770_v36 = vmul.f32 0.5, %v16369_v24  ;;  %v5947_v19 = vmul.f32 %v5647_v44, %v4747_v9 }
 0x3d7   :  { %v12412_v0 = vpop.eup %12411  ;;  %v5959_v15 = vmul.f32 %v5659_v32, %v4759_v54  ;;  %v5118_v13 = vmul.f32 0.70710677, %v16438_v12  ;;  %v16448_v58 = vadd.f32 %v3917_v4, %v3757_v41  ;;  %8220 = vmatpush2.bf16.msra.mxu1 %v11730_v28  ;;  %v3759_v35 = vadd.f32 %v3758_v29, %v16051_v31  ;;  %v3919_v25 = vpop.f32.mrf.mxu0  ;;  %v19088_v29 = vld [vmem:[#allocation9_spill] sm:$0xff] }
 0x3d8   :  { %v16450_v39 = vpack.c.bf16 %v5958_v27, %v5946_v51  ;;  %12425 = verf.f32 %v5107_v52  ;;  %v3760_v6 = vpop.f32.mrf.mxu1  ;;  %8511 = vmatprep.subr.bf16.mxu1 %v11741_v49  ;;  %v5670_v45 = vadd.f32 1.0, %v12412_v0  ;;  %v4782_v28 = vmul.f32 0.5, %v16387_v22 }
 0x3d9   :  { %v12414_v56 = vpop.eup %12413  ;;  %12427 = verf.f32 %v5118_v13  ;;  %v5119_v54 = vmul.f32 0.70710677, %v16448_v58  ;;  %v3761_v24 = vadd.f32 %v3760_v6, %v16082_v59  ;;  %8381 = vmatpush2.bf16.msra.mxu0 %v11736_v50  ;;  %v16456_v44 = vadd.f32 %v3919_v25, %v3759_v35  ;;  %v3921_v63 = vpop.f32.mrf.mxu0  ;;  %v19087_v50 = vld [vmem:[#allocation5_spill] sm:$0xff] }
 0x3da   :  { %19085 = vst [vmem:[#allocation67_spill] sm:$0xff] %v16450_v39  ;;  %v12416_v10 = vpop.eup %12415  ;;  %v5671_v48 = vadd.f32 1.0, %v12414_v56  ;;  %v3764_v43 = vpop.f32.mrf.mxu1  ;;  %4387 = vmatmul.mubr.bf16.gmra.mxu1 %v14203_v33  ;;  %8672 = vmatprep.subr.bf16.mxu0 %v11756_v57  ;;  %v16459_v49 = vpack.c.bf16 %v5959_v15, %v5947_v19  ;;  %v5101_v22 = vmul.f32 0.70710677, %v16420_v62  ;;  %v4771_v27 = vmul.f32 0.5, %v16380_v2 }
 0x3db   :  { %v5682_v32 = vadd.f32 1.0, %v12416_v10  ;;  %12429 = verf.f32 %v5119_v54  ;;  %v16461_v41 = vadd.f32 %v3921_v63, %v3761_v24  ;;  %v3765_v51 = vadd.f32 %v3764_v43, %v16051_v31  ;;  %4396 = vmatprep.mubr.bf16.mxu1 %v19087_v50  ;;  %v3925_v4 = vpop.f32.mrf.mxu0 }
 0x3dc   :  { %19086 = vst [vmem:[#allocation68_spill] sm:$0xff] %v16459_v49  ;;  %v12418_v9 = vpop.eup %12417  ;;  %v4783_v52 = vmul.f32 0.5, %v16398_v11  ;;  %v5130_v33 = vmul.f32 0.70710677, %v16456_v44  ;;  %4548 = vmatmul.mubr.bf16.gmra.mxu0 %v19088_v29  ;;  %v3766_v57 = vpop.f32.mrf.mxu1  ;;  %v5970_v0 = vmul.f32 %v5670_v45, %v4770_v36  ;;  %v5971_v35 = vmul.f32 %v5671_v48, %v4771_v27 }
 0x3dd   :  { %v5982_v15 = vmul.f32 %v5682_v32, %v4782_v28  ;;  %v5683_v13 = vadd.f32 1.0, %v12418_v9  ;;  %v5131_v19 = vmul.f32 0.70710677, %v16461_v41  ;;  %4557 = vmatprep.mubr.bf16.mxu0 %v18816_v55  ;;  %v16472_v25 = vadd.f32 %v3925_v4, %v3765_v51  ;;  %v3927_v11 = vpop.f32.mrf.mxu0 }
 0x3de   :  { %12431 = verf.f32 %v5130_v33  ;;  %v3767_v2 = vadd.f32 %v3766_v57, %v16082_v59  ;;  %v3768_v6 = vpop.f32.mrf.mxu1  ;;  %v16482_v63 = vadd.f32 1.0, %v16244_v26  ;;  %v4794_v33 = vmul.f32 0.5, %v16407_v60  ;;  %v19092_v57 = vld [vmem:[#allocation12_spill] sm:$0xff] }
 0x3df   :  { %v12420_v56 = vpop.eup %12419  ;;  %v16475_v54 = vpack.c.bf16 %v5982_v15, %v5970_v0  ;;  %v5983_v24 = vmul.f32 %v5683_v13, %v4783_v52  ;;  %12433 = verf.f32 %v5131_v19  ;;  %v3769_v36 = vadd.f32 %v3768_v6, %v16051_v31  ;;  %v3929_v48 = vpop.f32.mrf.mxu0 }
 0x3e0   :  { %12435 = verf.f32 %v5101_v22  ;;  %v5142_v45 = vmul.f32 0.70710677, %v16472_v25  ;;  %v16479_v10 = vadd.f32 %v3927_v11, %v3767_v2  ;;  %v3770_v28 = vpop.f32.mrf.mxu1  ;;  %v12422_v43 = vpop.eup %12421  ;;  %v5694_v32 = vadd.f32 1.0, %v12420_v56  ;;  %v19091_v22 = vld [vmem:[#allocation72_spill] sm:$0xff]  ;;  %v19094_v56 = vld [vmem:[#allocation7_spill] sm:$0xff] }
 0x3e1   :  { %19089 = vst [vmem:[#allocation66_spill] sm:$0xff] %v16475_v54  ;;  %v16484_v51 = vadd.f32 %v3929_v48, %v3769_v36  ;;  %v3771_v50 = vadd.f32 %v3770_v28, %v16082_v59  ;;  %v16487_v9 = vpack.c.bf16 %v5983_v24, %v5971_v35  ;;  %v2795_v52 = vadd.f32 %v19091_v22, %v14409_v23  ;;  %v3931_v29 = vpop.f32.mrf.mxu0  ;;  %v19093_v35 = vld [vmem:[#allocation14_spill] sm:$0xff] }
 0x3e2   :  { %v12424_v27 = vpop.eup %12423  ;;  %12437 = verf.f32 %v5142_v45  ;;  %v5143_v4 = vmul.f32 0.70710677, %v16479_v10  ;;  %v3774_v26 = vpop.f32.mrf.mxu1  ;;  %4397 = vmatmul.mubr.bf16.gmra.mxu1 %v19092_v57  ;;  %v4795_v0 = vmul.f32 0.5, %v16409_v3  ;;  %v4806_v15 = vmul.f32 0.5, %v16424_v47 }
 0x3e3   :  { %19090 = vst [vmem:[#allocation10_spill] sm:$0xff] %v16487_v9  ;;  %v5706_v13 = vadd.f32 1.0, %v12424_v27  ;;  %v5154_v19 = vmul.f32 0.70710677, %v16484_v51  ;;  %4406 = vmatprep.mubr.bf16.mxu1 %v19093_v35  ;;  %v5695_v2 = vadd.f32 1.0, %v12422_v43  ;;  %v16498_v11 = vadd.f32 %v3931_v29, %v3771_v50  ;;  %v3935_v6 = vpop.f32.mrf.mxu0  ;;  %v19095_v29 = vld [vmem:[#allocation71_spill] sm:$0xff] }
 0x3e4   :  { %12439 = verf.f32 %v5143_v4  ;;  %v3775_v60 = vadd.f32 %v3774_v26, %v16051_v31  ;;  %4558 = vmatmul.mubr.bf16.gmra.mxu0 %v19094_v56  ;;  %v3776_v24 = vpop.f32.mrf.mxu1  ;;  %v5994_v45 = vmul.f32 %v5694_v32, %v4794_v33  ;;  %v4807_v28 = vmul.f32 0.5, %v16435_v17 }
 0x3e5   :  { %v12426_v36 = vpop.eup %12425  ;;  %v6006_v3 = vmul.f32 %v5706_v13, %v4806_v15  ;;  %12441 = verf.f32 %v5154_v19  ;;  %v3777_v47 = vadd.f32 %v3776_v24, %v16082_v59  ;;  %4567 = vmatprep.mubr.bf16.mxu0 %v18816_v55  ;;  %v5155_v50 = vmul.f32 0.70710677, %v16498_v11  ;;  %v3937_v22 = vpop.f32.mrf.mxu0 }
 0x3e6   :  { %v12428_v48 = vpop.eup %12427  ;;  %v5707_v43 = vadd.f32 1.0, %v12426_v36  ;;  %v16506_v27 = vadd.f32 %v3935_v6, %v3775_v60  ;;  %v3778_v4 = vpop.f32.mrf.mxu1  ;;  %v16509_v26 = vmul.f32 0.70710677, %v19095_v29  ;;  %v5995_v13 = vmul.f32 %v5695_v2, %v4795_v0  ;;  %v19097_v6 = vld [vmem:[#allocation70_spill] sm:$0xff] }
 0x3e7   :  { %v16511_v32 = vpack.c.bf16 %v6006_v3, %v5994_v45  ;;  %v16513_v33 = vadd.f32 %v3937_v22, %v3777_v47  ;;  %v3779_v57 = vadd.f32 %v3778_v4, %v16051_v31  ;;  %12443 = verf.f32 %v5155_v50  ;;  %v3939_v35 = vpop.f32.mrf.mxu0  ;;  %v19100_v4 = vld [vmem:[#allocation11_spill] sm:$0xff] }
 0x3e8   :  { %v12430_v15 = vpop.eup %12429  ;;  %v6007_v19 = vmul.f32 %v5707_v43, %v4807_v28  ;;  %v5166_v17 = vmul.f32 0.70710677, %v16506_v27  ;;  %v3780_v60 = vpop.f32.mrf.mxu1  ;;  %v16518_v56 = vadd.f32 %v19097_v6, %v2795_v52  ;;  %v4818_v24 = vmul.f32 0.5, %v16438_v12  ;;  %v19098_v28 = vld [vmem:[#allocation15_spill] sm:$0xff] }
 0x3e9   :  { %19096 = vst [vmem:[#allocation5_spill] sm:$0xff] %v16511_v32  ;;  %v5718_v36 = vadd.f32 1.0, %v12428_v48  ;;  %v5167_v45 = vmul.f32 0.70710677, %v16513_v33  ;;  %v16522_v3 = vadd.f32 %v3939_v35, %v3779_v57  ;;  %v3781_v47 = vadd.f32 %v3780_v60, %v16082_v59  ;;  %v3941_v0 = vpop.f32.mrf.mxu0 }
 0x3ea   :  { %12445 = verf.f32 %v5166_v17  ;;  %v3784_v2 = vpop.f32.mrf.mxu1  ;;  %4407 = vmatmul.mubr.bf16.gmra.mxu1 %v19098_v28  ;;  %v16526_v43 = vpack.c.bf16 %v6007_v19, %v5995_v13  ;;  %v4819_v52 = vmul.f32 0.5, %v16448_v58  ;;  %v5719_v22 = vadd.f32 1.0, %v12430_v15  ;;  %v19101_v19 = vld [vmem:[#allocation16_spill] sm:$0xff]  ;;  %v1161_v58 = vld [vmem:[%s18482_s4 + $0x8] sm:$0xf] }
 0x3eb   :  { %v12432_v50 = vpop.eup %12431  ;;  %v4830_v12 = vmul.f32 0.5, %v16456_v44  ;;  %v3785_v48 = vadd.f32 %v3784_v2, %v16051_v31  ;;  %4416 = vmatprep.mubr.bf16.mxu1 %v19100_v4  ;;  %v4831_v35 = vmul.f32 0.5, %v16461_v41  ;;  %v5178_v60 = vmul.f32 0.70710677, %v16522_v3  ;;  %v3945_v13 = vpop.f32.mrf.mxu0 }
 0x3ec   :  { %19099 = vst [vmem:[#allocation9_spill] sm:$0xff] %v16526_v43  ;;  %v12434_v57 = vpop.eup %12433  ;;  %v5730_v17 = vadd.f32 1.0, %v12432_v50  ;;  %v16534_v6 = vadd.f32 %v3941_v0, %v3781_v47  ;;  %4568 = vmatmul.mubr.bf16.gmra.mxu0 %v19101_v19  ;;  %v3786_v28 = vpop.f32.mrf.mxu1  ;;  %12447 = verf.f32 %v5167_v45  ;;  %v6018_v47 = vmul.f32 %v5718_v36, %v4818_v24 }
 0x3ed   :  { %v16540_v44 = vpop.eup %12435  ;;  %v5731_v31 = vadd.f32 1.0, %v12434_v57  ;;  %v16542_v15 = vadd.f32 %v3945_v13, %v3785_v48  ;;  %v3787_v41 = vadd.f32 %v3786_v28, %v16082_v59  ;;  %4577 = vmatprep.mubr.bf16.mxu0 %v18816_v55  ;;  %12449 = verf.f32 %v5178_v60  ;;  %v3947_v50 = vpop.f32.mrf.mxu0  ;;  %v19103_v57 = vld [vmem:[#allocation43_spill] sm:$0xff] }
 0x3ee   :  { %v6030_v0 = vmul.f32 %v5730_v17, %v4830_v12  ;;  %v5179_v2 = vmul.f32 0.70710677, %v16534_v6  ;;  %v3788_v4 = vpop.f32.mrf.mxu1  ;;  %v6019_v32 = vmul.f32 %v5719_v22, %v4819_v52  ;;  %v16550_v45 = vrot.slane %v1161_v58, %v19103_v57  ;;  %v19106_v52 = vld [vmem:[#allocation38_spill] sm:$0xff]  ;;  %v11766_v57 = vld [vmem:[#allocation2 + $0x4f8] ss:$12 sps:$4 sm:$0xff]  }
 0x3ef   :  { %19102 = vst [vmem:[#allocation72_spill] sm:$0xff] %v16542_v15  ;;  %v12438_v19 = vpop.eup %12437  ;;  %v6031_v43 = vmul.f32 %v5731_v31, %v4831_v35  ;;  %v16547_v54 = vadd.f32 %v3947_v50, %v3787_v41  ;;  %v5125_v48 = vmul.f32 0.70710677, %v16518_v56  ;;  %v3949_v24 = vpop.f32.mrf.mxu0  ;;  %v16557_v12 = vpack.c.bf16 %v16384_v53, %v16237_v8 }
 0x3f0   :  { %v16553_v59 = vpack.c.bf16 %v6030_v0, %v6018_v47  ;;  %12451 = verf.f32 %v5179_v2  ;;  %v3789_v36 = vpop.f32.mrf.mxu1  ;;  %v5742_v60 = vadd.f32 1.0, %v12438_v19  ;;  %v16560_v22 = vrot.slane %v1161_v58, %v19106_v52  ;;  %v19109_v0 = vld [vmem:[#allocation13_spill] sm:$0xff]  ;;  %v19110_v2 = vld [vmem:[#allocation64_spill] sm:$0xff] }
 0x3f1   :  { %19105 = vst [vmem:[#allocation14_spill] sm:$0xff] %v16557_v12  ;;  %v12440_v17 = vpop.eup %12439  ;;  %v5941_v35 = vmul.f32 %v16413_v7, %v16116_v38  ;;  %v16564_v13 = vpack.c.bf16 %v6031_v43, %v6019_v32  ;;  %v16567_v31 = vmul.f32 0.5, %v16420_v62  ;;  %v16570_v41 = vmul.f32 0.5, %v19095_v29  ;;  %v3950_v8 = vpop.f32.mrf.mxu0  ;;  %v19108_v29 = vld [vmem:[#allocation74_spill] sm:$0xff] }
 0x3f2   :  { %19104 = vst [vmem:[#allocation12_spill] sm:$0xff] %v16553_v59  ;;  %v12442_v28 = vpop.eup %12441  ;;  %12453 = verf.f32 %v16509_v26  ;;  %v3986_v53 = vpop.f32.mrf.mxu1  ;;  %4417 = vmatmul.mubr.bf16.gmra.mxu1 %v19033_v40  ;;  %v5953_v58 = vmul.f32 %v16482_v63, %v16194_v14  ;;  %v4842_v38 = vmul.f32 0.5, %v16472_v25  ;;  %v4854_v7 = vmul.f32 0.5, %v16484_v51  ;;  %v19112_v8 = vld [vmem:[#allocation80_spill] sm:$0xff] }
 0x3f3   :  { %19107 = vst [vmem:[#allocation7_spill] sm:$0xff] %v16564_v13  ;;  %v5754_v32 = vadd.f32 1.0, %v12442_v28  ;;  %v3987_v62 = vadd.f32 %v3986_v53, %v16550_v45  ;;  %4426 = vmatprep.mubr.bf16.mxu1 %v19036_v61  ;;  %12455 = verf.f32 %v5125_v48  ;;  %v5137_v43 = vmul.f32 0.70710677, %v19108_v29 }
 0x3f4   :  { %v5743_v26 = vadd.f32 1.0, %v12440_v17  ;;  %v4147_v47 = vpop.f32.mrf.mxu0  ;;  %4578 = vmatmul.mubr.bf16.gmra.mxu0 %v19109_v0  ;;  %v3988_v40 = vpop.f32.mrf.mxu1  ;;  %v5665_v50 = vadd.f32 1.0, %v19110_v2  ;;  %v6042_v63 = vmul.f32 %v5742_v60, %v4842_v38  ;;  %v4843_v61 = vmul.f32 0.5, %v16479_v10 }
 0x3f5   :  { %v12444_v14 = vpop.eup %12443  ;;  %v6054_v25 = vmul.f32 %v5754_v32, %v4854_v7  ;;  %v16583_v4 = vadd.f32 %v4147_v47, %v3987_v62  ;;  %v3989_v51 = vadd.f32 %v3988_v40, %v16560_v22  ;;  %4587 = vmatprep.mubr.bf16.mxu0 %v18816_v55  ;;  %v4855_v19 = vmul.f32 0.5, %v16498_v11  ;;  %v19114_v47 = vld [vmem:[#allocation47_spill] sm:$0xff] }
 0x3f6   :  { %v5755_v48 = vadd.f32 1.0, %v12444_v14  ;;  %v4149_v24 = vpop.f32.mrf.mxu0  ;;  %v3990_v36 = vpop.f32.mrf.mxu1  ;;  %v16589_v17 = vpack.c.bf16 %v5953_v58, %v5941_v35  ;;  %v2805_v60 = vadd.f32 %v19112_v8, %v14409_v23  ;;  %v6043_v55 = vmul.f32 %v5743_v26, %v4843_v61  ;;  %v19117_v61 = vld [vmem:[#allocation79_spill] sm:$0xff] }
 0x3f7   :  { %v12446_v28 = vpop.eup %12445  ;;  %v16593_v53 = vpack.c.bf16 %v6054_v25, %v6042_v63  ;;  %v4904_v38 = vmul.f32 0.70710677, %v16583_v4  ;;  %v16596_v7 = vadd.f32 %v4149_v24, %v3989_v51  ;;  %v3991_v10 = vadd.f32 %v3990_v36, %v16550_v45  ;;  %v19115_v25 = vld [vmem:[#allocation18_spill] sm:$0xff]  ;;  %v19118_v24 = vld [vmem:[#allocation31_spill] sm:$0xff] }
 0x3f8   :  { %19111 = vst [vmem:[#allocation71_spill] sm:$0xff] %v16589_v17  ;;  %v6055_v32 = vmul.f32 %v5755_v48, %v4855_v19  ;;  %v4151_v11 = vpop.f32.mrf.mxu0  ;;  %v3992_v62 = vpop.f32.mrf.mxu1  ;;  %v16600_v0 = vmul.f32 %v5665_v50, %v19114_v47  ;;  %12457 = verf.f32 %v5137_v43  ;;  %v5766_v35 = vadd.f32 1.0, %v12446_v28 }
 0x3f9   :  { %19113 = vst [vmem:[#allocation70_spill] sm:$0xff] %v16593_v53  ;;  %v4905_v58 = vmul.f32 0.70710677, %v16596_v7  ;;  %v5677_v23 = vadd.f32 1.0, %v16367_v5  ;;  %v12448_v40 = vpop.eup %12447  ;;  %12459 = verf.f32 %v4904_v38  ;;  %v16604_v2 = vadd.f32 %v4151_v11, %v3991_v10 }
 0x3fa   :  { %v3993_v26 = vadd.f32 %v3992_v62, %v16560_v22  ;;  %v4153_v14 = vpop.f32.mrf.mxu0  ;;  %v3996_v63 = vpop.f32.mrf.mxu1  ;;  %4427 = vmatmul.mubr.bf16.gmra.mxu1 %v19115_v25  ;;  %v16608_v51 = vpack.c.bf16 %v6055_v32, %v6043_v55  ;;  %v16611_v43 = vadd.f32 %v19117_v61, %v2805_v60  ;;  %v4866_v19 = vmul.f32 0.5, %v16506_v27  ;;  %v19119_v32 = vld [vmem:[#allocation17_spill] sm:$0xff]  ;;  %v19120_v62 = vld [vmem:[#allocation86_spill] sm:$0xff] }
 0x3fb   :  { %v12450_v50 = vpop.eup %12449  ;;  %v4878_v5 = vmul.f32 0.5, %v16522_v3  ;;  %v3997_v48 = vadd.f32 %v3996_v63, %v16550_v45  ;;  %8221 = vmatprep.mubr.bf16.mxu1 %v19118_v24  ;;  %v4879_v28 = vmul.f32 0.5, %v16534_v6  ;;  %v4916_v8 = vmul.f32 0.70710677, %v16604_v2 }
 0x3fc   :  { %19116 = vst [vmem:[#allocation15_spill] sm:$0xff] %v16608_v51  ;;  %v5778_v36 = vadd.f32 1.0, %v12450_v50  ;;  %v16619_v38 = vadd.f32 %v4153_v14, %v3993_v26  ;;  %v4157_v55 = vpop.f32.mrf.mxu0  ;;  %4588 = vmatmul.mubr.bf16.gmra.mxu0 %v19119_v32  ;;  %v3998_v60 = vpop.f32.mrf.mxu1  ;;  %v5767_v11 = vadd.f32 1.0, %v12448_v40  ;;  %12461 = verf.f32 %v4905_v58  ;;  %v11739_v14 = vld [vmem:[#allocation2 + $0x3a8] ss:$12 sps:$4 sm:$0xff]  }
 0x3fd   :  { %v12452_v10 = vpop.eup %12451  ;;  %v16622_v27 = vadd.f32 %v4157_v55, %v3997_v48  ;;  %v3999_v3 = vadd.f32 %v3998_v60, %v16560_v22  ;;  %8382 = vmatprep.mubr.bf16.mxu0 %v19120_v62  ;;  %v6066_v47 = vmul.f32 %v5766_v35, %v4866_v19  ;;  %12463 = verf.f32 %v4916_v8  ;;  %v19122_v62 = vld [vmem:[#allocation50_spill] sm:$0xff] }
 0x3fe   :  { %v6078_v63 = vmul.f32 %v5778_v36, %v4878_v5  ;;  %v5779_v6 = vadd.f32 1.0, %v12452_v10  ;;  %v4159_v25 = vpop.f32.mrf.mxu0  ;;  %v4000_v26 = vpop.f32.mrf.mxu1  ;;  %v4867_v61 = vmul.f32 0.5, %v16513_v33  ;;  %v4917_v32 = vmul.f32 0.70710677, %v16619_v38  ;;  %v11744_v36 = vld [vmem:[#allocation2 + $0x394] ss:$12 sps:$4 sm:$0xff]  }
 0x3ff   :  { %v12454_v50 = vpop.eup %12453  ;;  %v4928_v58 = vmul.f32 0.70710677, %v16622_v27  ;;  %v5701_v40 = vadd.f32 1.0, %v16540_v44  ;;  %v16632_v60 = vadd.f32 %v4159_v25, %v3999_v3  ;;  %v4001_v35 = vadd.f32 %v4000_v26, %v16550_v45  ;;  %v11754_v10 = vld [vmem:[#allocation2 + $0x528] ss:$12 sps:$4 sm:$0xff]  }
 0x400   :  { %v16630_v48 = vpack.c.bf16 %v6078_v63, %v6066_v47  ;;  %v6079_v55 = vmul.f32 %v5779_v6, %v4879_v28  ;;  %v4161_v19 = vpop.f32.mrf.mxu0  ;;  %v4002_v5 = vpop.f32.mrf.mxu1  ;;  %12465 = verf.f32 %v4917_v32  ;;  %v5977_v24 = vmul.f32 %v5677_v23, %v19122_v62  ;;  %v19123_v6 = vld [vmem:[#allocation33_spill] sm:$0xff] }
 0x401   :  { %v12456_v8 = vpop.eup %12455  ;;  %v4003_v33 = vadd.f32 %v4002_v5, %v16560_v22  ;;  %v5689_v52 = vadd.f32 1.0, %v16442_v46  ;;  %v6067_v44 = vmul.f32 %v5767_v11, %v4867_v61  ;;  %12467 = verf.f32 %v4928_v58  ;;  %v11762_v25 = vld [vmem:[#allocation2 + $0x514] ss:$12 sps:$4 sm:$0xff]   ;;  %v11742_v46 = vld [vmem:[#allocation2 + $0x390] ss:$12 sps:$4 sm:$0xff]  }
 0x402   :  { %19121 = vst [vmem:[#allocation11_spill] sm:$0xff] %v16630_v48  ;;  %v4929_v28 = vmul.f32 0.70710677, %v16632_v60  ;;  %v16639_v3 = vadd.f32 %v4161_v19, %v4001_v35  ;;  %v4163_v47 = vpop.f32.mrf.mxu0  ;;  %v4006_v63 = vpop.f32.mrf.mxu1  ;;  %8222 = vmatmul.mubr.bf16.vlgmr.msra.gmra.mxu1 %v19123_v6  ;;  %v5149_v26 = vmul.f32 0.70710677, %v16611_v43  ;;  %v19124_v23 = vld [vmem:[#allocation109_spill] sm:$0xff]  ;;  %v6001_v11 = vmul.f32 %v5701_v40, %v16567_v31 }
 0x403   :  { %v16643_v32 = vadd.f32 %v4163_v47, %v4003_v33  ;;  %v4007_v5 = vadd.f32 %v4006_v63, %v16550_v45  ;;  %8512 = vmatpush1.bf16.msra.mxu1 %v11739_v14  ;;  %8231 = vmatprep.mubr.bf16.mxu1 %v19124_v23  ;;  %v19125_v58 = vld [vmem:[#allocation85_spill] sm:$0xff]  ;;  %v11747_v19 = vld [vmem:[#allocation2 + $0x37c] ss:$12 sps:$4 sm:$0xff]   ;;  %v5713_v6 = vadd.f32 1.0, %v12454_v50  ;;  %v16650_v33 = vpack.c.bf16 %v6079_v55, %v6067_v44 }
 0x404   :  { %12469 = verf.f32 %v4929_v28  ;;  %v4940_v62 = vmul.f32 0.70710677, %v16639_v3  ;;  %v4167_v61 = vpop.f32.mrf.mxu0  ;;  %8383 = vmatmul.mubr.bf16.vlgmr.msra.gmra.mxu0 %v19125_v58  ;;  %v4008_v35 = vpop.f32.mrf.mxu1  ;;  %8513 = vmatprep.subr.bf16.mxu1 %v11744_v36  ;;  %v19127_v23 = vld [vmem:[#allocation24_spill] sm:$0xff]  ;;  %v5725_v40 = vadd.f32 1.0, %v12456_v8  ;;  %v4825_v58 = vmul.f32 0.5, %v16518_v56 }
 0x405   :  { %19126 = vst [vmem:[#allocation16_spill] sm:$0xff] %v16650_v33  ;;  %v4941_v47 = vmul.f32 0.70710677, %v16643_v32  ;;  %v16653_v14 = vadd.f32 %v4167_v61, %v4007_v5  ;;  %v4009_v63 = vadd.f32 %v4008_v35, %v16560_v22  ;;  %8392 = vmatprep.mubr.bf16.mxu0 %v19127_v23  ;;  %8673 = vmatpush1.bf16.msra.mxu0 %v11754_v10  ;;  %v11760_v31 = vld [vmem:[#allocation2 + $0x510] ss:$12 sps:$4 sm:$0xff]   ;;  %v12458_v28 = vpop.eup %12457  ;;  %v16659_v36 = vmul.f32 0.5, %v19108_v29 }
 0x406   :  { %12471 = verf.f32 %v4940_v62  ;;  %v4169_v50 = vpop.f32.mrf.mxu0  ;;  %v4010_v55 = vpop.f32.mrf.mxu1  ;;  %8674 = vmatprep.subr.bf16.mxu0 %v11762_v25  ;;  %v11768_v44 = vld [vmem:[#allocation2 + $0x4fc] ss:$12 sps:$4 sm:$0xff]   ;;  %v16662_v5 = vpack.c.bf16 %v5977_v24, %v16600_v0  ;;  %v19129_v35 = vld [vmem:[#allocation81_spill] sm:$0xff]  ;;  %v5989_v56 = vmul.f32 %v5689_v52, %v16308_v20  ;;  %v16668_v29 = vmul.f32 0.5, %v16611_v43 }
 0x407   :  { %v12460_v61 = vpop.eup %12459  ;;  %v5184_v23 = vmul.f32 0.70710677, %v19129_v35  ;;  %12473 = verf.f32 %v4941_v47  ;;  %v4952_v8 = vmul.f32 0.70710677, %v16653_v14  ;;  %8514 = vmatpush1.bf16.msra.mxu1 %v11742_v46  ;;  %v11745_v10 = vld [vmem:[#allocation2 + $0x378] ss:$12 sps:$4 sm:$0xff]   ;;  %v16670_v62 = vadd.f32 %v4169_v50, %v4009_v63 }
 0x408   :  { %19128 = vst [vmem:[#allocation74_spill] sm:$0xff] %v16662_v5  ;;  %12475 = verf.f32 %v5149_v26  ;;  %v4011_v25 = vadd.f32 %v4010_v55, %v16550_v45  ;;  %v4171_v0 = vpop.f32.mrf.mxu0  ;;  %v4012_v24 = vpop.f32.mrf.mxu1  ;;  %8515 = vmatprep.subr.bf16.mxu1 %v11747_v19  ;;  %v11750_v48 = vld [vmem:[#allocation2 + $0x364] ss:$12 sps:$4 sm:$0xff]   ;;  %v16674_v46 = vpack.c.bf16 %v6001_v11, %v5989_v56  ;;  %v16677_v20 = vmul.f32 %v5713_v6, %v16570_v41  ;;  %v19131_v33 = vld [vmem:[#allocation36_spill] sm:$0xff] }
 0x409   :  { %v4013_v47 = vadd.f32 %v4012_v24, %v16560_v22  ;;  %8675 = vmatpush1.bf16.msra.mxu0 %v11760_v31  ;;  %v16679_v52 = vmul.f32 %v5725_v40, %v4825_v58  ;;  %v12462_v43 = vpop.eup %12461  ;;  %v5504_v26 = vadd.f32 1.0, %v12460_v61  ;;  %12477 = verf.f32 %v4952_v8  ;;  %v11774_v31 = vld [vmem:[#allocation2 + $0x4e4] ss:$12 sps:$4 sm:$0xff]   ;;  %v11748_v58 = vld [vmem:[#allocation2 + $0x360] ss:$12 sps:$4 sm:$0xff]  }
 0x40a   :  { %19130 = vst [vmem:[#allocation13_spill] sm:$0xff] %v16674_v46  ;;  %v4953_v63 = vmul.f32 0.70710677, %v16670_v62  ;;  %v16682_v50 = vadd.f32 %v4171_v0, %v4011_v25  ;;  %v4173_v19 = vpop.f32.mrf.mxu0  ;;  %v4016_v55 = vpop.f32.mrf.mxu1  ;;  %8232 = vmatmul.mubr.bf16.gmra.mxu1 %v19131_v33  ;;  %8676 = vmatprep.subr.bf16.mxu0 %v11768_v44  ;;  %12479 = verf.f32 %v5184_v23  ;;  %v19132_v6 = vld [vmem:[#allocation59_spill] sm:$0xff]  ;;  %v11753_v40 = vld [vmem:[#allocation2 + $0x34c] ss:$12 sps:$4 sm:$0xff]  }
 0x40b   :  { %v12464_v11 = vpop.eup %12463  ;;  %v16685_v56 = vadd.f32 %v4173_v19, %v4013_v47  ;;  %v4017_v41 = vadd.f32 %v4016_v55, %v16550_v45  ;;  %8241 = vmatprep.mubr.bf16.mxu1 %v19132_v6  ;;  %8516 = vmatpush1.bf16.msra.mxu1 %v11745_v10  ;;  %v16689_v61 = vadd.f32 1.0, %v12458_v28  ;;  %v4604_v8 = vmul.f32 0.5, %v16583_v4  ;;  %v19133_v23 = vld [vmem:[#allocation87_spill] sm:$0xff]  ;;  %v11772_v4 = vld [vmem:[#allocation2 + $0x4e0] ss:$12 sps:$4 sm:$0xff]  }
 0x40c   :  { %v4616_v25 = vmul.f32 0.5, %v16604_v2  ;;  %v5516_v0 = vadd.f32 1.0, %v12464_v11  ;;  %v4964_v44 = vmul.f32 0.70710677, %v16682_v50  ;;  %v4177_v24 = vpop.f32.mrf.mxu0  ;;  %8393 = vmatmul.mubr.bf16.gmra.mxu0 %v19133_v23  ;;  %v4018_v47 = vpop.f32.mrf.mxu1  ;;  %8517 = vmatprep.subr.bf16.mxu1 %v11750_v48  ;;  %12481 = verf.f32 %v4953_v63  ;;  %v19134_v55 = vld [vmem:[#allocation23_spill] sm:$0xff] }
 0x40d   :  { %v4965_v19 = vmul.f32 0.70710677, %v16685_v56  ;;  %v16696_v10 = vadd.f32 %v4177_v24, %v4017_v41  ;;  %v4019_v28 = vadd.f32 %v4018_v47, %v16560_v22  ;;  %8402 = vmatprep.mubr.bf16.mxu0 %v19134_v55  ;;  %8677 = vmatpush1.bf16.msra.mxu0 %v11766_v57  ;;  %v12466_v2 = vpop.eup %12465  ;;  %v5804_v11 = vmul.f32 %v5504_v26, %v4604_v8  ;;  %v11780_v48 = vld [vmem:[#allocation2 + $0x4cc] ss:$12 sps:$4 sm:$0xff]   ;;  %v11751_v47 = vld [vmem:[#allocation2 + $0x348] ss:$12 sps:$4 sm:$0xff]  }
 0x40e   :  { %v5505_v6 = vadd.f32 1.0, %v12462_v43  ;;  %v5816_v33 = vmul.f32 %v5516_v0, %v4616_v25  ;;  %12483 = verf.f32 %v4964_v44  ;;  %v4179_v53 = vpop.f32.mrf.mxu0  ;;  %v4020_v23 = vpop.f32.mrf.mxu1  ;;  %8678 = vmatprep.subr.bf16.mxu0 %v11774_v31  ;;  %v4617_v51 = vmul.f32 0.5, %v16619_v38  ;;  %v11759_v25 = vld [vmem:[#allocation2 + $0x334] ss:$12 sps:$4 sm:$0xff]  }
 0x40f   :  { %v12468_v63 = vpop.eup %12467  ;;  %v5517_v41 = vadd.f32 1.0, %v12466_v2  ;;  %12485 = verf.f32 %v4965_v19  ;;  %v4976_v24 = vmul.f32 0.70710677, %v16696_v10  ;;  %8518 = vmatpush1.bf16.msra.mxu1 %v11748_v58  ;;  %v4605_v57 = vmul.f32 0.5, %v16596_v7  ;;  %v11778_v2 = vld [vmem:[#allocation2 + $0x4c8] ss:$12 sps:$4 sm:$0xff]  }
 0x410   :  { %v16703_v55 = vpack.c.bf16 %v5816_v33, %v5804_v11  ;;  %v16705_v43 = vadd.f32 %v4179_v53, %v4019_v28  ;;  %v4021_v26 = vadd.f32 %v4020_v23, %v16550_v45  ;;  %v4181_v8 = vpop.f32.mrf.mxu0  ;;  %v4022_v31 = vpop.f32.mrf.mxu1  ;;  %8519 = vmatprep.subr.bf16.mxu1 %v11753_v40  ;;  %v4628_v44 = vmul.f32 0.5, %v16622_v27  ;;  %v19136_v40 = vld [vmem:[#allocation46_spill] sm:$0xff] }
 0x411   :  { %v12470_v0 = vpop.eup %12469  ;;  %v5817_v38 = vmul.f32 %v5517_v41, %v4617_v51  ;;  %v5528_v19 = vadd.f32 1.0, %v12468_v63  ;;  %v4023_v58 = vadd.f32 %v4022_v31, %v16560_v22  ;;  %8679 = vmatpush1.bf16.msra.mxu0 %v11772_v4  ;;  %v5805_v7 = vmul.f32 %v5505_v6, %v4605_v57  ;;  %v11786_v51 = vld [vmem:[#allocation2 + $0x4b4] ss:$12 sps:$4 sm:$0xff]   ;;  %v19137_v4 = vld [vmem:[#allocation40_spill] sm:$0xff] }
 0x412   :  { %19135 = vst [vmem:[#allocation64_spill] sm:$0xff] %v16703_v55  ;;  %v4629_v33 = vmul.f32 0.5, %v16632_v60  ;;  %v4640_v53 = vmul.f32 0.5, %v16639_v3  ;;  %v4977_v23 = vmul.f32 0.70710677, %v16705_v43  ;;  %v4183_v28 = vpop.f32.mrf.mxu0  ;;  %v4026_v11 = vpop.f32.mrf.mxu1  ;;  %8242 = vmatmul.mubr.bf16.gmra.mxu1 %v19136_v40  ;;  %8680 = vmatprep.subr.bf16.mxu0 %v11780_v48  ;;  %12487 = verf.f32 %v4976_v24  ;;  %v19138_v48 = vld [vmem:[#allocation22_spill] sm:$0xff] }
 0x413   :  { %v12472_v41 = vpop.eup %12471  ;;  %v16714_v27 = vadd.f32 %v4181_v8, %v4021_v26  ;;  %v16716_v63 = vadd.f32 %v4183_v28, %v4023_v58  ;;  %v4027_v6 = vadd.f32 %v4026_v11, %v16550_v45  ;;  %8251 = vmatprep.mubr.bf16.mxu1 %v19137_v4  ;;  %8520 = vmatpush1.bf16.msra.mxu1 %v11751_v47  ;;  %v11757_v60 = vld [vmem:[#allocation2 + $0x330] ss:$12 sps:$4 sm:$0xff]   ;;  %v5529_v57 = vadd.f32 1.0, %v12470_v0  ;;  %v19140_v11 = vld [vmem:[#allocation89_spill] sm:$0xff] }
 0x414   :  { %v12474_v3 = vpop.eup %12473  ;;  %v5540_v31 = vadd.f32 1.0, %v12472_v41  ;;  %v4641_v55 = vmul.f32 0.5, %v16643_v32  ;;  %v4187_v40 = vpop.f32.mrf.mxu0  ;;  %8403 = vmatmul.mubr.bf16.gmra.mxu0 %v19138_v48  ;;  %8521 = vmatprep.subr.bf16.mxu1 %v11759_v25  ;;  %v11765_v24 = vld [vmem:[#allocation2 + $0x31c] ss:$12 sps:$4 sm:$0xff]   ;;  %v16722_v26 = vpack.c.bf16 %v5817_v38, %v5805_v7  ;;  %v5828_v58 = vmul.f32 %v5528_v19, %v4628_v44 }
 0x415   :  { %v4028_v59 = vpop.f32.mrf.mxu1  ;;  %v12476_v8 = vpop.eup %12475  ;;  %v5541_v28 = vadd.f32 1.0, %v12474_v3  ;;  %12489 = verf.f32 %v4977_v23  ;;  %v4988_v47 = vmul.f32 0.70710677, %v16714_v27  ;;  %8412 = vmatprep.mubr.bf16.mxu0 %v19140_v11  ;;  %8681 = vmatpush1.bf16.msra.mxu0 %v11778_v2  ;;  %v11784_v0 = vld [vmem:[#allocation2 + $0x4b0] ss:$12 sps:$4 sm:$0xff]   ;;  %v16727_v4 = vadd.f32 %v4187_v40, %v4027_v6 }
 0x416   :  { %19139 = vst [vmem:[#allocation80_spill] sm:$0xff] %v16722_v26  ;;  %v5840_v41 = vmul.f32 %v5540_v31, %v4640_v53  ;;  %v4989_v32 = vmul.f32 0.70710677, %v16716_v63  ;;  %v4029_v25 = vadd.f32 %v4028_v59, %v16560_v22  ;;  %v4189_v48 = vpop.f32.mrf.mxu0  ;;  %8682 = vmatprep.subr.bf16.mxu0 %v11786_v51  ;;  %v11792_v7 = vld [vmem:[#allocation2 + $0x49c] ss:$12 sps:$4 sm:$0xff]   ;;  %v12478_v44 = vpop.eup %12477  ;;  %v16733_v2 = vmul.f32 %v16689_v61, %v16659_v36 }
 0x417   :  { %v4030_v38 = vpop.f32.mrf.mxu1  ;;  %v5841_v19 = vmul.f32 %v5541_v28, %v4641_v55  ;;  %12491 = verf.f32 %v4988_v47  ;;  %8522 = vmatpush1.bf16.msra.mxu1 %v11757_v60  ;;  %v11763_v3 = vld [vmem:[#allocation2 + $0x318] ss:$12 sps:$4 sm:$0xff]   ;;  %v16735_v53 = vpop.eup %12479  ;;  %v5829_v40 = vmul.f32 %v5529_v57, %v4629_v33  ;;  %v5000_v59 = vmul.f32 0.70710677, %v16727_v4  ;;  %v19142_v28 = vld [vmem:[#allocation82_spill] sm:$0xff] }
 0x418   :  { %v4031_v23 = vadd.f32 %v4030_v38, %v16550_v45  ;;  %v16737_v6 = vpack.c.bf16 %v5840_v41, %v5828_v58  ;;  %12493 = verf.f32 %v4989_v32  ;;  %v4191_v51 = vpop.f32.mrf.mxu0  ;;  %8523 = vmatprep.subr.bf16.mxu1 %v11765_v24  ;;  %v11771_v55 = vld [vmem:[#allocation2 + $0x304] ss:$12 sps:$4 sm:$0xff]   ;;  %v16741_v47 = vmul.f32 0.70710677, %v19142_v28  ;;  %v11769_v24 = vld [vmem:[#allocation2 + $0x300] ss:$12 sps:$4 sm:$0xff]  }
 0x419   :  { %v4032_v31 = vpop.f32.mrf.mxu1  ;;  %v16743_v60 = vadd.f32 %v4189_v48, %v4029_v25  ;;  %8683 = vmatpush1.bf16.msra.mxu0 %v11784_v0  ;;  %v11790_v61 = vld [vmem:[#allocation2 + $0x498] ss:$12 sps:$4 sm:$0xff]   ;;  %v12482_v33 = vpop.eup %12481  ;;  %v5552_v57 = vadd.f32 1.0, %v12478_v44  ;;  %12495 = verf.f32 %v5000_v59  ;;  %v16749_v26 = vpack.c.bf16 %v5841_v19, %v5829_v40  ;;  %v19145_v59 = vld [vmem:[#allocation63_spill] sm:$0xff] }
 0x41a   :  { %19141 = vst [vmem:[#allocation47_spill] sm:$0xff] %v16737_v6  ;;  %v16745_v38 = vadd.f32 %v4191_v51, %v4031_v23  ;;  %v4033_v36 = vadd.f32 %v4032_v31, %v16560_v22  ;;  %v4193_v58 = vpop.f32.mrf.mxu0  ;;  %v19143_v32 = vld [vmem:[#allocation61_spill] sm:$0xff]  ;;  %8684 = vmatprep.subr.bf16.mxu0 %v11792_v7  ;;  %v5749_v6 = vadd.f32 1.0, %v12476_v8  ;;  %v4652_v25 = vmul.f32 0.5, %v16653_v14  ;;  %v19146_v40 = vld [vmem:[#allocation88_spill] sm:$0xff] }
 0x41b   :  { %v4036_v41 = vpop.f32.mrf.mxu1  ;;  %8252 = vmatmul.mubr.bf16.gmra.mxu1 %v19143_v32  ;;  %v11795_v11 = vld [vmem:[#allocation2 + $0x484] ss:$12 sps:$4 sm:$0xff]   ;;  %19144 = vst [vmem:[#allocation18_spill] sm:$0xff] %v16749_v26  ;;  %v12484_v48 = vpop.eup %12483  ;;  %v4664_v23 = vmul.f32 0.5, %v16682_v50  ;;  %v5001_v0 = vmul.f32 0.70710677, %v16743_v60 }
 0x41c   :  { %v5012_v44 = vmul.f32 0.70710677, %v16745_v38  ;;  %8261 = vmatprep.mubr.bf16.mxu1 %v19145_v59  ;;  %8524 = vmatpush1.bf16.msra.mxu1 %v11763_v3  ;;  %v12486_v51 = vpop.eup %12485  ;;  %v5564_v31 = vadd.f32 1.0, %v12484_v48  ;;  %v4665_v7 = vmul.f32 0.5, %v16685_v56  ;;  %v16757_v32 = vadd.f32 %v4193_v58, %v4033_v36  ;;  %v4197_v19 = vpop.f32.mrf.mxu0  ;;  %v11777_v50 = vld [vmem:[#allocation2 + $0x46c] ss:$12 sps:$4 sm:$0xff]  }
 0x41d   :  { %v4037_v8 = vadd.f32 %v4036_v41, %v16550_v45  ;;  %8413 = vmatmul.mubr.bf16.gmra.mxu0 %v19146_v40  ;;  %v4038_v14 = vpop.f32.mrf.mxu1  ;;  %8525 = vmatprep.subr.bf16.mxu1 %v11771_v55  ;;  %v5553_v26 = vadd.f32 1.0, %v12482_v33  ;;  %v5565_v13 = vadd.f32 1.0, %v12486_v51  ;;  %12497 = verf.f32 %v5001_v0  ;;  %v19147_v3 = vld [vmem:[#allocation92_spill] sm:$0xff]  ;;  %v11793_v48 = vld [vmem:[#allocation2 + $0x480] ss:$12 sps:$4 sm:$0xff]  }
 0x41e   :  { %v4039_v59 = vadd.f32 %v4038_v14, %v16560_v22  ;;  %8422 = vmatprep.mubr.bf16.mxu0 %v19147_v3  ;;  %8685 = vmatpush1.bf16.msra.mxu0 %v11790_v61  ;;  %v5852_v56 = vmul.f32 %v5552_v57, %v4652_v25  ;;  %v5864_v36 = vmul.f32 %v5564_v31, %v4664_v23  ;;  %12499 = verf.f32 %v5012_v44  ;;  %v4199_v41 = vpop.f32.mrf.mxu0  ;;  %v11801_v40 = vld [vmem:[#allocation2 + $0x5ec] ss:$12 sps:$4 sm:$0xff]   ;;  %v11775_v14 = vld [vmem:[#allocation2 + $0x468] ss:$12 sps:$4 sm:$0xff]  }
 0x41f   :  { %v5013_v58 = vmul.f32 0.70710677, %v16757_v32  ;;  %v4040_v15 = vpop.f32.mrf.mxu1  ;;  %8686 = vmatprep.subr.bf16.mxu0 %v11795_v11  ;;  %v4653_v55 = vmul.f32 0.5, %v16670_v62  ;;  %v5865_v33 = vmul.f32 %v5565_v13, %v4665_v7  ;;  %v16765_v51 = vadd.f32 %v4197_v19, %v4037_v8  ;;  %v12488_v61 = vpop.eup %12487  ;;  %v11783_v11 = vld [vmem:[#allocation2 + $0x454] ss:$12 sps:$4 sm:$0xff]  }
 0x420   :  { %v16767_v0 = vadd.f32 %v4199_v41, %v4039_v59  ;;  %8526 = vmatpush1.bf16.msra.mxu1 %v11769_v24  ;;  %v16769_v3 = vpack.c.bf16 %v5864_v36, %v5852_v56  ;;  %v4041_v57 = vadd.f32 %v4040_v15, %v16550_v45  ;;  %v4201_v25 = vpop.f32.mrf.mxu0  ;;  %v16773_v44 = vmul.f32 %v5749_v6, %v16668_v29  ;;  %v11799_v59 = vld [vmem:[#allocation2 + $0x5e8] ss:$12 sps:$4 sm:$0xff]   ;;  %v11781_v56 = vld [vmem:[#allocation2 + $0x450] ss:$12 sps:$4 sm:$0xff]  }
 0x421   :  { %12501 = verf.f32 %v5013_v58  ;;  %v4042_v23 = vpop.f32.mrf.mxu1  ;;  %8527 = vmatprep.subr.bf16.mxu1 %v11777_v50  ;;  %v16776_v13 = vmul.f32 0.5, %v19142_v28  ;;  %v5853_v62 = vmul.f32 %v5553_v26, %v4653_v55  ;;  %v5024_v24 = vmul.f32 0.70710677, %v16765_v51  ;;  %v19149_v7 = vld [vmem:[#allocation99_spill] sm:$0xff]  ;;  %v19150_v50 = vld [vmem:[#allocation65_spill] sm:$0xff] }
 0x422   :  { %19148 = vst [vmem:[#allocation79_spill] sm:$0xff] %v16769_v3  ;;  %12503 = verf.f32 %v16741_v47  ;;  %8687 = vmatpush1.bf16.msra.mxu0 %v11793_v48  ;;  %v12490_v31 = vpop.eup %12489  ;;  %v16781_v15 = vmul.f32 0.70710677, %v19149_v7  ;;  %v5025_v8 = vmul.f32 0.70710677, %v16767_v0  ;;  %v16784_v19 = vadd.f32 %v4201_v25, %v4041_v57  ;;  %v4203_v6 = vpop.f32.mrf.mxu0  ;;  %v19152_v25 = vld [vmem:[#allocation90_spill] sm:$0xff] }
 0x423   :  { %v4043_v29 = vadd.f32 %v4042_v23, %v16560_v22  ;;  %v4046_v28 = vpop.f32.mrf.mxu1  ;;  %8262 = vmatmul.mubr.bf16.gmra.mxu1 %v19150_v50  ;;  %8688 = vmatprep.subr.bf16.mxu0 %v11801_v40  ;;  %v11807_v26 = vld [vmem:[#allocation2 + $0x5d4] ss:$12 sps:$4 sm:$0xff]   ;;  %v5576_v47 = vadd.f32 1.0, %v12488_v61  ;;  %12505 = verf.f32 %v5024_v24  ;;  %v16790_v36 = vpack.c.bf16 %v5865_v33, %v5853_v62  ;;  %v11789_v23 = vld [vmem:[#allocation2 + $0x43c] ss:$12 sps:$4 sm:$0xff]  }
 0x424   :  { %v4047_v48 = vadd.f32 %v4046_v28, %v16550_v45  ;;  %8271 = vmatprep.mubr.bf16.mxu1 %v16557_v12  ;;  %8528 = vmatpush2.bf16.msra.mxu1 %v11775_v14  ;;  %v12492_v58 = vpop.eup %12491  ;;  %v4676_v41 = vmul.f32 0.5, %v16696_v10  ;;  %v4688_v55 = vmul.f32 0.5, %v16714_v27  ;;  %12507 = verf.f32 %v5025_v8  ;;  %v4207_v40 = vpop.f32.mrf.mxu0  ;;  %v19153_v10 = vld [vmem:[#allocation93_spill] sm:$0xff]  ;;  %v11805_v27 = vld [vmem:[#allocation2 + $0x5d0] ss:$12 sps:$4 sm:$0xff]  }
 0x425   :  { %19151 = vst [vmem:[#allocation17_spill] sm:$0xff] %v16790_v36  ;;  %v5036_v57 = vmul.f32 0.70710677, %v16784_v19  ;;  %8423 = vmatmul.mubr.bf16.gmra.mxu0 %v19152_v25  ;;  %v4048_v61 = vpop.f32.mrf.mxu1  ;;  %8529 = vmatprep.subr.bf16.mxu1 %v11783_v11  ;;  %v12494_v24 = vpop.eup %12493  ;;  %v5588_v28 = vadd.f32 1.0, %v12492_v58  ;;  %v16796_v14 = vadd.f32 %v4203_v6, %v4043_v29  ;;  %v5577_v8 = vadd.f32 1.0, %v12490_v31 }
 0x426   :  { %v16798_v33 = vadd.f32 %v4207_v40, %v4047_v48  ;;  %v4049_v62 = vadd.f32 %v4048_v61, %v16560_v22  ;;  %8432 = vmatprep.mubr.bf16.mxu0 %v19153_v10  ;;  %8689 = vmatpush2.bf16.msra.mxu0 %v11799_v59  ;;  %v4689_v12 = vmul.f32 0.5, %v16716_v63  ;;  %v5589_v50 = vadd.f32 1.0, %v12494_v24  ;;  %v4209_v25 = vpop.f32.mrf.mxu0  ;;  %v11810_v3 = vld [vmem:[#allocation2 + $0x5bc] ss:$12 sps:$4 sm:$0xff]   ;;  %v12496_v58 = vpop.eup %12495  ;;  %v11787_v61 = vld [vmem:[#allocation2 + $0x438] ss:$12 sps:$4 sm:$0xff]  }
 0x427   :  { %12509 = verf.f32 %v5036_v57  ;;  %v4050_v11 = vpop.f32.mrf.mxu1  ;;  %8690 = vmatprep.subr.bf16.mxu0 %v11807_v26  ;;  %v5876_v29 = vmul.f32 %v5576_v47, %v4676_v41  ;;  %v4677_v6 = vmul.f32 0.5, %v16705_v43  ;;  %v5888_v48 = vmul.f32 %v5588_v28, %v4688_v55  ;;  %v11798_v26 = vld [vmem:[#allocation2 + $0x424] ss:$12 sps:$4 sm:$0xff]  }
 0x428   :  { %v5037_v40 = vmul.f32 0.70710677, %v16796_v14  ;;  %8530 = vmatpush2.bf16.msra.mxu1 %v11781_v56  ;;  %v5889_v59 = vmul.f32 %v5589_v50, %v4689_v12  ;;  %v5600_v10 = vadd.f32 1.0, %v12496_v58  ;;  %v5048_v31 = vmul.f32 0.70710677, %v16798_v33  ;;  %v4211_v57 = vpop.f32.mrf.mxu0 }
 0x429   :  { %v16806_v63 = vadd.f32 %v4209_v25, %v4049_v62  ;;  %v4052_v24 = vpop.f32.mrf.mxu1  ;;  %8531 = vmatprep.subr.bf16.mxu1 %v11789_v23  ;;  %v16808_v36 = vpack.c.bf16 %v5888_v48, %v5876_v29  ;;  %v4051_v43 = vadd.f32 %v4050_v11, %v16550_v45  ;;  %v11808_v56 = vld [vmem:[#allocation2 + $0x5b8] ss:$12 sps:$4 sm:$0xff]   ;;  %v5877_v12 = vmul.f32 %v5577_v8, %v4677_v6 }
 0x42a   :  { %12511 = verf.f32 %v5037_v40  ;;  %v4053_v47 = vadd.f32 %v4052_v24, %v16560_v22  ;;  %8691 = vmatpush2.bf16.msra.mxu0 %v11805_v27  ;;  %v12498_v41 = vpop.eup %12497  ;;  %v4700_v50 = vmul.f32 0.5, %v16727_v4  ;;  %v4213_v25 = vpop.f32.mrf.mxu0  ;;  %v19155_v23 = vld [vmem:[#allocation69_spill] sm:$0xff]  ;;  %v4701_v11 = vmul.f32 0.5, %v16743_v60  ;;  %v11804_v60 = vld [vmem:[#allocation2 + $0x40c] ss:$12 sps:$4 sm:$0xff]  }
 0x42b   :  { %19154 = vst [vmem:[#allocation50_spill] sm:$0xff] %v16808_v36  ;;  %12513 = verf.f32 %v5048_v31  ;;  %v5049_v55 = vmul.f32 0.70710677, %v16806_v63  ;;  %v4056_v28 = vpop.f32.mrf.mxu1  ;;  %8272 = vmatmul.mubr.bf16.gmra.mxu1 %v19155_v23  ;;  %8692 = vmatprep.subr.bf16.mxu0 %v11810_v3  ;;  %v11816_v62 = vld [vmem:[#allocation2 + $0x5a4] ss:$12 sps:$4 sm:$0xff]   ;;  %v12500_v58 = vpop.eup %12499  ;;  %v16816_v29 = vadd.f32 %v4211_v57, %v4051_v43  ;;  %v5601_v6 = vadd.f32 1.0, %v12498_v41 }
 0x42c   :  { %v16818_v27 = vadd.f32 %v4213_v25, %v4053_v47  ;;  %v4057_v8 = vadd.f32 %v4056_v28, %v16550_v45  ;;  %8281 = vmatprep.mubr.bf16.mxu1 %v16589_v17  ;;  %8532 = vmatpush2.bf16.msra.mxu1 %v11787_v61  ;;  %v11796_v4 = vld [vmem:[#allocation2 + $0x420] ss:$12 sps:$4 sm:$0xff]   ;;  %v4712_v48 = vmul.f32 0.5, %v16745_v38  ;;  %v5612_v40 = vadd.f32 1.0, %v12500_v58  ;;  %v4217_v31 = vpop.f32.mrf.mxu0  ;;  %v19156_v3 = vld [vmem:[#allocation91_spill] sm:$0xff] }
 0x42d   :  { %8433 = vmatmul.mubr.bf16.gmra.mxu0 %v19156_v3  ;;  %v4058_v24 = vpop.f32.mrf.mxu1  ;;  %8533 = vmatprep.subr.bf16.mxu1 %v11798_v26  ;;  %v16824_v57 = vpack.c.bf16 %v5889_v59, %v5877_v12  ;;  %v5900_v47 = vmul.f32 %v5600_v10, %v4700_v50  ;;  %v4713_v25 = vmul.f32 0.5, %v16757_v32  ;;  %12515 = verf.f32 %v5049_v55  ;;  %v19158_v28 = vld [vmem:[#allocation95_spill] sm:$0xff]  ;;  %v11814_v38 = vld [vmem:[#allocation2 + $0x5a0] ss:$12 sps:$4 sm:$0xff]  }
 0x42e   :  { %v12502_v43 = vpop.eup %12501  ;;  %v5060_v61 = vmul.f32 0.70710677, %v16816_v29  ;;  %8442 = vmatprep.mubr.bf16.mxu0 %v19158_v28  ;;  %8693 = vmatpush2.bf16.msra.mxu0 %v11808_v56  ;;  %v5912_v58 = vmul.f32 %v5612_v40, %v4712_v48  ;;  %v5061_v3 = vmul.f32 0.70710677, %v16818_v27  ;;  %v16830_v26 = vadd.f32 %v4217_v31, %v4057_v8  ;;  %v4219_v59 = vpop.f32.mrf.mxu0  ;;  %v11819_v10 = vld [vmem:[#allocation2 + $0x58c] ss:$12 sps:$4 sm:$0xff]  }
 0x42f   :  { %19157 = vst [vmem:[#allocation81_spill] sm:$0xff] %v16824_v57  ;;  %v12504_v41 = vpop.eup %12503  ;;  %v5613_v17 = vadd.f32 1.0, %v12502_v43  ;;  %v4060_v12 = vpop.f32.mrf.mxu1  ;;  %8694 = vmatprep.subr.bf16.mxu0 %v11816_v62  ;;  %v16833_v32 = vadd.f32 1.0, %v16735_v53  ;;  %v4059_v50 = vadd.f32 %v4058_v24, %v16560_v22  ;;  %v11802_v55 = vld [vmem:[#allocation2 + $0x408] ss:$12 sps:$4 sm:$0xff]   ;;  %v5901_v40 = vmul.f32 %v5601_v6, %v4701_v11 }
 0x430   :  { %12517 = verf.f32 %v5060_v61  ;;  %v4061_v56 = vadd.f32 %v4060_v12, %v16550_v45  ;;  %8534 = vmatpush2.bf16.msra.mxu1 %v11796_v4  ;;  %v12506_v48 = vpop.eup %12505  ;;  %v16837_v43 = vpack.c.bf16 %v5912_v58, %v5900_v47  ;;  %v4221_v31 = vpop.f32.mrf.mxu0  ;;  %v11813_v62 = vld [vmem:[#allocation2 + $0x3f4] ss:$12 sps:$4 sm:$0xff]   ;;  %v5072_v53 = vmul.f32 0.70710677, %v16830_v26 }
 0x431   :  { %v5913_v8 = vmul.f32 %v5613_v17, %v4713_v25  ;;  %12519 = verf.f32 %v5061_v3  ;;  %v4062_v28 = vpop.f32.mrf.mxu1  ;;  %8535 = vmatprep.subr.bf16.mxu1 %v11804_v60  ;;  %v12508_v23 = vpop.eup %12507  ;;  %v16840_v61 = vadd.f32 %v4219_v59, %v4059_v50  ;;  %v5785_v4 = vadd.f32 1.0, %v12504_v41  ;;  %v11817_v12 = vld [vmem:[#allocation2 + $0x588] ss:$12 sps:$4 sm:$0xff]   ;;  %v19160_v47 = vld [vmem:[#allocation73_spill] sm:$0xff] }
 0x432   :  { %19159 = vst [vmem:[#allocation82_spill] sm:$0xff] %v16837_v43  ;;  %v16842_v24 = vadd.f32 %v4221_v31, %v4061_v56  ;;  %8695 = vmatpush2.bf16.msra.mxu0 %v11814_v38  ;;  %12521 = verf.f32 %v16781_v15  ;;  %v5624_v11 = vadd.f32 1.0, %v12506_v48  ;;  %v4063_v17 = vadd.f32 %v4062_v28, %v16560_v22  ;;  %v4223_v6 = vpop.f32.mrf.mxu0  ;;  %v11825_v60 = vld [vmem:[#allocation2 + $0x574] ss:$12 sps:$4 sm:$0xff]   ;;  %v11811_v38 = vld [vmem:[#allocation2 + $0x3f0] ss:$12 sps:$4 sm:$0xff]  }
 0x433   :  { %v4066_v3 = vpop.f32.mrf.mxu1  ;;  %8282 = vmatmul.mubr.bf16.gmra.mxu1 %v19160_v47  ;;  %8696 = vmatprep.subr.bf16.mxu0 %v11819_v10  ;;  %v16847_v25 = vpack.c.bf16 %v5913_v8, %v5901_v40  ;;  %12523 = verf.f32 %v5072_v53  ;;  %v5073_v59 = vmul.f32 0.70710677, %v16840_v61  ;;  %v16853_v15 = vpack.c.bf16 %v16679_v52, %v16677_v20  ;;  %v11822_v41 = vld [vmem:[#allocation2 + $0x3dc] ss:$12 sps:$4 sm:$0xff]  }
 0x434   :  { %v12510_v58 = vpop.eup %12509  ;;  %8291 = vmatprep.mubr.bf16.mxu1 %v16662_v5  ;;  %v16857_v28 = vpack.c.bf16 %v16773_v44, %v16733_v2  ;;  %8536 = vmatpush2.bf16.msra.mxu1 %v11802_v55  ;;  %v4724_v10 = vmul.f32 0.5, %v16765_v51  ;;  %v4736_v50 = vmul.f32 0.5, %v16784_v19  ;;  %v5084_v48 = vmul.f32 0.70710677, %v16842_v24  ;;  %v4227_v40 = vpop.f32.mrf.mxu0  ;;  %v19164_v8 = vld [vmem:[#allocation94_spill] sm:$0xff]  ;;  %v19165_v44 = vld [vmem:[#allocation27_spill] sm:$0xff] }
 0x435   :  { %19161 = vst [vmem:[#allocation99_spill] sm:$0xff] %v16847_v25  ;;  %19162 = vst [vmem:[#allocation117_spill] sm:$0xff] %v16853_v15  ;;  %v5636_v56 = vadd.f32 1.0, %v12510_v58  ;;  %8443 = vmatmul.mubr.bf16.gmra.mxu0 %v19164_v8  ;;  %v4068_v31 = vpop.f32.mrf.mxu1  ;;  %8537 = vmatprep.subr.bf16.mxu1 %v11813_v62  ;;  %12525 = verf.f32 %v5073_v59  ;;  %v16863_v20 = vadd.f32 %v4223_v6, %v4063_v17  ;;  %v11823_v51 = vld [vmem:[#allocation2 + $0x570] ss:$12 sps:$4 sm:$0xff]   ;;  %v5625_v53 = vadd.f32 1.0, %v12508_v23 }
 0x436   :  { %19163 = vst [vmem:[#allocation118_spill] sm:$0xff] %v16857_v28  ;;  %v4067_v52 = vadd.f32 %v4066_v3, %v16550_v45  ;;  %v4069_v2 = vadd.f32 %v4068_v31, %v16560_v22  ;;  %8452 = vmatprep.mubr.bf16.mxu0 %v19165_v44  ;;  %8697 = vmatpush2.bf16.msra.mxu0 %v11817_v12  ;;  %12527 = verf.f32 %v5084_v48  ;;  %v4229_v5 = vpop.f32.mrf.mxu0  ;;  %v11831_v62 = vld [vmem:[#allocation2 + $0x55c] ss:$12 sps:$4 sm:$0xff]   ;;  %v4737_v17 = vmul.f32 0.5, %v16796_v14  ;;  %v11820_v12 = vld [vmem:[#allocation2 + $0x3d8] ss:$12 sps:$4 sm:$0xff]  }
 0x437   :  { %v12512_v19 = vpop.eup %12511  ;;  %v5924_v55 = vmul.f32 %v5624_v11, %v4724_v10  ;;  %v5936_v58 = vmul.f32 %v5636_v56, %v4736_v50  ;;  %v4070_v8 = vpop.f32.mrf.mxu1  ;;  %8698 = vmatprep.subr.bf16.mxu0 %v11825_v60  ;;  %v5085_v3 = vmul.f32 0.70710677, %v16863_v20  ;;  %v4725_v44 = vmul.f32 0.5, %v16767_v0  ;;  %v11828_v56 = vld [vmem:[#allocation2 + $0x3c4] ss:$12 sps:$4 sm:$0xff]  }
 0x438   :  { %v12514_v59 = vpop.eup %12513  ;;  %v5637_v6 = vadd.f32 1.0, %v12512_v19  ;;  %v16870_v31 = vadd.f32 %v4227_v40, %v4067_v52  ;;  %8538 = vmatpush2.bf16.msra.mxu1 %v11811_v38  ;;  %v16875_v23 = vadd.f32 %v4229_v5, %v4069_v2  ;;  %v4071_v10 = vadd.f32 %v4070_v8, %v16550_v45  ;;  %v4231_v60 = vpop.f32.mrf.mxu0  ;;  %v11829_v38 = vld [vmem:[#allocation2 + $0x558] ss:$12 sps:$4 sm:$0xff]  }
 0x439   :  { %v16873_v11 = vpack.c.bf16 %v5936_v58, %v5924_v55  ;;  %v4072_v50 = vpop.f32.mrf.mxu1  ;;  %8539 = vmatprep.subr.bf16.mxu1 %v11822_v41  ;;  %12529 = verf.f32 %v5085_v3  ;;  %v16880_v40 = vmul.f32 %v5785_v4, %v16776_v13  ;;  %v5925_v52 = vmul.f32 %v5625_v53, %v4725_v44  ;;  %v19167_v41 = vld [vmem:[#allocation75_spill] sm:$0xff] }
 0x43a   :  { %v5937_v14 = vmul.f32 %v5637_v6, %v4737_v17  ;;  %v5096_v48 = vmul.f32 0.70710677, %v16870_v31  ;;  %8699 = vmatpush2.bf16.msra.mxu0 %v11823_v51  ;;  %v12516_v0 = vpop.eup %12515  ;;  %v4748_v5 = vmul.f32 0.5, %v16798_v33  ;;  %v5648_v2 = vadd.f32 1.0, %v12514_v59  ;;  %v4233_v19 = vpop.f32.mrf.mxu0  ;;  %v11834_v58 = vld [vmem:[#allocation2 + $0x544] ss:$12 sps:$4 sm:$0xff]  }
 0x43b   :  { %19166 = vst [vmem:[#allocation119_spill] sm:$0xff] %v16873_v11  ;;  %v5097_v8 = vmul.f32 0.70710677, %v16875_v23  ;;  %v4076_v55 = vpop.f32.mrf.mxu1  ;;  %8292 = vmatmul.mubr.bf16.gmra.mxu1 %v19167_v41  ;;  %8700 = vmatprep.subr.bf16.mxu0 %v11831_v62  ;;  %v16885_v17 = vadd.f32 %v4231_v60, %v4071_v10  ;;  %v4073_v13 = vadd.f32 %v4072_v50, %v16560_v22  ;;  %v11826_v33 = vld [vmem:[#allocation2 + $0x3c0] ss:$12 sps:$4 sm:$0xff]   ;;  %v4749_v51 = vmul.f32 0.5, %v16806_v63 }
 0x43c   :  { %12531 = verf.f32 %v5096_v48  ;;  %v4077_v4 = vadd.f32 %v4076_v55, %v16550_v45  ;;  %8301 = vmatprep.mubr.bf16.mxu1 %v16674_v46  ;;  %8540 = vmatpush2.bf16.msra.mxu1 %v11820_v12  ;;  %v4760_v53 = vmul.f32 0.5, %v16816_v29  ;;  %v4761_v59 = vmul.f32 0.5, %v16818_v27  ;;  %v4237_v62 = vpop.f32.mrf.mxu0  ;;  %v19168_v6 = vld [vmem:[#allocation21_spill] sm:$0xff]  ;;  %v11837_v10 = vld [vmem:[#allocation2 + $0x6ac] ss:$12 sps:$4 sm:$0xff]  }
 0x43d   :  { %v12518_v44 = vpop.eup %12517  ;;  %8453 = vmatmul.mubr.bf16.gmra.mxu0 %v19168_v6  ;;  %v4078_v3 = vpop.f32.mrf.mxu1  ;;  %8541 = vmatprep.subr.bf16.mxu1 %v11828_v56  ;;  %v16894_v60 = vpack.c.bf16 %v5937_v14, %v5925_v52  ;;  %v5649_v48 = vadd.f32 1.0, %v12516_v0  ;;  %v5108_v12 = vmul.f32 0.70710677, %v16885_v17  ;;  %v16897_v46 = vadd.f32 %v4233_v19, %v4073_v13  ;;  %v19170_v63 = vld [vmem:[#allocation26_spill] sm:$0xff]  ;;  %v19171_v13 = vld [vmem:[#allocation97_spill] sm:$0xff] }
 0x43e   :  { %v12520_v50 = vpop.eup %12519  ;;  %v5660_v55 = vadd.f32 1.0, %v12518_v44  ;;  %8462 = vmatprep.mubr.bf16.mxu0 %v19170_v63  ;;  %8701 = vmatpush2.bf16.msra.mxu0 %v11829_v38  ;;  %v11832_v29 = vld [vmem:[#allocation2 + $0x540] ss:$12 sps:$4 sm:$0xff]   ;;  %12533 = verf.f32 %v5097_v8  ;;  %v16900_v41 = vadd.f32 %v4237_v62, %v4077_v4  ;;  %v4079_v56 = vadd.f32 %v4078_v3, %v16560_v22  ;;  %v4239_v6 = vpop.f32.mrf.mxu0 }
 0x43f   :  { %19169 = vst [vmem:[#allocation120_spill] sm:$0xff] %v16894_v60  ;;  %v5661_v27 = vadd.f32 1.0, %v12520_v50  ;;  %v4080_v14 = vpop.f32.mrf.mxu1  ;;  %8702 = vmatprep.subr.bf16.mxu0 %v11834_v58  ;;  %v11852_v52 = vld [vmem:[#allocation2 + $0x82c] ss:$12 sps:$4 sm:$0xff]   ;;  %v16903_v0 = vpop.eup %12521  ;;  %v5948_v44 = vmul.f32 %v5648_v2, %v4748_v5  ;;  %12535 = verf.f32 %v5108_v12  ;;  %v5109_v19 = vmul.f32 0.70710677, %v16897_v46 }
 0x440   :  { %v5960_v47 = vmul.f32 %v5660_v55, %v4760_v53  ;;  %8542 = vmatpush2.bf16.msra.mxu1 %v11826_v33  ;;  %v12524_v38 = vpop.eup %12523  ;;  %v5186_v50 = vmul.f32 0.70710677, %v19171_v13  ;;  %v5120_v4 = vmul.f32 0.70710677, %v16900_v41  ;;  %v16908_v62 = vadd.f32 %v4239_v6, %v4079_v56  ;;  %v4241_v3 = vpop.f32.mrf.mxu0  ;;  %v19173_v12 = vld [vmem:[#allocation76_spill] sm:$0xff] }
 0x441   :  { %v5961_v8 = vmul.f32 %v5661_v27, %v4761_v59  ;;  %v4082_v63 = vpop.f32.mrf.mxu1  ;;  %8833 = vmatprep.subr.bf16.mxu1 %v11837_v10  ;;  %v5949_v58 = vmul.f32 %v5649_v48, %v4749_v51  ;;  %12537 = verf.f32 %v5109_v19  ;;  %v4081_v5 = vadd.f32 %v4080_v14, %v16550_v45  ;;  %v19174_v14 = vld [vmem:[#allocation96_spill] sm:$0xff] }
 0x442   :  { %v16910_v11 = vpack.c.bf16 %v5960_v47, %v5948_v44  ;;  %8703 = vmatpush2.bf16.msra.mxu0 %v11832_v29  ;;  %v12526_v2 = vpop.eup %12525  ;;  %v5672_v33 = vadd.f32 1.0, %v12524_v38  ;;  %12539 = verf.f32 %v5120_v4  ;;  %v5121_v53 = vmul.f32 0.70710677, %v16908_v62  ;;  %v4243_v55 = vpop.f32.mrf.mxu0  ;;  %v19176_v4 = vld [vmem:[#allocation100_spill] sm:$0xff] }
 0x443   :  { %v4083_v59 = vadd.f32 %v4082_v63, %v16560_v22  ;;  %v4086_v6 = vpop.f32.mrf.mxu1  ;;  %8302 = vmatmul.mubr.bf16.gmra.mxu1 %v19173_v12  ;;  %8994 = vmatprep.subr.bf16.mxu0 %v11852_v52  ;;  %v12528_v10 = vpop.eup %12527  ;;  %v4772_v47 = vmul.f32 0.5, %v16830_v26  ;;  %v4784_v51 = vmul.f32 0.5, %v16842_v24  ;;  %v16918_v48 = vadd.f32 %v4241_v3, %v4081_v5 }
 0x444   :  { %19172 = vst [vmem:[#allocation97_spill] sm:$0xff] %v16910_v11  ;;  %v4087_v29 = vadd.f32 %v4086_v6, %v16550_v45  ;;  %8311 = vmatprep.mubr.bf16.mxu1 %v16853_v15  ;;  %v5684_v27 = vadd.f32 1.0, %v12528_v10  ;;  %12541 = verf.f32 %v5121_v53  ;;  %v4247_v63 = vpop.f32.mrf.mxu0  ;;  %v16925_v52 = vpack.c.bf16 %v5961_v8, %v5949_v58 }
 0x445   :  { %v16922_v56 = vadd.f32 %v4243_v55, %v4083_v59  ;;  %8463 = vmatmul.mubr.bf16.gmra.mxu0 %v19174_v14  ;;  %v4088_v44 = vpop.f32.mrf.mxu1  ;;  %v4773_v26 = vmul.f32 0.5, %v16840_v61  ;;  %v5673_v19 = vadd.f32 1.0, %v12526_v2  ;;  %v5132_v24 = vmul.f32 0.70710677, %v16918_v48 }
 0x446   :  { %19175 = vst [vmem:[#allocation121_spill] sm:$0xff] %v16925_v52  ;;  %v16929_v38 = vadd.f32 %v4247_v63, %v4087_v29  ;;  %8472 = vmatprep.mubr.bf16.mxu0 %v19176_v4  ;;  %v12530_v3 = vpop.eup %12529  ;;  %v5972_v5 = vmul.f32 %v5672_v33, %v4772_v47  ;;  %v5984_v53 = vmul.f32 %v5684_v27, %v4784_v51  ;;  %v4249_v6 = vpop.f32.mrf.mxu0  ;;  %v4785_v8 = vmul.f32 0.5, %v16863_v20 }
 0x447   :  { %v5133_v59 = vmul.f32 0.70710677, %v16922_v56  ;;  %v4089_v55 = vadd.f32 %v4088_v44, %v16560_v22  ;;  %v4090_v10 = vpop.f32.mrf.mxu1  ;;  %v5685_v58 = vadd.f32 1.0, %v12530_v3  ;;  %12543 = verf.f32 %v5132_v24 }
 0x448   :  { %v5144_v61 = vmul.f32 0.70710677, %v16929_v38  ;;  %v16936_v29 = vpack.c.bf16 %v5984_v53, %v5972_v5  ;;  %v4091_v33 = vadd.f32 %v4090_v10, %v16550_v45  ;;  %v4251_v47 = vpop.f32.mrf.mxu0  ;;  %v5973_v27 = vmul.f32 %v5673_v19, %v4773_v26 }
 0x449   :  { %v12532_v2 = vpop.eup %12531  ;;  %12545 = verf.f32 %v5133_v59  ;;  %v16938_v63 = vadd.f32 %v4249_v6, %v4089_v55  ;;  %v4092_v51 = vpop.f32.mrf.mxu1  ;;  %v5985_v44 = vmul.f32 %v5685_v58, %v4785_v8  ;;  %v4887_v20 = vmul.f32 0.5, %v19149_v7  ;;  %v19178_v59 = vld [vmem:[#allocation77_spill] sm:$0xff] }
 0x44a   :  { %19177 = vst [vmem:[#allocation122_spill] sm:$0xff] %v16936_v29  ;;  %12547 = verf.f32 %v5186_v50  ;;  %v4093_v4 = vadd.f32 %v4092_v51, %v16560_v22  ;;  %v16944_v3 = vadd.f32 %v4251_v47, %v4091_v33  ;;  %v4253_v5 = vpop.f32.mrf.mxu0  ;;  %v5696_v6 = vadd.f32 1.0, %v12532_v2 }
 0x44b   :  { %12549 = verf.f32 %v5144_v61  ;;  %v5145_v24 = vmul.f32 0.70710677, %v16938_v63  ;;  %v4096_v53 = vpop.f32.mrf.mxu1  ;;  %8312 = vmatmul.mubr.bf16.gmra.mxu1 %v19178_v59  ;;  %v12534_v55 = vpop.eup %12533  ;;  %v16951_v26 = vpack.c.bf16 %v5985_v44, %v5973_v27  ;;  %v4796_v19 = vmul.f32 0.5, %v16870_v31  ;;  %v19180_v61 = vld [vmem:[#allocation98_spill] sm:$0xff]  ;;  %v19181_v27 = vld [vmem:[#allocation28_spill] sm:$0xff] }
 0x44c   :  { %v16947_v10 = vadd.f32 %v4253_v5, %v4093_v4  ;;  %v4097_v50 = vadd.f32 %v4096_v53, %v16550_v45  ;;  %8321 = vmatprep.mubr.bf16.mxu1 %v16857_v28  ;;  %v12536_v7 = vpop.eup %12535  ;;  %v5156_v8 = vmul.f32 0.70710677, %v16944_v3  ;;  %v4257_v58 = vpop.f32.mrf.mxu0  ;;  %v5787_v2 = vadd.f32 1.0, %v16903_v0 }
 0x44d   :  { %19179 = vst [vmem:[#allocation123_spill] sm:$0xff] %v16951_v26  ;;  %12551 = verf.f32 %v5145_v24  ;;  %8473 = vmatmul.mubr.bf16.gmra.mxu0 %v19180_v61  ;;  %v4098_v33 = vpop.f32.mrf.mxu1  ;;  %v4808_v4 = vmul.f32 0.5, %v16885_v17  ;;  %v5708_v47 = vadd.f32 1.0, %v12536_v7  ;;  %v5697_v31 = vadd.f32 1.0, %v12534_v55 }
 0x44e   :  { %v5157_v51 = vmul.f32 0.70710677, %v16947_v10  ;;  %v16959_v5 = vadd.f32 %v4257_v58, %v4097_v50  ;;  %8482 = vmatprep.mubr.bf16.mxu0 %v19181_v27  ;;  %v12538_v44 = vpop.eup %12537  ;;  %v4809_v24 = vmul.f32 0.5, %v16897_v46  ;;  %12553 = verf.f32 %v5156_v8  ;;  %v4259_v61 = vpop.f32.mrf.mxu0 }
 0x44f   :  { %v4099_v53 = vadd.f32 %v4098_v33, %v16560_v22  ;;  %v4100_v28 = vpop.f32.mrf.mxu1  ;;  %v12540_v59 = vpop.eup %12539  ;;  %v5996_v0 = vmul.f32 %v5696_v6, %v4796_v19  ;;  %v6008_v14 = vmul.f32 %v5708_v47, %v4808_v4  ;;  %v5709_v17 = vadd.f32 1.0, %v12538_v44 }
 0x450   :  { %12555 = verf.f32 %v5157_v51  ;;  %v4797_v7 = vmul.f32 0.5, %v16875_v23  ;;  %v5168_v50 = vmul.f32 0.70710677, %v16959_v5  ;;  %v4101_v55 = vadd.f32 %v4100_v28, %v16550_v45  ;;  %v4261_v27 = vpop.f32.mrf.mxu0  ;;  %v19183_v51 = vld [vmem:[#allocation78_spill] sm:$0xff] }
 0x451   :  { %v16966_v58 = vadd.f32 %v4259_v61, %v4099_v53  ;;  %v4102_v46 = vpop.f32.mrf.mxu1  ;;  %v12542_v8 = vpop.eup %12541  ;;  %v16969_v15 = vpack.c.bf16 %v6008_v14, %v5996_v0  ;;  %v6009_v33 = vmul.f32 %v5709_v17, %v4809_v24  ;;  %v6087_v6 = vmul.f32 %v5787_v2, %v4887_v20  ;;  %v12755_v28 = vld [vmem:[%s18482_s4 + $0x8] sm:$0xf] }
 0x452   :  { %v4103_v12 = vadd.f32 %v4102_v46, %v16560_v22  ;;  %v5997_v19 = vmul.f32 %v5697_v31, %v4797_v7  ;;  %v5720_v4 = vadd.f32 1.0, %v12540_v59  ;;  %12557 = verf.f32 %v5168_v50  ;;  %v4263_v47 = vpop.f32.mrf.mxu0  ;;  %v19184_v61 = vld [vmem:[#allocation42_spill] sm:$0xff]  ;;  %v19185_v59 = vld [vmem:[#allocation84_spill] sm:$0xff] }
 0x453   :  { %19182 = vst [vmem:[#allocation124_spill] sm:$0xff] %v16969_v15  ;;  %v4106_v23 = vpop.f32.mrf.mxu1  ;;  %8322 = vmatmul.mubr.bf16.gmra.mxu1 %v19183_v51  ;;  %v16977_v44 = vrot.slane %v12755_v28, %v19184_v61  ;;  %v5169_v14 = vmul.f32 0.70710677, %v16966_v58  ;;  %v16980_v24 = vadd.f32 %v4261_v27, %v4101_v55  ;;  %v4820_v31 = vmul.f32 0.5, %v16900_v41  ;;  %v19186_v50 = vld [vmem:[#allocation30_spill] sm:$0xff] }
 0x454   :  { %v16982_v53 = vadd.f32 %v4263_v47, %v4103_v12  ;;  %v4107_v20 = vadd.f32 %v4106_v23, %v16550_v45  ;;  %8331 = vmatprep.mubr.bf16.mxu1 %v19185_v59  ;;  %v12544_v2 = vpop.eup %12543  ;;  %v4821_v0 = vmul.f32 0.5, %v16908_v62  ;;  %v5721_v17 = vadd.f32 1.0, %v12542_v8  ;;  %v4267_v7 = vpop.f32.mrf.mxu0  ;;  %v19188_v47 = vld [vmem:[#allocation29_spill] sm:$0xff] }
 0x455   :  { %8483 = vmatmul.mubr.bf16.gmra.mxu0 %v19186_v50  ;;  %v4108_v46 = vpop.f32.mrf.mxu1  ;;  %v16989_v61 = vpack.c.bf16 %v6009_v33, %v5997_v19  ;;  %v4832_v12 = vmul.f32 0.5, %v16918_v48  ;;  %v5732_v55 = vadd.f32 1.0, %v12544_v2  ;;  %12559 = verf.f32 %v5169_v14 }
 0x456   :  { %v12546_v27 = vpop.eup %12545  ;;  %v5180_v45 = vmul.f32 0.70710677, %v16980_v24  ;;  %8492 = vmatprep.mubr.bf16.mxu0 %v19188_v47  ;;  %v4833_v41 = vmul.f32 0.5, %v16922_v56  ;;  %v5181_v8 = vmul.f32 0.70710677, %v16982_v53  ;;  %v16996_v59 = vadd.f32 %v4267_v7, %v4107_v20  ;;  %v4269_v50 = vpop.f32.mrf.mxu0 }
 0x457   :  { %19187 = vst [vmem:[#allocation125_spill] sm:$0xff] %v16989_v61  ;;  %v12548_v23 = vpop.eup %12547  ;;  %v5733_v62 = vadd.f32 1.0, %v12546_v27  ;;  %v4110_v33 = vpop.f32.mrf.mxu1  ;;  %v6020_v51 = vmul.f32 %v5720_v4, %v4820_v31  ;;  %v6032_v15 = vmul.f32 %v5732_v55, %v4832_v12  ;;  %v4109_v48 = vadd.f32 %v4108_v46, %v16560_v22  ;;  %v19193_v4 = vld [vmem:[#allocation34_spill] sm:$0xff]  ;;  %v19195_v46 = vld [vmem:[#allocation83_spill] sm:$0xff] }
 0x458   :  { %19189 = vst [vmem:[#allocation126_spill] sm:$0xff] %v16996_v59  ;;  %v12550_v19 = vpop.eup %12549  ;;  %12561 = verf.f32 %v5180_v45  ;;  %v4884_v14 = vmul.f32 0.5, %v19129_v35  ;;  %v6021_v2 = vmul.f32 %v5721_v17, %v4821_v0  ;;  %v4271_v61 = vpop.f32.mrf.mxu0  ;;  %v17006_v7 = vpack.c.bf16 %v16880_v40, %v16880_v40 }
 0x459   :  { %v6033_v47 = vmul.f32 %v5733_v62, %v4833_v41  ;;  %12563 = verf.f32 %v5181_v8  ;;  %v4111_v56 = vpop.f32.mrf.mxu1  ;;  %v17000_v29 = vpack.c.bf16 %v6032_v15, %v6020_v51  ;;  %v17002_v20 = vadd.f32 %v4269_v50, %v4109_v48  ;;  %v19198_v8 = vld [vmem:[#allocation25_spill] sm:$0xff] }
 0x45a   :  { %v12552_v27 = vpop.eup %12551  ;;  %19192 = vst [vmem:[#allocation129_spill] sm:$0xff] %v17006_v7  ;;  %v19194_v31 = vsub.s32 3, %v19193_v4  ;;  %v5786_v22 = vadd.f32 1.0, %v12548_v23  ;;  %v5744_v35 = vadd.f32 1.0, %v12550_v19  ;;  %v4272_v0 = vpop.f32.mrf.mxu0  ;;  %v6084_v51 = vmul.f32 %v16833_v32, %v4884_v14 }
 0x45b   :  { %19190 = vst [vmem:[#allocation127_spill] sm:$0xff] %v17000_v29  ;;  %19191 = vst [vmem:[#allocation128_spill] sm:$0xff] %v17002_v20  ;;  %v4308_v17 = vpop.f32.mrf.mxu1  ;;  %8332 = vmatmul.mubr.bf16.gmra.mxu1 %v19195_v46  ;;  %v17013_v61 = vpack.c.bf16 %v6033_v47, %v6021_v2  ;;  %v12554_v15 = vpop.eup %12553  ;;  %v4886_v50 = vmul.f32 0.5, %v19171_v13  ;;  %v17019_v55 = vpack.c.bf16 %v6087_v6, %v6087_v6  ;;  %v4844_v45 = vmul.f32 0.5, %v16929_v38  ;;  %v19213_v46 = vld [vmem:[#allocation62_spill] sm:$0xff] }
 0x45c   :  { %v17010_v12 = vrot.slane %v12755_v28, %v19194_v31  ;;  %v4309_v40 = vadd.f32 %v4308_v17, %v16977_v44  ;;  %8341 = vmatprep.mubr.bf16.mxu1 %v17006_v7  ;;  %v5745_v23 = vadd.f32 1.0, %v12552_v27  ;;  %v4856_v41 = vmul.f32 0.5, %v16944_v3  ;;  %v4469_v47 = vpop.f32.mrf.mxu0 }
 0x45d   :  { %19196 = vst [vmem:[#allocation34_spill] sm:$0xff] %v17013_v61  ;;  %19197 = vst [vmem:[#allocation130_spill] sm:$0xff] %v17019_v55  ;;  %v12556_v28 = vpop.eup %12555  ;;  %v5756_v62 = vadd.f32 1.0, %v12554_v15  ;;  %8493 = vmatmul.mubr.bf16.gmra.mxu0 %v19198_v8  ;;  %v4310_v33 = vpop.f32.mrf.mxu1  ;;  %v4857_v32 = vmul.f32 0.5, %v16947_v10  ;;  %v6086_v6 = vmul.f32 %v5786_v22, %v4886_v50  ;;  %v6044_v14 = vmul.f32 %v5744_v35, %v4844_v45  ;;  %v11937_v61 = vld [vmem:[#allocation2 + $0x2f0] ss:$12 sps:$4 sm:$0xff]  }
 0x45e   :  { %v5757_v13 = vadd.f32 1.0, %v12556_v28  ;;  %v17025_v19 = vadd.f32 %v4469_v47, %v4309_v40  ;;  %v4311_v48 = vadd.f32 %v4310_v33, %v17010_v12  ;;  %8502 = vmatprep.mubr.bf16.mxu0 %v17019_v55  ;;  %v4845_v38 = vmul.f32 0.5, %v16938_v63  ;;  %v4471_v3 = vpop.f32.mrf.mxu0  ;;  %v11870_v55 = vld [vmem:[#allocation2 + $0x7e4] ss:$12 sps:$4 sm:$0xff]  }
 0x45f   :  { %v6056_v2 = vmul.f32 %v5756_v62, %v4856_v41  ;;  %v4312_v56 = vpop.f32.mrf.mxu1  ;;  %v12558_v27 = vpop.eup %12557  ;;  %v17033_v10 = vpack.c.bf16 %v6084_v51, %v6084_v51  ;;  %v17040_v45 = vpack.c.bf16 %v6086_v6, %v6086_v6  ;;  %v4868_v6 = vmul.f32 0.5, %v16959_v5 }
 0x460   :  { %v6057_v4 = vmul.f32 %v5757_v13, %v4857_v32  ;;  %v4906_v31 = vmul.f32 0.70710677, %v17025_v19  ;;  %v17031_v0 = vadd.f32 %v4471_v3, %v4311_v48  ;;  %v6045_v17 = vmul.f32 %v5745_v23, %v4845_v38  ;;  %v4473_v22 = vpop.f32.mrf.mxu0  ;;  %v19203_v13 = vld [vmem:[#allocation103_spill] sm:$0xff] }
 0x461   :  { %19199 = vst [vmem:[#allocation131_spill] sm:$0xff] %v17033_v10  ;;  %v17035_v15 = vpack.c.bf16 %v6056_v2, %v6044_v14  ;;  %v4313_v40 = vadd.f32 %v4312_v56, %v16977_v44  ;;  %v4314_v35 = vpop.f32.mrf.mxu1  ;;  %19201 = vst [vmem:[#allocation133_spill] sm:$0xff] %v17040_v45  ;;  %v5768_v47 = vadd.f32 1.0, %v12558_v27  ;;  %v4869_v14 = vmul.f32 0.5, %v16966_v58 }
 0x462   :  { %v4907_v63 = vmul.f32 0.70710677, %v17031_v0  ;;  %v4315_v50 = vadd.f32 %v4314_v35, %v17010_v12  ;;  %v12560_v28 = vpop.eup %12559  ;;  %12565 = verf.f32 %v4906_v31  ;;  %v4475_v62 = vpop.f32.mrf.mxu0  ;;  %v17045_v23 = vpack.c.bf16 %v6057_v4, %v6045_v17 }
 0x463   :  { %19200 = vst [vmem:[#allocation132_spill] sm:$0xff] %v17035_v15  ;;  %v17042_v41 = vadd.f32 %v4473_v22, %v4313_v40  ;;  %v4318_v51 = vpop.f32.mrf.mxu1  ;;  %8342 = vmatmul.mubr.bf16.gmra.mxu1 %v17033_v10  ;;  %v5769_v38 = vadd.f32 1.0, %v12560_v28  ;;  %v4880_v4 = vmul.f32 0.5, %v16980_v24  ;;  %v4881_v17 = vmul.f32 0.5, %v16982_v53  ;;  %v19204_v22 = vld [vmem:[#allocation48_spill] sm:$0xff]  ;;  %v19211_v10 = vld [vmem:[#allocation37_spill] sm:$0xff] }
 0x464   :  { %19202 = vst [vmem:[#allocation134_spill] sm:$0xff] %v17045_v23  ;;  %12567 = verf.f32 %v4907_v63  ;;  %v17047_v33 = vadd.f32 %v4475_v62, %v4315_v50  ;;  %v4319_v32 = vadd.f32 %v4318_v51, %v16977_v44  ;;  %8543 = vmatprep.mubr.bf16.mxu1 %v19203_v13  ;;  %v4479_v3 = vpop.f32.mrf.mxu0  ;;  %v6068_v28 = vmul.f32 %v5768_v47, %v4868_v6  ;;  %v11835_v51 = vld [vmem:[#allocation2 + $0x6a8] ss:$12 sps:$4 sm:$0xff]   ;;  %v11897_v23 = vld [vmem:[#allocation2 + $0x8ec] ss:$12 sps:$4 sm:$0xff]  }
 0x465   :  { %v12562_v48 = vpop.eup %12561  ;;  %v4918_v2 = vmul.f32 0.70710677, %v17042_v41  ;;  %8503 = vmatmul.mubr.bf16.gmra.mxu0 %v17040_v45  ;;  %v4320_v56 = vpop.f32.mrf.mxu1  ;;  %v11850_v6 = vld [vmem:[#allocation2 + $0x828] ss:$12 sps:$4 sm:$0xff]   ;;  %v4607_v8 = vmul.f32 0.5, %v17031_v0  ;;  %v4618_v7 = vmul.f32 0.5, %v17042_v41 }
 0x466   :  { %v12564_v27 = vpop.eup %12563  ;;  %v5780_v31 = vadd.f32 1.0, %v12562_v48  ;;  %v4919_v40 = vmul.f32 0.70710677, %v17047_v33  ;;  %8704 = vmatprep.mubr.bf16.mxu0 %v19204_v22  ;;  %v17059_v58 = vadd.f32 %v4479_v3, %v4319_v32  ;;  %v4321_v35 = vadd.f32 %v4320_v56, %v17010_v12  ;;  %v4481_v63 = vpop.f32.mrf.mxu0 }
 0x467   :  { %v5781_v5 = vadd.f32 1.0, %v12564_v27  ;;  %12569 = verf.f32 %v4918_v2  ;;  %v4322_v50 = vpop.f32.mrf.mxu1  ;;  %v6069_v48 = vmul.f32 %v5769_v38, %v4869_v14  ;;  %v11840_v27 = vld [vmem:[#allocation2 + $0x694] ss:$12 sps:$4 sm:$0xff]   ;;  %v4619_v41 = vmul.f32 0.5, %v17047_v33 }
 0x468   :  { %v6080_v62 = vmul.f32 %v5780_v31, %v4880_v4  ;;  %12571 = verf.f32 %v4919_v40  ;;  %v4323_v24 = vadd.f32 %v4322_v50, %v16977_v44  ;;  %v4930_v45 = vmul.f32 0.70710677, %v17059_v58  ;;  %v4483_v13 = vpop.f32.mrf.mxu0  ;;  %v19206_v31 = vld [vmem:[#allocation102_spill] sm:$0xff]  ;;  %v11858_v14 = vld [vmem:[#allocation2 + $0x814] ss:$12 sps:$4 sm:$0xff]  }
 0x469   :  { %v6081_v53 = vmul.f32 %v5781_v5, %v4881_v17  ;;  %v4324_v22 = vpop.f32.mrf.mxu1  ;;  %v17066_v32 = vadd.f32 %v4481_v63, %v4321_v35  ;;  %v19208_v5 = vld [vmem:[#allocation35_spill] sm:$0xff]  ;;  %v19209_v63 = vld [vmem:[#allocation49_spill] sm:$0xff] }
 0x46a   :  { %v17064_v2 = vpack.c.bf16 %v6080_v62, %v6068_v28  ;;  %v17068_v3 = vadd.f32 %v4483_v13, %v4323_v24  ;;  %v4325_v47 = vadd.f32 %v4324_v22, %v17010_v12  ;;  %12573 = verf.f32 %v4930_v45  ;;  %v4485_v56 = vpop.f32.mrf.mxu0  ;;  %v11838_v13 = vld [vmem:[#allocation2 + $0x690] ss:$12 sps:$4 sm:$0xff]  }
 0x46b   :  { %v4328_v4 = vpop.f32.mrf.mxu1  ;;  %8544 = vmatmul.mubr.bf16.vlgmr.msra.gmra.mxu1 %v19206_v31  ;;  %v17072_v38 = vpack.c.bf16 %v6081_v53, %v6069_v48  ;;  %v4931_v17 = vmul.f32 0.70710677, %v17066_v32  ;;  %v11843_v28 = vld [vmem:[#allocation2 + $0x67c] ss:$12 sps:$4 sm:$0xff]   ;;  %v11862_v31 = vld [vmem:[#allocation2 + $0x7f8] ss:$12 sps:$4 sm:$0xff]  }
 0x46c   :  { %19205 = vst [vmem:[#allocation135_spill] sm:$0xff] %v17064_v2  ;;  %v4942_v40 = vmul.f32 0.70710677, %v17068_v3  ;;  %8834 = vmatpush1.bf16.msra.mxu1 %v11835_v51  ;;  %8553 = vmatprep.mubr.bf16.mxu1 %v19208_v5  ;;  %v17077_v35 = vadd.f32 %v4485_v56, %v4325_v47  ;;  %v4329_v22 = vadd.f32 %v4328_v4, %v16977_v44  ;;  %v4489_v45 = vpop.f32.mrf.mxu0  ;;  %v19210_v24 = vld [vmem:[#allocation52_spill] sm:$0xff] }
 0x46d   :  { %19207 = vst [vmem:[#allocation136_spill] sm:$0xff] %v17072_v38  ;;  %8705 = vmatmul.mubr.bf16.vlgmr.msra.gmra.mxu0 %v19209_v63  ;;  %v4330_v50 = vpop.f32.mrf.mxu1  ;;  %8835 = vmatprep.subr.bf16.mxu1 %v11840_v27  ;;  %12575 = verf.f32 %v4931_v17  ;;  %v11856_v51 = vld [vmem:[#allocation2 + $0x810] ss:$12 sps:$4 sm:$0xff]   ;;  %v11841_v17 = vld [vmem:[#allocation2 + $0x678] ss:$12 sps:$4 sm:$0xff]  }
 0x46e   :  { %v4331_v62 = vadd.f32 %v4330_v50, %v17010_v12  ;;  %8714 = vmatprep.mubr.bf16.mxu0 %v19210_v24  ;;  %8995 = vmatpush1.bf16.msra.mxu0 %v11850_v6  ;;  %12577 = verf.f32 %v4942_v40  ;;  %v4943_v48 = vmul.f32 0.70710677, %v17077_v35  ;;  %v17084_v53 = vadd.f32 %v4489_v45, %v4329_v22  ;;  %v4491_v47 = vpop.f32.mrf.mxu0  ;;  %v11864_v4 = vld [vmem:[#allocation2 + $0x7fc] ss:$12 sps:$4 sm:$0xff]   ;;  %v11846_v22 = vld [vmem:[#allocation2 + $0x664] ss:$12 sps:$4 sm:$0xff]  }
 0x46f   :  { %v4332_v56 = vpop.f32.mrf.mxu1  ;;  %8996 = vmatprep.subr.bf16.mxu0 %v11858_v14  ;;  %v12566_v63 = vpop.eup %12565  ;;  %v4606_v45 = vmul.f32 0.5, %v17025_v19 }
 0x470   :  { %v17086_v5 = vadd.f32 %v4491_v47, %v4331_v62  ;;  %v4333_v27 = vadd.f32 %v4332_v56, %v16977_v44  ;;  %8836 = vmatpush1.bf16.msra.mxu1 %v11838_v13  ;;  %12579 = verf.f32 %v4943_v48  ;;  %v4954_v6 = vmul.f32 0.70710677, %v17084_v53  ;;  %v4493_v40 = vpop.f32.mrf.mxu0 }
 0x471   :  { %v12568_v50 = vpop.eup %12567  ;;  %v4334_v24 = vpop.f32.mrf.mxu1  ;;  %8837 = vmatprep.subr.bf16.mxu1 %v11843_v28  ;;  %v5506_v62 = vadd.f32 1.0, %v12566_v63  ;;  %v19212_v63 = vld [vmem:[#allocation105_spill] sm:$0xff] }
 0x472   :  { %v4955_v14 = vmul.f32 0.70710677, %v17086_v5  ;;  %8997 = vmatpush1.bf16.msra.mxu0 %v11856_v51  ;;  %12581 = verf.f32 %v4954_v6  ;;  %v17092_v47 = vadd.f32 %v4493_v40, %v4333_v27  ;;  %v4335_v13 = vadd.f32 %v4334_v24, %v17010_v12  ;;  %v4495_v56 = vpop.f32.mrf.mxu0  ;;  %v11844_v27 = vld [vmem:[#allocation2 + $0x660] ss:$12 sps:$4 sm:$0xff]  }
 0x473   :  { %v4338_v48 = vpop.f32.mrf.mxu1  ;;  %8554 = vmatmul.mubr.bf16.gmra.mxu1 %v19211_v10  ;;  %8998 = vmatprep.subr.bf16.mxu0 %v11864_v4  ;;  %v5507_v19 = vadd.f32 1.0, %v12568_v50  ;;  %v11849_v50 = vld [vmem:[#allocation2 + $0x64c] ss:$12 sps:$4 sm:$0xff]  }
 0x474   :  { %v12570_v28 = vpop.eup %12569  ;;  %v4339_v51 = vadd.f32 %v4338_v48, %v16977_v44  ;;  %8563 = vmatprep.mubr.bf16.mxu1 %v19212_v63  ;;  %8838 = vmatpush1.bf16.msra.mxu1 %v11841_v17  ;;  %12583 = verf.f32 %v4955_v14  ;;  %v4966_v40 = vmul.f32 0.70710677, %v17092_v47  ;;  %v17101_v10 = vadd.f32 %v4495_v56, %v4335_v13  ;;  %v4499_v4 = vpop.f32.mrf.mxu0  ;;  %v11868_v14 = vld [vmem:[#allocation2 + $0x7e0] ss:$12 sps:$4 sm:$0xff]  }
 0x475   :  { %v12572_v6 = vpop.eup %12571  ;;  %v5518_v24 = vadd.f32 1.0, %v12570_v28  ;;  %8715 = vmatmul.mubr.bf16.gmra.mxu0 %v19213_v46  ;;  %v4340_v0 = vpop.f32.mrf.mxu1  ;;  %8839 = vmatprep.subr.bf16.mxu1 %v11846_v22  ;;  %v5806_v28 = vmul.f32 %v5506_v62, %v4606_v45  ;;  %v11876_v22 = vld [vmem:[#allocation2 + $0x7cc] ss:$12 sps:$4 sm:$0xff]  }
 0x476   :  { %v5519_v48 = vadd.f32 1.0, %v12572_v6  ;;  %v17105_v2 = vadd.f32 %v4499_v4, %v4339_v51  ;;  %v4341_v17 = vadd.f32 %v4340_v0, %v17010_v12  ;;  %8724 = vmatprep.mubr.bf16.mxu0 %v16323_v16  ;;  %8999 = vmatpush1.bf16.msra.mxu0 %v11862_v31  ;;  %12585 = verf.f32 %v4966_v40  ;;  %v4501_v46 = vpop.f32.mrf.mxu0  ;;  %v11847_v4 = vld [vmem:[#allocation2 + $0x648] ss:$12 sps:$4 sm:$0xff]  }
 0x477   :  { %v5818_v13 = vmul.f32 %v5518_v24, %v4618_v7  ;;  %v4967_v56 = vmul.f32 0.70710677, %v17101_v10  ;;  %v4342_v63 = vpop.f32.mrf.mxu1  ;;  %9000 = vmatprep.subr.bf16.mxu0 %v11870_v55  ;;  %v12574_v38 = vpop.eup %12573  ;;  %v5807_v0 = vmul.f32 %v5507_v19, %v4607_v8  ;;  %v11855_v24 = vld [vmem:[#allocation2 + $0x634] ss:$12 sps:$4 sm:$0xff]   ;;  %v4630_v8 = vmul.f32 0.5, %v17059_v58 }
 0x478   :  { %v5819_v33 = vmul.f32 %v5519_v48, %v4619_v41  ;;  %v4978_v51 = vmul.f32 0.70710677, %v17105_v2  ;;  %v17111_v6 = vadd.f32 %v4501_v46, %v4341_v17  ;;  %8840 = vmatpush1.bf16.msra.mxu1 %v11844_v27  ;;  %v4343_v7 = vadd.f32 %v4342_v63, %v16977_v44  ;;  %v4503_v45 = vpop.f32.mrf.mxu0  ;;  %v11874_v46 = vld [vmem:[#allocation2 + $0x7c8] ss:$12 sps:$4 sm:$0xff]   ;;  %v19215_v63 = vld [vmem:[#allocation104_spill] sm:$0xff] }
 0x479   :  { %v17113_v31 = vpack.c.bf16 %v5818_v13, %v5806_v28  ;;  %12587 = verf.f32 %v4967_v56  ;;  %v4344_v62 = vpop.f32.mrf.mxu1  ;;  %8841 = vmatprep.subr.bf16.mxu1 %v11849_v50  ;;  %v5530_v55 = vadd.f32 1.0, %v12574_v38  ;;  %v11882_v50 = vld [vmem:[#allocation2 + $0x7b4] ss:$12 sps:$4 sm:$0xff]   ;;  %v4631_v13 = vmul.f32 0.5, %v17066_v32  ;;  %v11853_v58 = vld [vmem:[#allocation2 + $0x630] ss:$12 sps:$4 sm:$0xff]  }
 0x47a   :  { %12589 = verf.f32 %v4978_v51  ;;  %v4979_v40 = vmul.f32 0.70710677, %v17111_v6  ;;  %v4345_v41 = vadd.f32 %v4344_v62, %v17010_v12  ;;  %9001 = vmatpush1.bf16.msra.mxu0 %v11868_v14  ;;  %v12576_v27 = vpop.eup %12575  ;;  %v17119_v19 = vadd.f32 %v4503_v45, %v4343_v7  ;;  %v4505_v48 = vpop.f32.mrf.mxu0  ;;  %v19217_v51 = vld [vmem:[#allocation107_spill] sm:$0xff]  ;;  %v11861_v7 = vld [vmem:[#allocation2 + $0x61c] ss:$12 sps:$4 sm:$0xff]  }
 0x47b   :  { %19214 = vst [vmem:[#allocation137_spill] sm:$0xff] %v17113_v31  ;;  %v4348_v17 = vpop.f32.mrf.mxu1  ;;  %8564 = vmatmul.mubr.bf16.gmra.mxu1 %v19215_v63  ;;  %9002 = vmatprep.subr.bf16.mxu0 %v11876_v22  ;;  %v17122_v28 = vpack.c.bf16 %v5819_v33, %v5807_v0  ;;  %v12578_v38 = vpop.eup %12577  ;;  %v5531_v45 = vadd.f32 1.0, %v12576_v27  ;;  %v4642_v62 = vmul.f32 0.5, %v17068_v3  ;;  %v11880_v3 = vld [vmem:[#allocation2 + $0x7b0] ss:$12 sps:$4 sm:$0xff]  }
 0x47c   :  { %12591 = verf.f32 %v4979_v40  ;;  %v17125_v56 = vadd.f32 %v4505_v48, %v4345_v41  ;;  %v4349_v14 = vadd.f32 %v4348_v17, %v16977_v44  ;;  %8573 = vmatprep.mubr.bf16.mxu1 %v19217_v51  ;;  %8842 = vmatpush1.bf16.msra.mxu1 %v11847_v4  ;;  %v5542_v22 = vadd.f32 1.0, %v12578_v38  ;;  %v4509_v0 = vpop.f32.mrf.mxu0 }
 0x47d   :  { %19216 = vst [vmem:[#allocation138_spill] sm:$0xff] %v17122_v28  ;;  %v4990_v33 = vmul.f32 0.70710677, %v17119_v19  ;;  %8725 = vmatmul.mubr.bf16.gmra.mxu0 %v16313_v30  ;;  %v4350_v32 = vpop.f32.mrf.mxu1  ;;  %8843 = vmatprep.subr.bf16.mxu1 %v11855_v24  ;;  %v12580_v40 = vpop.eup %12579  ;;  %v5830_v41 = vmul.f32 %v5530_v55, %v4630_v8  ;;  %v4643_v48 = vmul.f32 0.5, %v17077_v35  ;;  %v11888_v24 = vld [vmem:[#allocation2 + $0x79c] ss:$12 sps:$4 sm:$0xff]  }
 0x47e   :  { %v4991_v17 = vmul.f32 0.70710677, %v17125_v56  ;;  %v17134_v4 = vadd.f32 %v4509_v0, %v4349_v14  ;;  %8734 = vmatprep.mubr.bf16.mxu0 %v16350_v34  ;;  %9003 = vmatpush1.bf16.msra.mxu0 %v11874_v46  ;;  %v5842_v27 = vmul.f32 %v5542_v22, %v4642_v62  ;;  %v5543_v38 = vadd.f32 1.0, %v12580_v40  ;;  %v4511_v30 = vpop.f32.mrf.mxu0  ;;  %v11859_v14 = vld [vmem:[#allocation2 + $0x618] ss:$12 sps:$4 sm:$0xff]   ;;  %v19219_v34 = vld [vmem:[#allocation115_spill] sm:$0xff] }
 0x47f   :  { %12593 = verf.f32 %v4990_v33  ;;  %v4351_v51 = vadd.f32 %v4350_v32, %v17010_v12  ;;  %v4352_v63 = vpop.f32.mrf.mxu1  ;;  %9004 = vmatprep.subr.bf16.mxu0 %v11882_v50  ;;  %v12582_v55 = vpop.eup %12581  ;;  %v5831_v0 = vmul.f32 %v5531_v45, %v4631_v13  ;;  %v11867_v40 = vld [vmem:[#allocation2 + $0x604] ss:$12 sps:$4 sm:$0xff]   ;;  %v17145_v16 = vmul.f32 0.70710677, %v19219_v34 }
 0x480   :  { %12595 = verf.f32 %v4991_v17  ;;  %v5002_v35 = vmul.f32 0.70710677, %v17134_v4  ;;  %v4353_v8 = vadd.f32 %v4352_v63, %v16977_v44  ;;  %8844 = vmatpush1.bf16.msra.mxu1 %v11853_v58  ;;  %v17140_v46 = vpack.c.bf16 %v5842_v27, %v5830_v41  ;;  %v4513_v33 = vpop.f32.mrf.mxu0  ;;  %v11886_v13 = vld [vmem:[#allocation2 + $0x798] ss:$12 sps:$4 sm:$0xff]  }
 0x481   :  { %v5843_v62 = vmul.f32 %v5543_v38, %v4643_v48  ;;  %v17142_v22 = vadd.f32 %v4511_v30, %v4351_v51  ;;  %v4354_v32 = vpop.f32.mrf.mxu1  ;;  %8845 = vmatprep.subr.bf16.mxu1 %v11861_v7  ;;  %v12584_v50 = vpop.eup %12583  ;;  %v4654_v58 = vmul.f32 0.5, %v17084_v53  ;;  %v5554_v45 = vadd.f32 1.0, %v12582_v55  ;;  %v19220_v7 = vld [vmem:[#allocation106_spill] sm:$0xff]  ;;  %v11891_v48 = vld [vmem:[#allocation2 + $0x784] ss:$12 sps:$4 sm:$0xff]  }
 0x482   :  { %19218 = vst [vmem:[#allocation139_spill] sm:$0xff] %v17140_v46  ;;  %12597 = verf.f32 %v5002_v35  ;;  %v17147_v17 = vadd.f32 %v4513_v33, %v4353_v8  ;;  %v4355_v63 = vadd.f32 %v4354_v32, %v17010_v12  ;;  %9005 = vmatpush1.bf16.msra.mxu0 %v11880_v3  ;;  %v4515_v51 = vpop.f32.mrf.mxu0  ;;  %v4655_v35 = vmul.f32 0.5, %v17086_v5  ;;  %v19222_v53 = vld [vmem:[#allocation39_spill] sm:$0xff]  ;;  %v11865_v55 = vld [vmem:[#allocation2 + $0x600] ss:$12 sps:$4 sm:$0xff]  }
 0x483   :  { %v5003_v30 = vmul.f32 0.70710677, %v17142_v22  ;;  %v4358_v41 = vpop.f32.mrf.mxu1  ;;  %8574 = vmatmul.mubr.bf16.gmra.mxu1 %v19220_v7  ;;  %9006 = vmatprep.subr.bf16.mxu0 %v11888_v24  ;;  %v17153_v27 = vpack.c.bf16 %v5843_v62, %v5831_v0  ;;  %v12586_v38 = vpop.eup %12585  ;;  %v4666_v8 = vmul.f32 0.5, %v17092_v47  ;;  %v5555_v32 = vadd.f32 1.0, %v12584_v50  ;;  %v11873_v5 = vld [vmem:[#allocation2 + $0x76c] ss:$12 sps:$4 sm:$0xff]  }
 0x484   :  { %v5014_v3 = vmul.f32 0.70710677, %v17147_v17  ;;  %v17158_v33 = vadd.f32 %v4515_v51, %v4355_v63  ;;  %8583 = vmatprep.mubr.bf16.mxu1 %v19222_v53  ;;  %8846 = vmatpush1.bf16.msra.mxu1 %v11859_v14  ;;  %v5566_v15 = vadd.f32 1.0, %v12586_v38  ;;  %v4359_v24 = vadd.f32 %v4358_v41, %v16977_v44  ;;  %v4519_v0 = vpop.f32.mrf.mxu0  ;;  %v11889_v50 = vld [vmem:[#allocation2 + $0x780] ss:$12 sps:$4 sm:$0xff]  }
 0x485   :  { %19221 = vst [vmem:[#allocation115_spill] sm:$0xff] %v17153_v27  ;;  %12599 = verf.f32 %v5003_v30  ;;  %8735 = vmatmul.mubr.bf16.gmra.mxu0 %v16343_v21  ;;  %v4360_v62 = vpop.f32.mrf.mxu1  ;;  %8847 = vmatprep.subr.bf16.mxu1 %v11867_v40  ;;  %v4667_v7 = vmul.f32 0.5, %v17101_v10  ;;  %v5854_v51 = vmul.f32 %v5554_v45, %v4654_v58  ;;  %v19223_v10 = vld [vmem:[#allocation116_spill] sm:$0xff]  ;;  %v5855_v59 = vmul.f32 %v5555_v32, %v4655_v35 }
 0x486   :  { %v12588_v47 = vpop.eup %12587  ;;  %12601 = verf.f32 %v5014_v3  ;;  %v5015_v63 = vmul.f32 0.70710677, %v17158_v33  ;;  %v4361_v14 = vadd.f32 %v4360_v62, %v17010_v12  ;;  %8744 = vmatprep.mubr.bf16.mxu0 %v16390_v1  ;;  %9007 = vmatpush1.bf16.msra.mxu0 %v11886_v13  ;;  %v5866_v41 = vmul.f32 %v5566_v15, %v4666_v8  ;;  %v4521_v40 = vpop.f32.mrf.mxu0  ;;  %v11871_v13 = vld [vmem:[#allocation2 + $0x768] ss:$12 sps:$4 sm:$0xff]  }
 0x487   :  { %v12590_v30 = vpop.eup %12589  ;;  %v5567_v38 = vadd.f32 1.0, %v12588_v47  ;;  %v17167_v21 = vadd.f32 %v4519_v0, %v4359_v24  ;;  %v4362_v53 = vpop.f32.mrf.mxu1  ;;  %9008 = vmatprep.subr.bf16.mxu0 %v11891_v48  ;;  %v5189_v3 = vmul.f32 0.70710677, %v19223_v10  ;;  %v11879_v48 = vld [vmem:[#allocation2 + $0x754] ss:$12 sps:$4 sm:$0xff]   ;;  %v4678_v0 = vmul.f32 0.5, %v17105_v2 }
 0x488   :  { %12603 = verf.f32 %v5015_v63  ;;  %v17170_v29 = vadd.f32 %v4521_v40, %v4361_v14  ;;  %v4363_v62 = vadd.f32 %v4362_v53, %v16977_v44  ;;  %8848 = vmatpush1.bf16.msra.mxu1 %v11865_v55  ;;  %v17173_v58 = vpack.c.bf16 %v5866_v41, %v5854_v51  ;;  %v4523_v8 = vpop.f32.mrf.mxu0  ;;  %v11895_v53 = vld [vmem:[#allocation2 + $0x8e8] ss:$12 sps:$4 sm:$0xff]   ;;  %v19225_v14 = vld [vmem:[#allocation108_spill] sm:$0xff] }
 0x489   :  { %v12592_v1 = vpop.eup %12591  ;;  %v5867_v15 = vmul.f32 %v5567_v38, %v4667_v7  ;;  %v5026_v45 = vmul.f32 0.70710677, %v17167_v21  ;;  %v4364_v24 = vpop.f32.mrf.mxu1  ;;  %8849 = vmatprep.subr.bf16.mxu1 %v11873_v5  ;;  %v5578_v47 = vadd.f32 1.0, %v12590_v30  ;;  %v11903_v51 = vld [vmem:[#allocation2 + $0x8d4] ss:$12 sps:$4 sm:$0xff]   ;;  %v4679_v2 = vmul.f32 0.5, %v17111_v6 }
 0x48a   :  { %19224 = vst [vmem:[#allocation116_spill] sm:$0xff] %v17173_v58  ;;  %v5027_v63 = vmul.f32 0.70710677, %v17170_v29  ;;  %9009 = vmatpush1.bf16.msra.mxu0 %v11889_v50  ;;  %v17178_v55 = vadd.f32 %v4523_v8, %v4363_v62  ;;  %v4365_v35 = vadd.f32 %v4364_v24, %v17010_v12  ;;  %v4525_v32 = vpop.f32.mrf.mxu0  ;;  %v5579_v30 = vadd.f32 1.0, %v12592_v1  ;;  %v19227_v40 = vld [vmem:[#allocation110_spill] sm:$0xff] }
 0x48b   :  { %12605 = verf.f32 %v5026_v45  ;;  %v4368_v7 = vpop.f32.mrf.mxu1  ;;  %8584 = vmatmul.mubr.bf16.gmra.mxu1 %v19225_v14  ;;  %9010 = vmatprep.subr.bf16.mxu0 %v11897_v23  ;;  %v17182_v5 = vpack.c.bf16 %v5867_v15, %v5855_v59  ;;  %v4690_v50 = vmul.f32 0.5, %v17119_v19  ;;  %v11877_v62 = vld [vmem:[#allocation2 + $0x750] ss:$12 sps:$4 sm:$0xff]   ;;  %v4691_v19 = vmul.f32 0.5, %v17125_v56 }
 0x48c   :  { %v12594_v41 = vpop.eup %12593  ;;  %v4369_v38 = vadd.f32 %v4368_v7, %v16977_v44  ;;  %8593 = vmatprep.mubr.bf16.mxu1 %v19227_v40  ;;  %8850 = vmatpush2.bf16.msra.mxu1 %v11871_v13  ;;  %12607 = verf.f32 %v5027_v63  ;;  %v5038_v23 = vmul.f32 0.70710677, %v17178_v55  ;;  %v17189_v24 = vadd.f32 %v4525_v32, %v4365_v35  ;;  %v4529_v59 = vpop.f32.mrf.mxu0  ;;  %v11885_v1 = vld [vmem:[#allocation2 + $0x73c] ss:$12 sps:$4 sm:$0xff]  }
 0x48d   :  { %19226 = vst [vmem:[#allocation140_spill] sm:$0xff] %v17182_v5  ;;  %v12596_v45 = vpop.eup %12595  ;;  %v5590_v8 = vadd.f32 1.0, %v12594_v41  ;;  %8745 = vmatmul.mubr.bf16.gmra.mxu0 %v16372_v42  ;;  %v4370_v6 = vpop.f32.mrf.mxu1  ;;  %8851 = vmatprep.subr.bf16.mxu1 %v11879_v48  ;;  %v11901_v63 = vld [vmem:[#allocation2 + $0x8d0] ss:$12 sps:$4 sm:$0xff]   ;;  %v5878_v35 = vmul.f32 %v5578_v47, %v4678_v0  ;;  %v5879_v56 = vmul.f32 %v5579_v30, %v4679_v2 }
 0x48e   :  { %v5591_v15 = vadd.f32 1.0, %v12596_v45  ;;  %v17193_v7 = vadd.f32 %v4529_v59, %v4369_v38  ;;  %v4371_v13 = vadd.f32 %v4370_v6, %v17010_v12  ;;  %8754 = vmatprep.mubr.bf16.mxu0 %v16428_v18  ;;  %9011 = vmatpush2.bf16.msra.mxu0 %v11895_v53  ;;  %12609 = verf.f32 %v5038_v23  ;;  %v4531_v40 = vpop.f32.mrf.mxu0  ;;  %v11906_v14 = vld [vmem:[#allocation2 + $0x8bc] ss:$12 sps:$4 sm:$0xff]   ;;  %v11883_v59 = vld [vmem:[#allocation2 + $0x738] ss:$12 sps:$4 sm:$0xff]  }
 0x48f   :  { %v12598_v41 = vpop.eup %12597  ;;  %v5890_v32 = vmul.f32 %v5590_v8, %v4690_v50  ;;  %v5039_v42 = vmul.f32 0.70710677, %v17189_v24  ;;  %v4372_v48 = vpop.f32.mrf.mxu1  ;;  %9012 = vmatprep.subr.bf16.mxu0 %v11903_v51  ;;  %12611 = verf.f32 %v5189_v3  ;;  %v11894_v8 = vld [vmem:[#allocation2 + $0x724] ss:$12 sps:$4 sm:$0xff]   ;;  %v4702_v3 = vmul.f32 0.5, %v17134_v4 }
 0x490   :  { %v5891_v38 = vmul.f32 %v5591_v15, %v4691_v19  ;;  %v5050_v45 = vmul.f32 0.70710677, %v17193_v7  ;;  %8852 = vmatpush2.bf16.msra.mxu1 %v11877_v62  ;;  %v17201_v53 = vadd.f32 %v4531_v40, %v4371_v13  ;;  %v4373_v0 = vadd.f32 %v4372_v48, %v16977_v44  ;;  %v4533_v47 = vpop.f32.mrf.mxu0  ;;  %v11904_v62 = vld [vmem:[#allocation2 + $0x8b8] ss:$12 sps:$4 sm:$0xff]  }
 0x491   :  { %v17199_v6 = vpack.c.bf16 %v5890_v32, %v5878_v35  ;;  %12613 = verf.f32 %v5039_v42  ;;  %v4374_v50 = vpop.f32.mrf.mxu1  ;;  %8853 = vmatprep.subr.bf16.mxu1 %v11885_v1  ;;  %v5602_v2 = vadd.f32 1.0, %v12598_v41  ;;  %v19230_v35 = vld [vmem:[#allocation8_spill] sm:$0xff]  ;;  %v11912_v4 = vld [vmem:[#allocation2 + $0x8a4] ss:$12 sps:$4 sm:$0xff]   ;;  %v4714_v41 = vmul.f32 0.5, %v17147_v17 }
 0x492   :  { %v12600_v51 = vpop.eup %12599  ;;  %v4375_v30 = vadd.f32 %v4374_v50, %v17010_v12  ;;  %9013 = vmatpush2.bf16.msra.mxu0 %v11901_v63  ;;  %v17206_v23 = vpack.c.bf16 %v5891_v38, %v5879_v56  ;;  %12615 = verf.f32 %v5050_v45  ;;  %v5051_v40 = vmul.f32 0.70710677, %v17201_v53  ;;  %v4535_v13 = vpop.f32.mrf.mxu0  ;;  %v19231_v56 = vld [vmem:[#allocation111_spill] sm:$0xff]  ;;  %v11892_v38 = vld [vmem:[#allocation2 + $0x720] ss:$12 sps:$4 sm:$0xff]  }
 0x493   :  { %19228 = vst [vmem:[#allocation141_spill] sm:$0xff] %v17199_v6  ;;  %v12602_v19 = vpop.eup %12601  ;;  %v5603_v42 = vadd.f32 1.0, %v12600_v51  ;;  %v17209_v15 = vadd.f32 %v4533_v47, %v4373_v0  ;;  %v4378_v1 = vpop.f32.mrf.mxu1  ;;  %8594 = vmatmul.mubr.bf16.gmra.mxu1 %v19230_v35  ;;  %9014 = vmatprep.subr.bf16.mxu0 %v11906_v14  ;;  %v4703_v0 = vmul.f32 0.5, %v17142_v22  ;;  %v4715_v47 = vmul.f32 0.5, %v17158_v33  ;;  %v11900_v51 = vld [vmem:[#allocation2 + $0x70c] ss:$12 sps:$4 sm:$0xff]  }
 0x494   :  { %19229 = vst [vmem:[#allocation142_spill] sm:$0xff] %v17206_v23  ;;  %v5614_v32 = vadd.f32 1.0, %v12602_v19  ;;  %v17213_v63 = vadd.f32 %v4535_v13, %v4375_v30  ;;  %v4379_v48 = vadd.f32 %v4378_v1, %v16977_v44  ;;  %8603 = vmatprep.mubr.bf16.mxu1 %v19231_v56  ;;  %8854 = vmatpush2.bf16.msra.mxu1 %v11883_v59  ;;  %12617 = verf.f32 %v5051_v40  ;;  %v4539_v50 = vpop.f32.mrf.mxu0  ;;  %v11910_v22 = vld [vmem:[#allocation2 + $0x8a0] ss:$12 sps:$4 sm:$0xff]  }
 0x495   :  { %v12604_v45 = vpop.eup %12603  ;;  %v5062_v14 = vmul.f32 0.70710677, %v17209_v15  ;;  %8755 = vmatmul.mubr.bf16.gmra.mxu0 %v16415_v37  ;;  %v4380_v17 = vpop.f32.mrf.mxu1  ;;  %8855 = vmatprep.subr.bf16.mxu1 %v11894_v8  ;;  %v5902_v30 = vmul.f32 %v5602_v2, %v4702_v3  ;;  %v5903_v1 = vmul.f32 %v5603_v42, %v4703_v0  ;;  %v11915_v8 = vld [vmem:[#allocation2 + $0x88c] ss:$12 sps:$4 sm:$0xff]   ;;  %v17231_v42 = vmul.f32 0.5, %v19223_v10 }
 0x496   :  { %v5914_v19 = vmul.f32 %v5614_v32, %v4714_v41  ;;  %v5615_v13 = vadd.f32 1.0, %v12604_v45  ;;  %v5063_v59 = vmul.f32 0.70710677, %v17213_v63  ;;  %8764 = vmatprep.mubr.bf16.mxu0 %v16459_v49  ;;  %9015 = vmatpush2.bf16.msra.mxu0 %v11904_v62  ;;  %v17223_v33 = vadd.f32 %v4539_v50, %v4379_v48  ;;  %v4541_v56 = vpop.f32.mrf.mxu0  ;;  %v11898_v62 = vld [vmem:[#allocation2 + $0x708] ss:$12 sps:$4 sm:$0xff]  }
 0x497   :  { %12619 = verf.f32 %v5062_v14  ;;  %v4381_v40 = vadd.f32 %v4380_v17, %v17010_v12  ;;  %v4382_v37 = vpop.f32.mrf.mxu1  ;;  %9016 = vmatprep.subr.bf16.mxu0 %v11912_v4  ;;  %v11909_v0 = vld [vmem:[#allocation2 + $0x6f4] ss:$12 sps:$4 sm:$0xff]   ;;  %v4726_v50 = vmul.f32 0.5, %v17167_v21  ;;  %v11927_v49 = vld [vmem:[#allocation2 + $0x85c] ss:$12 sps:$4 sm:$0xff]  }
 0x498   :  { %v12606_v35 = vpop.eup %12605  ;;  %v17226_v3 = vpack.c.bf16 %v5914_v19, %v5902_v30  ;;  %v5915_v2 = vmul.f32 %v5615_v13, %v4715_v47  ;;  %12621 = verf.f32 %v5063_v59  ;;  %v4383_v41 = vadd.f32 %v4382_v37, %v16977_v44  ;;  %8856 = vmatpush2.bf16.msra.mxu1 %v11892_v38  ;;  %v4543_v4 = vpop.f32.mrf.mxu0  ;;  %v19234_v19 = vld [vmem:[#allocation45_spill] sm:$0xff] }
 0x499   :  { %12623 = verf.f32 %v17145_v16  ;;  %v5074_v32 = vmul.f32 0.70710677, %v17223_v33  ;;  %v17234_v48 = vadd.f32 %v4541_v56, %v4381_v40  ;;  %v4384_v45 = vpop.f32.mrf.mxu1  ;;  %8857 = vmatprep.subr.bf16.mxu1 %v11900_v51  ;;  %v12608_v14 = vpop.eup %12607  ;;  %v17237_v47 = vmul.f32 0.70710677, %v16547_v54  ;;  %v11913_v16 = vld [vmem:[#allocation2 + $0x888] ss:$12 sps:$4 sm:$0xff]  }
 0x49a   :  { %19232 = vst [vmem:[#allocation143_spill] sm:$0xff] %v17226_v3  ;;  %v17239_v37 = vadd.f32 %v4543_v4, %v4383_v41  ;;  %v4385_v38 = vadd.f32 %v4384_v45, %v17010_v12  ;;  %9017 = vmatpush2.bf16.msra.mxu0 %v11910_v22  ;;  %v17242_v10 = vpack.c.bf16 %v5915_v2, %v5903_v1  ;;  %v5626_v56 = vadd.f32 1.0, %v12606_v35  ;;  %v4545_v51 = vpop.f32.mrf.mxu0  ;;  %v11921_v13 = vld [vmem:[#allocation2 + $0x874] ss:$12 sps:$4 sm:$0xff]   ;;  %v11907_v35 = vld [vmem:[#allocation2 + $0x6f0] ss:$12 sps:$4 sm:$0xff]  }
 0x49b   :  { %12625 = verf.f32 %v5074_v32  ;;  %v5075_v17 = vmul.f32 0.70710677, %v17234_v48  ;;  %v4388_v30 = vpop.f32.mrf.mxu1  ;;  %8604 = vmatmul.mubr.bf16.gmra.mxu1 %v19234_v19  ;;  %9018 = vmatprep.subr.bf16.mxu0 %v11915_v8  ;;  %v12610_v59 = vpop.eup %12609  ;;  %v4727_v40 = vmul.f32 0.5, %v17170_v29  ;;  %v4738_v22 = vmul.f32 0.5, %v17178_v55  ;;  %v19235_v21 = vld [vmem:[#allocation41_spill] sm:$0xff] }
 0x49c   :  { %19233 = vst [vmem:[#allocation144_spill] sm:$0xff] %v17242_v10  ;;  %v5086_v1 = vmul.f32 0.70710677, %v17239_v37  ;;  %v17250_v2 = vadd.f32 %v4545_v51, %v4385_v38  ;;  %8613 = vmatprep.mubr.bf16.mxu1 %v19235_v21  ;;  %8858 = vmatpush2.bf16.msra.mxu1 %v11898_v62  ;;  %v12612_v41 = vpop.eup %12611  ;;  %v5627_v32 = vadd.f32 1.0, %v12608_v14  ;;  %v5638_v4 = vadd.f32 1.0, %v12610_v59  ;;  %v4549_v45 = vpop.f32.mrf.mxu0 }
 0x49d   :  { %12627 = verf.f32 %v5075_v17  ;;  %v4389_v8 = vadd.f32 %v4388_v30, %v16977_v44  ;;  %8765 = vmatmul.mubr.bf16.gmra.mxu0 %v16450_v39  ;;  %v4390_v29 = vpop.f32.mrf.mxu1  ;;  %8859 = vmatprep.subr.bf16.mxu1 %v11909_v0  ;;  %v11918_v55 = vld [vmem:[#allocation2 + $0x6dc] ss:$12 sps:$4 sm:$0xff]   ;;  %v4739_v38 = vmul.f32 0.5, %v17189_v24  ;;  %v5926_v17 = vmul.f32 %v5626_v56, %v4726_v50 }
 0x49e   :  { %v12614_v19 = vpop.eup %12613  ;;  %12629 = verf.f32 %v5086_v1  ;;  %v5087_v51 = vmul.f32 0.70710677, %v17250_v2  ;;  %v4391_v62 = vadd.f32 %v4390_v29, %v17010_v12  ;;  %8774 = vmatprep.mubr.bf16.mxu0 %v16487_v9  ;;  %9019 = vmatpush2.bf16.msra.mxu0 %v11913_v16  ;;  %v11919_v14 = vld [vmem:[#allocation2 + $0x870] ss:$12 sps:$4 sm:$0xff]   ;;  %v5938_v30 = vmul.f32 %v5638_v4, %v4738_v22  ;;  %v4551_v39 = vpop.f32.mrf.mxu0  ;;  %v11916_v16 = vld [vmem:[#allocation2 + $0x6d8] ss:$12 sps:$4 sm:$0xff]  }
 0x49f   :  { %v5639_v59 = vadd.f32 1.0, %v12614_v19  ;;  %v17259_v21 = vadd.f32 %v4549_v45, %v4389_v8  ;;  %v4392_v0 = vpop.f32.mrf.mxu1  ;;  %9020 = vmatprep.subr.bf16.mxu0 %v11921_v13  ;;  %v12616_v18 = vpop.eup %12615  ;;  %v17264_v29 = vadd.f32 1.0, %v12612_v41  ;;  %v5927_v9 = vmul.f32 %v5627_v32, %v4727_v40  ;;  %v11924_v13 = vld [vmem:[#allocation2 + $0x6c4] ss:$12 sps:$4 sm:$0xff]  }
 0x4a0   :  { %12631 = verf.f32 %v5087_v51  ;;  %v17261_v24 = vadd.f32 %v4551_v39, %v4391_v62  ;;  %v4393_v1 = vadd.f32 %v4392_v0, %v16977_v44  ;;  %8860 = vmatpush2.bf16.msra.mxu1 %v11907_v35  ;;  %v17266_v50 = vpack.c.bf16 %v5938_v30, %v5926_v17  ;;  %v4553_v22 = vpop.f32.mrf.mxu0  ;;  %v11925_v40 = vld [vmem:[#allocation2 + $0x858] ss:$12 sps:$4 sm:$0xff]   ;;  %v11922_v0 = vld [vmem:[#allocation2 + $0x6c0] ss:$12 sps:$4 sm:$0xff]  }
 0x4a1   :  { %v5939_v56 = vmul.f32 %v5639_v59, %v4739_v38  ;;  %v5098_v19 = vmul.f32 0.70710677, %v17259_v21  ;;  %v4394_v4 = vpop.f32.mrf.mxu1  ;;  %8861 = vmatprep.subr.bf16.mxu1 %v11918_v55  ;;  %v12618_v8 = vpop.eup %12617  ;;  %12633 = verf.f32 %v17237_v47  ;;  %v4750_v39 = vmul.f32 0.5, %v17193_v7  ;;  %v19237_v62 = vld [vmem:[#allocation112_spill] sm:$0xff]  ;;  %v11930_v55 = vld [vmem:[#allocation2 + $0x844] ss:$12 sps:$4 sm:$0xff]  }
 0x4a2   :  { %19236 = vst [vmem:[#allocation145_spill] sm:$0xff] %v17266_v50  ;;  %v5099_v35 = vmul.f32 0.70710677, %v17261_v24  ;;  %v17272_v41 = vadd.f32 %v4553_v22, %v4393_v1  ;;  %9021 = vmatpush2.bf16.msra.mxu0 %v11919_v14  ;;  %v5650_v32 = vadd.f32 1.0, %v12616_v18  ;;  %v4395_v45 = vadd.f32 %v4394_v4, %v17010_v12  ;;  %v4555_v38 = vpop.f32.mrf.mxu0  ;;  %v19239_v59 = vld [vmem:[#allocation114_spill] sm:$0xff] }
 0x4a3   :  { %12635 = verf.f32 %v5098_v19  ;;  %v4398_v51 = vpop.f32.mrf.mxu1  ;;  %8614 = vmatmul.mubr.bf16.gmra.mxu1 %v19237_v62  ;;  %9022 = vmatprep.subr.bf16.mxu0 %v11927_v49  ;;  %v17276_v17 = vpack.c.bf16 %v5939_v56, %v5927_v9  ;;  %v4762_v7 = vmul.f32 0.5, %v17209_v15  ;;  %v4763_v30 = vmul.f32 0.5, %v17213_v63  ;;  %v19240_v56 = vld [vmem:[#allocation66_spill] sm:$0xff]  ;;  %v11931_v63 = vld [vmem:[#allocation2 + $0x170] ss:$12 sps:$4 sm:$0xff]  }
 0x4a4   :  { %v12620_v47 = vpop.eup %12619  ;;  %v5110_v14 = vmul.f32 0.70710677, %v17272_v41  ;;  %v4399_v18 = vadd.f32 %v4398_v51, %v16977_v44  ;;  %8623 = vmatprep.mubr.bf16.mxu1 %v19239_v59  ;;  %8862 = vmatpush2.bf16.msra.mxu1 %v11916_v16  ;;  %v5651_v19 = vadd.f32 1.0, %v12618_v8  ;;  %12637 = verf.f32 %v5099_v35  ;;  %v4559_v9 = vpop.f32.mrf.mxu0  ;;  %v19241_v59 = vld [vmem:[#allocation9_spill] sm:$0xff] }
 0x4a5   :  { %19238 = vst [vmem:[#allocation146_spill] sm:$0xff] %v17276_v17  ;;  %v12622_v1 = vpop.eup %12621  ;;  %v5662_v22 = vadd.f32 1.0, %v12620_v47  ;;  %v17283_v49 = vadd.f32 %v4555_v38, %v4395_v45  ;;  %8775 = vmatmul.mubr.bf16.gmra.mxu0 %v19240_v56  ;;  %v4400_v15 = vpop.f32.mrf.mxu1  ;;  %8863 = vmatprep.subr.bf16.mxu1 %v11924_v13  ;;  %v11928_v8 = vld [vmem:[#allocation2 + $0x840] ss:$12 sps:$4 sm:$0xff]   ;;  %v5950_v35 = vmul.f32 %v5650_v32, %v4750_v39  ;;  %v4751_v45 = vmul.f32 0.5, %v17201_v53 }
 0x4a6   :  { %v17286_v4 = vpop.eup %12623  ;;  %v5663_v62 = vadd.f32 1.0, %v12622_v1  ;;  %12639 = verf.f32 %v5110_v14  ;;  %v17288_v51 = vadd.f32 %v4559_v9, %v4399_v18  ;;  %v4401_v16 = vadd.f32 %v4400_v15, %v17010_v12  ;;  %8784 = vmatprep.mubr.bf16.mxu0 %v19241_v59  ;;  %9023 = vmatpush2.bf16.msra.mxu0 %v11925_v40  ;;  %v4561_v13 = vpop.f32.mrf.mxu0 }
 0x4a7   :  { %v5962_v38 = vmul.f32 %v5662_v22, %v4762_v7  ;;  %v5111_v47 = vmul.f32 0.70710677, %v17283_v49  ;;  %v4402_v56 = vpop.f32.mrf.mxu1  ;;  %9024 = vmatprep.subr.bf16.mxu0 %v11930_v55  ;;  %v4774_v18 = vmul.f32 0.5, %v17223_v33  ;;  %v5951_v40 = vmul.f32 %v5651_v19, %v4751_v45 }
 0x4a8   :  { %v12626_v1 = vpop.eup %12625  ;;  %v5963_v14 = vmul.f32 %v5663_v62, %v4763_v30  ;;  %v5122_v9 = vmul.f32 0.70710677, %v17288_v51  ;;  %v17296_v15 = vadd.f32 %v4561_v13, %v4401_v16  ;;  %8864 = vmatpush2.bf16.msra.mxu1 %v11922_v0  ;;  %v4403_v53 = vadd.f32 %v4402_v56, %v16977_v44  ;;  %v4563_v32 = vpop.f32.mrf.mxu0  ;;  %v19243_v56 = vld [vmem:[#allocation113_spill] sm:$0xff] }
 0x4a9   :  { %v17298_v39 = vpack.c.bf16 %v5962_v38, %v5950_v35  ;;  %12641 = verf.f32 %v5111_v47  ;;  %v4404_v7 = vpop.f32.mrf.mxu1  ;;  %10627 = vmatprep.subr.bf16.mxu1 %v11931_v63  ;;  %v5674_v22 = vadd.f32 1.0, %v12626_v1  ;;  %v4786_v0 = vmul.f32 0.5, %v17239_v37 }
 0x4aa   :  { %v12628_v55 = vpop.eup %12627  ;;  %12643 = verf.f32 %v5122_v9  ;;  %v5123_v62 = vmul.f32 0.70710677, %v17296_v15  ;;  %v4405_v33 = vadd.f32 %v4404_v7, %v17010_v12  ;;  %9025 = vmatpush2.bf16.msra.mxu0 %v11928_v8  ;;  %v17304_v19 = vadd.f32 %v4563_v32, %v4403_v53  ;;  %v4565_v35 = vpop.f32.mrf.mxu0  ;;  %v19245_v8 = vld [vmem:[#allocation60_spill] sm:$0xff] }
 0x4ab   :  { %19242 = vst [vmem:[#allocation147_spill] sm:$0xff] %v17298_v39  ;;  %v12630_v30 = vpop.eup %12629  ;;  %v5675_v16 = vadd.f32 1.0, %v12628_v55  ;;  %v4408_v45 = vpop.f32.mrf.mxu1  ;;  %8624 = vmatmul.mubr.bf16.gmra.mxu1 %v19243_v56  ;;  %10721 = vmatprep.subr.bf16.mxu0 %v11937_v61  ;;  %v17307_v63 = vpack.c.bf16 %v5963_v14, %v5951_v40  ;;  %v19246_v9 = vld [vmem:[#allocation72_spill] sm:$0xff]  ;;  %v4775_v53 = vmul.f32 0.5, %v17234_v48  ;;  %v4787_v32 = vmul.f32 0.5, %v17250_v2  ;;  %v19247_v14 = vld [vmem:[#allocation5_spill] sm:$0xff] }
 0x4ac   :  { %v5686_v38 = vadd.f32 1.0, %v12630_v30  ;;  %12645 = verf.f32 %v5123_v62  ;;  %v17309_v47 = vadd.f32 %v4565_v35, %v4405_v33  ;;  %v4409_v13 = vadd.f32 %v4408_v45, %v16977_v44  ;;  %8633 = vmatprep.mubr.bf16.mxu1 %v19245_v8  ;;  %v4569_v61 = vpop.f32.mrf.mxu0  ;;  %v19248_v35 = vld [vmem:[#allocation7_spill] sm:$0xff] }
 0x4ad   :  { %19244 = vst [vmem:[#allocation148_spill] sm:$0xff] %v17307_v63  ;;  %v12632_v1 = vpop.eup %12631  ;;  %v5190_v37 = vmul.f32 0.70710677, %v19246_v9  ;;  %v5134_v7 = vmul.f32 0.70710677, %v17304_v19  ;;  %8785 = vmatmul.mubr.bf16.gmra.mxu0 %v19247_v14  ;;  %v4410_v40 = vpop.f32.mrf.mxu1  ;;  %v5974_v55 = vmul.f32 %v5674_v22, %v4774_v18  ;;  %v5975_v8 = vmul.f32 %v5675_v16, %v4775_v53 }
 0x4ae   :  { %v5986_v62 = vmul.f32 %v5686_v38, %v4786_v0  ;;  %v5687_v33 = vadd.f32 1.0, %v12632_v1  ;;  %v5135_v30 = vmul.f32 0.70710677, %v17309_v47  ;;  %8794 = vmatprep.mubr.bf16.mxu0 %v19248_v35  ;;  %v12634_v45 = vpop.eup %12633  ;;  %v17320_v56 = vadd.f32 %v4569_v61, %v4409_v13  ;;  %v4571_v2 = vpop.f32.mrf.mxu0 }
 0x4af   :  { %12647 = verf.f32 %v5134_v7  ;;  %v4411_v48 = vadd.f32 %v4410_v40, %v17010_v12  ;;  %v4412_v59 = vpop.f32.mrf.mxu1  ;;  %v17331_v13 = vmul.f32 %v17264_v29, %v17231_v42  ;;  %v5791_v42 = vadd.f32 1.0, %v12634_v45 }
 0x4b0   :  { %v12636_v20 = vpop.eup %12635  ;;  %v17323_v39 = vpack.c.bf16 %v5986_v62, %v5974_v55  ;;  %v5987_v14 = vmul.f32 %v5687_v33, %v4787_v32  ;;  %12649 = verf.f32 %v5135_v30  ;;  %v4413_v18 = vadd.f32 %v4412_v59, %v16977_v44  ;;  %v4573_v16 = vpop.f32.mrf.mxu0  ;;  %v19251_v33 = vld [vmem:[#allocation32_spill] sm:$0xff] }
 0x4b1   :  { %12651 = verf.f32 %v5190_v37  ;;  %v5146_v22 = vmul.f32 0.70710677, %v17320_v56  ;;  %v17327_v0 = vadd.f32 %v4571_v2, %v4411_v48  ;;  %v4414_v38 = vpop.f32.mrf.mxu1  ;;  %v12638_v1 = vpop.eup %12637  ;;  %v5698_v53 = vadd.f32 1.0, %v12636_v20 }
 0x4b2   :  { %19249 = vst [vmem:[#allocation72_spill] sm:$0xff] %v17323_v39  ;;  %v17333_v7 = vadd.f32 %v4573_v16, %v4413_v18  ;;  %v4415_v32 = vadd.f32 %v4414_v38, %v17010_v12  ;;  %v17336_v61 = vpack.c.bf16 %v5987_v14, %v5975_v8  ;;  %v4798_v37 = vmul.f32 0.5, %v17259_v21  ;;  %v4575_v55 = vpop.f32.mrf.mxu0  ;;  %v19252_v8 = vld [vmem:[#allocation101_spill] sm:$0xff] }
 0x4b3   :  { %v12640_v59 = vpop.eup %12639  ;;  %12653 = verf.f32 %v5146_v22  ;;  %v5147_v40 = vmul.f32 0.70710677, %v17327_v0  ;;  %v4418_v62 = vpop.f32.mrf.mxu1  ;;  %8634 = vmatmul.mubr.bf16.gmra.mxu1 %v19251_v33  ;;  %v4799_v29 = vmul.f32 0.5, %v17261_v24  ;;  %v4810_v20 = vmul.f32 0.5, %v17272_v41  ;;  %v19253_v22 = vld [vmem:[#allocation12_spill] sm:$0xff] }
 0x4b4   :  { %19250 = vst [vmem:[#allocation149_spill] sm:$0xff] %v17336_v61  ;;  %v5710_v30 = vadd.f32 1.0, %v12640_v59  ;;  %v5158_v48 = vmul.f32 0.70710677, %v17333_v7  ;;  %8643 = vmatprep.mubr.bf16.mxu1 %v19252_v8  ;;  %v5699_v14 = vadd.f32 1.0, %v12638_v1  ;;  %v17345_v21 = vadd.f32 %v4575_v55, %v4415_v32  ;;  %v4579_v18 = vpop.f32.mrf.mxu0  ;;  %v19254_v59 = vld [vmem:[#allocation15_spill] sm:$0xff] }
 0x4b5   :  { %12655 = verf.f32 %v5147_v40  ;;  %v4419_v2 = vadd.f32 %v4418_v62, %v16977_v44  ;;  %8795 = vmatmul.mubr.bf16.gmra.mxu0 %v19253_v22  ;;  %v4420_v16 = vpop.f32.mrf.mxu1  ;;  %v5998_v38 = vmul.f32 %v5698_v53, %v4798_v37  ;;  %v4811_v1 = vmul.f32 0.5, %v17283_v49 }
 0x4b6   :  { %v12642_v45 = vpop.eup %12641  ;;  %v6010_v24 = vmul.f32 %v5710_v30, %v4810_v20  ;;  %12657 = verf.f32 %v5158_v48  ;;  %v4421_v41 = vadd.f32 %v4420_v16, %v17010_v12  ;;  %8804 = vmatprep.mubr.bf16.mxu0 %v19254_v59  ;;  %v5159_v32 = vmul.f32 0.70710677, %v17345_v21  ;;  %v4581_v62 = vpop.f32.mrf.mxu0 }
 0x4b7   :  { %v12644_v33 = vpop.eup %12643  ;;  %v5711_v40 = vadd.f32 1.0, %v12642_v45  ;;  %v17353_v55 = vadd.f32 %v4579_v18, %v4419_v2  ;;  %v4422_v8 = vpop.f32.mrf.mxu1  ;;  %v4891_v22 = vmul.f32 0.5, %v16547_v54  ;;  %v5999_v30 = vmul.f32 %v5699_v14, %v4799_v29  ;;  %v19256_v29 = vld [vmem:[#allocation19_spill] sm:$0xff] }
 0x4b8   :  { %v17356_v35 = vpack.c.bf16 %v6010_v24, %v5998_v38  ;;  %v17358_v53 = vadd.f32 %v4581_v62, %v4421_v41  ;;  %v4423_v37 = vadd.f32 %v4422_v8, %v16977_v44  ;;  %12659 = verf.f32 %v5159_v32  ;;  %v4583_v16 = vpop.f32.mrf.mxu0 }
 0x4b9   :  { %v12646_v20 = vpop.eup %12645  ;;  %v6011_v48 = vmul.f32 %v5711_v40, %v4811_v1  ;;  %v5170_v49 = vmul.f32 0.70710677, %v17353_v55  ;;  %v4424_v45 = vpop.f32.mrf.mxu1  ;;  %v4822_v2 = vmul.f32 0.5, %v17288_v51  ;;  %v5722_v18 = vadd.f32 1.0, %v12644_v33 }
 0x4ba   :  { %19255 = vst [vmem:[#allocation150_spill] sm:$0xff] %v17356_v35  ;;  %v5171_v59 = vmul.f32 0.70710677, %v17358_v53  ;;  %v6091_v54 = vmul.f32 %v5791_v42, %v4891_v22  ;;  %v17364_v38 = vadd.f32 %v4583_v16, %v4423_v37  ;;  %v4425_v24 = vadd.f32 %v4424_v45, %v17010_v12  ;;  %v4585_v8 = vpop.f32.mrf.mxu0  ;;  %v19258_v42 = vld [vmem:[#allocation44_spill] sm:$0xff] }
 0x4bb   :  { %12661 = verf.f32 %v5170_v49  ;;  %v4428_v41 = vpop.f32.mrf.mxu1  ;;  %8644 = vmatmul.mubr.bf16.gmra.mxu1 %v19256_v29  ;;  %v17368_v14 = vpack.c.bf16 %v6011_v48, %v5999_v30  ;;  %v4823_v40 = vmul.f32 0.5, %v17296_v15  ;;  %v5723_v32 = vadd.f32 1.0, %v12646_v20  ;;  %v19259_v30 = vld [vmem:[#allocation70_spill] sm:$0xff]  ;;  %v6636_v15 = vld [vmem:[%s18484_s6] sm:$0x7] }
 0x4bc   :  { %v12648_v1 = vpop.eup %12647  ;;  %v4834_v51 = vmul.f32 0.5, %v17304_v19  ;;  %v4429_v33 = vadd.f32 %v4428_v41, %v16977_v44  ;;  %8653 = vmatprep.mubr.bf16.mxu1 %v19258_v42  ;;  %12663 = verf.f32 %v5171_v59  ;;  %v5182_v37 = vmul.f32 0.70710677, %v17364_v38  ;;  %v4589_v16 = vpop.f32.mrf.mxu0  ;;  %v19260_v41 = vld [vmem:[#allocation16_spill] sm:$0xff] }
 0x4bd   :  { %19257 = vst [vmem:[#allocation151_spill] sm:$0xff] %v17368_v14  ;;  %v12650_v22 = vpop.eup %12649  ;;  %v5734_v62 = vadd.f32 1.0, %v12648_v1  ;;  %v17375_v49 = vadd.f32 %v4585_v8, %v4425_v24  ;;  %8805 = vmatmul.mubr.bf16.gmra.mxu0 %v19259_v30  ;;  %v4430_v48 = vpop.f32.mrf.mxu1  ;;  %v4835_v44 = vmul.f32 0.5, %v17309_v47  ;;  %v6022_v24 = vmul.f32 %v5722_v18, %v4822_v2  ;;  %v19261_v47 = vld [vmem:[#allocation43_spill] sm:$0xff] }
 0x4be   :  { %v12652_v19 = vpop.eup %12651  ;;  %v5735_v20 = vadd.f32 1.0, %v12650_v22  ;;  %v17382_v45 = vadd.f32 %v4589_v16, %v4429_v33  ;;  %v4431_v59 = vadd.f32 %v4430_v48, %v17010_v12  ;;  %8814 = vmatprep.mubr.bf16.mxu0 %v19260_v41  ;;  %12665 = verf.f32 %v5182_v37  ;;  %v4591_v30 = vpop.f32.mrf.mxu0 }
 0x4bf   :  { %v6034_v8 = vmul.f32 %v5734_v62, %v4834_v51  ;;  %v5183_v1 = vmul.f32 0.70710677, %v17375_v49  ;;  %v4432_v42 = vpop.f32.mrf.mxu1  ;;  %v6023_v35 = vmul.f32 %v5723_v32, %v4823_v40  ;;  %v17390_v22 = vrot.slane %v6636_v15, %v19261_v47  ;;  %v19264_v40 = vld [vmem:[#allocation38_spill] sm:$0xff] }
 0x4c0   :  { %v12654_v29 = vpop.eup %12653  ;;  %v6035_v14 = vmul.f32 %v5735_v20, %v4835_v44  ;;  %v17387_v39 = vadd.f32 %v4591_v30, %v4431_v59  ;;  %v5788_v33 = vadd.f32 1.0, %v17286_v4  ;;  %v4593_v2 = vpop.f32.mrf.mxu0  ;;  %v17397_v42 = vpack.c.bf16 %v17331_v13, %v17331_v13  ;;  %v19266_v20 = vld [vmem:[#allocation20_spill] sm:$0xff] }
 0x4c1   :  { %v17393_v12 = vpack.c.bf16 %v6034_v8, %v6022_v24  ;;  %12667 = verf.f32 %v5183_v1  ;;  %v4433_v18 = vpop.f32.mrf.mxu1  ;;  %v5746_v62 = vadd.f32 1.0, %v12654_v29  ;;  %v17400_v32 = vrot.slane %v6636_v15, %v19264_v40  ;;  %v19268_v8 = vld [vmem:[#allocation11_spill] sm:$0xff] }
 0x4c2   :  { %v12656_v51 = vpop.eup %12655  ;;  %19263 = vst [vmem:[#allocation152_spill] sm:$0xff] %v17397_v42  ;;  %v17402_v37 = vpack.c.bf16 %v6035_v14, %v6023_v35  ;;  %v4888_v30 = vmul.f32 0.5, %v19219_v34  ;;  %v5790_v4 = vadd.f32 1.0, %v12652_v19  ;;  %v4594_v48 = vpop.f32.mrf.mxu0  ;;  %v17406_v59 = vpack.c.bf16 %v6091_v54, %v6091_v54 }
 0x4c3   :  { %19262 = vst [vmem:[#allocation43_spill] sm:$0xff] %v17393_v12  ;;  %v12658_v16 = vpop.eup %12657  ;;  %v8223_v44 = vpop.f32.mrf.mxu1  ;;  %8654 = vmatmul.mubr.bf16.gmra.mxu1 %v19266_v20  ;;  %v4846_v29 = vmul.f32 0.5, %v17320_v56  ;;  %v4858_v13 = vmul.f32 0.5, %v17333_v7  ;;  %v4890_v14 = vmul.f32 0.5, %v19246_v9  ;;  %v5747_v34 = vadd.f32 1.0, %v12656_v51 }
 0x4c4   :  { %19265 = vst [vmem:[#allocation38_spill] sm:$0xff] %v17402_v37  ;;  %19267 = vst [vmem:[#allocation153_spill] sm:$0xff] %v17406_v59  ;;  %v5758_v24 = vadd.f32 1.0, %v12658_v16  ;;  %v8224_v15 = vadd.f32 %v8223_v44, %v17390_v22  ;;  %8663 = vmatprep.mubr.bf16.mxu1 %v17397_v42  ;;  %v6088_v35 = vmul.f32 %v5788_v33, %v4888_v30  ;;  %v8384_v19 = vpop.f32.mrf.mxu0  ;;  %v4847_v40 = vmul.f32 0.5, %v17327_v0 }
 0x4c5   :  { %8815 = vmatmul.mubr.bf16.gmra.mxu0 %v19268_v8  ;;  %v8225_v1 = vpop.f32.mrf.mxu1  ;;  %v12660_v47 = vpop.eup %12659  ;;  %v6046_v54 = vmul.f32 %v5746_v62, %v4846_v29  ;;  %v6090_v7 = vmul.f32 %v5790_v4, %v4890_v14  ;;  %v4859_v33 = vmul.f32 0.5, %v17345_v21 }
 0x4c6   :  { %v6058_v2 = vmul.f32 %v5758_v24, %v4858_v13  ;;  %v17414_v18 = vadd.f32 %v8384_v19, %v8224_v15  ;;  %v8226_v56 = vadd.f32 %v8225_v1, %v17400_v32  ;;  %8824 = vmatprep.mubr.bf16.mxu0 %v17406_v59  ;;  %v5759_v9 = vadd.f32 1.0, %v12660_v47  ;;  %v8386_v51 = vpop.f32.mrf.mxu0 }
 0x4c7   :  { %v8227_v16 = vpop.f32.mrf.mxu1  ;;  %v17425_v29 = vpack.c.bf16 %v6088_v35, %v6088_v35  ;;  %v6047_v13 = vmul.f32 %v5747_v34, %v4847_v40  ;;  %v17430_v19 = vpack.c.bf16 %v6090_v7, %v6090_v7  ;;  %v19273_v40 = vld [vmem:[#allocation80_spill] sm:$0xff]  ;;  %v4882_v7 = vmul.f32 0.5, %v17364_v38 }
 0x4c8   :  { %v12662_v30 = vpop.eup %12661  ;;  %v17420_v48 = vpack.c.bf16 %v6058_v2, %v6046_v54  ;;  %v17422_v44 = vadd.f32 %v8386_v51, %v8226_v56  ;;  %v8228_v62 = vadd.f32 %v8227_v16, %v17390_v22  ;;  %v6059_v24 = vmul.f32 %v5759_v9, %v4859_v33  ;;  %v8388_v15 = vpop.f32.mrf.mxu0 }
 0x4c9   :  { %19270 = vst [vmem:[#allocation155_spill] sm:$0xff] %v17425_v29  ;;  %v8229_v4 = vpop.f32.mrf.mxu1  ;;  %v12664_v14 = vpop.eup %12663  ;;  %19271 = vst [vmem:[#allocation156_spill] sm:$0xff] %v17430_v19  ;;  %v5770_v1 = vadd.f32 1.0, %v12662_v30  ;;  %v4870_v33 = vmul.f32 0.5, %v17353_v55  ;;  %v4883_v55 = vmul.f32 0.5, %v17375_v49 }
 0x4ca   :  { %19269 = vst [vmem:[#allocation154_spill] sm:$0xff] %v17420_v48  ;;  %v17427_v0 = vadd.f32 %v8388_v15, %v8228_v62  ;;  %v8230_v21 = vadd.f32 %v8229_v4, %v17400_v32  ;;  %v8390_v47 = vpop.f32.mrf.mxu0  ;;  %v17433_v2 = vpack.c.bf16 %v6059_v24, %v6047_v13  ;;  %v5771_v9 = vadd.f32 1.0, %v12664_v14  ;;  %v11938_v49 = vld [vmem:[#allocation2 + $0x230] ss:$12 sps:$4 sm:$0xff]  }
 0x4cb   :  { %v8233_v54 = vpop.f32.mrf.mxu1  ;;  %8664 = vmatmul.mubr.bf16.gmra.mxu1 %v17425_v29  ;;  %v12666_v35 = vpop.eup %12665  ;;  %v4871_v13 = vmul.f32 0.5, %v17358_v53  ;;  %v6070_v4 = vmul.f32 %v5770_v1, %v4870_v33  ;;  %v11933_v29 = vld [vmem:[#allocation2 + $0x158] ss:$12 sps:$4 sm:$0xff]  }
 0x4cc   :  { %19272 = vst [vmem:[#allocation157_spill] sm:$0xff] %v17433_v2  ;;  %v17435_v56 = vadd.f32 %v8390_v47, %v8230_v21  ;;  %v8234_v34 = vadd.f32 %v8233_v54, %v17390_v22  ;;  %8865 = vmatprep.mubr.bf16.mxu1 %v19273_v40  ;;  %v5782_v51 = vadd.f32 1.0, %v12666_v35  ;;  %v8394_v16 = vpop.f32.mrf.mxu0 }
 0x4cd   :  { %8825 = vmatmul.mubr.bf16.gmra.mxu0 %v17430_v19  ;;  %v8235_v30 = vpop.f32.mrf.mxu1  ;;  %v11932_v19 = vld [vmem:[#allocation2 + $0xb0] ss:$12 sps:$4 sm:$0xff]   ;;  %v6071_v40 = vmul.f32 %v5771_v9, %v4871_v13  ;;  %v19277_v13 = vld [vmem:[#allocation18_spill] sm:$0xff] }
 0x4ce   :  { %v12668_v62 = vpop.eup %12667  ;;  %v17443_v24 = vadd.f32 %v8394_v16, %v8234_v34  ;;  %v8236_v15 = vadd.f32 %v8235_v30, %v17400_v32  ;;  %9026 = vmatprep.mubr.bf16.mxu0 %v17122_v28  ;;  %v6082_v21 = vmul.f32 %v5782_v51, %v4882_v7  ;;  %v8396_v38 = vpop.f32.mrf.mxu0  ;;  %v19275_v51 = vld [vmem:[#allocation64_spill] sm:$0xff] }
 0x4cf   :  { %v5783_v14 = vadd.f32 1.0, %v12668_v62  ;;  %v8237_v47 = vpop.f32.mrf.mxu1  ;;  %v11941_v62 = vld [vmem:[#allocation2 + $0x2d8] ss:$12 sps:$4 sm:$0xff]  }
 0x4d0   :  { %v17448_v54 = vadd.f32 %v8396_v38, %v8236_v15  ;;  %v8238_v35 = vadd.f32 %v8237_v47, %v17390_v22  ;;  %v17451_v53 = vpack.c.bf16 %v6082_v21, %v6070_v4  ;;  %v8398_v16 = vpop.f32.mrf.mxu0  ;;  %v11934_v4 = vld [vmem:[#allocation2 + $0x98] ss:$12 sps:$4 sm:$0xff]  }
 0x4d1   :  { %v6083_v34 = vmul.f32 %v5783_v14, %v4883_v55  ;;  %v8239_v30 = vpop.f32.mrf.mxu1  ;;  %v11935_v14 = vld [vmem:[#allocation2 + $0x140] ss:$12 sps:$4 sm:$0xff]  }
 0x4d2   :  { %19274 = vst [vmem:[#allocation158_spill] sm:$0xff] %v17451_v53  ;;  %v17453_v28 = vadd.f32 %v8398_v16, %v8238_v35  ;;  %v8240_v1 = vadd.f32 %v8239_v30, %v17400_v32  ;;  %v8400_v33 = vpop.f32.mrf.mxu0 }
 0x4d3   :  { %v8243_v7 = vpop.f32.mrf.mxu1  ;;  %8866 = vmatmul.mubr.bf16.vlgmr.msra.gmra.mxu1 %v19275_v51  ;;  %v17457_v15 = vpack.c.bf16 %v6083_v34, %v6071_v40  ;;  %v11942_v40 = vld [vmem:[#allocation2 + $0x218] ss:$12 sps:$4 sm:$0xff]  }
 0x4d4   :  { %v17459_v38 = vadd.f32 %v8400_v33, %v8240_v1  ;;  %v8244_v9 = vadd.f32 %v8243_v7, %v17390_v22  ;;  %10628 = vmatpush3.bf16.msra.mxu1 %v11932_v19  ;;  %8875 = vmatprep.mubr.bf16.mxu1 %v19277_v13  ;;  %v8404_v21 = vpop.f32.mrf.mxu0  ;;  %v11945_v19 = vld [vmem:[#allocation2 + $0x2c0] ss:$12 sps:$4 sm:$0xff]  }
 0x4d5   :  { %19276 = vst [vmem:[#allocation159_spill] sm:$0xff] %v17457_v15  ;;  %9027 = vmatmul.mubr.bf16.vlgmr.msra.gmra.mxu0 %v17113_v31  ;;  %v8245_v55 = vpop.f32.mrf.mxu1  ;;  %10629 = vmatprep.subr.bf16.mxu1 %v11933_v29  ;;  %v11936_v33 = vld [vmem:[#allocation2 + $0x80] ss:$12 sps:$4 sm:$0xff]  }
 0x4d6   :  { %v17464_v47 = vadd.f32 %v8404_v21, %v8244_v9  ;;  %v8246_v35 = vadd.f32 %v8245_v55, %v17400_v32  ;;  %9036 = vmatprep.mubr.bf16.mxu0 %v17153_v27  ;;  %10722 = vmatpush3.bf16.msra.mxu0 %v11938_v49  ;;  %v8406_v34 = vpop.f32.mrf.mxu0  ;;  %v11939_v9 = vld [vmem:[#allocation2 + $0x128] ss:$12 sps:$4 sm:$0xff]   ;;  %v11946_v49 = vld [vmem:[#allocation2 + $0x200] ss:$12 sps:$4 sm:$0xff]  }
 0x4d7   :  { %v8247_v16 = vpop.f32.mrf.mxu1  ;;  %10723 = vmatprep.subr.bf16.mxu0 %v11941_v62  ;;  %v19278_v62 = vld [vmem:[#allocation47_spill] sm:$0xff] }
 0x4d8   :  { %v17468_v30 = vadd.f32 %v8406_v34, %v8246_v35  ;;  %v8248_v1 = vadd.f32 %v8247_v16, %v17390_v22  ;;  %10630 = vmatpush3.bf16.msra.mxu1 %v11934_v4  ;;  %v8408_v29 = vpop.f32.mrf.mxu0  ;;  %v11949_v35 = vld [vmem:[#allocation2 + $0x2a8] ss:$12 sps:$4 sm:$0xff]   ;;  %v19279_v16 = vld [vmem:[#allocation17_spill] sm:$0xff] }
 0x4d9   :  { %v8249_v7 = vpop.f32.mrf.mxu1  ;;  %10631 = vmatprep.subr.bf16.mxu1 %v11935_v14  ;;  %v11940_v14 = vld [vmem:[#allocation2 + $0x68] ss:$12 sps:$4 sm:$0xff]  }
 0x4da   :  { %v17471_v21 = vadd.f32 %v8408_v29, %v8248_v1  ;;  %v8250_v55 = vadd.f32 %v8249_v7, %v17400_v32  ;;  %10724 = vmatpush3.bf16.msra.mxu0 %v11942_v40  ;;  %v8410_v27 = vpop.f32.mrf.mxu0  ;;  %v11943_v40 = vld [vmem:[#allocation2 + $0x110] ss:$12 sps:$4 sm:$0xff]  }
 0x4db   :  { %v8253_v31 = vpop.f32.mrf.mxu1  ;;  %8876 = vmatmul.mubr.bf16.gmra.mxu1 %v19278_v62  ;;  %10725 = vmatprep.subr.bf16.mxu0 %v11945_v19 }
 0x4dc   :  { %v17475_v34 = vadd.f32 %v8410_v27, %v8250_v55  ;;  %v8254_v4 = vadd.f32 %v8253_v31, %v17390_v22  ;;  %8885 = vmatprep.mubr.bf16.mxu1 %v19279_v16  ;;  %10632 = vmatpush3.bf16.msra.mxu1 %v11936_v33  ;;  %v11950_v27 = vld [vmem:[#allocation2 + $0x1e8] ss:$12 sps:$4 sm:$0xff]   ;;  %v11953_v55 = vld [vmem:[#allocation2 + $0x290] ss:$12 sps:$4 sm:$0xff]  }
 0x4dd   :  { %v8414_v1 = vpop.f32.mrf.mxu0  ;;  %9037 = vmatmul.mubr.bf16.gmra.mxu0 %v17140_v46  ;;  %v8255_v29 = vpop.f32.mrf.mxu1  ;;  %10633 = vmatprep.subr.bf16.mxu1 %v11939_v9  ;;  %v11944_v46 = vld [vmem:[#allocation2 + $0x50] ss:$12 sps:$4 sm:$0xff]  }
 0x4de   :  { %v17480_v7 = vadd.f32 %v8414_v1, %v8254_v4  ;;  %v8256_v62 = vadd.f32 %v8255_v29, %v17400_v32  ;;  %9046 = vmatprep.mubr.bf16.mxu0 %v17182_v5  ;;  %10726 = vmatpush3.bf16.msra.mxu0 %v11946_v49  ;;  %v11947_v4 = vld [vmem:[#allocation2 + $0xf8] ss:$12 sps:$4 sm:$0xff]   ;;  %v11954_v49 = vld [vmem:[#allocation2 + $0x1d0] ss:$12 sps:$4 sm:$0xff]  }
 0x4df   :  { %v8416_v19 = vpop.f32.mrf.mxu0  ;;  %v8257_v31 = vpop.f32.mrf.mxu1  ;;  %10727 = vmatprep.subr.bf16.mxu0 %v11949_v35  ;;  %v19280_v35 = vld [vmem:[#allocation79_spill] sm:$0xff] }
 0x4e0   :  { %v17484_v33 = vadd.f32 %v8416_v19, %v8256_v62  ;;  %v8258_v16 = vadd.f32 %v8257_v31, %v17390_v22  ;;  %10634 = vmatpush3.bf16.msra.mxu1 %v11940_v14  ;;  %v11957_v62 = vld [vmem:[#allocation2 + $0x278] ss:$12 sps:$4 sm:$0xff]  }
 0x4e1   :  { %v8418_v9 = vpop.f32.mrf.mxu0  ;;  %v8259_v13 = vpop.f32.mrf.mxu1  ;;  %10635 = vmatprep.subr.bf16.mxu1 %v11943_v40  ;;  %v11948_v40 = vld [vmem:[#allocation2 + $0x38] ss:$12 sps:$4 sm:$0xff]  }
 0x4e2   :  { %v17487_v1 = vadd.f32 %v8418_v9, %v8258_v16  ;;  %v8260_v29 = vadd.f32 %v8259_v13, %v17400_v32  ;;  %10728 = vmatpush3.bf16.msra.mxu0 %v11950_v27  ;;  %v11951_v27 = vld [vmem:[#allocation2 + $0xe0] ss:$12 sps:$4 sm:$0xff]  }
 0x4e3   :  { %v8420_v5 = vpop.f32.mrf.mxu0  ;;  %v8263_v51 = vpop.f32.mrf.mxu1  ;;  %8886 = vmatmul.mubr.bf16.gmra.mxu1 %v19280_v35  ;;  %10729 = vmatprep.subr.bf16.mxu0 %v11953_v55 }
 0x4e4   :  { %v17491_v19 = vadd.f32 %v8420_v5, %v8260_v29  ;;  %v8264_v14 = vadd.f32 %v8263_v51, %v17390_v22  ;;  %8895 = vmatprep.mubr.bf16.mxu1 %v16824_v57  ;;  %10636 = vmatpush3.bf16.msra.mxu1 %v11944_v46  ;;  %v11958_v5 = vld [vmem:[#allocation2 + $0x1b8] ss:$12 sps:$4 sm:$0xff]   ;;  %v11959_v29 = vld [vmem:[#allocation2 + $0x260] ss:$12 sps:$4 sm:$0xff]  }
 0x4e5   :  { %v8424_v16 = vpop.f32.mrf.mxu0  ;;  %9047 = vmatmul.mubr.bf16.gmra.mxu0 %v17173_v58  ;;  %v8265_v13 = vpop.f32.mrf.mxu1  ;;  %10637 = vmatprep.subr.bf16.mxu1 %v11947_v4  ;;  %v11952_v58 = vld [vmem:[#allocation2 + $0x20] ss:$12 sps:$4 sm:$0xff]  }
 0x4e6   :  { %v17496_v31 = vadd.f32 %v8424_v16, %v8264_v14  ;;  %v8266_v9 = vadd.f32 %v8265_v13, %v17400_v32  ;;  %9056 = vmatprep.mubr.bf16.mxu0 %v17206_v23  ;;  %10730 = vmatpush3.bf16.msra.mxu0 %v11954_v49  ;;  %v11955_v14 = vld [vmem:[#allocation2 + $0xc8] ss:$12 sps:$4 sm:$0xff]   ;;  %v11960_v49 = vld [vmem:[#allocation2 + $0x1a0] ss:$12 sps:$4 sm:$0xff]  }
 0x4e7   :  { %v8426_v55 = vpop.f32.mrf.mxu0  ;;  %v8267_v51 = vpop.f32.mrf.mxu1  ;;  %10731 = vmatprep.subr.bf16.mxu0 %v11957_v62  ;;  %v11961_v62 = vld [vmem:[#allocation2 + $0x248] ss:$12 sps:$4 sm:$0xff]  }
 0x4e8   :  { %v17500_v46 = vadd.f32 %v8426_v55, %v8266_v9  ;;  %v8268_v57 = vadd.f32 %v8267_v51, %v17390_v22  ;;  %10638 = vmatpush3.bf16.msra.mxu1 %v11948_v40 }
 0x4e9   :  { %v8428_v4 = vpop.f32.mrf.mxu0  ;;  %v8269_v35 = vpop.f32.mrf.mxu1  ;;  %10639 = vmatprep.subr.bf16.mxu1 %v11951_v27  ;;  %v11956_v27 = vld [vmem:[#allocation2 + $0x8] ss:$12 sps:$4 sm:$0xff]  }
 0x4ea   :  { %v17503_v16 = vadd.f32 %v8428_v4, %v8268_v57  ;;  %v8270_v13 = vadd.f32 %v8269_v35, %v17400_v32  ;;  %10732 = vmatpush3.bf16.msra.mxu0 %v11958_v5  ;;  %v11963_v5 = vld [vmem:[#allocation2 + $0x470] ss:$12 sps:$4 sm:$0xff]  }
 0x4eb   :  { %v8430_v23 = vpop.f32.mrf.mxu0  ;;  %v8273_v59 = vpop.f32.mrf.mxu1  ;;  %8896 = vmatmul.mubr.bf16.gmra.mxu1 %v16808_v36  ;;  %10733 = vmatprep.subr.bf16.mxu0 %v11959_v29  ;;  %v11969_v4 = vld [vmem:[#allocation2 + $0x5f0] ss:$12 sps:$4 sm:$0xff]  }
 0x4ec   :  { %v17507_v9 = vadd.f32 %v8430_v23, %v8270_v13  ;;  %v8274_v40 = vadd.f32 %v8273_v59, %v17390_v22  ;;  %8905 = vmatprep.mubr.bf16.mxu1 %v16847_v25  ;;  %10640 = vmatpush3.bf16.msra.mxu1 %v11952_v58  ;;  %v11962_v23 = vld [vmem:[#allocation2 + $0x188] ss:$12 sps:$4 sm:$0xff]   ;;  %v19286_v25 = vld [vmem:[#allocation128_spill] sm:$0xff] }
 0x4ed   :  { %v8434_v57 = vpop.f32.mrf.mxu0  ;;  %9057 = vmatmul.mubr.bf16.gmra.mxu0 %v17199_v6  ;;  %v8275_v35 = vpop.f32.mrf.mxu1  ;;  %10641 = vmatprep.subr.bf16.mxu1 %v11955_v14  ;;  %v5193_v36 = vmul.f32 0.70710677, %v19286_v25 }
 0x4ee   :  { %v17512_v55 = vadd.f32 %v8434_v57, %v8274_v40  ;;  %v8276_v51 = vadd.f32 %v8275_v35, %v17400_v32  ;;  %9066 = vmatprep.mubr.bf16.mxu0 %v17242_v10  ;;  %10734 = vmatpush3.bf16.msra.mxu0 %v11960_v49 }
 0x4ef   :  { %v8436_v29 = vpop.f32.mrf.mxu0  ;;  %v8277_v59 = vpop.f32.mrf.mxu1  ;;  %10735 = vmatprep.subr.bf16.mxu0 %v11961_v62  ;;  %12669 = verf.f32 %v5193_v36 }
 0x4f0   :  { %v17516_v58 = vadd.f32 %v8436_v29, %v8276_v51  ;;  %v8278_v13 = vadd.f32 %v8277_v59, %v17390_v22  ;;  %10642 = vmatpush3.bf16.msra.mxu1 %v11956_v27 }
 0x4f1   :  { %v8438_v6 = vpop.f32.mrf.mxu0  ;;  %v8279_v14 = vpop.f32.mrf.mxu1  ;;  %10815 = vmatprep.subr.bf16.mxu1 %v11963_v5 }
 0x4f2   :  { %v17519_v40 = vadd.f32 %v8438_v6, %v8278_v13  ;;  %v8280_v57 = vadd.f32 %v8279_v14, %v17400_v32  ;;  %10736 = vmatpush3.bf16.msra.mxu0 %v11962_v23 }
 0x4f3   :  { %v8440_v35 = vpop.f32.mrf.mxu0  ;;  %v8283_v49 = vpop.f32.mrf.mxu1  ;;  %8906 = vmatmul.mubr.bf16.gmra.mxu1 %v16837_v43  ;;  %10909 = vmatprep.subr.bf16.mxu0 %v11969_v4 }
 0x4f4   :  { %v17523_v62 = vadd.f32 %v8440_v35, %v8280_v57  ;;  %v8284_v51 = vadd.f32 %v8283_v49, %v17390_v22  ;;  %8915 = vmatprep.mubr.bf16.mxu1 %v16894_v60 }
 0x4f5   :  { %v8444_v27 = vpop.f32.mrf.mxu0  ;;  %9067 = vmatmul.mubr.bf16.gmra.mxu0 %v17226_v3  ;;  %v8285_v5 = vpop.f32.mrf.mxu1 }
 0x4f6   :  { %v17528_v6 = vadd.f32 %v8444_v27, %v8284_v51  ;;  %v8286_v29 = vadd.f32 %v8285_v5, %v17400_v32  ;;  %9076 = vmatprep.mubr.bf16.mxu0 %v17276_v17  ;;  %v19281_v51 = vld [vmem:[#allocation119_spill] sm:$0xff] }
 0x4f7   :  { %v8446_v23 = vpop.f32.mrf.mxu0  ;;  %v8287_v59 = vpop.f32.mrf.mxu1 }
 0x4f8   :  { %v17532_v13 = vadd.f32 %v8446_v23, %v8286_v29  ;;  %v8288_v4 = vadd.f32 %v8287_v59, %v17390_v22 }
 0x4f9   :  { %v8448_v14 = vpop.f32.mrf.mxu0  ;;  %v8289_v57 = vpop.f32.mrf.mxu1 }
 0x4fa   :  { %v17535_v35 = vadd.f32 %v8448_v14, %v8288_v4  ;;  %v8290_v49 = vadd.f32 %v8289_v57, %v17400_v32 }
 0x4fb   :  { %v8450_v3 = vpop.f32.mrf.mxu0  ;;  %v8293_v60 = vpop.f32.mrf.mxu1  ;;  %8916 = vmatmul.mubr.bf16.gmra.mxu1 %v19281_v51 }
 0x4fc   :  { %v17539_v27 = vadd.f32 %v8450_v3, %v8290_v49  ;;  %v8294_v5 = vadd.f32 %v8293_v60, %v17390_v22  ;;  %8925 = vmatprep.mubr.bf16.mxu1 %v16925_v52 }
 0x4fd   :  { %v8454_v29 = vpop.f32.mrf.mxu0  ;;  %9077 = vmatmul.mubr.bf16.gmra.mxu0 %v17266_v50  ;;  %v8295_v23 = vpop.f32.mrf.mxu1 }
 0x4fe   :  { %v17544_v59 = vadd.f32 %v8454_v29, %v8294_v5  ;;  %v8296_v4 = vadd.f32 %v8295_v23, %v17400_v32  ;;  %9086 = vmatprep.mubr.bf16.mxu0 %v17307_v63 }
 0x4ff   :  { %v8456_v14 = vpop.f32.mrf.mxu0  ;;  %v8297_v57 = vpop.f32.mrf.mxu1 }
 0x500   :  { %v17548_v17 = vadd.f32 %v8456_v14, %v8296_v4  ;;  %v8298_v3 = vadd.f32 %v8297_v57, %v17390_v22  ;;  %v19282_v4 = vld [vmem:[#allocation147_spill] sm:$0xff] }
 0x501   :  { %v8458_v49 = vpop.f32.mrf.mxu0  ;;  %v8299_v60 = vpop.f32.mrf.mxu1 }
 0x502   :  { %v17551_v51 = vadd.f32 %v8458_v49, %v8298_v3  ;;  %v8300_v52 = vadd.f32 %v8299_v60, %v17400_v32 }
 0x503   :  { %v8460_v50 = vpop.f32.mrf.mxu0  ;;  %v8303_v43 = vpop.f32.mrf.mxu1  ;;  %8926 = vmatmul.mubr.bf16.gmra.mxu1 %v16910_v11 }
 0x504   :  { %v17555_v5 = vadd.f32 %v8460_v50, %v8300_v52  ;;  %v8304_v29 = vadd.f32 %v8303_v43, %v17390_v22  ;;  %8935 = vmatprep.mubr.bf16.mxu1 %v16951_v26 }
 0x505   :  { %v8464_v23 = vpop.f32.mrf.mxu0  ;;  %9087 = vmatmul.mubr.bf16.gmra.mxu0 %v19282_v4  ;;  %v8305_v14 = vpop.f32.mrf.mxu1 }
 0x506   :  { %v17560_v57 = vadd.f32 %v8464_v23, %v8304_v29  ;;  %v8306_v3 = vadd.f32 %v8305_v14, %v17400_v32  ;;  %9096 = vmatprep.mubr.bf16.mxu0 %v17336_v61  ;;  %v19283_v29 = vld [vmem:[#allocation122_spill] sm:$0xff]  ;;  %v19284_v61 = vld [vmem:[#allocation125_spill] sm:$0xff] }
 0x507   :  { %v8466_v49 = vpop.f32.mrf.mxu0  ;;  %v8307_v60 = vpop.f32.mrf.mxu1 }
 0x508   :  { %v17564_v63 = vadd.f32 %v8466_v49, %v8306_v3  ;;  %v8308_v52 = vadd.f32 %v8307_v60, %v17390_v22  ;;  %v19285_v49 = vld [vmem:[#allocation72_spill] sm:$0xff] }
 0x509   :  { %v8468_v50 = vpop.f32.mrf.mxu0  ;;  %v8309_v43 = vpop.f32.mrf.mxu1 }
 0x50a   :  { %v17567_v11 = vadd.f32 %v8468_v50, %v8308_v52  ;;  %v8310_v26 = vadd.f32 %v8309_v43, %v17400_v32  ;;  %v19288_v43 = vld [vmem:[#allocation151_spill] sm:$0xff] }
 0x50b   :  { %v8470_v4 = vpop.f32.mrf.mxu0  ;;  %v8313_v10 = vpop.f32.mrf.mxu1  ;;  %8936 = vmatmul.mubr.bf16.gmra.mxu1 %v19283_v29 }
 0x50c   :  { %v17571_v23 = vadd.f32 %v8470_v4, %v8310_v26  ;;  %v8314_v14 = vadd.f32 %v8313_v10, %v17390_v22  ;;  %8945 = vmatprep.mubr.bf16.mxu1 %v19284_v61  ;;  %v5195_v26 = vmul.f32 0.70710677, %v17387_v39 }
 0x50d   :  { %v8474_v3 = vpop.f32.mrf.mxu0  ;;  %9097 = vmatmul.mubr.bf16.gmra.mxu0 %v19285_v49  ;;  %v8315_v60 = vpop.f32.mrf.mxu1 }
 0x50e   :  { %v17577_v52 = vadd.f32 %v8474_v3, %v8314_v14  ;;  %v8316_v50 = vadd.f32 %v8315_v60, %v17400_v32  ;;  %9106 = vmatprep.mubr.bf16.mxu0 %v19288_v43  ;;  %v19290_v60 = vld [vmem:[#allocation124_spill] sm:$0xff]  ;;  %12671 = verf.f32 %v5195_v26  ;;  %v5194_v26 = vmul.f32 0.70710677, %v17382_v45 }
 0x50f   :  { %v8476_v8 = vpop.f32.mrf.mxu0  ;;  %v8317_v29 = vpop.f32.mrf.mxu1 }
 0x510   :  { %19287 = vst [vmem:[#allocation128_spill] sm:$0xff] %v17577_v52  ;;  %v17582_v4 = vadd.f32 %v8476_v8, %v8316_v50  ;;  %v8318_v10 = vadd.f32 %v8317_v29, %v17390_v22  ;;  %v19292_v8 = vld [vmem:[#allocation34_spill] sm:$0xff] }
 0x511   :  { %v8478_v61 = vpop.f32.mrf.mxu0  ;;  %v8319_v42 = vpop.f32.mrf.mxu1  ;;  %v19293_v50 = vld [vmem:[#allocation126_spill] sm:$0xff] }
 0x512   :  { %19289 = vst [vmem:[#allocation160_spill] sm:$0xff] %v17582_v4  ;;  %v17585_v49 = vadd.f32 %v8478_v61, %v8318_v10  ;;  %v8320_v14 = vadd.f32 %v8319_v42, %v17400_v32  ;;  %v5192_v29 = vmul.f32 0.70710677, %v19293_v50  ;;  %v19294_v52 = vld [vmem:[#allocation150_spill] sm:$0xff] }
 0x513   :  { %v8480_v3 = vpop.f32.mrf.mxu0  ;;  %v8323_v20 = vpop.f32.mrf.mxu1  ;;  %8946 = vmatmul.mubr.bf16.gmra.mxu1 %v19290_v60 }
 0x514   :  { %v17589_v43 = vadd.f32 %v8480_v3, %v8320_v14  ;;  %v8324_v41 = vadd.f32 %v8323_v20, %v17390_v22  ;;  %8955 = vmatprep.mubr.bf16.mxu1 %v19292_v8  ;;  %12673 = verf.f32 %v5192_v29 }
 0x515   :  { %v8484_v4 = vpop.f32.mrf.mxu0  ;;  %9107 = vmatmul.mubr.bf16.gmra.mxu0 %v19294_v52  ;;  %v8325_v36 = vpop.f32.mrf.mxu1  ;;  %12675 = verf.f32 %v5194_v26  ;;  %v19297_v52 = vld [vmem:[#allocation127_spill] sm:$0xff] }
 0x516   :  { %19291 = vst [vmem:[#allocation161_spill] sm:$0xff] %v17589_v43  ;;  %v17595_v61 = vadd.f32 %v8484_v4, %v8324_v41  ;;  %v8326_v42 = vadd.f32 %v8325_v36, %v17400_v32  ;;  %9116 = vmatprep.mubr.bf16.mxu0 %v17402_v37 }
 0x517   :  { %v8486_v10 = vpop.f32.mrf.mxu0  ;;  %v8327_v14 = vpop.f32.mrf.mxu1 }
 0x518   :  { %19295 = vst [vmem:[#allocation126_spill] sm:$0xff] %v17595_v61  ;;  %v17600_v3 = vadd.f32 %v8486_v10, %v8326_v42  ;;  %v8328_v20 = vadd.f32 %v8327_v14, %v17390_v22  ;;  %v19299_v42 = vld [vmem:[#allocation134_spill] sm:$0xff] }
 0x519   :  { %v8488_v8 = vpop.f32.mrf.mxu0  ;;  %v8329_v60 = vpop.f32.mrf.mxu1 }
 0x51a   :  { %v17603_v43 = vadd.f32 %v8488_v8, %v8328_v20  ;;  %v8330_v41 = vadd.f32 %v8329_v60, %v17400_v32  ;;  %v12670_v60 = vpop.eup %12669 }
 0x51b   :  { %v8490_v4 = vpop.f32.mrf.mxu0  ;;  %v8333_v36 = vpop.f32.mrf.mxu1  ;;  %8956 = vmatmul.mubr.bf16.gmra.mxu1 %v19297_v52 }
 0x51c   :  { %19296 = vst [vmem:[#allocation162_spill] sm:$0xff] %v17603_v43  ;;  %v17607_v37 = vadd.f32 %v8490_v4, %v8330_v41  ;;  %v8334_v61 = vadd.f32 %v8333_v36, %v17390_v22  ;;  %8965 = vmatprep.mubr.bf16.mxu1 %v19299_v42  ;;  %v12672_v4 = vpop.eup %12671 }
 0x51d   :  { %v8494_v10 = vpop.f32.mrf.mxu0  ;;  %9117 = vmatmul.mubr.bf16.gmra.mxu0 %v17393_v12  ;;  %v8335_v29 = vpop.f32.mrf.mxu1 }
 0x51e   :  { %19298 = vst [vmem:[#allocation163_spill] sm:$0xff] %v17607_v37  ;;  %v17612_v14 = vadd.f32 %v8494_v10, %v8334_v61  ;;  %v8336_v8 = vadd.f32 %v8335_v29, %v17400_v32  ;;  %9126 = vmatprep.mubr.bf16.mxu0 %v17433_v2  ;;  %v5793_v61 = vadd.f32 1.0, %v12670_v60  ;;  %v19303_v29 = vld [vmem:[#allocation132_spill] sm:$0xff]  ;;  %v4893_v2 = vmul.f32 0.5, %v19286_v25 }
 0x51f   :  { %v8496_v26 = vpop.f32.mrf.mxu0  ;;  %v8337_v20 = vpop.f32.mrf.mxu1 }
 0x520   :  { %19300 = vst [vmem:[#allocation164_spill] sm:$0xff] %v17612_v14  ;;  %v17616_v52 = vadd.f32 %v8496_v26, %v8336_v8  ;;  %v8338_v41 = vadd.f32 %v8337_v20, %v17390_v22  ;;  %v19305_v26 = vld [vmem:[#allocation136_spill] sm:$0xff]  ;;  %v5795_v20 = vadd.f32 1.0, %v12672_v4  ;;  %v6093_v25 = vmul.f32 %v5793_v61, %v4893_v2 }
 0x521   :  { %v8498_v36 = vpop.f32.mrf.mxu0  ;;  %v8339_v42 = vpop.f32.mrf.mxu1 }
 0x522   :  { %19301 = vst [vmem:[#allocation165_spill] sm:$0xff] %v17616_v52  ;;  %v17619_v37 = vadd.f32 %v8498_v36, %v8338_v41  ;;  %v8340_v12 = vadd.f32 %v8339_v42, %v17400_v32  ;;  %v12674_v36 = vpop.eup %12673  ;;  %v4895_v42 = vmul.f32 0.5, %v17387_v39  ;;  %v4892_v39 = vmul.f32 0.5, %v19293_v50 }
 0x523   :  { %v8500_v10 = vpop.f32.mrf.mxu0  ;;  %v8343_v14 = vpop.f32.mrf.mxu1  ;;  %8966 = vmatmul.mubr.bf16.gmra.mxu1 %v19303_v29 }
 0x524   :  { %19302 = vst [vmem:[#allocation166_spill] sm:$0xff] %v17619_v37  ;;  %v17624_v43 = vadd.f32 %v8500_v10, %v8340_v12  ;;  %v8344_v8 = vadd.f32 %v8343_v14, %v17390_v22  ;;  %8975 = vmatprep.mubr.bf16.mxu1 %v19305_v26  ;;  %v12676_v22 = vpop.eup %12675  ;;  %v6095_v4 = vmul.f32 %v5795_v20, %v4895_v42  ;;  %v5792_v26 = vadd.f32 1.0, %v12674_v36 }
 0x525   :  { %v8504_v52 = vpop.f32.mrf.mxu0  ;;  %9127 = vmatmul.mubr.bf16.gmra.mxu0 %v17420_v48  ;;  %v8345_v41 = vpop.f32.mrf.mxu1  ;;  %v17636_v37 = vpack.c.bf16 %v6093_v25, %v6093_v25  ;;  %v4894_v20 = vmul.f32 0.5, %v17382_v45 }
 0x526   :  { %19304 = vst [vmem:[#allocation167_spill] sm:$0xff] %v17624_v43  ;;  %v17630_v60 = vadd.f32 %v8504_v52, %v8344_v8  ;;  %v8346_v29 = vadd.f32 %v8345_v41, %v17400_v32  ;;  %9136 = vmatprep.mubr.bf16.mxu0 %v17457_v15  ;;  %v5794_v52 = vadd.f32 1.0, %v12676_v22  ;;  %v19308_v32 = vld [vmem:[#allocation135_spill] sm:$0xff]  ;;  %v17642_v61 = vpack.c.bf16 %v6095_v4, %v6095_v4 }
 0x527   :  { %v8506_v12 = vpop.f32.mrf.mxu0  ;;  %v8347_v10 = vpop.f32.mrf.mxu1  ;;  %19307 = vst [vmem:[#allocation169_spill] sm:$0xff] %v17636_v37 }
 0x528   :  { %19306 = vst [vmem:[#allocation168_spill] sm:$0xff] %v17630_v60  ;;  %v17634_v14 = vadd.f32 %v8506_v12, %v8346_v29  ;;  %19309 = vst [vmem:[#allocation170_spill] sm:$0xff] %v17642_v61  ;;  %v6092_v29 = vmul.f32 %v5792_v26, %v4892_v39  ;;  %v6094_v36 = vmul.f32 %v5794_v52, %v4894_v20 }
 0x529   :  { %v8508_v43 = vpop.f32.mrf.mxu0  ;;  %v8348_v48 = vpop.f32.mrf.mxu1 }
 0x52a   :  { %v17653_v26 = vpack.c.bf16 %v6092_v29, %v6092_v29  ;;  %v17658_v4 = vpack.c.bf16 %v6094_v36, %v6094_v36 }
 0x52b   :  { %v8509_v8 = vpop.f32.mrf.mxu0  ;;  %v8545_v60 = vpop.f32.mrf.mxu1  ;;  %8976 = vmatmul.mubr.bf16.gmra.mxu1 %v19308_v32 }
 0x52c   :  { %v8546_v2 = vadd.f32 %v8545_v60, %v17414_v18  ;;  %8985 = vmatprep.mubr.bf16.mxu1 %v17636_v37  ;;  %19310 = vst [vmem:[#allocation171_spill] sm:$0xff] %v17653_v26  ;;  %19311 = vst [vmem:[#allocation172_spill] sm:$0xff] %v17658_v4 }
 0x52d   :  { %v8706_v43 = vpop.f32.mrf.mxu0  ;;  %9137 = vmatmul.mubr.bf16.gmra.mxu0 %v17451_v53  ;;  %v8547_v48 = vpop.f32.mrf.mxu1 }
 0x52e   :  { %v17646_v41 = vadd.f32 %v8706_v43, %v8546_v2  ;;  %v8548_v50 = vadd.f32 %v8547_v48, %v17422_v44  ;;  %9146 = vmatprep.mubr.bf16.mxu0 %v17642_v61  ;;  %v19312_v2 = vld [vmem:[#allocation31_spill] sm:$0xff]  ;;  %v19313_v43 = vld [vmem:[#allocation86_spill] sm:$0xff] }
 0x52f   :  { %v8708_v42 = vpop.f32.mrf.mxu0  ;;  %v8549_v18 = vpop.f32.mrf.mxu1 }
 0x530   :  { %v17650_v60 = vadd.f32 %v8708_v42, %v8548_v50  ;;  %v8550_v25 = vadd.f32 %v8549_v18, %v17427_v0  ;;  %v11964_v18 = vld [vmem:[#allocation2 + $0x3b0] ss:$12 sps:$4 sm:$0xff]  }
 0x531   :  { %v8710_v45 = vpop.f32.mrf.mxu0  ;;  %v8551_v12 = vpop.f32.mrf.mxu1 }
 0x532   :  { %v17655_v10 = vadd.f32 %v8710_v45, %v8550_v25  ;;  %v8552_v22 = vadd.f32 %v8551_v12, %v17435_v56  ;;  %v11965_v45 = vld [vmem:[#allocation2 + $0x458] ss:$12 sps:$4 sm:$0xff]  }
 0x533   :  { %v8712_v44 = vpop.f32.mrf.mxu0  ;;  %v8555_v39 = vpop.f32.mrf.mxu1  ;;  %8986 = vmatmul.mubr.bf16.gmra.mxu1 %v17653_v26  ;;  %v19362_v26 = vld [vmem:[#allocation28_spill] sm:$0xff] }
 0x534   :  { %v17661_v52 = vadd.f32 %v8712_v44, %v8552_v22  ;;  %v8556_v8 = vadd.f32 %v8555_v39, %v17443_v24  ;;  %9187 = vmatprep.mubr.bf16.mxu1 %v19312_v2  ;;  %v11970_v44 = vld [vmem:[#allocation2 + $0x530] ss:$12 sps:$4 sm:$0xff]   ;;  %v11973_v2 = vld [vmem:[#allocation2 + $0x5d8] ss:$12 sps:$4 sm:$0xff]  }
 0x535   :  { %v8716_v0 = vpop.f32.mrf.mxu0  ;;  %9147 = vmatmul.mubr.bf16.gmra.mxu0 %v17658_v4  ;;  %v8557_v29 = vpop.f32.mrf.mxu1 }
 0x536   :  { %v17666_v20 = vadd.f32 %v8716_v0, %v8556_v8  ;;  %v8558_v56 = vadd.f32 %v8557_v29, %v17448_v54  ;;  %9323 = vmatprep.mubr.bf16.mxu0 %v19313_v43  ;;  %v19314_v54 = vld [vmem:[#allocation33_spill] sm:$0xff] }
 0x537   :  { %v8718_v48 = vpop.f32.mrf.mxu0  ;;  %v8559_v50 = vpop.f32.mrf.mxu1 }
 0x538   :  { %v17670_v36 = vadd.f32 %v8718_v48, %v8558_v56  ;;  %v8560_v42 = vadd.f32 %v8559_v50, %v17453_v28  ;;  %v19315_v28 = vld [vmem:[#allocation109_spill] sm:$0xff] }
 0x539   :  { %v8720_v24 = vpop.f32.mrf.mxu0  ;;  %v8561_v25 = vpop.f32.mrf.mxu1  ;;  %v11966_v56 = vld [vmem:[#allocation2 + $0x398] ss:$12 sps:$4 sm:$0xff]  }
 0x53a   :  { %v17673_v12 = vadd.f32 %v8720_v24, %v8560_v42  ;;  %v8562_v22 = vadd.f32 %v8561_v25, %v17459_v38  ;;  %v19316_v48 = vld [vmem:[#allocation85_spill] sm:$0xff]  ;;  %v19317_v25 = vld [vmem:[#allocation24_spill] sm:$0xff] }
 0x53b   :  { %v8722_v39 = vpop.f32.mrf.mxu0  ;;  %v8565_v8 = vpop.f32.mrf.mxu1  ;;  %9188 = vmatmul.mubr.bf16.vlgmr.msra.gmra.mxu1 %v19314_v54  ;;  %v11967_v38 = vld [vmem:[#allocation2 + $0x440] ss:$12 sps:$4 sm:$0xff]  }
 0x53c   :  { %v17677_v0 = vadd.f32 %v8722_v39, %v8562_v22  ;;  %v8566_v29 = vadd.f32 %v8565_v8, %v17464_v47  ;;  %10816 = vmatpush3.bf16.msra.mxu1 %v11964_v18  ;;  %9195 = vmatprep.mubr.bf16.mxu1 %v19315_v28  ;;  %v11974_v22 = vld [vmem:[#allocation2 + $0x518] ss:$12 sps:$4 sm:$0xff]   ;;  %v11977_v18 = vld [vmem:[#allocation2 + $0x5c0] ss:$12 sps:$4 sm:$0xff]  }
 0x53d   :  { %v8726_v43 = vpop.f32.mrf.mxu0  ;;  %9324 = vmatmul.mubr.bf16.vlgmr.msra.gmra.mxu0 %v19316_v48  ;;  %v8567_v50 = vpop.f32.mrf.mxu1  ;;  %10817 = vmatprep.subr.bf16.mxu1 %v11965_v45  ;;  %v11968_v28 = vld [vmem:[#allocation2 + $0x380] ss:$12 sps:$4 sm:$0xff]  }
 0x53e   :  { %v17682_v42 = vadd.f32 %v8726_v43, %v8566_v29  ;;  %v8568_v24 = vadd.f32 %v8567_v50, %v17468_v30  ;;  %9331 = vmatprep.mubr.bf16.mxu0 %v19317_v25  ;;  %10910 = vmatpush3.bf16.msra.mxu0 %v11970_v44  ;;  %v11971_v29 = vld [vmem:[#allocation2 + $0x428] ss:$12 sps:$4 sm:$0xff]   ;;  %v11978_v44 = vld [vmem:[#allocation2 + $0x500] ss:$12 sps:$4 sm:$0xff]  }
 0x53f   :  { %v8728_v39 = vpop.f32.mrf.mxu0  ;;  %v8569_v47 = vpop.f32.mrf.mxu1  ;;  %10911 = vmatprep.subr.bf16.mxu0 %v11973_v2  ;;  %v19318_v2 = vld [vmem:[#allocation36_spill] sm:$0xff] }
 0x540   :  { %v17686_v8 = vadd.f32 %v8728_v39, %v8568_v24  ;;  %v8570_v54 = vadd.f32 %v8569_v47, %v17471_v21  ;;  %10818 = vmatpush3.bf16.msra.mxu1 %v11966_v56  ;;  %v11981_v24 = vld [vmem:[#allocation2 + $0x5a8] ss:$12 sps:$4 sm:$0xff]  }
 0x541   :  { %v8730_v45 = vpop.f32.mrf.mxu0  ;;  %v8571_v48 = vpop.f32.mrf.mxu1  ;;  %10819 = vmatprep.subr.bf16.mxu1 %v11967_v38  ;;  %v19319_v56 = vld [vmem:[#allocation59_spill] sm:$0xff] }
 0x542   :  { %v17689_v43 = vadd.f32 %v8730_v45, %v8570_v54  ;;  %v8572_v30 = vadd.f32 %v8571_v48, %v17475_v34  ;;  %10912 = vmatpush3.bf16.msra.mxu0 %v11974_v22  ;;  %v11972_v38 = vld [vmem:[#allocation2 + $0x368] ss:$12 sps:$4 sm:$0xff]   ;;  %v11975_v22 = vld [vmem:[#allocation2 + $0x410] ss:$12 sps:$4 sm:$0xff]  }
 0x543   :  { %v8732_v50 = vpop.f32.mrf.mxu0  ;;  %v8575_v25 = vpop.f32.mrf.mxu1  ;;  %9196 = vmatmul.mubr.bf16.gmra.mxu1 %v19318_v2  ;;  %10913 = vmatprep.subr.bf16.mxu0 %v11977_v18  ;;  %v19320_v54 = vld [vmem:[#allocation87_spill] sm:$0xff] }
 0x544   :  { %v17693_v39 = vadd.f32 %v8732_v50, %v8572_v30  ;;  %v8576_v21 = vadd.f32 %v8575_v25, %v17480_v7  ;;  %9203 = vmatprep.mubr.bf16.mxu1 %v19319_v56  ;;  %10820 = vmatpush3.bf16.msra.mxu1 %v11968_v28  ;;  %v19321_v18 = vld [vmem:[#allocation23_spill] sm:$0xff] }
 0x545   :  { %v8736_v47 = vpop.f32.mrf.mxu0  ;;  %9332 = vmatmul.mubr.bf16.gmra.mxu0 %v19320_v54  ;;  %v8577_v34 = vpop.f32.mrf.mxu1  ;;  %10821 = vmatprep.subr.bf16.mxu1 %v11971_v29  ;;  %v11982_v30 = vld [vmem:[#allocation2 + $0x4e8] ss:$12 sps:$4 sm:$0xff]   ;;  %v11985_v25 = vld [vmem:[#allocation2 + $0x590] ss:$12 sps:$4 sm:$0xff]  }
 0x546   :  { %v17698_v45 = vadd.f32 %v8736_v47, %v8576_v21  ;;  %v8578_v48 = vadd.f32 %v8577_v34, %v17484_v33  ;;  %9339 = vmatprep.mubr.bf16.mxu0 %v19321_v18  ;;  %10914 = vmatpush3.bf16.msra.mxu0 %v11978_v44  ;;  %v11976_v56 = vld [vmem:[#allocation2 + $0x350] ss:$12 sps:$4 sm:$0xff]   ;;  %v11979_v21 = vld [vmem:[#allocation2 + $0x3f8] ss:$12 sps:$4 sm:$0xff]  }
 0x547   :  { %v8738_v50 = vpop.f32.mrf.mxu0  ;;  %v8579_v7 = vpop.f32.mrf.mxu1  ;;  %10915 = vmatprep.subr.bf16.mxu0 %v11981_v24  ;;  %v11986_v44 = vld [vmem:[#allocation2 + $0x4d0] ss:$12 sps:$4 sm:$0xff]   ;;  %v19322_v24 = vld [vmem:[#allocation46_spill] sm:$0xff] }
 0x548   :  { %v17702_v28 = vadd.f32 %v8738_v50, %v8578_v48  ;;  %v8580_v2 = vadd.f32 %v8579_v7, %v17487_v1  ;;  %10822 = vmatpush3.bf16.msra.mxu1 %v11972_v38  ;;  %v11989_v48 = vld [vmem:[#allocation2 + $0x578] ss:$12 sps:$4 sm:$0xff]  }
 0x549   :  { %v8740_v29 = vpop.f32.mrf.mxu0  ;;  %v8581_v54 = vpop.f32.mrf.mxu1  ;;  %10823 = vmatprep.subr.bf16.mxu1 %v11975_v22  ;;  %v19323_v38 = vld [vmem:[#allocation40_spill] sm:$0xff] }
 0x54a   :  { %v17705_v47 = vadd.f32 %v8740_v29, %v8580_v2  ;;  %v8582_v33 = vadd.f32 %v8581_v54, %v17491_v19  ;;  %10916 = vmatpush3.bf16.msra.mxu0 %v11982_v30  ;;  %v11980_v22 = vld [vmem:[#allocation2 + $0x338] ss:$12 sps:$4 sm:$0xff]   ;;  %v19324_v2 = vld [vmem:[#allocation22_spill] sm:$0xff] }
 0x54b   :  { %v8742_v34 = vpop.f32.mrf.mxu0  ;;  %v8585_v18 = vpop.f32.mrf.mxu1  ;;  %9204 = vmatmul.mubr.bf16.gmra.mxu1 %v19322_v24  ;;  %10917 = vmatprep.subr.bf16.mxu0 %v11985_v25  ;;  %v11983_v30 = vld [vmem:[#allocation2 + $0x3e0] ss:$12 sps:$4 sm:$0xff]  }
 0x54c   :  { %v17709_v50 = vadd.f32 %v8742_v34, %v8582_v33  ;;  %v8586_v1 = vadd.f32 %v8585_v18, %v17496_v31  ;;  %9211 = vmatprep.mubr.bf16.mxu1 %v19323_v38  ;;  %10824 = vmatpush3.bf16.msra.mxu1 %v11976_v56  ;;  %v19325_v25 = vld [vmem:[#allocation89_spill] sm:$0xff] }
 0x54d   :  { %v8746_v7 = vpop.f32.mrf.mxu0  ;;  %9340 = vmatmul.mubr.bf16.gmra.mxu0 %v19324_v2  ;;  %v8587_v19 = vpop.f32.mrf.mxu1  ;;  %10825 = vmatprep.subr.bf16.mxu1 %v11979_v21  ;;  %v11990_v33 = vld [vmem:[#allocation2 + $0x4b8] ss:$12 sps:$4 sm:$0xff]   ;;  %v11991_v18 = vld [vmem:[#allocation2 + $0x560] ss:$12 sps:$4 sm:$0xff]  }
 0x54e   :  { %v17714_v29 = vadd.f32 %v8746_v7, %v8586_v1  ;;  %v8588_v54 = vadd.f32 %v8587_v19, %v17500_v46  ;;  %9347 = vmatprep.mubr.bf16.mxu0 %v19325_v25  ;;  %10918 = vmatpush3.bf16.msra.mxu0 %v11986_v44  ;;  %v11984_v38 = vld [vmem:[#allocation2 + $0x320] ss:$12 sps:$4 sm:$0xff]   ;;  %v11987_v1 = vld [vmem:[#allocation2 + $0x3c8] ss:$12 sps:$4 sm:$0xff]  }
 0x54f   :  { %v8748_v34 = vpop.f32.mrf.mxu0  ;;  %v8589_v31 = vpop.f32.mrf.mxu1  ;;  %10919 = vmatprep.subr.bf16.mxu0 %v11989_v48  ;;  %v11992_v44 = vld [vmem:[#allocation2 + $0x4a0] ss:$12 sps:$4 sm:$0xff]  }
 0x550   :  { %v17718_v56 = vadd.f32 %v8748_v34, %v8588_v54  ;;  %v8590_v24 = vadd.f32 %v8589_v31, %v17503_v16  ;;  %10826 = vmatpush3.bf16.msra.mxu1 %v11980_v22  ;;  %v19326_v48 = vld [vmem:[#allocation61_spill] sm:$0xff]  ;;  %v11993_v54 = vld [vmem:[#allocation2 + $0x548] ss:$12 sps:$4 sm:$0xff]  }
 0x551   :  { %v8750_v21 = vpop.f32.mrf.mxu0  ;;  %v8591_v2 = vpop.f32.mrf.mxu1  ;;  %10827 = vmatprep.subr.bf16.mxu1 %v11983_v30  ;;  %v19327_v22 = vld [vmem:[#allocation63_spill] sm:$0xff] }
 0x552   :  { %v17721_v7 = vadd.f32 %v8750_v21, %v8590_v24  ;;  %v8592_v46 = vadd.f32 %v8591_v2, %v17507_v9  ;;  %10920 = vmatpush3.bf16.msra.mxu0 %v11990_v33  ;;  %v11988_v30 = vld [vmem:[#allocation2 + $0x308] ss:$12 sps:$4 sm:$0xff]   ;;  %v19328_v24 = vld [vmem:[#allocation88_spill] sm:$0xff] }
 0x553   :  { %v8752_v19 = vpop.f32.mrf.mxu0  ;;  %v8595_v25 = vpop.f32.mrf.mxu1  ;;  %9212 = vmatmul.mubr.bf16.gmra.mxu1 %v19326_v48  ;;  %10921 = vmatprep.subr.bf16.mxu0 %v11991_v18  ;;  %v11995_v33 = vld [vmem:[#allocation2 + $0x770] ss:$12 sps:$4 sm:$0xff]  }
 0x554   :  { %v17725_v34 = vadd.f32 %v8752_v19, %v8592_v46  ;;  %v8596_v16 = vadd.f32 %v8595_v25, %v17512_v55  ;;  %9219 = vmatprep.mubr.bf16.mxu1 %v19327_v22  ;;  %10828 = vmatpush3.bf16.msra.mxu1 %v11984_v38  ;;  %v19329_v18 = vld [vmem:[#allocation92_spill] sm:$0xff]  ;;  %v11994_v46 = vld [vmem:[#allocation2 + $0x488] ss:$12 sps:$4 sm:$0xff]  }
 0x555   :  { %v8756_v31 = vpop.f32.mrf.mxu0  ;;  %9348 = vmatmul.mubr.bf16.gmra.mxu0 %v19328_v24  ;;  %v8597_v9 = vpop.f32.mrf.mxu1  ;;  %10829 = vmatprep.subr.bf16.mxu1 %v11987_v1  ;;  %v17734_v25 = vld [vmem:[#allocation2 + $0x8f0] ss:$12 sps:$4 sm:$0xff]   ;;  %v19330_v24 = vld [vmem:[#allocation65_spill] sm:$0xff] }
 0x556   :  { %v17730_v21 = vadd.f32 %v8756_v31, %v8596_v16  ;;  %v8598_v2 = vadd.f32 %v8597_v9, %v17516_v58  ;;  %9355 = vmatprep.mubr.bf16.mxu0 %v19329_v18  ;;  %10922 = vmatpush3.bf16.msra.mxu0 %v11992_v44 }
 0x557   :  { %v8758_v19 = vpop.f32.mrf.mxu0  ;;  %v8599_v55 = vpop.f32.mrf.mxu1  ;;  %10923 = vmatprep.subr.bf16.mxu0 %v11993_v54 }
 0x558   :  { %v17736_v38 = vadd.f32 %v8758_v19, %v8598_v2  ;;  %v8600_v48 = vadd.f32 %v8599_v55, %v17519_v40  ;;  %10830 = vmatpush3.bf16.msra.mxu1 %v11988_v30  ;;  %v19331_v40 = vld [vmem:[#allocation14_spill] sm:$0xff] }
 0x559   :  { %v8760_v1 = vpop.f32.mrf.mxu0  ;;  %v8601_v22 = vpop.f32.mrf.mxu1  ;;  %11003 = vmatprep.subr.bf16.mxu1 %v11995_v33  ;;  %v19332_v2 = vld [vmem:[#allocation90_spill] sm:$0xff] }
 0x55a   :  { %v17739_v16 = vadd.f32 %v8760_v1, %v8600_v48  ;;  %v8602_v58 = vadd.f32 %v8601_v22, %v17523_v62  ;;  %10924 = vmatpush3.bf16.msra.mxu0 %v11994_v46  ;;  %v19333_v46 = vld [vmem:[#allocation93_spill] sm:$0xff] }
 0x55b   :  { %v8762_v44 = vpop.f32.mrf.mxu0  ;;  %v8605_v31 = vpop.f32.mrf.mxu1  ;;  %9220 = vmatmul.mubr.bf16.gmra.mxu1 %v19330_v24  ;;  %11097 = vmatprep.subr.bf16.mxu0 %v17734_v25 }
 0x55c   :  { %v17744_v54 = vadd.f32 %v8762_v44, %v8602_v58  ;;  %v8606_v9 = vadd.f32 %v8605_v31, %v17528_v6  ;;  %9227 = vmatprep.mubr.bf16.mxu1 %v19331_v40 }
 0x55d   :  { %v8766_v30 = vpop.f32.mrf.mxu0  ;;  %9356 = vmatmul.mubr.bf16.gmra.mxu0 %v19332_v2  ;;  %v8607_v33 = vpop.f32.mrf.mxu1 }
 0x55e   :  { %v17749_v18 = vadd.f32 %v8766_v30, %v8606_v9  ;;  %v8608_v62 = vadd.f32 %v8607_v33, %v17532_v13  ;;  %9363 = vmatprep.mubr.bf16.mxu0 %v19333_v46  ;;  %v19334_v9 = vld [vmem:[#allocation69_spill] sm:$0xff]  ;;  %v19335_v30 = vld [vmem:[#allocation71_spill] sm:$0xff] }
 0x55f   :  { %v8768_v19 = vpop.f32.mrf.mxu0  ;;  %v8609_v55 = vpop.f32.mrf.mxu1  ;;  %v19336_v33 = vld [vmem:[#allocation91_spill] sm:$0xff] }
 0x560   :  { %v17753_v48 = vadd.f32 %v8768_v19, %v8608_v62  ;;  %v8610_v1 = vadd.f32 %v8609_v55, %v17535_v35  ;;  %v19337_v19 = vld [vmem:[#allocation95_spill] sm:$0xff] }
 0x561   :  { %v8770_v22 = vpop.f32.mrf.mxu0  ;;  %v8611_v6 = vpop.f32.mrf.mxu1 }
 0x562   :  { %v17756_v58 = vadd.f32 %v8770_v22, %v8610_v1  ;;  %v8612_v44 = vadd.f32 %v8611_v6, %v17539_v27 }
 0x563   :  { %v8772_v31 = vpop.f32.mrf.mxu0  ;;  %v8615_v24 = vpop.f32.mrf.mxu1  ;;  %9228 = vmatmul.mubr.bf16.gmra.mxu1 %v19334_v9 }
 0x564   :  { %v17760_v40 = vadd.f32 %v8772_v31, %v8612_v44  ;;  %v8616_v13 = vadd.f32 %v8615_v24, %v17544_v59  ;;  %9235 = vmatprep.mubr.bf16.mxu1 %v19335_v30 }
 0x565   :  { %v8776_v2 = vpop.f32.mrf.mxu0  ;;  %9364 = vmatmul.mubr.bf16.gmra.mxu0 %v19336_v33  ;;  %v8617_v35 = vpop.f32.mrf.mxu1 }
 0x566   :  { %v17765_v62 = vadd.f32 %v8776_v2, %v8616_v13  ;;  %v8618_v46 = vadd.f32 %v8617_v35, %v17548_v17  ;;  %9371 = vmatprep.mubr.bf16.mxu0 %v19337_v19  ;;  %v19338_v13 = vld [vmem:[#allocation73_spill] sm:$0xff]  ;;  %v19339_v2 = vld [vmem:[#allocation74_spill] sm:$0xff] }
 0x567   :  { %v8778_v27 = vpop.f32.mrf.mxu0  ;;  %v8619_v55 = vpop.f32.mrf.mxu1  ;;  %v19340_v35 = vld [vmem:[#allocation94_spill] sm:$0xff] }
 0x568   :  { %v17769_v1 = vadd.f32 %v8778_v27, %v8618_v46  ;;  %v8620_v22 = vadd.f32 %v8619_v55, %v17551_v51  ;;  %v19341_v27 = vld [vmem:[#allocation27_spill] sm:$0xff] }
 0x569   :  { %v8780_v6 = vpop.f32.mrf.mxu0  ;;  %v8621_v59 = vpop.f32.mrf.mxu1 }
 0x56a   :  { %v17772_v44 = vadd.f32 %v8780_v6, %v8620_v22  ;;  %v8622_v31 = vadd.f32 %v8621_v59, %v17555_v5 }
 0x56b   :  { %v8782_v24 = vpop.f32.mrf.mxu0  ;;  %v8625_v9 = vpop.f32.mrf.mxu1  ;;  %9236 = vmatmul.mubr.bf16.gmra.mxu1 %v19338_v13 }
 0x56c   :  { %v17776_v30 = vadd.f32 %v8782_v24, %v8622_v31  ;;  %v8626_v17 = vadd.f32 %v8625_v9, %v17560_v57  ;;  %9243 = vmatprep.mubr.bf16.mxu1 %v19339_v2 }
 0x56d   :  { %v8786_v33 = vpop.f32.mrf.mxu0  ;;  %9372 = vmatmul.mubr.bf16.gmra.mxu0 %v19340_v35  ;;  %v8627_v51 = vpop.f32.mrf.mxu1  ;;  %v19344_v35 = vld [vmem:[#allocation13_spill] sm:$0xff] }
 0x56e   :  { %v17781_v46 = vadd.f32 %v8786_v33, %v8626_v17  ;;  %v8628_v19 = vadd.f32 %v8627_v51, %v17564_v63  ;;  %9379 = vmatprep.mubr.bf16.mxu0 %v19341_v27  ;;  %v19342_v17 = vld [vmem:[#allocation75_spill] sm:$0xff]  ;;  %v19343_v63 = vld [vmem:[#allocation128_spill] sm:$0xff] }
 0x56f   :  { %v8788_v5 = vpop.f32.mrf.mxu0  ;;  %v8629_v55 = vpop.f32.mrf.mxu1 }
 0x570   :  { %v17785_v22 = vadd.f32 %v8788_v5, %v8628_v19  ;;  %v8630_v6 = vadd.f32 %v8629_v55, %v17567_v11  ;;  %v19345_v19 = vld [vmem:[#allocation21_spill] sm:$0xff]  ;;  %v19346_v5 = vld [vmem:[#allocation160_spill] sm:$0xff] }
 0x571   :  { %v8790_v59 = vpop.f32.mrf.mxu0  ;;  %v8631_v57 = vpop.f32.mrf.mxu1 }
 0x572   :  { %v17788_v31 = vadd.f32 %v8790_v59, %v8630_v6  ;;  %v8632_v24 = vadd.f32 %v8631_v57, %v17571_v23  ;;  %v19347_v6 = vld [vmem:[#allocation26_spill] sm:$0xff] }
 0x573   :  { %v8792_v9 = vpop.f32.mrf.mxu0  ;;  %v8635_v13 = vpop.f32.mrf.mxu1  ;;  %9244 = vmatmul.mubr.bf16.gmra.mxu1 %v19342_v17 }
 0x574   :  { %v17792_v2 = vadd.f32 %v8792_v9, %v8632_v24  ;;  %v8636_v33 = vadd.f32 %v8635_v13, %v19343_v63  ;;  %9251 = vmatprep.mubr.bf16.mxu1 %v19344_v35  ;;  %v19348_v63 = vld [vmem:[#allocation161_spill] sm:$0xff] }
 0x575   :  { %v8796_v51 = vpop.f32.mrf.mxu0  ;;  %9380 = vmatmul.mubr.bf16.gmra.mxu0 %v19345_v19  ;;  %v8637_v11 = vpop.f32.mrf.mxu1 }
 0x576   :  { %v17797_v27 = vadd.f32 %v8796_v51, %v8636_v33  ;;  %v8638_v55 = vadd.f32 %v8637_v11, %v19346_v5  ;;  %9387 = vmatprep.mubr.bf16.mxu0 %v19347_v6  ;;  %v19349_v33 = vld [vmem:[#allocation76_spill] sm:$0xff]  ;;  %v19350_v11 = vld [vmem:[#allocation126_spill] sm:$0xff]  ;;  %v19351_v6 = vld [vmem:[#allocation117_spill] sm:$0xff] }
 0x577   :  { %v8798_v23 = vpop.f32.mrf.mxu0  ;;  %v8639_v59 = vpop.f32.mrf.mxu1 }
 0x578   :  { %v17801_v57 = vadd.f32 %v8798_v23, %v8638_v55  ;;  %v8640_v24 = vadd.f32 %v8639_v59, %v17585_v49  ;;  %v19352_v23 = vld [vmem:[#allocation96_spill] sm:$0xff] }
 0x579   :  { %v8800_v9 = vpop.f32.mrf.mxu0  ;;  %v8641_v13 = vpop.f32.mrf.mxu1 }
 0x57a   :  { %v17804_v17 = vadd.f32 %v8800_v9, %v8640_v24  ;;  %v8642_v35 = vadd.f32 %v8641_v13, %v19348_v63  ;;  %v19353_v9 = vld [vmem:[#allocation100_spill] sm:$0xff] }
 0x57b   :  { %v8802_v19 = vpop.f32.mrf.mxu0  ;;  %v8645_v4 = vpop.f32.mrf.mxu1  ;;  %9252 = vmatmul.mubr.bf16.gmra.mxu1 %v19349_v33 }
 0x57c   :  { %v17808_v51 = vadd.f32 %v8802_v19, %v8642_v35  ;;  %v8646_v5 = vadd.f32 %v8645_v4, %v19350_v11  ;;  %9259 = vmatprep.mubr.bf16.mxu1 %v19351_v6  ;;  %v19354_v35 = vld [vmem:[#allocation162_spill] sm:$0xff]  ;;  %v19355_v6 = vld [vmem:[#allocation163_spill] sm:$0xff] }
 0x57d   :  { %v8806_v55 = vpop.f32.mrf.mxu0  ;;  %9388 = vmatmul.mubr.bf16.gmra.mxu0 %v19352_v23  ;;  %v8647_v49 = vpop.f32.mrf.mxu1 }
 0x57e   :  { %v17813_v59 = vadd.f32 %v8806_v55, %v8646_v5  ;;  %v8648_v24 = vadd.f32 %v8647_v49, %v17600_v3  ;;  %9395 = vmatprep.mubr.bf16.mxu0 %v19353_v9  ;;  %v19356_v5 = vld [vmem:[#allocation77_spill] sm:$0xff]  ;;  %v19358_v3 = vld [vmem:[#allocation164_spill] sm:$0xff]  ;;  %v19359_v9 = vld [vmem:[#allocation118_spill] sm:$0xff] }
 0x57f   :  { %v8808_v13 = vpop.f32.mrf.mxu0  ;;  %v8649_v63 = vpop.f32.mrf.mxu1 }
 0x580   :  { %v17817_v61 = vadd.f32 %v8808_v13, %v8648_v24  ;;  %v8650_v19 = vadd.f32 %v8649_v63, %v19354_v35  ;;  %v19360_v13 = vld [vmem:[#allocation98_spill] sm:$0xff] }
 0x581   :  { %v8810_v33 = vpop.f32.mrf.mxu0  ;;  %v8651_v4 = vpop.f32.mrf.mxu1 }
 0x582   :  { %v17820_v11 = vadd.f32 %v8810_v33, %v8650_v19  ;;  %v8652_v53 = vadd.f32 %v8651_v4, %v19355_v6  ;;  %v19361_v19 = vld [vmem:[#allocation165_spill] sm:$0xff] }
 0x583   :  { %v8812_v23 = vpop.f32.mrf.mxu0  ;;  %v8655_v15 = vpop.f32.mrf.mxu1  ;;  %9260 = vmatmul.mubr.bf16.gmra.mxu1 %v19356_v5 }
 0x584   :  { %v17824_v55 = vadd.f32 %v8812_v23, %v8652_v53  ;;  %v8656_v49 = vadd.f32 %v8655_v15, %v19358_v3  ;;  %9267 = vmatprep.mubr.bf16.mxu1 %v19359_v9  ;;  %v19363_v53 = vld [vmem:[#allocation166_spill] sm:$0xff]  ;;  %v19365_v9 = vld [vmem:[#allocation167_spill] sm:$0xff] }
 0x585   :  { %v8816_v24 = vpop.f32.mrf.mxu0  ;;  %9396 = vmatmul.mubr.bf16.gmra.mxu0 %v19360_v13  ;;  %v8657_v63 = vpop.f32.mrf.mxu1 }
 0x586   :  { %19357 = vst [vmem:[#allocation31_spill] sm:$0xff] %v17824_v55  ;;  %v17829_v35 = vadd.f32 %v8816_v24, %v8656_v49  ;;  %v8658_v33 = vadd.f32 %v8657_v63, %v19361_v19  ;;  %9403 = vmatprep.mubr.bf16.mxu0 %v19362_v26  ;;  %v19366_v49 = vld [vmem:[#allocation78_spill] sm:$0xff]  ;;  %v19367_v63 = vld [vmem:[#allocation168_spill] sm:$0xff] }
 0x587   :  { %v8818_v4 = vpop.f32.mrf.mxu0  ;;  %v8659_v6 = vpop.f32.mrf.mxu1  ;;  %v19368_v19 = vld [vmem:[#allocation84_spill] sm:$0xff] }
 0x588   :  { %v17833_v37 = vadd.f32 %v8818_v4, %v8658_v33  ;;  %v8660_v23 = vadd.f32 %v8659_v6, %v19363_v53  ;;  %v19369_v4 = vld [vmem:[#allocation30_spill] sm:$0xff] }
 0x589   :  { %v8820_v5 = vpop.f32.mrf.mxu0  ;;  %v8661_v15 = vpop.f32.mrf.mxu1 }
 0x58a   :  { %v17836_v3 = vadd.f32 %v8820_v5, %v8660_v23  ;;  %v8662_v32 = vadd.f32 %v8661_v15, %v19365_v9  ;;  %v19370_v5 = vld [vmem:[#allocation29_spill] sm:$0xff] }
 0x58b   :  { %v8822_v13 = vpop.f32.mrf.mxu0  ;;  %v8665_v55 = vpop.f32.mrf.mxu1  ;;  %9268 = vmatmul.mubr.bf16.gmra.mxu1 %v19366_v49 }
 0x58c   :  { %19364 = vst [vmem:[#allocation86_spill] sm:$0xff] %v17836_v3  ;;  %v17840_v24 = vadd.f32 %v8822_v13, %v8662_v32  ;;  %v8666_v26 = vadd.f32 %v8665_v55, %v19367_v63  ;;  %9275 = vmatprep.mubr.bf16.mxu1 %v19368_v19  ;;  %v19371_v63 = vld [vmem:[#allocation83_spill] sm:$0xff] }
 0x58d   :  { %v8826_v33 = vpop.f32.mrf.mxu0  ;;  %9404 = vmatmul.mubr.bf16.gmra.mxu0 %v19369_v4  ;;  %v8667_v6 = vpop.f32.mrf.mxu1  ;;  %v19372_v4 = vld [vmem:[#allocation129_spill] sm:$0xff] }
 0x58e   :  { %v17845_v53 = vadd.f32 %v8826_v33, %v8666_v26  ;;  %v8668_v23 = vadd.f32 %v8667_v6, %v17634_v14  ;;  %9411 = vmatprep.mubr.bf16.mxu0 %v19370_v5  ;;  %v19373_v33 = vld [vmem:[#allocation25_spill] sm:$0xff] }
 0x58f   :  { %v8828_v15 = vpop.f32.mrf.mxu0  ;;  %v8669_v9 = vpop.f32.mrf.mxu1 }
 0x590   :  { %v17849_v3 = vadd.f32 %v8828_v15, %v8668_v23  ;;  %v19374_v9 = vld [vmem:[#allocation130_spill] sm:$0xff] }
 0x591   :  { %v8830_v32 = vpop.f32.mrf.mxu0  ;;  %v8670_v13 = vpop.f32.mrf.mxu1 }
 0x593   :  { %v8831_v49 = vpop.f32.mrf.mxu0  ;;  %v8867_v55 = vpop.f32.mrf.mxu1  ;;  %9276 = vmatmul.mubr.bf16.gmra.mxu1 %v19371_v63 }
 0x594   :  { %v8868_v19 = vadd.f32 %v8867_v55, %v17646_v41  ;;  %9283 = vmatprep.mubr.bf16.mxu1 %v19372_v4  ;;  %v19375_v4 = vld [vmem:[#allocation131_spill] sm:$0xff] }
 0x595   :  { %v9028_v26 = vpop.f32.mrf.mxu0  ;;  %9412 = vmatmul.mubr.bf16.gmra.mxu0 %v19373_v33  ;;  %v8869_v14 = vpop.f32.mrf.mxu1  ;;  %v19376_v33 = vld [vmem:[#allocation103_spill] sm:$0xff] }
 0x596   :  { %v9029_v6 = vadd.f32 %v9028_v26, %v8868_v19  ;;  %v8870_v5 = vadd.f32 %v8869_v14, %v17650_v60  ;;  %9419 = vmatprep.mubr.bf16.mxu0 %v19374_v9 }
 0x597   :  { %v9030_v23 = vpop.f32.mrf.mxu0  ;;  %v8871_v15 = vpop.f32.mrf.mxu1 }
 0x598   :  { %9971 = vst [vmem:[%s18485_s7] sm:$0xff] %v9029_v6  ;;  %v9031_v32 = vadd.f32 %v9030_v23, %v8870_v5  ;;  %v8872_v41 = vadd.f32 %v8871_v15, %v17655_v10  ;;  %v19377_v6 = vld [vmem:[#allocation133_spill] sm:$0xff]  ;;  %v19378_v23 = vld [vmem:[#allocation48_spill] sm:$0xff] }
 0x599   :  { %v9032_v13 = vpop.f32.mrf.mxu0  ;;  %v8873_v49 = vpop.f32.mrf.mxu1 }
 0x59a   :  { %9972 = vst [vmem:[%s18485_s7 + $0x8] sm:$0xff] %v9031_v32  ;;  %v9033_v55 = vadd.f32 %v9032_v13, %v8872_v41  ;;  %v8874_v60 = vadd.f32 %v8873_v49, %v17661_v52  ;;  %v11996_v13 = vld [vmem:[#allocation2 + $0x6b0] ss:$12 sps:$4 sm:$0xff]  }
 0x59b   :  { %v9034_v63 = vpop.f32.mrf.mxu0  ;;  %v8877_v19 = vpop.f32.mrf.mxu1  ;;  %9284 = vmatmul.mubr.bf16.gmra.mxu1 %v19375_v4 }
 0x59c   :  { %9974 = vst [vmem:[%s18485_s7 + $0x18] sm:$0xff] %v9033_v55  ;;  %v9035_v26 = vadd.f32 %v9034_v63, %v8874_v60  ;;  %v8878_v10 = vadd.f32 %v8877_v19, %v17666_v20  ;;  %9459 = vmatprep.mubr.bf16.mxu1 %v19376_v33  ;;  %v11997_v60 = vld [vmem:[#allocation2 + $0x758] ss:$12 sps:$4 sm:$0xff]   ;;  %v17885_v19 = vld [vmem:[#allocation2 + $0x830] ss:$12 sps:$4 sm:$0xff]  }
 0x59d   :  { %v9038_v14 = vpop.f32.mrf.mxu0  ;;  %9420 = vmatmul.mubr.bf16.gmra.mxu0 %v19377_v6  ;;  %v8879_v5 = vpop.f32.mrf.mxu1  ;;  %v17888_v33 = vld [vmem:[#allocation2 + $0x8d8] ss:$12 sps:$4 sm:$0xff]   ;;  %v19380_v6 = vld [vmem:[#allocation35_spill] sm:$0xff] }
 0x59e   :  { %9975 = vst [vmem:[%s18485_s7 + $0x20] sm:$0xff] %v9035_v26  ;;  %v9039_v52 = vadd.f32 %v9038_v14, %v8878_v10  ;;  %v8880_v9 = vadd.f32 %v8879_v5, %v17670_v36  ;;  %9595 = vmatprep.mubr.bf16.mxu0 %v19378_v23  ;;  %v19379_v10 = vld [vmem:[#allocation102_spill] sm:$0xff]  ;;  %v11998_v5 = vld [vmem:[#allocation2 + $0x698] ss:$12 sps:$4 sm:$0xff]  }
 0x59f   :  { %v9040_v15 = vpop.f32.mrf.mxu0  ;;  %v8881_v32 = vpop.f32.mrf.mxu1  ;;  %v11999_v23 = vld [vmem:[#allocation2 + $0x740] ss:$12 sps:$4 sm:$0xff]  }
 0x5a0   :  { %9977 = vst [vmem:[%s18485_s7 + $0x30] sm:$0xff] %v9039_v52  ;;  %v9041_v20 = vadd.f32 %v9040_v15, %v8880_v9  ;;  %v8882_v41 = vadd.f32 %v8881_v32, %v17673_v12  ;;  %v19381_v52 = vld [vmem:[#allocation49_spill] sm:$0xff] }
 0x5a1   :  { %v9042_v49 = vpop.f32.mrf.mxu0  ;;  %v8883_v55 = vpop.f32.mrf.mxu1 }
 0x5a2   :  { %9978 = vst [vmem:[%s18485_s7 + $0x38] sm:$0xff] %v9041_v20  ;;  %v9043_v36 = vadd.f32 %v9042_v49, %v8882_v41  ;;  %v8884_v63 = vadd.f32 %v8883_v55, %v17677_v0  ;;  %v19382_v20 = vld [vmem:[#allocation52_spill] sm:$0xff]  ;;  %v17905_v49 = vld [vmem:[#allocation2 + $0x8c0] ss:$12 sps:$4 sm:$0xff]  }
 0x5a3   :  { %v9044_v4 = vpop.f32.mrf.mxu0  ;;  %v8887_v26 = vpop.f32.mrf.mxu1  ;;  %9460 = vmatmul.mubr.bf16.vlgmr.msra.gmra.mxu1 %v19379_v10 }
 0x5a4   :  { %9980 = vst [vmem:[%s18485_s7 + $0x48] sm:$0xff] %v9043_v36  ;;  %v9045_v12 = vadd.f32 %v9044_v4, %v8884_v63  ;;  %v8888_v14 = vadd.f32 %v8887_v26, %v17682_v42  ;;  %11004 = vmatpush3.bf16.msra.mxu1 %v11996_v13  ;;  %9467 = vmatprep.mubr.bf16.mxu1 %v19380_v6  ;;  %v17902_v42 = vld [vmem:[#allocation2 + $0x818] ss:$12 sps:$4 sm:$0xff]   ;;  %v12003_v4 = vld [vmem:[#allocation2 + $0x728] ss:$12 sps:$4 sm:$0xff]  }
 0x5a5   :  { %v9048_v0 = vpop.f32.mrf.mxu0  ;;  %9596 = vmatmul.mubr.bf16.vlgmr.msra.gmra.mxu0 %v19381_v52  ;;  %v8889_v9 = vpop.f32.mrf.mxu1  ;;  %11005 = vmatprep.subr.bf16.mxu1 %v11997_v60 }
 0x5a6   :  { %9981 = vst [vmem:[%s18485_s7 + $0x50] sm:$0xff] %v9045_v12  ;;  %v9049_v15 = vadd.f32 %v9048_v0, %v8888_v14  ;;  %v8890_v32 = vadd.f32 %v8889_v9, %v17686_v8  ;;  %9603 = vmatprep.mubr.bf16.mxu0 %v19382_v20  ;;  %11098 = vmatpush3.bf16.msra.mxu0 %v17885_v19  ;;  %v12000_v8 = vld [vmem:[#allocation2 + $0x680] ss:$12 sps:$4 sm:$0xff]   ;;  %v12004_v9 = vld [vmem:[#allocation2 + $0x668] ss:$12 sps:$4 sm:$0xff]  }
 0x5a7   :  { %v9050_v41 = vpop.f32.mrf.mxu0  ;;  %v8891_v13 = vpop.f32.mrf.mxu1  ;;  %11099 = vmatprep.subr.bf16.mxu0 %v17888_v33  ;;  %v17916_v12 = vld [vmem:[#allocation2 + $0x800] ss:$12 sps:$4 sm:$0xff]   ;;  %v12007_v20 = vld [vmem:[#allocation2 + $0x710] ss:$12 sps:$4 sm:$0xff]  }
 0x5a8   :  { %9983 = vst [vmem:[%s18485_s7 + $0x60] sm:$0xff] %v9049_v15  ;;  %v9051_v55 = vadd.f32 %v9050_v41, %v8890_v32  ;;  %v8892_v60 = vadd.f32 %v8891_v13, %v17689_v43  ;;  %11006 = vmatpush3.bf16.msra.mxu1 %v11998_v5  ;;  %v19383_v43 = vld [vmem:[#allocation37_spill] sm:$0xff]  ;;  %v17920_v5 = vld [vmem:[#allocation2 + $0x8a8] ss:$12 sps:$4 sm:$0xff]  }
 0x5a9   :  { %v9052_v36 = vpop.f32.mrf.mxu0  ;;  %v8893_v63 = vpop.f32.mrf.mxu1  ;;  %11007 = vmatprep.subr.bf16.mxu1 %v11999_v23  ;;  %v19385_v15 = vld [vmem:[#allocation62_spill] sm:$0xff] }
 0x5aa   :  { %9984 = vst [vmem:[%s18485_s7 + $0x68] sm:$0xff] %v9051_v55  ;;  %v9053_v26 = vadd.f32 %v9052_v36, %v8892_v60  ;;  %v8894_v10 = vadd.f32 %v8893_v63, %v17693_v39  ;;  %11100 = vmatpush3.bf16.msra.mxu0 %v17902_v42  ;;  %v19384_v39 = vld [vmem:[#allocation105_spill] sm:$0xff]  ;;  %v19386_v55 = vld [vmem:[#allocation51_spill] sm:$0xff] }
 0x5ab   :  { %v9054_v14 = vpop.f32.mrf.mxu0  ;;  %v8897_v6 = vpop.f32.mrf.mxu1  ;;  %9468 = vmatmul.mubr.bf16.gmra.mxu1 %v19383_v43  ;;  %11101 = vmatprep.subr.bf16.mxu0 %v17905_v49  ;;  %v17937_v36 = vld [vmem:[#allocation2 + $0x890] ss:$12 sps:$4 sm:$0xff]  }
 0x5ac   :  { %9986 = vst [vmem:[%s18485_s7 + $0x78] sm:$0xff] %v9053_v26  ;;  %v9055_v0 = vadd.f32 %v9054_v14, %v8894_v10  ;;  %v8898_v52 = vadd.f32 %v8897_v6, %v17698_v45  ;;  %9475 = vmatprep.mubr.bf16.mxu1 %v19384_v39  ;;  %11008 = vmatpush3.bf16.msra.mxu1 %v12000_v8  ;;  %v17934_v45 = vld [vmem:[#allocation2 + $0x7e8] ss:$12 sps:$4 sm:$0xff]   ;;  %v12011_v14 = vld [vmem:[#allocation2 + $0x6f8] ss:$12 sps:$4 sm:$0xff]  }
 0x5ad   :  { %v9058_v23 = vpop.f32.mrf.mxu0  ;;  %9604 = vmatmul.mubr.bf16.gmra.mxu0 %v19385_v15  ;;  %v8899_v32 = vpop.f32.mrf.mxu1  ;;  %11009 = vmatprep.subr.bf16.mxu1 %v12003_v4 }
 0x5ae   :  { %9987 = vst [vmem:[%s18485_s7 + $0x80] sm:$0xff] %v9055_v0  ;;  %v9059_v41 = vadd.f32 %v9058_v23, %v8898_v52  ;;  %v8900_v13 = vadd.f32 %v8899_v32, %v17702_v28  ;;  %9611 = vmatprep.mubr.bf16.mxu0 %v19386_v55  ;;  %11102 = vmatpush3.bf16.msra.mxu0 %v17916_v12  ;;  %v12008_v28 = vld [vmem:[#allocation2 + $0x650] ss:$12 sps:$4 sm:$0xff]   ;;  %v12012_v32 = vld [vmem:[#allocation2 + $0x638] ss:$12 sps:$4 sm:$0xff]  }
 0x5af   :  { %v9060_v60 = vpop.f32.mrf.mxu0  ;;  %v8901_v8 = vpop.f32.mrf.mxu1  ;;  %11103 = vmatprep.subr.bf16.mxu0 %v17920_v5  ;;  %v17948_v0 = vld [vmem:[#allocation2 + $0x7d0] ss:$12 sps:$4 sm:$0xff]   ;;  %v12015_v55 = vld [vmem:[#allocation2 + $0x6e0] ss:$12 sps:$4 sm:$0xff]  }
 0x5b0   :  { %9989 = vst [vmem:[%s18485_s7 + $0x90] sm:$0xff] %v9059_v41  ;;  %v9061_v63 = vadd.f32 %v9060_v60, %v8900_v13  ;;  %v8902_v4 = vadd.f32 %v8901_v8, %v17705_v47  ;;  %11010 = vmatpush3.bf16.msra.mxu1 %v12004_v9  ;;  %v19387_v47 = vld [vmem:[#allocation104_spill] sm:$0xff]  ;;  %v19389_v41 = vld [vmem:[#allocation53_spill] sm:$0xff] }
 0x5b1   :  { %v9062_v26 = vpop.f32.mrf.mxu0  ;;  %v8903_v10 = vpop.f32.mrf.mxu1  ;;  %11011 = vmatprep.subr.bf16.mxu1 %v12007_v20  ;;  %v17952_v9 = vld [vmem:[#allocation2 + $0x878] ss:$12 sps:$4 sm:$0xff]  }
 0x5b2   :  { %9990 = vst [vmem:[%s18485_s7 + $0x98] sm:$0xff] %v9061_v63  ;;  %v9063_v6 = vadd.f32 %v9062_v26, %v8902_v4  ;;  %v8904_v43 = vadd.f32 %v8903_v10, %v17709_v50  ;;  %11104 = vmatpush3.bf16.msra.mxu0 %v17934_v45  ;;  %v19388_v50 = vld [vmem:[#allocation107_spill] sm:$0xff]  ;;  %v19390_v63 = vld [vmem:[#allocation56_spill] sm:$0xff]  ;;  %v17969_v26 = vld [vmem:[#allocation2 + $0x860] ss:$12 sps:$4 sm:$0xff]  }
 0x5b3   :  { %v9064_v52 = vpop.f32.mrf.mxu0  ;;  %v8907_v39 = vpop.f32.mrf.mxu1  ;;  %9476 = vmatmul.mubr.bf16.gmra.mxu1 %v19387_v47  ;;  %11105 = vmatprep.subr.bf16.mxu0 %v17937_v36 }
 0x5b4   :  { %9992 = vst [vmem:[%s18485_s7 + $0xa8] sm:$0xff] %v9063_v6  ;;  %v9065_v23 = vadd.f32 %v9064_v52, %v8904_v43  ;;  %v8908_v15 = vadd.f32 %v8907_v39, %v17714_v29  ;;  %9483 = vmatprep.mubr.bf16.mxu1 %v19388_v50  ;;  %11012 = vmatpush3.bf16.msra.mxu1 %v12008_v28  ;;  %v17966_v29 = vld [vmem:[#allocation2 + $0x7b8] ss:$12 sps:$4 sm:$0xff]   ;;  %v12019_v52 = vld [vmem:[#allocation2 + $0x6c8] ss:$12 sps:$4 sm:$0xff]  }
 0x5b5   :  { %v9068_v20 = vpop.f32.mrf.mxu0  ;;  %9612 = vmatmul.mubr.bf16.gmra.mxu0 %v19389_v41  ;;  %v8909_v13 = vpop.f32.mrf.mxu1  ;;  %11013 = vmatprep.subr.bf16.mxu1 %v12011_v14 }
 0x5b6   :  { %9993 = vst [vmem:[%s18485_s7 + $0xb0] sm:$0xff] %v9065_v23  ;;  %v9069_v60 = vadd.f32 %v9068_v20, %v8908_v15  ;;  %v8910_v8 = vadd.f32 %v8909_v13, %v17718_v56  ;;  %9619 = vmatprep.mubr.bf16.mxu0 %v19390_v63  ;;  %11106 = vmatpush3.bf16.msra.mxu0 %v17948_v0  ;;  %v12016_v56 = vld [vmem:[#allocation2 + $0x620] ss:$12 sps:$4 sm:$0xff]   ;;  %v12020_v13 = vld [vmem:[#allocation2 + $0x608] ss:$12 sps:$4 sm:$0xff]  }
 0x5b7   :  { %v9070_v4 = vpop.f32.mrf.mxu0  ;;  %v8911_v28 = vpop.f32.mrf.mxu1  ;;  %11107 = vmatprep.subr.bf16.mxu0 %v17952_v9  ;;  %v17980_v23 = vld [vmem:[#allocation2 + $0x7a0] ss:$12 sps:$4 sm:$0xff]  }
 0x5b8   :  { %9995 = vst [vmem:[%s18485_s7 + $0xc0] sm:$0xff] %v9069_v60  ;;  %v9071_v10 = vadd.f32 %v9070_v4, %v8910_v8  ;;  %v8912_v14 = vadd.f32 %v8911_v28, %v17721_v7  ;;  %11014 = vmatpush3.bf16.msra.mxu1 %v12012_v32  ;;  %v19391_v7 = vld [vmem:[#allocation106_spill] sm:$0xff]  ;;  %v19393_v60 = vld [vmem:[#allocation55_spill] sm:$0xff] }
 0x5b9   :  { %v9072_v6 = vpop.f32.mrf.mxu0  ;;  %v8913_v43 = vpop.f32.mrf.mxu1  ;;  %11015 = vmatprep.subr.bf16.mxu1 %v12015_v55  ;;  %v17984_v32 = vld [vmem:[#allocation2 + $0x848] ss:$12 sps:$4 sm:$0xff]  }
 0x5ba   :  { %9996 = vst [vmem:[%s18485_s7 + $0xc8] sm:$0xff] %v9071_v10  ;;  %v9073_v39 = vadd.f32 %v9072_v6, %v8912_v14  ;;  %v8914_v47 = vadd.f32 %v8913_v43, %v17725_v34  ;;  %11108 = vmatpush3.bf16.msra.mxu0 %v17966_v29  ;;  %v19392_v34 = vld [vmem:[#allocation39_spill] sm:$0xff]  ;;  %v19394_v28 = vld [vmem:[#allocation58_spill] sm:$0xff] }
 0x5bb   :  { %v9074_v15 = vpop.f32.mrf.mxu0  ;;  %v8917_v50 = vpop.f32.mrf.mxu1  ;;  %9484 = vmatmul.mubr.bf16.gmra.mxu1 %v19391_v7  ;;  %11109 = vmatprep.subr.bf16.mxu0 %v17969_v26  ;;  %v19396_v7 = vld [vmem:[#allocation110_spill] sm:$0xff] }
 0x5bc   :  { %9998 = vst [vmem:[%s18485_s7 + $0xd8] sm:$0xff] %v9073_v39  ;;  %v9075_v20 = vadd.f32 %v9074_v15, %v8914_v47  ;;  %v8918_v41 = vadd.f32 %v8917_v50, %v17730_v21  ;;  %9491 = vmatprep.mubr.bf16.mxu1 %v19392_v34  ;;  %11016 = vmatpush3.bf16.msra.mxu1 %v12016_v56  ;;  %v17998_v21 = vld [vmem:[#allocation2 + $0x788] ss:$12 sps:$4 sm:$0xff]   ;;  %v19395_v50 = vld [vmem:[#allocation108_spill] sm:$0xff] }
 0x5bd   :  { %v9078_v55 = vpop.f32.mrf.mxu0  ;;  %9620 = vmatmul.mubr.bf16.gmra.mxu0 %v19393_v60  ;;  %v8919_v8 = vpop.f32.mrf.mxu1  ;;  %11017 = vmatprep.subr.bf16.mxu1 %v12019_v52 }
 0x5be   :  { %9999 = vst [vmem:[%s18485_s7 + $0xe0] sm:$0xff] %v9075_v20  ;;  %v9079_v63 = vadd.f32 %v9078_v55, %v8918_v41  ;;  %v8920_v4 = vadd.f32 %v8919_v8, %v17736_v38  ;;  %9627 = vmatprep.mubr.bf16.mxu0 %v19394_v28  ;;  %11110 = vmatpush3.bf16.msra.mxu0 %v17980_v23  ;;  %v19397_v41 = vld [vmem:[#allocation54_spill] sm:$0xff]  ;;  %v19398_v55 = vld [vmem:[#allocation57_spill] sm:$0xff] }
 0x5bf   :  { %v9080_v10 = vpop.f32.mrf.mxu0  ;;  %v8921_v14 = vpop.f32.mrf.mxu1  ;;  %11111 = vmatprep.subr.bf16.mxu0 %v17984_v32 }
 0x5c0   :  { %10001 = vst [vmem:[%s18485_s7 + $0xf0] sm:$0xff] %v9079_v63  ;;  %v9081_v56 = vadd.f32 %v9080_v10, %v8920_v4  ;;  %v8922_v6 = vadd.f32 %v8921_v14, %v17739_v16  ;;  %11018 = vmatpush3.bf16.msra.mxu1 %v12020_v13 }
 0x5c1   :  { %v9082_v43 = vpop.f32.mrf.mxu0  ;;  %v8923_v38 = vpop.f32.mrf.mxu1  ;;  %11191 = vmatprep.subr.bf16.mxu1 %v17734_v25 }
 0x5c2   :  { %10002 = vst [vmem:[%s18485_s7 + $0xf8] sm:$0xff] %v9081_v56  ;;  %v9083_v52 = vadd.f32 %v9082_v43, %v8922_v6  ;;  %v8924_v39 = vadd.f32 %v8923_v38, %v17744_v54  ;;  %11112 = vmatpush3.bf16.msra.mxu0 %v17998_v21  ;;  %v19399_v6 = vld [vmem:[#allocation8_spill] sm:$0xff]  ;;  %v19400_v38 = vld [vmem:[#allocation111_spill] sm:$0xff] }
 0x5c3   :  { %v9084_v47 = vpop.f32.mrf.mxu0  ;;  %v8927_v15 = vpop.f32.mrf.mxu1  ;;  %9492 = vmatmul.mubr.bf16.gmra.mxu1 %v19395_v50  ;;  %v19402_v50 = vld [vmem:[#allocation68_spill] sm:$0xff] }
 0x5c4   :  { %10004 = vst [vmem:[%s18485_s7 + $0x108] sm:$0xff] %v9083_v52  ;;  %v9085_v16 = vadd.f32 %v9084_v47, %v8924_v39  ;;  %v8928_v25 = vadd.f32 %v8927_v15, %v17749_v18  ;;  %9499 = vmatprep.mubr.bf16.mxu1 %v19396_v7  ;;  %v19401_v39 = vld [vmem:[#allocation6_spill] sm:$0xff] }
 0x5c5   :  { %v9088_v20 = vpop.f32.mrf.mxu0  ;;  %9628 = vmatmul.mubr.bf16.gmra.mxu0 %v19397_v41  ;;  %v8929_v34 = vpop.f32.mrf.mxu1 }
 0x5c6   :  { %10005 = vst [vmem:[%s18485_s7 + $0x110] sm:$0xff] %v9085_v16  ;;  %v9089_v54 = vadd.f32 %v9088_v20, %v8928_v25  ;;  %v8930_v13 = vadd.f32 %v8929_v34, %v17753_v48  ;;  %9635 = vmatprep.mubr.bf16.mxu0 %v19398_v55  ;;  %v19403_v55 = vld [vmem:[#allocation45_spill] sm:$0xff] }
 0x5c7   :  { %v9090_v60 = vpop.f32.mrf.mxu0  ;;  %v8931_v8 = vpop.f32.mrf.mxu1 }
 0x5c8   :  { %10007 = vst [vmem:[%s18485_s7 + $0x120] sm:$0xff] %v9089_v54  ;;  %v9091_v18 = vadd.f32 %v9090_v60, %v8930_v13  ;;  %v8932_v63 = vadd.f32 %v8931_v8, %v17756_v58  ;;  %v19404_v8 = vld [vmem:[#allocation41_spill] sm:$0xff] }
 0x5c9   :  { %v9092_v4 = vpop.f32.mrf.mxu0  ;;  %v8933_v28 = vpop.f32.mrf.mxu1 }
 0x5ca   :  { %10008 = vst [vmem:[%s18485_s7 + $0x128] sm:$0xff] %v9091_v18  ;;  %v9093_v10 = vadd.f32 %v9092_v4, %v8932_v63  ;;  %v8934_v48 = vadd.f32 %v8933_v28, %v17760_v40  ;;  %v19405_v63 = vld [vmem:[#allocation67_spill] sm:$0xff] }
 0x5cb   :  { %v9094_v14 = vpop.f32.mrf.mxu0  ;;  %v8937_v56 = vpop.f32.mrf.mxu1  ;;  %9500 = vmatmul.mubr.bf16.gmra.mxu1 %v19399_v6 }
 0x5cc   :  { %10010 = vst [vmem:[%s18485_s7 + $0x138] sm:$0xff] %v9093_v10  ;;  %v9095_v43 = vadd.f32 %v9094_v14, %v8934_v48  ;;  %v8938_v58 = vadd.f32 %v8937_v56, %v17765_v62  ;;  %9507 = vmatprep.mubr.bf16.mxu1 %v19400_v38  ;;  %v19406_v10 = vld [vmem:[#allocation10_spill] sm:$0xff] }
 0x5cd   :  { %v9098_v52 = vpop.f32.mrf.mxu0  ;;  %9636 = vmatmul.mubr.bf16.gmra.mxu0 %v19401_v39  ;;  %v8939_v47 = vpop.f32.mrf.mxu1  ;;  %v19407_v39 = vld [vmem:[#allocation112_spill] sm:$0xff] }
 0x5ce   :  { %10011 = vst [vmem:[%s18485_s7 + $0x140] sm:$0xff] %v9095_v43  ;;  %v9099_v40 = vadd.f32 %v9098_v52, %v8938_v58  ;;  %v8940_v15 = vadd.f32 %v8939_v47, %v17769_v1  ;;  %9643 = vmatprep.mubr.bf16.mxu0 %v19402_v50  ;;  %v19409_v50 = vld [vmem:[#allocation66_spill] sm:$0xff] }
 0x5cf   :  { %v9100_v16 = vpop.f32.mrf.mxu0  ;;  %v8941_v25 = vpop.f32.mrf.mxu1 }
 0x5d0   :  { %10013 = vst [vmem:[%s18485_s7 + $0x150] sm:$0xff] %v9099_v40  ;;  %v9101_v62 = vadd.f32 %v9100_v16, %v8940_v15  ;;  %v8942_v7 = vadd.f32 %v8941_v25, %v17772_v44  ;;  %v19408_v40 = vld [vmem:[#allocation114_spill] sm:$0xff] }
 0x5d1   :  { %v9102_v20 = vpop.f32.mrf.mxu0  ;;  %v8943_v41 = vpop.f32.mrf.mxu1 }
 0x5d2   :  { %10014 = vst [vmem:[%s18485_s7 + $0x158] sm:$0xff] %v9101_v62  ;;  %v9103_v34 = vadd.f32 %v9102_v20, %v8942_v7  ;;  %v8944_v1 = vadd.f32 %v8943_v41, %v17776_v30  ;;  %v19410_v62 = vld [vmem:[#allocation9_spill] sm:$0xff] }
 0x5d3   :  { %v9104_v54 = vpop.f32.mrf.mxu0  ;;  %v8947_v13 = vpop.f32.mrf.mxu1  ;;  %9508 = vmatmul.mubr.bf16.gmra.mxu1 %v19403_v55 }
 0x5d4   :  { %10016 = vst [vmem:[%s18485_s7 + $0x168] sm:$0xff] %v9103_v34  ;;  %v9105_v60 = vadd.f32 %v9104_v54, %v8944_v1  ;;  %v8948_v44 = vadd.f32 %v8947_v13, %v17781_v46  ;;  %9515 = vmatprep.mubr.bf16.mxu1 %v19404_v8  ;;  %v19412_v8 = vld [vmem:[#allocation60_spill] sm:$0xff] }
 0x5d5   :  { %v9108_v18 = vpop.f32.mrf.mxu0  ;;  %9644 = vmatmul.mubr.bf16.gmra.mxu0 %v19405_v63  ;;  %v8949_v4 = vpop.f32.mrf.mxu1  ;;  %v19413_v63 = vld [vmem:[#allocation5_spill] sm:$0xff] }
 0x5d6   :  { %10017 = vst [vmem:[%s18485_s7 + $0x170] sm:$0xff] %v9105_v60  ;;  %v9109_v30 = vadd.f32 %v9108_v18, %v8948_v44  ;;  %v8950_v28 = vadd.f32 %v8949_v4, %v17785_v22  ;;  %9651 = vmatprep.mubr.bf16.mxu0 %v19406_v10  ;;  %v19411_v60 = vld [vmem:[#allocation113_spill] sm:$0xff] }
 0x5d7   :  { %v9110_v48 = vpop.f32.mrf.mxu0  ;;  %v8951_v14 = vpop.f32.mrf.mxu1 }
 0x5d8   :  { %10019 = vst [vmem:[%s18485_s7 + $0x180] sm:$0xff] %v9109_v30  ;;  %v9111_v46 = vadd.f32 %v9110_v48, %v8950_v28  ;;  %v8952_v56 = vadd.f32 %v8951_v14, %v17788_v31  ;;  %v19414_v28 = vld [vmem:[#allocation7_spill] sm:$0xff] }
 0x5d9   :  { %v9112_v6 = vpop.f32.mrf.mxu0  ;;  %v8953_v43 = vpop.f32.mrf.mxu1 }
 0x5da   :  { %10020 = vst [vmem:[%s18485_s7 + $0x188] sm:$0xff] %v9111_v46  ;;  %v9113_v58 = vadd.f32 %v9112_v6, %v8952_v56  ;;  %v8954_v22 = vadd.f32 %v8953_v43, %v17792_v2  ;;  %v19415_v43 = vld [vmem:[#allocation31_spill] sm:$0xff] }
 0x5db   :  { %v9114_v38 = vpop.f32.mrf.mxu0  ;;  %v8957_v52 = vpop.f32.mrf.mxu1  ;;  %9516 = vmatmul.mubr.bf16.gmra.mxu1 %v19407_v39  ;;  %v19417_v39 = vld [vmem:[#allocation101_spill] sm:$0xff] }
 0x5dc   :  { %10022 = vst [vmem:[%s18485_s7 + $0x198] sm:$0xff] %v9113_v58  ;;  %v9115_v47 = vadd.f32 %v9114_v38, %v8954_v22  ;;  %v8958_v31 = vadd.f32 %v8957_v52, %v17797_v27  ;;  %9523 = vmatprep.mubr.bf16.mxu1 %v19408_v40  ;;  %v19416_v38 = vld [vmem:[#allocation32_spill] sm:$0xff] }
 0x5dd   :  { %v9118_v15 = vpop.f32.mrf.mxu0  ;;  %9652 = vmatmul.mubr.bf16.gmra.mxu0 %v19409_v50  ;;  %v8959_v16 = vpop.f32.mrf.mxu1 }
 0x5de   :  { %10023 = vst [vmem:[%s18485_s7 + $0x1a0] sm:$0xff] %v9115_v47  ;;  %v9119_v2 = vadd.f32 %v9118_v15, %v8958_v31  ;;  %v8960_v25 = vadd.f32 %v8959_v16, %v17801_v57  ;;  %9659 = vmatprep.mubr.bf16.mxu0 %v19410_v62  ;;  %v19418_v31 = vld [vmem:[#allocation12_spill] sm:$0xff]  ;;  %v19419_v16 = vld [vmem:[#allocation15_spill] sm:$0xff]  ;;  %v19420_v62 = vld [vmem:[#allocation86_spill] sm:$0xff] }
 0x5df   :  { %v9120_v7 = vpop.f32.mrf.mxu0  ;;  %v8961_v20 = vpop.f32.mrf.mxu1 }
 0x5e0   :  { %10025 = vst [vmem:[%s18485_s7 + $0x1b0] sm:$0xff] %v9119_v2  ;;  %v9121_v27 = vadd.f32 %v9120_v7, %v8960_v25  ;;  %v8962_v41 = vadd.f32 %v8961_v20, %v17804_v17 }
 0x5e1   :  { %v9122_v34 = vpop.f32.mrf.mxu0  ;;  %v8963_v1 = vpop.f32.mrf.mxu1 }
 0x5e2   :  { %10026 = vst [vmem:[%s18485_s7 + $0x1b8] sm:$0xff] %v9121_v27  ;;  %v9123_v54 = vadd.f32 %v9122_v34, %v8962_v41  ;;  %v8964_v57 = vadd.f32 %v8963_v1, %v17808_v51 }
 0x5e3   :  { %v9124_v13 = vpop.f32.mrf.mxu0  ;;  %v8967_v55 = vpop.f32.mrf.mxu1  ;;  %9524 = vmatmul.mubr.bf16.gmra.mxu1 %v19411_v60 }
 0x5e4   :  { %10028 = vst [vmem:[%s18485_s7 + $0x1c8] sm:$0xff] %v9123_v54  ;;  %v9125_v44 = vadd.f32 %v9124_v13, %v8964_v57  ;;  %v8968_v17 = vadd.f32 %v8967_v55, %v17813_v59  ;;  %9531 = vmatprep.mubr.bf16.mxu1 %v19412_v8  ;;  %v19421_v54 = vld [vmem:[#allocation19_spill] sm:$0xff]  ;;  %v19422_v55 = vld [vmem:[#allocation44_spill] sm:$0xff] }
 0x5e5   :  { %v9128_v18 = vpop.f32.mrf.mxu0  ;;  %9660 = vmatmul.mubr.bf16.gmra.mxu0 %v19413_v63  ;;  %v8969_v4 = vpop.f32.mrf.mxu1 }
 0x5e6   :  { %10029 = vst [vmem:[%s18485_s7 + $0x1d0] sm:$0xff] %v9125_v44  ;;  %v9129_v51 = vadd.f32 %v9128_v18, %v8968_v17  ;;  %v8970_v30 = vadd.f32 %v8969_v4, %v17817_v61  ;;  %9667 = vmatprep.mubr.bf16.mxu0 %v19414_v28  ;;  %v19423_v44 = vld [vmem:[#allocation70_spill] sm:$0xff]  ;;  %v19424_v18 = vld [vmem:[#allocation16_spill] sm:$0xff] }
 0x5e7   :  { %v9130_v10 = vpop.f32.mrf.mxu0  ;;  %v8971_v48 = vpop.f32.mrf.mxu1 }
 0x5e8   :  { %10031 = vst [vmem:[%s18485_s7 + $0x1e0] sm:$0xff] %v9129_v51  ;;  %v9131_v59 = vadd.f32 %v9130_v10, %v8970_v30  ;;  %v8972_v14 = vadd.f32 %v8971_v48, %v17820_v11  ;;  %v19425_v48 = vld [vmem:[#allocation20_spill] sm:$0xff] }
 0x5e9   :  { %v9132_v46 = vpop.f32.mrf.mxu0  ;;  %v8973_v56 = vpop.f32.mrf.mxu1 }
 0x5ea   :  { %10032 = vst [vmem:[%s18485_s7 + $0x1e8] sm:$0xff] %v9131_v59  ;;  %v9133_v6 = vadd.f32 %v9132_v46, %v8972_v14  ;;  %v8974_v61 = vadd.f32 %v8973_v56, %v19415_v43  ;;  %v12756_v59 = vld [vmem:[%s18484_s6] sm:$0x7]  ;;  %v19427_v14 = vld [vmem:[#allocation42_spill] sm:$0xff] }
 0x5eb   :  { %v9134_v58 = vpop.f32.mrf.mxu0  ;;  %v8977_v22 = vpop.f32.mrf.mxu1  ;;  %9532 = vmatmul.mubr.bf16.gmra.mxu1 %v19416_v38  ;;  %v18155_v46 = vrot.slane %v12756_v59, %v19427_v14 }
 0x5ec   :  { %10034 = vst [vmem:[%s18485_s7 + $0x1f8] sm:$0xff] %v9133_v6  ;;  %v9135_v52 = vadd.f32 %v9134_v58, %v8974_v61  ;;  %v8978_v11 = vadd.f32 %v8977_v22, %v17829_v35  ;;  %9539 = vmatprep.mubr.bf16.mxu1 %v19417_v39  ;;  %v19428_v6 = vld [vmem:[#allocation11_spill] sm:$0xff]  ;;  %v19429_v58 = vld [vmem:[#allocation153_spill] sm:$0xff] }
 0x5ed   :  { %v9138_v47 = vpop.f32.mrf.mxu0  ;;  %9668 = vmatmul.mubr.bf16.gmra.mxu0 %v19418_v31  ;;  %v8979_v40 = vpop.f32.mrf.mxu1 }
 0x5ee   :  { %10035 = vst [vmem:[%s18485_s7 + $0x200] sm:$0xff] %v9135_v52  ;;  %v9139_v15 = vadd.f32 %v9138_v47, %v8978_v11  ;;  %v8980_v50 = vadd.f32 %v8979_v40, %v17833_v37  ;;  %9675 = vmatprep.mubr.bf16.mxu0 %v19419_v16  ;;  %v19430_v16 = vld [vmem:[#allocation155_spill] sm:$0xff] }
 0x5ef   :  { %v9140_v2 = vpop.f32.mrf.mxu0  ;;  %v8981_v25 = vpop.f32.mrf.mxu1 }
 0x5f0   :  { %10037 = vst [vmem:[%s18485_s7 + $0x210] sm:$0xff] %v9139_v15  ;;  %v9141_v35 = vadd.f32 %v9140_v2, %v8980_v50  ;;  %v8982_v7 = vadd.f32 %v8981_v25, %v19420_v62 }
 0x5f1   :  { %v9142_v20 = vpop.f32.mrf.mxu0  ;;  %v8983_v27 = vpop.f32.mrf.mxu1 }
 0x5f2   :  { %10038 = vst [vmem:[%s18485_s7 + $0x218] sm:$0xff] %v9141_v35  ;;  %v9143_v41 = vadd.f32 %v9142_v20, %v8982_v7  ;;  %v8984_v37 = vadd.f32 %v8983_v27, %v17840_v24  ;;  %v19431_v35 = vld [vmem:[#allocation80_spill] sm:$0xff] }
 0x5f3   :  { %v9144_v34 = vpop.f32.mrf.mxu0  ;;  %v8987_v1 = vpop.f32.mrf.mxu1  ;;  %9540 = vmatmul.mubr.bf16.gmra.mxu1 %v19421_v54  ;;  %v19432_v7 = vld [vmem:[#allocation156_spill] sm:$0xff] }
 0x5f4   :  { %10040 = vst [vmem:[%s18485_s7 + $0x228] sm:$0xff] %v9143_v41  ;;  %v9145_v57 = vadd.f32 %v9144_v34, %v8984_v37  ;;  %v8988_v13 = vadd.f32 %v8987_v1, %v17845_v53  ;;  %9547 = vmatprep.mubr.bf16.mxu1 %v19422_v55  ;;  %v19433_v37 = vld [vmem:[#allocation138_spill] sm:$0xff] }
 0x5f5   :  { %v9148_v60 = vpop.f32.mrf.mxu0  ;;  %9676 = vmatmul.mubr.bf16.gmra.mxu0 %v19423_v44  ;;  %v8989_v17 = vpop.f32.mrf.mxu1 }
 0x5f6   :  { %10041 = vst [vmem:[%s18485_s7 + $0x230] sm:$0xff] %v9145_v57  ;;  %v9149_v24 = vadd.f32 %v9148_v60, %v8988_v13  ;;  %v8990_v8 = vadd.f32 %v8989_v17, %v17849_v3  ;;  %9683 = vmatprep.mubr.bf16.mxu0 %v19424_v18  ;;  %v19426_v3 = vld [vmem:[#allocation152_spill] sm:$0xff] }
 0x5f7   :  { %v9150_v63 = vpop.f32.mrf.mxu0  ;;  %v8991_v4 = vpop.f32.mrf.mxu1 }
 0x5f8   :  { %10043 = vst [vmem:[%s18485_s7 + $0x240] sm:$0xf] %v9149_v24  ;;  %v9151_v53 = vadd.f32 %v9150_v63, %v8990_v8  ;;  %v19434_v8 = vld [vmem:[#allocation64_spill] sm:$0xff]  ;;  %v19435_v4 = vld [vmem:[#allocation18_spill] sm:$0xff] }
 0x5f9   :  { %v9152_v51 = vpop.f32.mrf.mxu0  ;;  %v8992_v30 = vpop.f32.mrf.mxu1 }
 0x5fa   :  { %10044 = vst [vmem:[%s18485_s7 + $0x248] sm:$0xf] %v9151_v53  ;;  %v19436_v51 = vld [vmem:[#allocation137_spill] sm:$0xff] }
 0x5fb   :  { %v9153_v28 = vpop.f32.mrf.mxu0  ;;  %v10643_v10 = vpop.f32.mrf.mxu1  ;;  %9548 = vmatmul.mubr.bf16.gmra.mxu1 %v19425_v48  ;;  %v19437_v48 = vld [vmem:[#allocation115_spill] sm:$0xff] }
 0x5fc   :  { %9555 = vmatprep.mubr.bf16.mxu1 %v19426_v3 }
 0x5fd   :  { %v10737_v56 = vpop.f32.mrf.mxu0  ;;  %9684 = vmatmul.mubr.bf16.gmra.mxu0 %v19428_v6  ;;  %v10644_v43 = vpop.f32.mrf.mxu1 }
 0x5fe   :  { %v10645_v61 = vadd.f32 %v10644_v43, %v10643_v10  ;;  %9691 = vmatprep.mubr.bf16.mxu0 %v19429_v58 }
 0x5ff   :  { %v10738_v22 = vpop.f32.mrf.mxu0  ;;  %v10646_v38 = vpop.f32.mrf.mxu1 }
 0x600   :  { %v9190_v52 = vadd.f32 %v10645_v61, %v18155_v46  ;;  %v10739_v11 = vadd.f32 %v10738_v22, %v10737_v56  ;;  %v19438_v22 = vld [vmem:[#allocation47_spill] sm:$0xff] }
 0x601   :  { %v10740_v39 = vpop.f32.mrf.mxu0  ;;  %v10647_v47 = vpop.f32.mrf.mxu1 }
 0x602   :  { %v18160_v31 = vadd.f32 %v10739_v11, %v9190_v52  ;;  %v10648_v40 = vadd.f32 %v10647_v47, %v10646_v38  ;;  %v19439_v11 = vld [vmem:[#allocation17_spill] sm:$0xff] }
 0x603   :  { %v10741_v15 = vpop.f32.mrf.mxu0  ;;  %v10649_v50 = vpop.f32.mrf.mxu1  ;;  %9556 = vmatmul.mubr.bf16.gmra.mxu1 %v19430_v16 }
 0x604   :  { %v9193_v2 = vadd.f32 %v10648_v40, %v18155_v46  ;;  %v10742_v25 = vadd.f32 %v10741_v15, %v10740_v39  ;;  %9731 = vmatprep.mubr.bf16.mxu1 %v19431_v35  ;;  %v19441_v15 = vld [vmem:[#allocation140_spill] sm:$0xff] }
 0x605   :  { %v10743_v62 = vpop.f32.mrf.mxu0  ;;  %9692 = vmatmul.mubr.bf16.gmra.mxu0 %v19432_v7  ;;  %v10650_v20 = vpop.f32.mrf.mxu1 }
 0x606   :  { %v18166_v27 = vadd.f32 %v10742_v25, %v9193_v2  ;;  %v10651_v41 = vadd.f32 %v10650_v20, %v10649_v50  ;;  %9867 = vmatprep.mubr.bf16.mxu0 %v19433_v37 }
 0x607   :  { %v10744_v34 = vpop.f32.mrf.mxu0  ;;  %v10652_v1 = vpop.f32.mrf.mxu1 }
 0x608   :  { %v9198_v54 = vadd.f32 %v10651_v41, %v18155_v46  ;;  %v10745_v57 = vadd.f32 %v10744_v34, %v10743_v62  ;;  %v19442_v41 = vld [vmem:[#allocation79_spill] sm:$0xff] }
 0x609   :  { %v10746_v13 = vpop.f32.mrf.mxu0  ;;  %v10653_v55 = vpop.f32.mrf.mxu1 }
 0x60a   :  { %v18170_v60 = vadd.f32 %v10745_v57, %v9198_v54  ;;  %v10654_v44 = vadd.f32 %v10653_v55, %v10652_v1  ;;  %v19443_v1 = vld [vmem:[#allocation81_spill] sm:$0xff]  ;;  %v19445_v55 = vld [vmem:[#allocation142_spill] sm:$0xff] }
 0x60b   :  { %v10747_v17 = vpop.f32.mrf.mxu0  ;;  %v10655_v24 = vpop.f32.mrf.mxu1  ;;  %9732 = vmatmul.mubr.bf16.vlgmr.msra.gmra.mxu1 %v19434_v8 }
 0x60c   :  { %v9201_v18 = vadd.f32 %v10654_v44, %v18155_v46  ;;  %v10748_v63 = vadd.f32 %v10747_v17, %v10746_v13  ;;  %11199 = vmatpush3.bf16.msra.mxu1 %v17885_v19  ;;  %9739 = vmatprep.mubr.bf16.mxu1 %v19435_v4 }
 0x60d   :  { %v10749_v53 = vpop.f32.mrf.mxu0  ;;  %9868 = vmatmul.mubr.bf16.vlgmr.msra.gmra.mxu0 %v19436_v51  ;;  %v10656_v30 = vpop.f32.mrf.mxu1  ;;  %11192 = vmatprep.subr.bf16.mxu1 %v17888_v33  ;;  %v19446_v51 = vld [vmem:[#allocation50_spill] sm:$0xff] }
 0x60e   :  { %v18178_v28 = vadd.f32 %v10748_v63, %v9201_v18  ;;  %v10657_v10 = vadd.f32 %v10656_v30, %v10655_v24  ;;  %9875 = vmatprep.mubr.bf16.mxu0 %v19437_v48  ;;  %v19447_v48 = vld [vmem:[#allocation99_spill] sm:$0xff] }
 0x60f   :  { %v10750_v3 = vpop.f32.mrf.mxu0  ;;  %v10658_v59 = vpop.f32.mrf.mxu1 }
 0x610   :  { %v9206_v14 = vadd.f32 %v10657_v10, %v18155_v46  ;;  %v10751_v56 = vadd.f32 %v10750_v3, %v10749_v53  ;;  %11200 = vmatpush3.bf16.msra.mxu1 %v17902_v42  ;;  %v19440_v42 = vld [vmem:[#allocation139_spill] sm:$0xff] }
 0x611   :  { %v10752_v19 = vpop.f32.mrf.mxu0  ;;  %v10659_v6 = vpop.f32.mrf.mxu1  ;;  %11193 = vmatprep.subr.bf16.mxu1 %v17905_v49 }
 0x612   :  { %v18184_v43 = vadd.f32 %v10751_v56, %v9206_v14  ;;  %v10660_v61 = vadd.f32 %v10659_v6, %v10658_v59  ;;  %v19449_v56 = vld [vmem:[#allocation144_spill] sm:$0xff] }
 0x613   :  { %v10753_v33 = vpop.f32.mrf.mxu0  ;;  %v10661_v58 = vpop.f32.mrf.mxu1  ;;  %9740 = vmatmul.mubr.bf16.gmra.mxu1 %v19438_v22 }
 0x614   :  { %v9209_v38 = vadd.f32 %v10660_v61, %v18155_v46  ;;  %v10754_v52 = vadd.f32 %v10753_v33, %v10752_v19  ;;  %9747 = vmatprep.mubr.bf16.mxu1 %v19439_v11  ;;  %11201 = vmatpush3.bf16.msra.mxu1 %v17916_v12 }
 0x615   :  { %v10755_v39 = vpop.f32.mrf.mxu0  ;;  %9876 = vmatmul.mubr.bf16.gmra.mxu0 %v19440_v42  ;;  %v10662_v47 = vpop.f32.mrf.mxu1  ;;  %11194 = vmatprep.subr.bf16.mxu1 %v17920_v5 }
 0x616   :  { %v18192_v49 = vadd.f32 %v10754_v52, %v9209_v38  ;;  %v10663_v40 = vadd.f32 %v10662_v47, %v10661_v58  ;;  %9883 = vmatprep.mubr.bf16.mxu0 %v19441_v15  ;;  %v19451_v47 = vld [vmem:[#allocation120_spill] sm:$0xff]  ;;  %v19452_v15 = vld [vmem:[#allocation143_spill] sm:$0xff] }
 0x617   :  { %v10756_v50 = vpop.f32.mrf.mxu0  ;;  %v10664_v16 = vpop.f32.mrf.mxu1 }
 0x618   :  { %v9214_v2 = vadd.f32 %v10663_v40, %v18155_v46  ;;  %v10757_v25 = vadd.f32 %v10756_v50, %v10755_v39  ;;  %11202 = vmatpush3.bf16.msra.mxu1 %v17934_v45  ;;  %v19444_v45 = vld [vmem:[#allocation116_spill] sm:$0xff] }
 0x619   :  { %v10758_v35 = vpop.f32.mrf.mxu0  ;;  %v10665_v12 = vpop.f32.mrf.mxu1  ;;  %11195 = vmatprep.subr.bf16.mxu1 %v17937_v36 }
 0x61a   :  { %v18198_v62 = vadd.f32 %v10757_v25, %v9214_v2  ;;  %v10666_v7 = vadd.f32 %v10665_v12, %v10664_v16  ;;  %v19453_v2 = vld [vmem:[#allocation146_spill] sm:$0xff] }
 0x61b   :  { %v10759_v5 = vpop.f32.mrf.mxu0  ;;  %v10667_v20 = vpop.f32.mrf.mxu1  ;;  %9748 = vmatmul.mubr.bf16.gmra.mxu1 %v19442_v41 }
 0x61c   :  { %v9217_v37 = vadd.f32 %v10666_v7, %v18155_v46  ;;  %v10760_v34 = vadd.f32 %v10759_v5, %v10758_v35  ;;  %9755 = vmatprep.mubr.bf16.mxu1 %v19443_v1  ;;  %11203 = vmatpush3.bf16.msra.mxu1 %v17948_v0 }
 0x61d   :  { %v10761_v54 = vpop.f32.mrf.mxu0  ;;  %9884 = vmatmul.mubr.bf16.gmra.mxu0 %v19444_v45  ;;  %v10668_v57 = vpop.f32.mrf.mxu1  ;;  %11196 = vmatprep.subr.bf16.mxu1 %v17952_v9 }
 0x61e   :  { %v18206_v36 = vadd.f32 %v10760_v34, %v9217_v37  ;;  %v10669_v13 = vadd.f32 %v10668_v57, %v10667_v20  ;;  %9891 = vmatprep.mubr.bf16.mxu0 %v19445_v55 }
 0x61f   :  { %v10762_v44 = vpop.f32.mrf.mxu0  ;;  %v10670_v17 = vpop.f32.mrf.mxu1 }
 0x620   :  { %v9222_v24 = vadd.f32 %v10669_v13, %v18155_v46  ;;  %v10763_v8 = vadd.f32 %v10762_v44, %v10761_v54  ;;  %11204 = vmatpush3.bf16.msra.mxu1 %v17966_v29  ;;  %v19448_v29 = vld [vmem:[#allocation141_spill] sm:$0xff]  ;;  %v19454_v54 = vld [vmem:[#allocation119_spill] sm:$0xff] }
 0x621   :  { %v10764_v18 = vpop.f32.mrf.mxu0  ;;  %v10671_v0 = vpop.f32.mrf.mxu1  ;;  %11197 = vmatprep.subr.bf16.mxu1 %v17969_v26  ;;  %v19455_v13 = vld [vmem:[#allocation121_spill] sm:$0xff] }
 0x622   :  { %v18212_v63 = vadd.f32 %v10763_v8, %v9222_v24  ;;  %v10672_v4 = vadd.f32 %v10671_v0, %v10670_v17  ;;  %v19456_v44 = vld [vmem:[#allocation145_spill] sm:$0xff] }
 0x623   :  { %v10765_v9 = vpop.f32.mrf.mxu0  ;;  %v10673_v53 = vpop.f32.mrf.mxu1  ;;  %9756 = vmatmul.mubr.bf16.gmra.mxu1 %v19446_v51 }
 0x624   :  { %v9225_v30 = vadd.f32 %v10672_v4, %v18155_v46  ;;  %v10766_v10 = vadd.f32 %v10765_v9, %v10764_v18  ;;  %9763 = vmatprep.mubr.bf16.mxu1 %v19447_v48  ;;  %11205 = vmatpush3.bf16.msra.mxu1 %v17980_v23  ;;  %v19457_v18 = vld [vmem:[#allocation148_spill] sm:$0xff] }
 0x625   :  { %v10767_v3 = vpop.f32.mrf.mxu0  ;;  %9892 = vmatmul.mubr.bf16.gmra.mxu0 %v19448_v29  ;;  %v10674_v59 = vpop.f32.mrf.mxu1  ;;  %11198 = vmatprep.subr.bf16.mxu1 %v17984_v32  ;;  %v19450_v32 = vld [vmem:[#allocation82_spill] sm:$0xff] }
 0x626   :  { %v18220_v26 = vadd.f32 %v10766_v10, %v9225_v30  ;;  %v10675_v14 = vadd.f32 %v10674_v59, %v10673_v53  ;;  %9899 = vmatprep.mubr.bf16.mxu0 %v19449_v56  ;;  %v19458_v59 = vld [vmem:[#allocation97_spill] sm:$0xff] }
 0x627   :  { %v10768_v19 = vpop.f32.mrf.mxu0  ;;  %v10676_v6 = vpop.f32.mrf.mxu1 }
 0x628   :  { %v9230_v61 = vadd.f32 %v10675_v14, %v18155_v46  ;;  %v10769_v33 = vadd.f32 %v10768_v19, %v10767_v3  ;;  %11206 = vmatpush3.bf16.msra.mxu1 %v17998_v21  ;;  %v19459_v19 = vld [vmem:[#allocation123_spill] sm:$0xff] }
 0x629   :  { %v10770_v58 = vpop.f32.mrf.mxu0  ;;  %v10677_v23 = vpop.f32.mrf.mxu1 }
 0x62a   :  { %v18225_v22 = vadd.f32 %v10769_v33, %v9230_v61  ;;  %v10678_v38 = vadd.f32 %v10677_v23, %v10676_v6  ;;  %v19460_v61 = vld [vmem:[#allocation147_spill] sm:$0xff] }
 0x62b   :  { %v10771_v52 = vpop.f32.mrf.mxu0  ;;  %v10679_v11 = vpop.f32.mrf.mxu1  ;;  %9764 = vmatmul.mubr.bf16.gmra.mxu1 %v19450_v32 }
 0x62c   :  { %v9233_v39 = vadd.f32 %v10678_v38, %v18155_v46  ;;  %v10772_v42 = vadd.f32 %v10771_v52, %v10770_v58  ;;  %9771 = vmatprep.mubr.bf16.mxu1 %v19451_v47  ;;  %v19461_v38 = vld [vmem:[#allocation149_spill] sm:$0xff] }
 0x62d   :  { %v10773_v40 = vpop.f32.mrf.mxu0  ;;  %9900 = vmatmul.mubr.bf16.gmra.mxu0 %v19452_v15  ;;  %v10680_v50 = vpop.f32.mrf.mxu1 }
 0x62e   :  { %v18231_v16 = vadd.f32 %v10772_v42, %v9233_v39  ;;  %v10681_v21 = vadd.f32 %v10680_v50, %v10679_v11  ;;  %9907 = vmatprep.mubr.bf16.mxu0 %v19453_v2  ;;  %v19462_v2 = vld [vmem:[#allocation122_spill] sm:$0xff] }
 0x62f   :  { %v10774_v25 = vpop.f32.mrf.mxu0  ;;  %v10682_v35 = vpop.f32.mrf.mxu1 }
 0x630   :  { %v9238_v12 = vadd.f32 %v10681_v21, %v18155_v46  ;;  %v10775_v7 = vadd.f32 %v10774_v25, %v10773_v40 }
 0x631   :  { %v10776_v5 = vpop.f32.mrf.mxu0  ;;  %v10683_v20 = vpop.f32.mrf.mxu1 }
 0x632   :  { %v18235_v41 = vadd.f32 %v10775_v7, %v9238_v12  ;;  %v10684_v37 = vadd.f32 %v10683_v20, %v10682_v35  ;;  %v19463_v12 = vld [vmem:[#allocation125_spill] sm:$0xff] }
 0x633   :  { %v10777_v34 = vpop.f32.mrf.mxu0  ;;  %v10685_v1 = vpop.f32.mrf.mxu1  ;;  %9772 = vmatmul.mubr.bf16.gmra.mxu1 %v19454_v54 }
 0x634   :  { %v9241_v45 = vadd.f32 %v10684_v37, %v18155_v46  ;;  %v10778_v57 = vadd.f32 %v10777_v34, %v10776_v5  ;;  %9779 = vmatprep.mubr.bf16.mxu1 %v19455_v13  ;;  %v19464_v5 = vld [vmem:[#allocation72_spill] sm:$0xff] }
 0x635   :  { %v10779_v55 = vpop.f32.mrf.mxu0  ;;  %9908 = vmatmul.mubr.bf16.gmra.mxu0 %v19456_v44  ;;  %v10686_v17 = vpop.f32.mrf.mxu1 }
 0x636   :  { %v18241_v24 = vadd.f32 %v10778_v57, %v9241_v45  ;;  %v10687_v8 = vadd.f32 %v10686_v17, %v10685_v1  ;;  %9915 = vmatprep.mubr.bf16.mxu0 %v19457_v18  ;;  %v19465_v1 = vld [vmem:[#allocation151_spill] sm:$0xff] }
 0x637   :  { %v10780_v0 = vpop.f32.mrf.mxu0  ;;  %v10688_v4 = vpop.f32.mrf.mxu1 }
 0x638   :  { %v9246_v9 = vadd.f32 %v10687_v8, %v18155_v46  ;;  %v10781_v53 = vadd.f32 %v10780_v0, %v10779_v55 }
 0x639   :  { %v10782_v51 = vpop.f32.mrf.mxu0  ;;  %v10689_v30 = vpop.f32.mrf.mxu1 }
 0x63a   :  { %v18245_v10 = vadd.f32 %v10781_v53, %v9246_v9  ;;  %v10690_v48 = vadd.f32 %v10689_v30, %v10688_v4  ;;  %v19466_v4 = vld [vmem:[#allocation124_spill] sm:$0xff] }
 0x63b   :  { %v10783_v3 = vpop.f32.mrf.mxu0  ;;  %v10691_v29 = vpop.f32.mrf.mxu1  ;;  %9780 = vmatmul.mubr.bf16.gmra.mxu1 %v19458_v59 }
 0x63c   :  { %v9249_v14 = vadd.f32 %v10690_v48, %v18155_v46  ;;  %v10784_v56 = vadd.f32 %v10783_v3, %v10782_v51  ;;  %9787 = vmatprep.mubr.bf16.mxu1 %v19459_v19  ;;  %v19467_v51 = vld [vmem:[#allocation34_spill] sm:$0xff] }
 0x63d   :  { %v10785_v6 = vpop.f32.mrf.mxu0  ;;  %9916 = vmatmul.mubr.bf16.gmra.mxu0 %v19460_v61  ;;  %v10692_v33 = vpop.f32.mrf.mxu1  ;;  %v19468_v48 = vld [vmem:[#allocation150_spill] sm:$0xff] }
 0x63e   :  { %v18251_v58 = vadd.f32 %v10784_v56, %v9249_v14  ;;  %v10693_v23 = vadd.f32 %v10692_v33, %v10691_v29  ;;  %9923 = vmatprep.mubr.bf16.mxu0 %v19461_v38  ;;  %v19469_v14 = vld [vmem:[#allocation38_spill] sm:$0xff] }
 0x63f   :  { %v10786_v52 = vpop.f32.mrf.mxu0  ;;  %v10694_v11 = vpop.f32.mrf.mxu1 }
 0x640   :  { %v9254_v32 = vadd.f32 %v10693_v23, %v18155_v46  ;;  %v10787_v39 = vadd.f32 %v10786_v52, %v10785_v6 }
 0x641   :  { %v10788_v42 = vpop.f32.mrf.mxu0  ;;  %v10695_v47 = vpop.f32.mrf.mxu1 }
 0x642   :  { %v18255_v40 = vadd.f32 %v10787_v39, %v9254_v32  ;;  %v10696_v15 = vadd.f32 %v10695_v47, %v10694_v11  ;;  %v19470_v39 = vld [vmem:[#allocation127_spill] sm:$0xff] }
 0x643   :  { %v10789_v50 = vpop.f32.mrf.mxu0  ;;  %v10697_v21 = vpop.f32.mrf.mxu1  ;;  %9788 = vmatmul.mubr.bf16.gmra.mxu1 %v19462_v2 }
 0x644   :  { %v9257_v25 = vadd.f32 %v10696_v15, %v18155_v46  ;;  %v10790_v35 = vadd.f32 %v10789_v50, %v10788_v42  ;;  %9795 = vmatprep.mubr.bf16.mxu1 %v19463_v12  ;;  %v19471_v15 = vld [vmem:[#allocation134_spill] sm:$0xff]  ;;  %v19473_v12 = vld [vmem:[#allocation157_spill] sm:$0xff] }
 0x645   :  { %v10791_v7 = vpop.f32.mrf.mxu0  ;;  %9924 = vmatmul.mubr.bf16.gmra.mxu0 %v19464_v5  ;;  %v10698_v20 = vpop.f32.mrf.mxu1 }
 0x646   :  { %v18261_v37 = vadd.f32 %v10790_v35, %v9257_v25  ;;  %v10699_v34 = vadd.f32 %v10698_v20, %v10697_v21  ;;  %9931 = vmatprep.mubr.bf16.mxu0 %v19465_v1  ;;  %v19472_v21 = vld [vmem:[#allocation43_spill] sm:$0xff] }
 0x647   :  { %v10792_v54 = vpop.f32.mrf.mxu0  ;;  %v10700_v45 = vpop.f32.mrf.mxu1 }
 0x648   :  { %v9262_v57 = vadd.f32 %v10699_v34, %v18155_v46  ;;  %v10793_v13 = vadd.f32 %v10792_v54, %v10791_v7 }
 0x649   :  { %v10794_v55 = vpop.f32.mrf.mxu0  ;;  %v10701_v44 = vpop.f32.mrf.mxu1 }
 0x64a   :  { %v18265_v17 = vadd.f32 %v10793_v13, %v9262_v57  ;;  %v10702_v8 = vadd.f32 %v10701_v44, %v10700_v45  ;;  %v19474_v44 = vld [vmem:[#allocation132_spill] sm:$0xff] }
 0x64b   :  { %v10795_v18 = vpop.f32.mrf.mxu0  ;;  %v10703_v0 = vpop.f32.mrf.mxu1  ;;  %9796 = vmatmul.mubr.bf16.gmra.mxu1 %v19466_v4 }
 0x64c   :  { %v9265_v9 = vadd.f32 %v10702_v8, %v18155_v46  ;;  %v10796_v53 = vadd.f32 %v10795_v18, %v10794_v55  ;;  %9803 = vmatprep.mubr.bf16.mxu1 %v19467_v51 }
 0x64d   :  { %v10797_v30 = vpop.f32.mrf.mxu0  ;;  %9932 = vmatmul.mubr.bf16.gmra.mxu0 %v19468_v48  ;;  %v10704_v3 = vpop.f32.mrf.mxu1 }
 0x64e   :  { %v18271_v29 = vadd.f32 %v10796_v53, %v9265_v9  ;;  %v10705_v59 = vadd.f32 %v10704_v3, %v10703_v0  ;;  %9939 = vmatprep.mubr.bf16.mxu0 %v19469_v14  ;;  %v19475_v0 = vld [vmem:[#allocation136_spill] sm:$0xff]  ;;  %v19476_v9 = vld [vmem:[#allocation154_spill] sm:$0xff] }
 0x64f   :  { %v10798_v56 = vpop.f32.mrf.mxu0  ;;  %v10706_v19 = vpop.f32.mrf.mxu1 }
 0x650   :  { %v9270_v6 = vadd.f32 %v10705_v59, %v18155_v46  ;;  %v10799_v61 = vadd.f32 %v10798_v56, %v10797_v30 }
 0x651   :  { %v10800_v33 = vpop.f32.mrf.mxu0  ;;  %v10707_v23 = vpop.f32.mrf.mxu1 }
 0x652   :  { %v18275_v38 = vadd.f32 %v10799_v61, %v9270_v6  ;;  %v10708_v52 = vadd.f32 %v10707_v23, %v10706_v19  ;;  %v19477_v23 = vld [vmem:[#allocation135_spill] sm:$0xff] }
 0x653   :  { %v10801_v11 = vpop.f32.mrf.mxu0  ;;  %v10709_v32 = vpop.f32.mrf.mxu1  ;;  %9804 = vmatmul.mubr.bf16.gmra.mxu1 %v19470_v39 }
 0x654   :  { %v9273_v42 = vadd.f32 %v10708_v52, %v18155_v46  ;;  %v10802_v47 = vadd.f32 %v10801_v11, %v10800_v33  ;;  %9811 = vmatprep.mubr.bf16.mxu1 %v19471_v15  ;;  %v19478_v52 = vld [vmem:[#allocation169_spill] sm:$0xff] }
 0x655   :  { %v10803_v50 = vpop.f32.mrf.mxu0  ;;  %9940 = vmatmul.mubr.bf16.gmra.mxu0 %v19472_v21  ;;  %v10710_v2 = vpop.f32.mrf.mxu1 }
 0x656   :  { %v18281_v25 = vadd.f32 %v10802_v47, %v9273_v42  ;;  %v10711_v35 = vadd.f32 %v10710_v2, %v10709_v32  ;;  %9947 = vmatprep.mubr.bf16.mxu0 %v19473_v12 }
 0x657   :  { %v10804_v7 = vpop.f32.mrf.mxu0  ;;  %v10712_v5 = vpop.f32.mrf.mxu1 }
 0x658   :  { %v9278_v20 = vadd.f32 %v10711_v35, %v18155_v46  ;;  %v10805_v34 = vadd.f32 %v10804_v7, %v10803_v50 }
 0x659   :  { %v10806_v1 = vpop.f32.mrf.mxu0  ;;  %v10713_v54 = vpop.f32.mrf.mxu1 }
 0x65a   :  { %v18285_v45 = vadd.f32 %v10805_v34, %v9278_v20  ;;  %v10714_v57 = vadd.f32 %v10713_v54, %v10712_v5  ;;  %v19479_v5 = vld [vmem:[#allocation171_spill] sm:$0xff] }
 0x65b   :  { %v10807_v13 = vpop.f32.mrf.mxu0  ;;  %v10715_v55 = vpop.f32.mrf.mxu1  ;;  %9812 = vmatmul.mubr.bf16.gmra.mxu1 %v19474_v44 }
 0x65c   :  { %v9281_v8 = vadd.f32 %v10714_v57, %v18155_v46  ;;  %v10808_v18 = vadd.f32 %v10807_v13, %v10806_v1  ;;  %9819 = vmatprep.mubr.bf16.mxu1 %v19475_v0  ;;  %v19480_v1 = vld [vmem:[#allocation159_spill] sm:$0xff] }
 0x65d   :  { %v10809_v4 = vpop.f32.mrf.mxu0  ;;  %9948 = vmatmul.mubr.bf16.gmra.mxu0 %v19476_v9  ;;  %v10716_v53 = vpop.f32.mrf.mxu1 }
 0x65e   :  { %v18291_v51 = vadd.f32 %v10808_v18, %v9281_v8  ;;  %v10717_v30 = vadd.f32 %v10716_v53, %v10715_v55 }
 0x65f   :  { %v10810_v48 = vpop.f32.mrf.mxu0  ;;  %v10718_v3 = vpop.f32.mrf.mxu1 }
 0x660   :  { %v9286_v59 = vadd.f32 %v10717_v30, %v18155_v46  ;;  %v10811_v14 = vadd.f32 %v10810_v48, %v10809_v4  ;;  %v19481_v48 = vld [vmem:[#allocation158_spill] sm:$0xff] }
 0x661   :  { %v10812_v56 = vpop.f32.mrf.mxu0  ;;  %v10719_v19 = vpop.f32.mrf.mxu1 }
 0x662   :  { %v18294_v6 = vadd.f32 %v10811_v14, %v9286_v59  ;;  %v19482_v14 = vld [vmem:[#allocation170_spill] sm:$0xff] }
 0x663   :  { %v10813_v61 = vpop.f32.mrf.mxu0  ;;  %v10831_v33 = vpop.f32.mrf.mxu1  ;;  %9820 = vmatmul.mubr.bf16.gmra.mxu1 %v19477_v23 }
 0x664   :  { %9827 = vmatprep.mubr.bf16.mxu1 %v19478_v52 }
 0x665   :  { %v10925_v11 = vpop.f32.mrf.mxu0  ;;  %v10832_v32 = vpop.f32.mrf.mxu1 }
 0x666   :  { %v10833_v39 = vadd.f32 %v10832_v32, %v10831_v33 }
 0x667   :  { %v10926_v42 = vpop.f32.mrf.mxu0  ;;  %v10834_v47 = vpop.f32.mrf.mxu1 }
 0x668   :  { %v9462_v15 = vadd.f32 %v10833_v39, %v18160_v31  ;;  %v10927_v50 = vadd.f32 %v10926_v42, %v10925_v11 }
 0x669   :  { %v10928_v46 = vpop.f32.mrf.mxu0  ;;  %v10835_v21 = vpop.f32.mrf.mxu1 }
 0x66a   :  { %v18299_v2 = vadd.f32 %v10927_v50, %v9462_v15  ;;  %v10836_v35 = vadd.f32 %v10835_v21, %v10834_v47  ;;  %v19483_v50 = vld [vmem:[#allocation172_spill] sm:$0xff] }
 0x66b   :  { %v10929_v12 = vpop.f32.mrf.mxu0  ;;  %v10837_v7 = vpop.f32.mrf.mxu1  ;;  %9828 = vmatmul.mubr.bf16.gmra.mxu1 %v19479_v5 }
 0x66c   :  { %v9465_v20 = vadd.f32 %v10836_v35, %v18166_v27  ;;  %v10930_v34 = vadd.f32 %v10929_v12, %v10928_v46  ;;  %9955 = vmatprep.mubr.bf16.mxu1 %v19480_v1 }
 0x66d   :  { %v10931_v54 = vpop.f32.mrf.mxu0  ;;  %v10838_v57 = vpop.f32.mrf.mxu1 }
 0x66e   :  { %v18304_v13 = vadd.f32 %v10930_v34, %v9465_v20  ;;  %v10839_v31 = vadd.f32 %v10838_v57, %v10837_v7 }
 0x66f   :  { %v10932_v55 = vpop.f32.mrf.mxu0  ;;  %v10840_v44 = vpop.f32.mrf.mxu1 }
 0x670   :  { %v9470_v8 = vadd.f32 %v10839_v31, %v18170_v60  ;;  %v10933_v18 = vadd.f32 %v10932_v55, %v10931_v54 }
 0x671   :  { %v10934_v0 = vpop.f32.mrf.mxu0  ;;  %v10841_v4 = vpop.f32.mrf.mxu1 }
 0x672   :  { %v18307_v9 = vadd.f32 %v10933_v18, %v9470_v8  ;;  %v10842_v53 = vadd.f32 %v10841_v4, %v10840_v44 }
 0x673   :  { %v10935_v30 = vpop.f32.mrf.mxu0  ;;  %v10843_v27 = vpop.f32.mrf.mxu1  ;;  %9956 = vmatmul.mubr.bf16.vlgmr.msra.gmra.mxu1 %v19481_v48 }
 0x674   :  { %v9473_v3 = vadd.f32 %v10842_v53, %v18178_v28  ;;  %v10936_v59 = vadd.f32 %v10935_v30, %v10934_v0  ;;  %9963 = vmatprep.mubr.bf16.mxu1 %v19482_v14 }
 0x675   :  { %v10937_v56 = vpop.f32.mrf.mxu0  ;;  %v10844_v19 = vpop.f32.mrf.mxu1 }
 0x676   :  { %v18312_v61 = vadd.f32 %v10936_v59, %v9473_v3  ;;  %v10845_v60 = vadd.f32 %v10844_v19, %v10843_v27 }
 0x677   :  { %v10938_v33 = vpop.f32.mrf.mxu0  ;;  %v10846_v23 = vpop.f32.mrf.mxu1 }
 0x678   :  { %v9478_v52 = vadd.f32 %v10845_v60, %v18184_v43  ;;  %v10939_v11 = vadd.f32 %v10938_v33, %v10937_v56 }
 0x679   :  { %v10940_v32 = vpop.f32.mrf.mxu0  ;;  %v10847_v39 = vpop.f32.mrf.mxu1 }
 0x67a   :  { %v18315_v42 = vadd.f32 %v10939_v11, %v9478_v52  ;;  %v10848_v47 = vadd.f32 %v10847_v39, %v10846_v23 }
 0x67b   :  { %v10941_v15 = vpop.f32.mrf.mxu0  ;;  %v10849_v28 = vpop.f32.mrf.mxu1  ;;  %9964 = vmatmul.mubr.bf16.gmra.mxu1 %v19483_v50 }
 0x67c   :  { %v9481_v46 = vadd.f32 %v10848_v47, %v18192_v49  ;;  %v10942_v21 = vadd.f32 %v10941_v15, %v10940_v32 }
 0x67d   :  { %v10943_v35 = vpop.f32.mrf.mxu0  ;;  %v10850_v12 = vpop.f32.mrf.mxu1 }
 0x67e   :  { %v18319_v7 = vadd.f32 %v10942_v21, %v9481_v46  ;;  %v10851_v5 = vadd.f32 %v10850_v12, %v10849_v28 }
 0x67f   :  { %v10944_v20 = vpop.f32.mrf.mxu0  ;;  %v10852_v43 = vpop.f32.mrf.mxu1 }
 0x680   :  { %v9486_v34 = vadd.f32 %v10851_v5, %v18198_v62  ;;  %v10945_v1 = vadd.f32 %v10944_v20, %v10943_v35 }
 0x681   :  { %v10946_v54 = vpop.f32.mrf.mxu0  ;;  %v10853_v57 = vpop.f32.mrf.mxu1 }
 0x682   :  { %v18322_v31 = vadd.f32 %v10945_v1, %v9486_v34  ;;  %v10854_v55 = vadd.f32 %v10853_v57, %v10852_v43 }
 0x683   :  { %v10947_v44 = vpop.f32.mrf.mxu0  ;;  %v10855_v8 = vpop.f32.mrf.mxu1 }
 0x684   :  { %v9489_v49 = vadd.f32 %v10854_v55, %v18206_v36  ;;  %v10948_v18 = vadd.f32 %v10947_v44, %v10946_v54 }
 0x685   :  { %v10949_v0 = vpop.f32.mrf.mxu0  ;;  %v10856_v4 = vpop.f32.mrf.mxu1 }
 0x686   :  { %v18325_v53 = vadd.f32 %v10948_v18, %v9489_v49  ;;  %v10857_v30 = vadd.f32 %v10856_v4, %v10855_v8 }
 0x687   :  { %v10950_v27 = vpop.f32.mrf.mxu0  ;;  %v10858_v48 = vpop.f32.mrf.mxu1 }
 0x688   :  { %v9494_v62 = vadd.f32 %v10857_v30, %v18212_v63  ;;  %v10951_v3 = vadd.f32 %v10950_v27, %v10949_v0 }
 0x689   :  { %v10952_v59 = vpop.f32.mrf.mxu0  ;;  %v10859_v14 = vpop.f32.mrf.mxu1 }
 0x68a   :  { %v18328_v56 = vadd.f32 %v10951_v3, %v9494_v62  ;;  %v10860_v19 = vadd.f32 %v10859_v14, %v10858_v48 }
 0x68b   :  { %v10953_v60 = vpop.f32.mrf.mxu0  ;;  %v10861_v33 = vpop.f32.mrf.mxu1 }
 0x68c   :  { %v9497_v36 = vadd.f32 %v10860_v19, %v18220_v26  ;;  %v10954_v23 = vadd.f32 %v10953_v60, %v10952_v59 }
 0x68d   :  { %v10955_v52 = vpop.f32.mrf.mxu0  ;;  %v10862_v11 = vpop.f32.mrf.mxu1 }
 0x68e   :  { %v18331_v32 = vadd.f32 %v10954_v23, %v9497_v36  ;;  %v10863_v39 = vadd.f32 %v10862_v11, %v10861_v33 }
 0x68f   :  { %v10956_v47 = vpop.f32.mrf.mxu0  ;;  %v10864_v15 = vpop.f32.mrf.mxu1 }
 0x690   :  { %v9502_v63 = vadd.f32 %v10863_v39, %v18225_v22  ;;  %v10957_v28 = vadd.f32 %v10956_v47, %v10955_v52 }
 0x691   :  { %v10958_v50 = vpop.f32.mrf.mxu0  ;;  %v10865_v46 = vpop.f32.mrf.mxu1 }
 0x692   :  { %v18334_v21 = vadd.f32 %v10957_v28, %v9502_v63  ;;  %v10866_v35 = vadd.f32 %v10865_v46, %v10864_v15 }
 0x693   :  { %v10959_v12 = vpop.f32.mrf.mxu0  ;;  %v10867_v5 = vpop.f32.mrf.mxu1 }
 0x694   :  { %v9505_v26 = vadd.f32 %v10866_v35, %v18231_v16  ;;  %v10960_v20 = vadd.f32 %v10959_v12, %v10958_v50 }
 0x695   :  { %v10961_v43 = vpop.f32.mrf.mxu0  ;;  %v10868_v34 = vpop.f32.mrf.mxu1 }
 0x696   :  { %v18337_v1 = vadd.f32 %v10960_v20, %v9505_v26  ;;  %v10869_v54 = vadd.f32 %v10868_v34, %v10867_v5 }
 0x697   :  { %v10962_v57 = vpop.f32.mrf.mxu0  ;;  %v10870_v55 = vpop.f32.mrf.mxu1 }
 0x698   :  { %v9510_v22 = vadd.f32 %v10869_v54, %v18235_v41  ;;  %v10963_v44 = vadd.f32 %v10962_v57, %v10961_v43 }
 0x699   :  { %v10964_v8 = vpop.f32.mrf.mxu0  ;;  %v10871_v49 = vpop.f32.mrf.mxu1 }
 0x69a   :  { %v18340_v18 = vadd.f32 %v10963_v44, %v9510_v22  ;;  %v10872_v0 = vadd.f32 %v10871_v49, %v10870_v55 }
 0x69b   :  { %v10965_v4 = vpop.f32.mrf.mxu0  ;;  %v10873_v30 = vpop.f32.mrf.mxu1 }
 0x69c   :  { %v9513_v16 = vadd.f32 %v10872_v0, %v18241_v24  ;;  %v10966_v27 = vadd.f32 %v10965_v4, %v10964_v8 }
 0x69d   :  { %v10967_v48 = vpop.f32.mrf.mxu0  ;;  %v10874_v62 = vpop.f32.mrf.mxu1 }
 0x69e   :  { %v18343_v3 = vadd.f32 %v10966_v27, %v9513_v16  ;;  %v10875_v59 = vadd.f32 %v10874_v62, %v10873_v30 }
 0x69f   :  { %v10968_v14 = vpop.f32.mrf.mxu0  ;;  %v10876_v19 = vpop.f32.mrf.mxu1 }
 0x6a0   :  { %v9518_v41 = vadd.f32 %v10875_v59, %v18245_v10  ;;  %v10969_v60 = vadd.f32 %v10968_v14, %v10967_v48 }
 0x6a1   :  { %v10970_v33 = vpop.f32.mrf.mxu0  ;;  %v10877_v36 = vpop.f32.mrf.mxu1 }
 0x6a2   :  { %v18346_v23 = vadd.f32 %v10969_v60, %v9518_v41  ;;  %v10878_v52 = vadd.f32 %v10877_v36, %v10876_v19 }
 0x6a3   :  { %v10971_v11 = vpop.f32.mrf.mxu0  ;;  %v10879_v39 = vpop.f32.mrf.mxu1 }
 0x6a4   :  { %v9521_v24 = vadd.f32 %v10878_v52, %v18251_v58  ;;  %v10972_v47 = vadd.f32 %v10971_v11, %v10970_v33 }
 0x6a5   :  { %v10973_v15 = vpop.f32.mrf.mxu0  ;;  %v10880_v63 = vpop.f32.mrf.mxu1 }
 0x6a6   :  { %v18349_v28 = vadd.f32 %v10972_v47, %v9521_v24  ;;  %v10881_v50 = vadd.f32 %v10880_v63, %v10879_v39 }
 0x6a7   :  { %v10974_v46 = vpop.f32.mrf.mxu0  ;;  %v10882_v35 = vpop.f32.mrf.mxu1 }
 0x6a8   :  { %v9526_v10 = vadd.f32 %v10881_v50, %v18255_v40  ;;  %v10975_v12 = vadd.f32 %v10974_v46, %v10973_v15 }
 0x6a9   :  { %v10976_v5 = vpop.f32.mrf.mxu0  ;;  %v10883_v26 = vpop.f32.mrf.mxu1 }
 0x6aa   :  { %v18352_v20 = vadd.f32 %v10975_v12, %v9526_v10  ;;  %v10884_v43 = vadd.f32 %v10883_v26, %v10882_v35 }
 0x6ab   :  { %v10977_v34 = vpop.f32.mrf.mxu0  ;;  %v10885_v54 = vpop.f32.mrf.mxu1 }
 0x6ac   :  { %v9529_v58 = vadd.f32 %v10884_v43, %v18261_v37  ;;  %v10978_v57 = vadd.f32 %v10977_v34, %v10976_v5 }
 0x6ad   :  { %v10979_v55 = vpop.f32.mrf.mxu0  ;;  %v10886_v22 = vpop.f32.mrf.mxu1 }
 0x6ae   :  { %v18355_v44 = vadd.f32 %v10978_v57, %v9529_v58  ;;  %v10887_v8 = vadd.f32 %v10886_v22, %v10885_v54 }
 0x6af   :  { %v10980_v49 = vpop.f32.mrf.mxu0  ;;  %v10888_v0 = vpop.f32.mrf.mxu1 }
 0x6b0   :  { %v9534_v40 = vadd.f32 %v10887_v8, %v18265_v17  ;;  %v10981_v4 = vadd.f32 %v10980_v49, %v10979_v55 }
 0x6b1   :  { %v10982_v30 = vpop.f32.mrf.mxu0  ;;  %v10889_v16 = vpop.f32.mrf.mxu1 }
 0x6b2   :  { %v18358_v27 = vadd.f32 %v10981_v4, %v9534_v40  ;;  %v10890_v48 = vadd.f32 %v10889_v16, %v10888_v0 }
 0x6b3   :  { %v10983_v62 = vpop.f32.mrf.mxu0  ;;  %v10891_v59 = vpop.f32.mrf.mxu1 }
 0x6b4   :  { %v9537_v37 = vadd.f32 %v10890_v48, %v18271_v29  ;;  %v10984_v14 = vadd.f32 %v10983_v62, %v10982_v30 }
 0x6b5   :  { %v10985_v19 = vpop.f32.mrf.mxu0  ;;  %v10892_v41 = vpop.f32.mrf.mxu1 }
 0x6b6   :  { %v18361_v60 = vadd.f32 %v10984_v14, %v9537_v37  ;;  %v10893_v33 = vadd.f32 %v10892_v41, %v10891_v59 }
 0x6b7   :  { %v10986_v36 = vpop.f32.mrf.mxu0  ;;  %v10894_v52 = vpop.f32.mrf.mxu1 }
 0x6b8   :  { %v9542_v17 = vadd.f32 %v10893_v33, %v18275_v38  ;;  %v10987_v11 = vadd.f32 %v10986_v36, %v10985_v19 }
 0x6b9   :  { %v10988_v39 = vpop.f32.mrf.mxu0  ;;  %v10895_v24 = vpop.f32.mrf.mxu1 }
 0x6ba   :  { %v18364_v47 = vadd.f32 %v10987_v11, %v9542_v17  ;;  %v10896_v15 = vadd.f32 %v10895_v24, %v10894_v52 }
 0x6bb   :  { %v10989_v63 = vpop.f32.mrf.mxu0  ;;  %v10897_v50 = vpop.f32.mrf.mxu1 }
 0x6bc   :  { %v9545_v29 = vadd.f32 %v10896_v15, %v18281_v25  ;;  %v10990_v46 = vadd.f32 %v10989_v63, %v10988_v39 }
 0x6bd   :  { %v10991_v35 = vpop.f32.mrf.mxu0  ;;  %v10898_v10 = vpop.f32.mrf.mxu1 }
 0x6be   :  { %v18367_v12 = vadd.f32 %v10990_v46, %v9545_v29  ;;  %v10899_v5 = vadd.f32 %v10898_v10, %v10897_v50 }
 0x6bf   :  { %v10992_v26 = vpop.f32.mrf.mxu0  ;;  %v10900_v43 = vpop.f32.mrf.mxu1 }
 0x6c0   :  { %v9550_v38 = vadd.f32 %v10899_v5, %v18285_v45  ;;  %v10993_v34 = vadd.f32 %v10992_v26, %v10991_v35 }
 0x6c1   :  { %v10994_v54 = vpop.f32.mrf.mxu0  ;;  %v10901_v58 = vpop.f32.mrf.mxu1 }
 0x6c2   :  { %v18370_v57 = vadd.f32 %v10993_v34, %v9550_v38  ;;  %v10902_v55 = vadd.f32 %v10901_v58, %v10900_v43 }
 0x6c3   :  { %v10995_v22 = vpop.f32.mrf.mxu0  ;;  %v10903_v8 = vpop.f32.mrf.mxu1 }
 0x6c4   :  { %v9553_v25 = vadd.f32 %v10902_v55, %v18291_v51  ;;  %v10996_v49 = vadd.f32 %v10995_v22, %v10994_v54 }
 0x6c5   :  { %v10997_v0 = vpop.f32.mrf.mxu0  ;;  %v10904_v40 = vpop.f32.mrf.mxu1 }
 0x6c6   :  { %v18373_v4 = vadd.f32 %v10996_v49, %v9553_v25  ;;  %v10905_v30 = vadd.f32 %v10904_v40, %v10903_v8 }
 0x6c7   :  { %v10998_v16 = vpop.f32.mrf.mxu0  ;;  %v10906_v48 = vpop.f32.mrf.mxu1 }
 0x6c8   :  { %v9558_v45 = vadd.f32 %v10905_v30, %v18294_v6  ;;  %v10999_v62 = vadd.f32 %v10998_v16, %v10997_v0 }
 0x6c9   :  { %v11000_v59 = vpop.f32.mrf.mxu0  ;;  %v10907_v37 = vpop.f32.mrf.mxu1 }
 0x6ca   :  { %v18376_v14 = vadd.f32 %v10999_v62, %v9558_v45 }
 0x6cb   :  { %v11001_v19 = vpop.f32.mrf.mxu0  ;;  %v11019_v41 = vpop.f32.mrf.mxu1 }
 0x6cd   :  { %v11113_v33 = vpop.f32.mrf.mxu0  ;;  %v11020_v36 = vpop.f32.mrf.mxu1 }
 0x6ce   :  { %v11021_v51 = vadd.f32 %v11020_v36, %v11019_v41 }
 0x6cf   :  { %v11114_v52 = vpop.f32.mrf.mxu0  ;;  %v11022_v17 = vpop.f32.mrf.mxu1 }
 0x6d0   :  { %v9734_v11 = vadd.f32 %v11021_v51, %v18299_v2  ;;  %v11115_v39 = vadd.f32 %v11114_v52, %v11113_v33 }
 0x6d1   :  { %v11116_v24 = vpop.f32.mrf.mxu0  ;;  %v11023_v15 = vpop.f32.mrf.mxu1 }
 0x6d2   :  { %v9870_v63 = vadd.f32 %v11115_v39, %v9734_v11  ;;  %v11024_v50 = vadd.f32 %v11023_v15, %v11022_v17 }
 0x6d3   :  { %v11117_v6 = vpop.f32.mrf.mxu0  ;;  %v11025_v29 = vpop.f32.mrf.mxu1 }
 0x6d4   :  { %9973 = vst [vmem:[%s18485_s7 + $0x10] sm:$0xff] %v9870_v63  ;;  %v9737_v46 = vadd.f32 %v11024_v50, %v18304_v13  ;;  %v11118_v35 = vadd.f32 %v11117_v6, %v11116_v24 }
 0x6d5   :  { %v11119_v10 = vpop.f32.mrf.mxu0  ;;  %v11026_v5 = vpop.f32.mrf.mxu1 }
 0x6d6   :  { %v9873_v26 = vadd.f32 %v11118_v35, %v9737_v46  ;;  %v11027_v43 = vadd.f32 %v11026_v5, %v11025_v29 }
 0x6d7   :  { %v11120_v38 = vpop.f32.mrf.mxu0  ;;  %v11028_v2 = vpop.f32.mrf.mxu1 }
 0x6d8   :  { %9976 = vst [vmem:[%s18485_s7 + $0x28] sm:$0xff] %v9873_v26  ;;  %v9742_v34 = vadd.f32 %v11027_v43, %v18307_v9  ;;  %v11121_v54 = vadd.f32 %v11120_v38, %v11119_v10 }
 0x6d9   :  { %v11122_v58 = vpop.f32.mrf.mxu0  ;;  %v11029_v55 = vpop.f32.mrf.mxu1 }
 0x6da   :  { %v9878_v22 = vadd.f32 %v11121_v54, %v9742_v34  ;;  %v11030_v8 = vadd.f32 %v11029_v55, %v11028_v2 }
 0x6db   :  { %v11123_v25 = vpop.f32.mrf.mxu0  ;;  %v11031_v13 = vpop.f32.mrf.mxu1 }
 0x6dc   :  { %9979 = vst [vmem:[%s18485_s7 + $0x40] sm:$0xff] %v9878_v22  ;;  %v9745_v49 = vadd.f32 %v11030_v8, %v18312_v61  ;;  %v11124_v0 = vadd.f32 %v11123_v25, %v11122_v58 }
 0x6dd   :  { %v11125_v40 = vpop.f32.mrf.mxu0  ;;  %v11032_v30 = vpop.f32.mrf.mxu1 }
 0x6de   :  { %v9881_v16 = vadd.f32 %v11124_v0, %v9745_v49  ;;  %v11033_v48 = vadd.f32 %v11032_v30, %v11031_v13 }
 0x6df   :  { %v11126_v45 = vpop.f32.mrf.mxu0  ;;  %v11034_v9 = vpop.f32.mrf.mxu1 }
 0x6e0   :  { %9982 = vst [vmem:[%s18485_s7 + $0x58] sm:$0xff] %v9881_v16  ;;  %v9750_v62 = vadd.f32 %v11033_v48, %v18315_v42  ;;  %v11127_v59 = vadd.f32 %v11126_v45, %v11125_v40 }
 0x6e1   :  { %v11128_v37 = vpop.f32.mrf.mxu0  ;;  %v11035_v19 = vpop.f32.mrf.mxu1 }
 0x6e2   :  { %v9886_v41 = vadd.f32 %v11127_v59, %v9750_v62  ;;  %v11036_v33 = vadd.f32 %v11035_v19, %v11034_v9 }
 0x6e3   :  { %v11129_v36 = vpop.f32.mrf.mxu0  ;;  %v11037_v61 = vpop.f32.mrf.mxu1 }
 0x6e4   :  { %9985 = vst [vmem:[%s18485_s7 + $0x70] sm:$0xff] %v9886_v41  ;;  %v9753_v51 = vadd.f32 %v11036_v33, %v18319_v7  ;;  %v11130_v52 = vadd.f32 %v11129_v36, %v11128_v37 }
 0x6e5   :  { %v11131_v17 = vpop.f32.mrf.mxu0  ;;  %v11038_v11 = vpop.f32.mrf.mxu1 }
 0x6e6   :  { %v9889_v39 = vadd.f32 %v11130_v52, %v9753_v51  ;;  %v11039_v24 = vadd.f32 %v11038_v11, %v11037_v61 }
 0x6e7   :  { %v11132_v15 = vpop.f32.mrf.mxu0  ;;  %v11040_v42 = vpop.f32.mrf.mxu1 }
 0x6e8   :  { %9988 = vst [vmem:[%s18485_s7 + $0x88] sm:$0xff] %v9889_v39  ;;  %v9758_v63 = vadd.f32 %v11039_v24, %v18322_v31  ;;  %v11133_v50 = vadd.f32 %v11132_v15, %v11131_v17 }
 0x6e9   :  { %v11134_v6 = vpop.f32.mrf.mxu0  ;;  %v11041_v29 = vpop.f32.mrf.mxu1 }
 0x6ea   :  { %v9894_v46 = vadd.f32 %v11133_v50, %v9758_v63  ;;  %v11042_v35 = vadd.f32 %v11041_v29, %v11040_v42 }
 0x6eb   :  { %v11135_v10 = vpop.f32.mrf.mxu0  ;;  %v11043_v7 = vpop.f32.mrf.mxu1 }
 0x6ec   :  { %9991 = vst [vmem:[%s18485_s7 + $0xa0] sm:$0xff] %v9894_v46  ;;  %v9761_v5 = vadd.f32 %v11042_v35, %v18325_v53  ;;  %v11136_v26 = vadd.f32 %v11135_v10, %v11134_v6 }
 0x6ed   :  { %v11137_v43 = vpop.f32.mrf.mxu0  ;;  %v11044_v38 = vpop.f32.mrf.mxu1 }
 0x6ee   :  { %v9897_v2 = vadd.f32 %v11136_v26, %v9761_v5  ;;  %v11045_v34 = vadd.f32 %v11044_v38, %v11043_v7 }
 0x6ef   :  { %v11138_v54 = vpop.f32.mrf.mxu0  ;;  %v11046_v31 = vpop.f32.mrf.mxu1 }
 0x6f0   :  { %9994 = vst [vmem:[%s18485_s7 + $0xb8] sm:$0xff] %v9897_v2  ;;  %v9766_v58 = vadd.f32 %v11045_v34, %v18328_v56  ;;  %v11139_v55 = vadd.f32 %v11138_v54, %v11137_v43 }
 0x6f1   :  { %v11140_v22 = vpop.f32.mrf.mxu0  ;;  %v11047_v8 = vpop.f32.mrf.mxu1 }
 0x6f2   :  { %v9902_v25 = vadd.f32 %v11139_v55, %v9766_v58  ;;  %v11048_v13 = vadd.f32 %v11047_v8, %v11046_v31 }
 0x6f3   :  { %v11141_v49 = vpop.f32.mrf.mxu0  ;;  %v11049_v53 = vpop.f32.mrf.mxu1 }
 0x6f4   :  { %9997 = vst [vmem:[%s18485_s7 + $0xd0] sm:$0xff] %v9902_v25  ;;  %v9769_v0 = vadd.f32 %v11048_v13, %v18331_v32  ;;  %v11142_v40 = vadd.f32 %v11141_v49, %v11140_v22 }
 0x6f5   :  { %v11143_v30 = vpop.f32.mrf.mxu0  ;;  %v11050_v16 = vpop.f32.mrf.mxu1 }
 0x6f6   :  { %v9905_v48 = vadd.f32 %v11142_v40, %v9769_v0  ;;  %v11051_v45 = vadd.f32 %v11050_v16, %v11049_v53 }
 0x6f7   :  { %v11144_v9 = vpop.f32.mrf.mxu0  ;;  %v11052_v56 = vpop.f32.mrf.mxu1 }
 0x6f8   :  { %10000 = vst [vmem:[%s18485_s7 + $0xe8] sm:$0xff] %v9905_v48  ;;  %v9774_v62 = vadd.f32 %v11051_v45, %v18334_v21  ;;  %v11145_v59 = vadd.f32 %v11144_v9, %v11143_v30 }
 0x6f9   :  { %v11146_v37 = vpop.f32.mrf.mxu0  ;;  %v11053_v19 = vpop.f32.mrf.mxu1 }
 0x6fa   :  { %v9910_v41 = vadd.f32 %v11145_v59, %v9774_v62  ;;  %v11054_v33 = vadd.f32 %v11053_v19, %v11052_v56 }
 0x6fb   :  { %v11147_v36 = vpop.f32.mrf.mxu0  ;;  %v11055_v32 = vpop.f32.mrf.mxu1 }
 0x6fc   :  { %10003 = vst [vmem:[%s18485_s7 + $0x100] sm:$0xff] %v9910_v41  ;;  %v9777_v61 = vadd.f32 %v11054_v33, %v18337_v1  ;;  %v11148_v51 = vadd.f32 %v11147_v36, %v11146_v37 }
 0x6fd   :  { %v11149_v52 = vpop.f32.mrf.mxu0  ;;  %v11056_v17 = vpop.f32.mrf.mxu1 }
 0x6fe   :  { %v9913_v11 = vadd.f32 %v11148_v51, %v9777_v61  ;;  %v11057_v39 = vadd.f32 %v11056_v17, %v11055_v32 }
 0x6ff   :  { %v11150_v24 = vpop.f32.mrf.mxu0  ;;  %v11058_v21 = vpop.f32.mrf.mxu1 }
 0x700   :  { %10006 = vst [vmem:[%s18485_s7 + $0x118] sm:$0xff] %v9913_v11  ;;  %v9782_v15 = vadd.f32 %v11057_v39, %v18340_v18  ;;  %v11151_v42 = vadd.f32 %v11150_v24, %v11149_v52 }
 0x701   :  { %v11152_v63 = vpop.f32.mrf.mxu0  ;;  %v11059_v50 = vpop.f32.mrf.mxu1 }
 0x702   :  { %v9918_v6 = vadd.f32 %v11151_v42, %v9782_v15  ;;  %v11060_v29 = vadd.f32 %v11059_v50, %v11058_v21 }
 0x703   :  { %v11153_v46 = vpop.f32.mrf.mxu0  ;;  %v11061_v1 = vpop.f32.mrf.mxu1 }
 0x704   :  { %10009 = vst [vmem:[%s18485_s7 + $0x130] sm:$0xff] %v9918_v6  ;;  %v9785_v35 = vadd.f32 %v11060_v29, %v18343_v3  ;;  %v11154_v10 = vadd.f32 %v11153_v46, %v11152_v63 }
 0x705   :  { %v11155_v7 = vpop.f32.mrf.mxu0  ;;  %v11062_v5 = vpop.f32.mrf.mxu1 }
 0x706   :  { %v9921_v26 = vadd.f32 %v11154_v10, %v9785_v35  ;;  %v11063_v43 = vadd.f32 %v11062_v5, %v11061_v1 }
 0x707   :  { %v11156_v38 = vpop.f32.mrf.mxu0  ;;  %v11064_v18 = vpop.f32.mrf.mxu1 }
 0x708   :  { %10012 = vst [vmem:[%s18485_s7 + $0x148] sm:$0xff] %v9921_v26  ;;  %v9790_v2 = vadd.f32 %v11063_v43, %v18346_v23  ;;  %v11157_v34 = vadd.f32 %v11156_v38, %v11155_v7 }
 0x709   :  { %v11158_v54 = vpop.f32.mrf.mxu0  ;;  %v11065_v31 = vpop.f32.mrf.mxu1 }
 0x70a   :  { %v9926_v58 = vadd.f32 %v11157_v34, %v9790_v2  ;;  %v11066_v55 = vadd.f32 %v11065_v31, %v11064_v18 }
 0x70b   :  { %v11159_v22 = vpop.f32.mrf.mxu0  ;;  %v11067_v3 = vpop.f32.mrf.mxu1 }
 0x70c   :  { %10015 = vst [vmem:[%s18485_s7 + $0x160] sm:$0xff] %v9926_v58  ;;  %v9793_v8 = vadd.f32 %v11066_v55, %v18349_v28  ;;  %v11160_v25 = vadd.f32 %v11159_v22, %v11158_v54 }
 0x70d   :  { %v11161_v13 = vpop.f32.mrf.mxu0  ;;  %v11068_v49 = vpop.f32.mrf.mxu1 }
 0x70e   :  { %v9929_v53 = vadd.f32 %v11160_v25, %v9793_v8  ;;  %v11069_v0 = vadd.f32 %v11068_v49, %v11067_v3 }
 0x70f   :  { %v11162_v40 = vpop.f32.mrf.mxu0  ;;  %v11070_v23 = vpop.f32.mrf.mxu1 }
 0x710   :  { %10018 = vst [vmem:[%s18485_s7 + $0x178] sm:$0xff] %v9929_v53  ;;  %v9798_v30 = vadd.f32 %v11069_v0, %v18352_v20  ;;  %v11163_v16 = vadd.f32 %v11162_v40, %v11161_v13 }
 0x711   :  { %v11164_v48 = vpop.f32.mrf.mxu0  ;;  %v11071_v45 = vpop.f32.mrf.mxu1 }
 0x712   :  { %v9934_v9 = vadd.f32 %v11163_v16, %v9798_v30  ;;  %v11072_v56 = vadd.f32 %v11071_v45, %v11070_v23 }
 0x713   :  { %v11165_v62 = vpop.f32.mrf.mxu0  ;;  %v11073_v28 = vpop.f32.mrf.mxu1 }
 0x714   :  { %10021 = vst [vmem:[%s18485_s7 + $0x190] sm:$0xff] %v9934_v9  ;;  %v9801_v59 = vadd.f32 %v11072_v56, %v18355_v44  ;;  %v11166_v37 = vadd.f32 %v11165_v62, %v11164_v48 }
 0x715   :  { %v11167_v19 = vpop.f32.mrf.mxu0  ;;  %v11074_v41 = vpop.f32.mrf.mxu1 }
 0x716   :  { %v9937_v33 = vadd.f32 %v11166_v37, %v9801_v59  ;;  %v11075_v36 = vadd.f32 %v11074_v41, %v11073_v28 }
 0x717   :  { %v11168_v32 = vpop.f32.mrf.mxu0  ;;  %v11076_v20 = vpop.f32.mrf.mxu1 }
 0x718   :  { %10024 = vst [vmem:[%s18485_s7 + $0x1a8] sm:$0xff] %v9937_v33  ;;  %v9806_v61 = vadd.f32 %v11075_v36, %v18358_v27  ;;  %v11169_v51 = vadd.f32 %v11168_v32, %v11167_v19 }
 0x719   :  { %v11170_v52 = vpop.f32.mrf.mxu0  ;;  %v11077_v17 = vpop.f32.mrf.mxu1 }
 0x71a   :  { %v9942_v11 = vadd.f32 %v11169_v51, %v9806_v61  ;;  %v11078_v39 = vadd.f32 %v11077_v17, %v11076_v20 }
 0x71b   :  { %v11171_v24 = vpop.f32.mrf.mxu0  ;;  %v11079_v44 = vpop.f32.mrf.mxu1 }
 0x71c   :  { %10027 = vst [vmem:[%s18485_s7 + $0x1c0] sm:$0xff] %v9942_v11  ;;  %v9809_v21 = vadd.f32 %v11078_v39, %v18361_v60  ;;  %v11172_v15 = vadd.f32 %v11171_v24, %v11170_v52 }
 0x71d   :  { %v11173_v42 = vpop.f32.mrf.mxu0  ;;  %v11080_v63 = vpop.f32.mrf.mxu1 }
 0x71e   :  { %v9945_v50 = vadd.f32 %v11172_v15, %v9809_v21  ;;  %v11081_v6 = vadd.f32 %v11080_v63, %v11079_v44 }
 0x71f   :  { %v11174_v29 = vpop.f32.mrf.mxu0  ;;  %v11082_v27 = vpop.f32.mrf.mxu1 }
 0x720   :  { %10030 = vst [vmem:[%s18485_s7 + $0x1d8] sm:$0xff] %v9945_v50  ;;  %v9814_v46 = vadd.f32 %v11081_v6, %v18364_v47  ;;  %v11175_v1 = vadd.f32 %v11174_v29, %v11173_v42 }
 0x721   :  { %v11176_v35 = vpop.f32.mrf.mxu0  ;;  %v11083_v10 = vpop.f32.mrf.mxu1 }
 0x722   :  { %v9950_v7 = vadd.f32 %v11175_v1, %v9814_v46  ;;  %v11084_v5 = vadd.f32 %v11083_v10, %v11082_v27 }
 0x723   :  { %v11177_v26 = vpop.f32.mrf.mxu0  ;;  %v11085_v60 = vpop.f32.mrf.mxu1 }
 0x724   :  { %10033 = vst [vmem:[%s18485_s7 + $0x1f0] sm:$0xff] %v9950_v7  ;;  %v9817_v43 = vadd.f32 %v11084_v5, %v18367_v12  ;;  %v11178_v38 = vadd.f32 %v11177_v26, %v11176_v35 }
 0x725   :  { %v11086_v18 = vpop.f32.mrf.mxu1 }
 0x726   :  { %v9953_v2 = vadd.f32 %v11178_v38, %v9817_v43  ;;  %v11087_v22 = vadd.f32 %v11086_v18, %v11085_v60 }
 0x727   :  { %v11088_v34 = vpop.f32.mrf.mxu1 }
 0x728   :  { %10036 = vst [vmem:[%s18485_s7 + $0x208] sm:$0xff] %v9953_v2  ;;  %v9822_v25 = vadd.f32 %v11087_v22, %v18370_v57 }
 0x729   :  { %v11089_v47 = vpop.f32.mrf.mxu1 }
 0x72a   :  { %v11090_v13 = vadd.f32 %v11089_v47, %v11088_v34 }
 0x72b   :  { %v11091_v54 = vpop.f32.mrf.mxu1 }
 0x72c   :  { %v9825_v40 = vadd.f32 %v11090_v13, %v18373_v4 }
 0x72d   :  { %v11092_v31 = vpop.f32.mrf.mxu1 }
 0x72e   :  { %v11093_v23 = vadd.f32 %v11092_v31, %v11091_v54 }
 0x72f   :  { %v11094_v58 = vpop.f32.mrf.mxu1 }
 0x730   :  { %v9830_v9 = vadd.f32 %v11093_v23, %v18376_v14 }
 0x731   :  { %v11095_v55 = vpop.f32.mrf.mxu1 }
 0x733   :  { %v11179_v3 = vpop.f32.mrf.mxu1 }
 0x735   :  { %v11180_v8 = vpop.f32.mrf.mxu1 }
 0x736   :  { %v11181_v12 = vadd.f32 %v11180_v8, %v11179_v3 }
 0x737   :  { %v11182_v49 = vpop.f32.mrf.mxu1 }
 0x738   :  { %v9958_v53 = vadd.f32 %v11181_v12, %v9822_v25 }
 0x739   :  { %v11183_v0 = vpop.f32.mrf.mxu1 }
 0x73a   :  { %10039 = vst [vmem:[%s18485_s7 + $0x220] sm:$0xff] %v9958_v53  ;;  %v11184_v30 = vadd.f32 %v11183_v0, %v11182_v49 }
 0x73b   :  { %v11185_v16 = vpop.f32.mrf.mxu1 }
 0x73c   :  { %v9961_v48 = vadd.f32 %v11184_v30, %v9825_v40 }
 0x73d   :  { %v11186_v45 = vpop.f32.mrf.mxu1 }
 0x73e   :  { %10042 = vst [vmem:[%s18485_s7 + $0x238] sm:$0xff] %v9961_v48  ;;  %v11187_v57 = vadd.f32 %v11186_v45, %v11185_v16 }
 0x73f   :  { %v11188_v56 = vpop.f32.mrf.mxu1 }
 0x740   :  { %v9966_v62 = vadd.f32 %v11187_v57, %v9830_v9 }
 0x741   :  { %v11189_v28 = vpop.f32.mrf.mxu1 }
 0x742   :  { %10045 = vst [vmem:[%s18485_s7 + $0x250] sm:$0xf] %v9966_v62 }
 0x743   :  { %10050 = vsyncpa [#allocation3], 1 }

</bundles_post_ra>
